<compile_context>
chip_gen: v7x
topology: tpu7x:2x2x1
jax: 0.10.0
libtpu: 0.0.40
codegen_flags: <defaults>
</compile_context>

<pallas_src>
import functools

import numpy as np
import jax
import jax.numpy as jnp
from jax.experimental import pallas as pl
from jax.experimental.pallas import tpu as pltpu


_VMEM_LIMIT = 32 << 20  # portable to v5e / v6e / v7x


# ---------------------------------------------------------------------------
# Pallas kernel: fused  out = act(x @ w + b)
# ---------------------------------------------------------------------------
def _mm_bias_act_kernel(x_ref, w_ref, b_ref, o_ref, *, relu):
    acc = jnp.dot(x_ref[...], w_ref[...], preferred_element_type=jnp.float32)
    acc = acc + b_ref[...]
    if relu:
        acc = jnp.maximum(acc, 0.0)
    o_ref[...] = acc.astype(o_ref.dtype)


def matmul_bias_act(x, w, b2, *, relu, tm=None):
    """x: (M, K) f32, w: (K, N) f32, b2: (1, N) f32 -> (M, N) f32 via Pallas.

    tm=None  -> single grid step over all rows (M padded only to a multiple of 8).
    tm=int   -> row-tile of tm with a 1-D "parallel" grid (megacore-friendly).
    """
    M, K = x.shape
    Kw, N = w.shape
    assert K == Kw and b2.shape == (1, N)

    if tm is None:
        tm = max(8, ((M + 7) // 8) * 8)   # one block, sublane-aligned
    Mp = ((M + tm - 1) // tm) * tm
    x_pad = x if Mp == M else jnp.pad(x, ((0, Mp - M), (0, 0)))

    kernel = functools.partial(_mm_bias_act_kernel, relu=relu)
    out = pl.pallas_call(
        kernel,
        out_shape=jax.ShapeDtypeStruct((Mp, N), x.dtype),
        grid_spec=pltpu.PrefetchScalarGridSpec(
            num_scalar_prefetch=0,
            grid=(Mp // tm,),
            in_specs=[
                pl.BlockSpec((tm, K), lambda i: (i, 0)),   # activation row-tile
                pl.BlockSpec((K, N), lambda i: (0, 0)),    # full weight, resident
                pl.BlockSpec((1, N), lambda i: (0, 0)),    # bias row
            ],
            out_specs=pl.BlockSpec((tm, N), lambda i: (i, 0)),
        ),
        compiler_params=pltpu.CompilerParams(
            dimension_semantics=("parallel",),
            vmem_limit_bytes=_VMEM_LIMIT,
        ),
    )(x_pad, w, b2)
    return out[:M] if Mp != M else out


# ---------------------------------------------------------------------------
# Pallas kernel: fused FC head  out = relu(x @ W4 + b4) @ W5 + b5
# ---------------------------------------------------------------------------
def _fc_head_kernel(x_ref, w4_ref, b4_ref, w5_ref, b5_ref, o_ref):
    h = jnp.dot(x_ref[...], w4_ref[...], preferred_element_type=jnp.float32)
    h = jnp.maximum(h + b4_ref[...], 0.0)
    out = jnp.dot(h, w5_ref[...], preferred_element_type=jnp.float32)
    o_ref[...] = (out + b5_ref[...]).astype(o_ref.dtype)


def fc_head(x, w4t, b4, w5t, b5):
    """x: (B, 3136), w4t: (3136, 512), w5t: (512, n_actions). One pallas_call."""
    M, K = x.shape
    K4, H = w4t.shape
    H5, N = w5t.shape
    assert K == K4 and H == H5

    Mp = max(8, ((M + 7) // 8) * 8)
    x_pad = x if Mp == M else jnp.pad(x, ((0, Mp - M), (0, 0)))

    out = pl.pallas_call(
        _fc_head_kernel,
        out_shape=jax.ShapeDtypeStruct((Mp, N), x.dtype),
        grid_spec=pltpu.PrefetchScalarGridSpec(
            num_scalar_prefetch=0,
            grid=(1,),
            in_specs=[
                pl.BlockSpec((Mp, K), lambda i: (0, 0)),
                pl.BlockSpec((K, H), lambda i: (0, 0)),
                pl.BlockSpec((1, H), lambda i: (0, 0)),
                pl.BlockSpec((H, N), lambda i: (0, 0)),
                pl.BlockSpec((1, N), lambda i: (0, 0)),
            ],
            out_specs=pl.BlockSpec((Mp, N), lambda i: (0, 0)),
        ),
        compiler_params=pltpu.CompilerParams(
            dimension_semantics=("arbitrary",),
            vmem_limit_bytes=_VMEM_LIMIT,
        ),
    )(x_pad, w4t, b4, w5t, b5)
    return out[:M] if Mp != M else out


# ---------------------------------------------------------------------------
# Conv2d (valid padding, square kernel, stride s) via im2col + Pallas matmul
# ---------------------------------------------------------------------------
def conv2d_relu(x_nhwc, w_mat, b2, *, kh, kw, stride, tm=None):
    """w_mat is the pre-transposed (C*kh*kw, O) weight; b2 is (1, O)."""
    B, H, W, C = x_nhwc.shape
    K, O = w_mat.shape
    assert K == C * kh * kw
    Ho = (H - kh) // stride + 1
    Wo = (W - kw) // stride + 1

    # im2col glue (strided slices); flattened patch ordering is
    # (c, i, j) -> c*kh*kw + i*kw + j, matching PyTorch's weight.reshape(O, -1).
    # TODO(synk): fuse the im2col into the pallas input pipeline (in-kernel taps or
    # allow_input_fusion) to avoid the HBM round-trip of the patch matrix.
    cols = []
    for i in range(kh):
        for j in range(kw):
            sl = jax.lax.slice(
                x_nhwc,
                (0, i, j, 0),
                (B, i + stride * (Ho - 1) + 1, j + stride * (Wo - 1) + 1, C),
                (1, stride, stride, 1),
            )  # (B, Ho, Wo, C)
            cols.append(sl)
    patches = jnp.stack(cols, axis=-1)                 # (B, Ho, Wo, C, kh*kw)
    patches = patches.reshape(B * Ho * Wo, C * kh * kw)

    out = matmul_bias_act(patches, w_mat, b2, relu=True, tm=tm)
    return out.reshape(B, Ho, Wo, O)


# ---------------------------------------------------------------------------
# Parameter init (PyTorch-default-style uniform(-1/sqrt(fan_in))), stored in
# the matmul-ready layouts so the jitted forward never transposes weights, and
# with torch's NCHW Flatten folded into the first FC weight's row order.
# ---------------------------------------------------------------------------
def init_params(key, in_ch, n_actions):
    def uinit(k, shape, fan_in):
        bound = 1.0 / np.sqrt(fan_in)
        return jax.random.uniform(k, shape, jnp.float32, -bound, bound)

    ks = jax.random.split(key, 10)
    w1 = uinit(ks[0], (32, in_ch, 8, 8), in_ch * 8 * 8)
    b1 = uinit(ks[1], (32,), in_ch * 8 * 8)
    w2 = uinit(ks[2], (64, 32, 4, 4), 32 * 4 * 4)
    b2 = uinit(ks[3], (64,), 32 * 4 * 4)
    w3 = uinit(ks[4], (64, 64, 3, 3), 64 * 3 * 3)
    b3 = uinit(ks[5], (64,), 64 * 3 * 3)
    w4 = uinit(ks[6], (512, 3136), 3136)
    b4 = uinit(ks[7], (512,), 3136)
    w5 = uinit(ks[8], (n_actions, 512), 512)
    b5 = uinit(ks[9], (512,), 512)
    b5 = uinit(ks[9], (n_actions,), 512)

    # torch flattens the (B, 64, 7, 7) conv3 output channel-major:
    #   p = c*49 + h*7 + w
    # our conv3 output is NHWC and is flattened spatial-major:
    #   q = (h*7 + w)*64 + c
    # Permute w4^T's rows so that  x_nhwc_flat @ w4t_perm == x_nchw_flat @ w4^T.
    perm = np.arange(3136).reshape(64, 7, 7).transpose(1, 2, 0).reshape(-1)
    w4t_perm = jnp.take(w4.T, jnp.asarray(perm), axis=0)   # (3136, 512)

    return {
        # conv weights pre-flattened+transposed to (C*kh*kw, O); biases as (1, O)
        "w1m": w1.reshape(32, -1).T, "b1": b1.reshape(1, -1),
        "w2m": w2.reshape(64, -1).T, "b2": b2.reshape(1, -1),
        "w3m": w3.reshape(64, -1).T, "b3": b3.reshape(1, -1),
        # FC weights pre-transposed to (in, out); w4 also row-permuted (see above)
        "w4t": w4t_perm, "b4": b4.reshape(1, -1),
        "w5t": w5.T, "b5": b5.reshape(1, -1),
    }


# ---------------------------------------------------------------------------
# Full forward pass (equivalent to DQNHuman.forward)
# ---------------------------------------------------------------------------
def dqn_forward(params, x_nchw):
    x = jnp.transpose(x_nchw, (0, 2, 3, 1))                               # NCHW -> NHWC
    # conv1: M = B*20*20 = 800 -> tm=400 gives 2 exact parallel steps (v7x megacore)
    x = conv2d_relu(x, params["w1m"], params["b1"], kh=8, kw=8, stride=4, tm=400)
    # conv2: M = B*9*9 = 162 -> single block (padded to 168)
    x = conv2d_relu(x, params["w2m"], params["b2"], kh=4, kw=4, stride=2)
    # conv3: M = B*7*7 = 98 -> single block (padded to 104)
    x = conv2d_relu(x, params["w3m"], params["b3"], kh=3, kw=3, stride=1)
    B = x.shape[0]
    # torch's NCHW Flatten is folded into w4's row order at init, so a plain
    # row-major reshape of the NHWC tensor is all that's needed here.
    x = x.reshape(B, -1)                                                  # (B, 3136)
    # fused Linear(3136,512)+ReLU+Linear(512,n_actions) in one pallas_call
    x = fc_head(x, params["w4t"], params["b4"], params["w5t"], params["b5"])
    return x


if __name__ == "__main__":
    key = jax.random.PRNGKey(0)
    k_param, k_input = jax.random.split(key)

    input_dim = (4, 84, 84)   # forced by nn.Linear(3136, 512) in the reference module
    n_actions = 6
    batch = 2

    params = init_params(k_param, input_dim[0], n_actions)
    x = jax.random.normal(k_input, (batch,) + input_dim, dtype=jnp.float32)

    fwd = jax.jit(dqn_forward)
    out = jax.block_until_ready(fwd(params, x))

    assert out.shape == (batch, n_actions), out.shape
    assert bool(jnp.all(jnp.isfinite(out)))
    print("KERNEL_OK")
</pallas_src>

<mosaic_0001>
module attributes {stable_mosaic.version = 11 : i64} {
  func.func @_mm_bias_act_kernel(%arg0: i32, %arg1: memref<400x256xf32, #tpu.memory_space<vmem>>, %arg2: memref<256x32xf32, #tpu.memory_space<vmem>>, %arg3: memref<1x32xf32, #tpu.memory_space<vmem>>, %arg4: memref<400x32xf32, #tpu.memory_space<vmem>>) attributes {dimension_semantics = [#tpu.dimension_semantics<parallel>], iteration_bounds = array<i64: 2>, scalar_prefetch = 0 : i64, scratch_operands = 0 : i64, tpu.core_type = #tpu.core_type<tc>, window_params = [{transform_indices = @transform_0, window_bounds = array<i64: 400, 256>}, {pipeline_mode = #tpu.pipeline_mode<synchronous>, transform_indices = @transform_1, window_bounds = array<i64: 256, 32>}, {pipeline_mode = #tpu.pipeline_mode<synchronous>, transform_indices = @transform_2, window_bounds = array<i64: 1, 32>}, {transform_indices = @transform_3, window_bounds = array<i64: 400, 32>}]} {
    %c0 = arith.constant 0 : index
    %c0_0 = arith.constant 0 : index
    %0 = vector.load %arg1[%c0, %c0_0] : memref<400x256xf32, #tpu.memory_space<vmem>>, vector<400x256xf32>
    %c0_1 = arith.constant 0 : index
    %c0_2 = arith.constant 0 : index
    %1 = vector.load %arg2[%c0_1, %c0_2] : memref<256x32xf32, #tpu.memory_space<vmem>>, vector<256x32xf32>
    %cst = arith.constant dense<0.000000e+00> : vector<400x32xf32>
    %2 = tpu.matmul %0, %1, %cst {dimension_numbers = #tpu.dot_dimension_numbers<[1], [0], [0], [1], [0, 0, 1, 1], [], []>} : vector<400x256xf32>, vector<256x32xf32>, vector<400x32xf32> -> vector<400x32xf32>
    %c0_3 = arith.constant 0 : index
    %c0_4 = arith.constant 0 : index
    %3 = vector.load %arg3[%c0_3, %c0_4] : memref<1x32xf32, #tpu.memory_space<vmem>>, vector<1x32xf32>
    %4 = vector.broadcast %3 : vector<1x32xf32> to vector<400x32xf32>
    %5 = arith.addf %2, %4 : vector<400x32xf32>
    %cst_5 = arith.constant 0.000000e+00 : f32
    %6 = vector.broadcast %cst_5 : f32 to vector<400x32xf32>
    %7 = arith.maximumf %5, %6 : vector<400x32xf32>
    %c0_6 = arith.constant 0 : index
    %c0_7 = arith.constant 0 : index
    %8 = vector.load %arg4[%c0_6, %c0_7] : memref<400x32xf32, #tpu.memory_space<vmem>>, vector<400x32xf32>
    tpu.vector_store %arg4[%c0_6, %c0_7], %7 {strides = array<i32>} : memref<400x32xf32, #tpu.memory_space<vmem>>, vector<400x32xf32>,
    return
  }
  func.func @transform_0(%arg0: i32) -> (i32, i32) {
    %c0_i32 = arith.constant 0 : i32
    %c0_i32_0 = arith.constant 0 : i32
    return %arg0, %c0_i32 : i32, i32
  }
  func.func @transform_1(%arg0: i32) -> (i32, i32) {
    %c0_i32 = arith.constant 0 : i32
    %c0_i32_0 = arith.constant 0 : i32
    %c0_i32_1 = arith.constant 0 : i32
    return %c0_i32, %c0_i32_0 : i32, i32
  }
  func.func @transform_2(%arg0: i32) -> (i32, i32) {
    %c0_i32 = arith.constant 0 : i32
    %c0_i32_0 = arith.constant 0 : i32
    %c0_i32_1 = arith.constant 0 : i32
    return %c0_i32, %c0_i32_0 : i32, i32
  }
  func.func @transform_3(%arg0: i32) -> (i32, i32) {
    %c0_i32 = arith.constant 0 : i32
    %c0_i32_0 = arith.constant 0 : i32
    return %arg0, %c0_i32 : i32, i32
  }
}

module attributes {stable_mosaic.version = 11 : i64} {
  func.func @_mm_bias_act_kernel(%arg0: i32, %arg1: memref<168x512xf32, #tpu.memory_space<vmem>>, %arg2: memref<512x64xf32, #tpu.memory_space<vmem>>, %arg3: memref<1x64xf32, #tpu.memory_space<vmem>>, %arg4: memref<168x64xf32, #tpu.memory_space<vmem>>) attributes {dimension_semantics = [#tpu.dimension_semantics<parallel>], iteration_bounds = array<i64: 1>, scalar_prefetch = 0 : i64, scratch_operands = 0 : i64, tpu.core_type = #tpu.core_type<tc>, window_params = [{transform_indices = @transform_0, window_bounds = array<i64: 168, 512>}, {pipeline_mode = #tpu.pipeline_mode<synchronous>, transform_indices = @transform_1, window_bounds = array<i64: 512, 64>}, {pipeline_mode = #tpu.pipeline_mode<synchronous>, transform_indices = @transform_2, window_bounds = array<i64: 1, 64>}, {transform_indices = @transform_3, window_bounds = array<i64: 168, 64>}]} {
    %c0 = arith.constant 0 : index
    %c0_0 = arith.constant 0 : index
    %0 = vector.load %arg1[%c0, %c0_0] : memref<168x512xf32, #tpu.memory_space<vmem>>, vector<168x512xf32>
    %c0_1 = arith.constant 0 : index
    %c0_2 = arith.constant 0 : index
    %1 = vector.load %arg2[%c0_1, %c0_2] : memref<512x64xf32, #tpu.memory_space<vmem>>, vector<512x64xf32>
    %cst = arith.constant dense<0.000000e+00> : vector<168x64xf32>
    %2 = tpu.matmul %0, %1, %cst {dimension_numbers = #tpu.dot_dimension_numbers<[1], [0], [0], [1], [0, 0, 1, 1], [], []>} : vector<168x512xf32>, vector<512x64xf32>, vector<168x64xf32> -> vector<168x64xf32>
    %c0_3 = arith.constant 0 : index
    %c0_4 = arith.constant 0 : index
    %3 = vector.load %arg3[%c0_3, %c0_4] : memref<1x64xf32, #tpu.memory_space<vmem>>, vector<1x64xf32>
    %4 = vector.broadcast %3 : vector<1x64xf32> to vector<168x64xf32>
    %5 = arith.addf %2, %4 : vector<168x64xf32>
    %cst_5 = arith.constant 0.000000e+00 : f32
    %6 = vector.broadcast %cst_5 : f32 to vector<168x64xf32>
    %7 = arith.maximumf %5, %6 : vector<168x64xf32>
    %c0_6 = arith.constant 0 : index
    %c0_7 = arith.constant 0 : index
    %8 = vector.load %arg4[%c0_6, %c0_7] : memref<168x64xf32, #tpu.memory_space<vmem>>, vector<168x64xf32>
    tpu.vector_store %arg4[%c0_6, %c0_7], %7 {strides = array<i32>} : memref<168x64xf32, #tpu.memory_space<vmem>>, vector<168x64xf32>,
    return
  }
  func.func @transform_0(%arg0: i32) -> (i32, i32) {
    %c0_i32 = arith.constant 0 : i32
    %c0_i32_0 = arith.constant 0 : i32
    return %arg0, %c0_i32 : i32, i32
  }
  func.func @transform_1(%arg0: i32) -> (i32, i32) {
    %c0_i32 = arith.constant 0 : i32
    %c0_i32_0 = arith.constant 0 : i32
    %c0_i32_1 = arith.constant 0 : i32
    return %c0_i32, %c0_i32_0 : i32, i32
  }
  func.func @transform_2(%arg0: i32) -> (i32, i32) {
    %c0_i32 = arith.constant 0 : i32
    %c0_i32_0 = arith.constant 0 : i32
    %c0_i32_1 = arith.constant 0 : i32
    return %c0_i32, %c0_i32_0 : i32, i32
  }
  func.func @transform_3(%arg0: i32) -> (i32, i32) {
    %c0_i32 = arith.constant 0 : i32
    %c0_i32_0 = arith.constant 0 : i32
    return %arg0, %c0_i32 : i32, i32
  }
}

module attributes {stable_mosaic.version = 11 : i64} {
  func.func @_mm_bias_act_kernel(%arg0: i32, %arg1: memref<104x576xf32, #tpu.memory_space<vmem>>, %arg2: memref<576x64xf32, #tpu.memory_space<vmem>>, %arg3: memref<1x64xf32, #tpu.memory_space<vmem>>, %arg4: memref<104x64xf32, #tpu.memory_space<vmem>>) attributes {dimension_semantics = [#tpu.dimension_semantics<parallel>], iteration_bounds = array<i64: 1>, scalar_prefetch = 0 : i64, scratch_operands = 0 : i64, tpu.core_type = #tpu.core_type<tc>, window_params = [{transform_indices = @transform_0, window_bounds = array<i64: 104, 576>}, {pipeline_mode = #tpu.pipeline_mode<synchronous>, transform_indices = @transform_1, window_bounds = array<i64: 576, 64>}, {pipeline_mode = #tpu.pipeline_mode<synchronous>, transform_indices = @transform_2, window_bounds = array<i64: 1, 64>}, {transform_indices = @transform_3, window_bounds = array<i64: 104, 64>}]} {
    %c0 = arith.constant 0 : index
    %c0_0 = arith.constant 0 : index
    %0 = vector.load %arg1[%c0, %c0_0] : memref<104x576xf32, #tpu.memory_space<vmem>>, vector<104x576xf32>
    %c0_1 = arith.constant 0 : index
    %c0_2 = arith.constant 0 : index
    %1 = vector.load %arg2[%c0_1, %c0_2] : memref<576x64xf32, #tpu.memory_space<vmem>>, vector<576x64xf32>
    %cst = arith.constant dense<0.000000e+00> : vector<104x64xf32>
    %2 = tpu.matmul %0, %1, %cst {dimension_numbers = #tpu.dot_dimension_numbers<[1], [0], [0], [1], [0, 0, 1, 1], [], []>} : vector<104x576xf32>, vector<576x64xf32>, vector<104x64xf32> -> vector<104x64xf32>
    %c0_3 = arith.constant 0 : index
    %c0_4 = arith.constant 0 : index
    %3 = vector.load %arg3[%c0_3, %c0_4] : memref<1x64xf32, #tpu.memory_space<vmem>>, vector<1x64xf32>
    %4 = vector.broadcast %3 : vector<1x64xf32> to vector<104x64xf32>
    %5 = arith.addf %2, %4 : vector<104x64xf32>
    %cst_5 = arith.constant 0.000000e+00 : f32
    %6 = vector.broadcast %cst_5 : f32 to vector<104x64xf32>
    %7 = arith.maximumf %5, %6 : vector<104x64xf32>
    %c0_6 = arith.constant 0 : index
    %c0_7 = arith.constant 0 : index
    %8 = vector.load %arg4[%c0_6, %c0_7] : memref<104x64xf32, #tpu.memory_space<vmem>>, vector<104x64xf32>
    tpu.vector_store %arg4[%c0_6, %c0_7], %7 {strides = array<i32>} : memref<104x64xf32, #tpu.memory_space<vmem>>, vector<104x64xf32>,
    return
  }
  func.func @transform_0(%arg0: i32) -> (i32, i32) {
    %c0_i32 = arith.constant 0 : i32
    %c0_i32_0 = arith.constant 0 : i32
    return %arg0, %c0_i32 : i32, i32
  }
  func.func @transform_1(%arg0: i32) -> (i32, i32) {
    %c0_i32 = arith.constant 0 : i32
    %c0_i32_0 = arith.constant 0 : i32
    %c0_i32_1 = arith.constant 0 : i32
    return %c0_i32, %c0_i32_0 : i32, i32
  }
  func.func @transform_2(%arg0: i32) -> (i32, i32) {
    %c0_i32 = arith.constant 0 : i32
    %c0_i32_0 = arith.constant 0 : i32
    %c0_i32_1 = arith.constant 0 : i32
    return %c0_i32, %c0_i32_0 : i32, i32
  }
  func.func @transform_3(%arg0: i32) -> (i32, i32) {
    %c0_i32 = arith.constant 0 : i32
    %c0_i32_0 = arith.constant 0 : i32
    return %arg0, %c0_i32 : i32, i32
  }
}

module attributes {stable_mosaic.version = 11 : i64} {
  func.func @_fc_head_kernel(%arg0: i32, %arg1: memref<8x3136xf32, #tpu.memory_space<vmem>>, %arg2: memref<3136x512xf32, #tpu.memory_space<vmem>>, %arg3: memref<1x512xf32, #tpu.memory_space<vmem>>, %arg4: memref<512x6xf32, #tpu.memory_space<vmem>>, %arg5: memref<1x6xf32, #tpu.memory_space<vmem>>, %arg6: memref<8x6xf32, #tpu.memory_space<vmem>>) attributes {dimension_semantics = [#tpu.dimension_semantics<arbitrary>], iteration_bounds = array<i64: 1>, scalar_prefetch = 0 : i64, scratch_operands = 0 : i64, tpu.core_type = #tpu.core_type<tc>, window_params = [{pipeline_mode = #tpu.pipeline_mode<synchronous>, transform_indices = @transform_0, window_bounds = array<i64: 8, 3136>}, {pipeline_mode = #tpu.pipeline_mode<synchronous>, transform_indices = @transform_1, window_bounds = array<i64: 3136, 512>}, {pipeline_mode = #tpu.pipeline_mode<synchronous>, transform_indices = @transform_2, window_bounds = array<i64: 1, 512>}, {pipeline_mode = #tpu.pipeline_mode<synchronous>, transform_indices = @transform_3, window_bounds = array<i64: 512, 6>}, {pipeline_mode = #tpu.pipeline_mode<synchronous>, transform_indices = @transform_4, window_bounds = array<i64: 1, 6>}, {pipeline_mode = #tpu.pipeline_mode<synchronous>, transform_indices = @transform_5, window_bounds = array<i64: 8, 6>}]} {
    %c0 = arith.constant 0 : index
    %c0_0 = arith.constant 0 : index
    %0 = vector.load %arg1[%c0, %c0_0] : memref<8x3136xf32, #tpu.memory_space<vmem>>, vector<8x3136xf32>
    %c0_1 = arith.constant 0 : index
    %c0_2 = arith.constant 0 : index
    %1 = vector.load %arg2[%c0_1, %c0_2] : memref<3136x512xf32, #tpu.memory_space<vmem>>, vector<3136x512xf32>
    %cst = arith.constant dense<0.000000e+00> : vector<8x512xf32>
    %2 = tpu.matmul %0, %1, %cst {dimension_numbers = #tpu.dot_dimension_numbers<[1], [0], [0], [1], [0, 0, 1, 1], [], []>} : vector<8x3136xf32>, vector<3136x512xf32>, vector<8x512xf32> -> vector<8x512xf32>
    %c0_3 = arith.constant 0 : index
    %c0_4 = arith.constant 0 : index
    %3 = vector.load %arg3[%c0_3, %c0_4] : memref<1x512xf32, #tpu.memory_space<vmem>>, vector<1x512xf32>
    %4 = vector.broadcast %3 : vector<1x512xf32> to vector<8x512xf32>
    %5 = arith.addf %2, %4 : vector<8x512xf32>
    %cst_5 = arith.constant 0.000000e+00 : f32
    %6 = vector.broadcast %cst_5 : f32 to vector<8x512xf32>
    %7 = arith.maximumf %5, %6 : vector<8x512xf32>
    %c0_6 = arith.constant 0 : index
    %c0_7 = arith.constant 0 : index
    %8 = vector.load %arg4[%c0_6, %c0_7] : memref<512x6xf32, #tpu.memory_space<vmem>>, vector<512x6xf32>
    %cst_8 = arith.constant dense<0.000000e+00> : vector<8x6xf32>
    %9 = tpu.matmul %7, %8, %cst_8 {dimension_numbers = #tpu.dot_dimension_numbers<[1], [0], [0], [1], [0, 0, 1, 1], [], []>} : vector<8x512xf32>, vector<512x6xf32>, vector<8x6xf32> -> vector<8x6xf32>
    %c0_9 = arith.constant 0 : index
    %c0_10 = arith.constant 0 : index
    %10 = vector.load %arg5[%c0_9, %c0_10] : memref<1x6xf32, #tpu.memory_space<vmem>>, vector<1x6xf32>
    %11 = vector.broadcast %10 : vector<1x6xf32> to vector<8x6xf32>
    %12 = arith.addf %9, %11 : vector<8x6xf32>
    %c0_11 = arith.constant 0 : index
    %c0_12 = arith.constant 0 : index
    %13 = vector.load %arg6[%c0_11, %c0_12] : memref<8x6xf32, #tpu.memory_space<vmem>>, vector<8x6xf32>
    tpu.vector_store %arg6[%c0_11, %c0_12], %12 {strides = array<i32>} : memref<8x6xf32, #tpu.memory_space<vmem>>, vector<8x6xf32>,
    return
  }
  func.func @transform_0(%arg0: i32) -> (i32, i32) {
    %c0_i32 = arith.constant 0 : i32
    %c0_i32_0 = arith.constant 0 : i32
    %c0_i32_1 = arith.constant 0 : i32
    return %c0_i32, %c0_i32_0 : i32, i32
  }
  func.func @transform_1(%arg0: i32) -> (i32, i32) {
    %c0_i32 = arith.constant 0 : i32
    %c0_i32_0 = arith.constant 0 : i32
    %c0_i32_1 = arith.constant 0 : i32
    return %c0_i32, %c0_i32_0 : i32, i32
  }
  func.func @transform_2(%arg0: i32) -> (i32, i32) {
    %c0_i32 = arith.constant 0 : i32
    %c0_i32_0 = arith.constant 0 : i32
    %c0_i32_1 = arith.constant 0 : i32
    return %c0_i32, %c0_i32_0 : i32, i32
  }
  func.func @transform_3(%arg0: i32) -> (i32, i32) {
    %c0_i32 = arith.constant 0 : i32
    %c0_i32_0 = arith.constant 0 : i32
    %c0_i32_1 = arith.constant 0 : i32
    return %c0_i32, %c0_i32_0 : i32, i32
  }
  func.func @transform_4(%arg0: i32) -> (i32, i32) {
    %c0_i32 = arith.constant 0 : i32
    %c0_i32_0 = arith.constant 0 : i32
    %c0_i32_1 = arith.constant 0 : i32
    return %c0_i32, %c0_i32_0 : i32, i32
  }
  func.func @transform_5(%arg0: i32) -> (i32, i32) {
    %c0_i32 = arith.constant 0 : i32
    %c0_i32_0 = arith.constant 0 : i32
    %c0_i32_1 = arith.constant 0 : i32
    return %c0_i32, %c0_i32_0 : i32, i32
  }
}

</mosaic_0001>

<bundles_post_ra>
// kernel: dqn_forward.4
= control target key start
LH: loop header
LB: loop body
LE: loop exit
PB: predicated region body
PF: predicated region fallthrough
CT: control target
= control target key end

     0   :  { %s918_s12 = smov 0   ;;  %s1326_s0 = inlined_call_operand.vmem [shape: f32[800,256], index: 0, kind: input, shape index: {}]   ;;  %s1327_s1 = inlined_call_operand.vmem [shape: f32[256,32], index: 1, kind: input, shape index: {}]   ;;  %s1328_s2 = inlined_call_operand.vmem [shape: f32[1,32], index: 2, kind: input, shape index: {}]   ;;  %s1329_s3 = inlined_call_operand.vmem [shape: f32[800,32], index: 3, kind: output, shape index: {}]  }
   0x1 LB: > { %s788_s13 = sadd.s32 4294967295, %s895_s12   ;;  %p792_p0 = scmp.ge.s32.totalorder %s895_s12, 1  ;;  %s895_s12 = sphi %s918_s12, %s13_s12  }
   0x2   : > { %p139_p1 = scmp.lt.s32.totalorder %s895_s12, 3 }
   0x4   : > { %p140_p2 = pnand %p792_p0, %p139_p1 }
   0x5   : > { %v277_v0 = vld [vmem:[%s1327_s1] sm:$0xff] (!%p140_p2)  ;;  %v278_v1 = vld [vmem:[%s1327_s1 + $0x8] sm:$0xff] (!%p140_p2)  ;;  %v279_v2 = vld [vmem:[%s1327_s1 + $0x10] sm:$0xff] (!%p140_p2)  ;;  %s164_s20 = smul.u32 (!%p140_p2), 50, %s788_s13  ;;  %v897_v3 = vmov (!%p140_p2), 0.0|0.0   ;;  %vm681_vm0 = vcmask (!%p140_p2), 261120  }
   0x6   : > { %143 = sbr.rel (%p140_p2) target bundleno = 384 (0x180), region = 32  ;;  %800 = vmatprep.subr.bf16.mxu0 (!%p140_p2), %v897_v3  ;;  %848 = vmatprep.subr.bf16.mxu1 (!%p140_p2), %v897_v3  ;;  %v801_v4 = vpack.c.bf16 (!%p140_p2), %v278_v1, %v277_v0  ;;  %v280_v5 = vld [vmem:[%s1327_s1 + $0x18] sm:$0xff] (!%p140_p2)  ;;  %v281_v7 = vld [vmem:[%s1327_s1 + $0x20] sm:$0xff] (!%p140_p2)  ;;  %v282_v8 = vld [vmem:[%s1327_s1 + $0x28] sm:$0xff] (!%p140_p2) }
   0x7   : > { %p165_p3 = scmp.lt.s32.totalorder (!%p140_p2), %s164_s20, 99  ;;  %v804_v6 = vpack.c.bf16 (!%p140_p2), %v280_v5, %v279_v2  ;;  %v807_v9 = vpack.c.bf16 (!%p140_p2), %v282_v8, %v281_v7  ;;  %v283_v10 = vld [vmem:[%s1327_s1 + $0x30] sm:$0xff] (!%p140_p2)  ;;  %v284_v11 = vld [vmem:[%s1327_s1 + $0x38] sm:$0xff] (!%p140_p2)  ;;  %v285_v15 = vld [vmem:[%s1327_s1 + $0x40] sm:$0xff] (!%p140_p2) }
   0x8   : > { %802 = vmatpush1.bf16.msra.mxu0 (!%p140_p2), %v801_v4  ;;  %864 = vmatpush1.bf16.msra.mxu1 (!%p140_p2), %v801_v4  ;;  %v810_v13 = vpack.c.bf16 (!%p140_p2), %v284_v11, %v283_v10  ;;  %v286_v16 = vld [vmem:[%s1327_s1 + $0x48] sm:$0xff] (!%p140_p2)  ;;  %v287_v18 = vld [vmem:[%s1327_s1 + $0x50] sm:$0xff] (!%p140_p2)  ;;  %v288_v19 = vld [vmem:[%s1327_s1 + $0x58] sm:$0xff] (!%p140_p2) }
   0x9   : > { %803 = vmatprep.subr.bf16.mxu0 (!%p140_p2), %v897_v3  ;;  %849 = vmatprep.subr.bf16.mxu1 (!%p140_p2), %v897_v3  ;;  %v813_v17 = vpack.c.bf16 (!%p140_p2), %v286_v16, %v285_v15  ;;  %v816_v20 = vpack.c.bf16 (!%p140_p2), %v288_v19, %v287_v18  ;;  %v289_v21 = vld [vmem:[%s1327_s1 + $0x60] sm:$0xff] (!%p140_p2)  ;;  %v290_v22 = vld [vmem:[%s1327_s1 + $0x68] sm:$0xff] (!%p140_p2)  ;;  %v291_v24 = vld [vmem:[%s1327_s1 + $0x70] sm:$0xff] (!%p140_p2) }
   0xa   : > { %v819_v23 = vpack.c.bf16 (!%p140_p2), %v290_v22, %v289_v21  ;;  %v292_v25 = vld [vmem:[%s1327_s1 + $0x78] sm:$0xff] (!%p140_p2)  ;;  %v293_v27 = vld [vmem:[%s1327_s1 + $0x80] sm:$0xff] (!%p140_p2)  ;;  %v294_v28 = vld [vmem:[%s1327_s1 + $0x88] sm:$0xff] (!%p140_p2) }
   0xb   : > { %v822_v26 = vpack.c.bf16 (!%p140_p2), %v292_v25, %v291_v24  ;;  %v825_v29 = vpack.c.bf16 (!%p140_p2), %v294_v28, %v293_v27  ;;  %v295_v30 = vld [vmem:[%s1327_s1 + $0x90] sm:$0xff] (!%p140_p2)  ;;  %v296_v31 = vld [vmem:[%s1327_s1 + $0x98] sm:$0xff] (!%p140_p2)  ;;  %v297_v33 = vld [vmem:[%s1327_s1 + $0xa0] sm:$0xff] (!%p140_p2) }
   0xc   : > { %805 = vmatpush1.bf16.msra.mxu0 (!%p140_p2), %v804_v6  ;;  %865 = vmatpush1.bf16.msra.mxu1 (!%p140_p2), %v804_v6  ;;  %v828_v32 = vpack.c.bf16 (!%p140_p2), %v296_v31, %v295_v30  ;;  %v298_v34 = vld [vmem:[%s1327_s1 + $0xa8] sm:$0xff] (!%p140_p2)  ;;  %v299_v36 = vld [vmem:[%s1327_s1 + $0xb0] sm:$0xff] (!%p140_p2)  ;;  %v300_v37 = vld [vmem:[%s1327_s1 + $0xb8] sm:$0xff] (!%p140_p2) }
   0xd   : > { %s1331_s20 = smov (!%p165_p3, %s164_s20), 99  ;;  %806 = vmatprep.subr.bf16.mxu0 %v897_v3  ;;  %850 = vmatprep.subr.bf16.mxu1 %v897_v3  ;;  %v831_v35 = vpack.c.bf16 %v298_v34, %v297_v33  ;;  %v834_v38 = vpack.c.bf16 %v300_v37, %v299_v36  ;;  %v301_v39 = vld [vmem:[%s1327_s1 + $0xc0] sm:$0xff]  ;;  %v302_v40 = vld [vmem:[%s1327_s1 + $0xc8] sm:$0xff]  ;;  %v303_v42 = vld [vmem:[%s1327_s1 + $0xd0] sm:$0xff] }
   0xe   : > { %s799_s27 = sshll.u32 %s1331_s20, 4  ;;  %v837_v41 = vpack.c.bf16 %v302_v40, %v301_v39  ;;  %v304_v43 = vld [vmem:[%s1327_s1 + $0xd8] sm:$0xff]  ;;  %v305_v45 = vld [vmem:[%s1327_s1 + $0xe0] sm:$0xff]  ;;  %v306_v46 = vld [vmem:[%s1327_s1 + $0xe8] sm:$0xff]  ;;  %s795_s10 = sshll.u32 %s1331_s20, 3 }
   0xf   : > { %s954_s30 = scalar_lea.vmem %s1326_s0, %s799_s27  ;;  %v840_v44 = vpack.c.bf16 %v304_v43, %v303_v42  ;;  %v843_v47 = vpack.c.bf16 %v306_v46, %v305_v45  ;;  %v307_v48 = vld [vmem:[%s1327_s1 + $0xf0] sm:$0xff]  ;;  %v308_v49 = vld [vmem:[%s1327_s1 + $0xf8] sm:$0xff] }
  0x10   : > { %v178_v12 = vld [vmem:[%s954_s30 + $0x8] sm:$0xff]  ;;  %808 = vmatpush1.bf16.msra.mxu0 %v807_v9  ;;  %866 = vmatpush1.bf16.msra.mxu1 %v807_v9  ;;  %v228_v14 = vld [vmem:[%s954_s30 + $0x198] sm:$0xff]  ;;  %v846_v50 = vpack.c.bf16 %v308_v49, %v307_v48  ;;  %v177_v51 = vld [vmem:[%s954_s30] sm:$0xff] }
  0x11   : > { %809 = vmatprep.subr.bf16.mxu0 %v897_v3  ;;  %851 = vmatprep.subr.bf16.mxu1 %v897_v3  ;;  %v227_v52 = vld [vmem:[%s954_s30 + $0x190] sm:$0xff]  ;;  %v180_v53 = vld [vmem:[%s954_s30 + $0x18] sm:$0xff]  ;;  %v230_v54 = vld [vmem:[%s954_s30 + $0x1a8] sm:$0xff] }
  0x12   : > { %380 = vmatprep.mubr.f32.mxu0 %v178_v12  ;;  %505 = vmatprep.mubr.f32.mxu1 %v228_v14  ;;  %v179_v55 = vld [vmem:[%s954_s30 + $0x10] sm:$0xff]  ;;  %v229_v56 = vld [vmem:[%s954_s30 + $0x1a0] sm:$0xff]  ;;  %v182_v57 = vld [vmem:[%s954_s30 + $0x28] sm:$0xff] }
  0x13   : > { %v232_v58 = vld [vmem:[%s954_s30 + $0x1b8] sm:$0xff]  ;;  %v181_v59 = vld [vmem:[%s954_s30 + $0x20] sm:$0xff]  ;;  %v231_v60 = vld [vmem:[%s954_s30 + $0x1b0] sm:$0xff] }
  0x14   : > { %811 = vmatpush1.bf16.msra.mxu0 %v810_v13  ;;  %867 = vmatpush1.bf16.msra.mxu1 %v810_v13  ;;  %v184_v61 = vld [vmem:[%s954_s30 + $0x38] sm:$0xff]  ;;  %v234_v62 = vld [vmem:[%s954_s30 + $0x1c8] sm:$0xff]  ;;  %v183_v63 = vld [vmem:[%s954_s30 + $0x30] sm:$0xff] }
  0x15   : > { %812 = vmatprep.subr.bf16.mxu0 %v897_v3  ;;  %852 = vmatprep.subr.bf16.mxu1 %v897_v3  ;;  %v233_v0 = vld [vmem:[%s954_s30 + $0x1c0] sm:$0xff]  ;;  %v186_v1 = vld [vmem:[%s954_s30 + $0x48] sm:$0xff]  ;;  %v236_v2 = vld [vmem:[%s954_s30 + $0x1d8] sm:$0xff] }
  0x16   : > { %v235_v4 = vld [vmem:[%s954_s30 + $0x1d0] sm:$0xff]  ;;  %v188_v5 = vld [vmem:[%s954_s30 + $0x58] sm:$0xff]  ;;  %v238_v6 = vld [vmem:[%s954_s30 + $0x1e8] sm:$0xff] }
  0x17   : > { %v187_v7 = vld [vmem:[%s954_s30 + $0x50] sm:$0xff]  ;;  %v237_v8 = vld [vmem:[%s954_s30 + $0x1e0] sm:$0xff]  ;;  %v190_v9 = vld [vmem:[%s954_s30 + $0x68] sm:$0xff] }
  0x18   : > { %814 = vmatpush1.bf16.msra.mxu0 %v813_v17  ;;  %868 = vmatpush1.bf16.msra.mxu1 %v813_v17  ;;  %v240_v10 = vld [vmem:[%s954_s30 + $0x1f8] sm:$0xff]  ;;  %v189_v11 = vld [vmem:[%s954_s30 + $0x60] sm:$0xff]  ;;  %v239_v12 = vld [vmem:[%s954_s30 + $0x1f0] sm:$0xff] }
  0x19   : > { %815 = vmatprep.subr.bf16.mxu0 %v897_v3  ;;  %853 = vmatprep.subr.bf16.mxu1 %v897_v3  ;;  %v192_v13 = vld [vmem:[%s954_s30 + $0x78] sm:$0xff]  ;;  %v242_v14 = vld [vmem:[%s954_s30 + $0x208] sm:$0xff]  ;;  %v191_v15 = vld [vmem:[%s954_s30 + $0x70] sm:$0xff] }
  0x1a   : > { %v241_v16 = vld [vmem:[%s954_s30 + $0x200] sm:$0xff]  ;;  %v194_v17 = vld [vmem:[%s954_s30 + $0x88] sm:$0xff]  ;;  %v244_v18 = vld [vmem:[%s954_s30 + $0x218] sm:$0xff] }
  0x1b   : > { %v193_v19 = vld [vmem:[%s954_s30 + $0x80] sm:$0xff]  ;;  %v196_v21 = vld [vmem:[%s954_s30 + $0x98] sm:$0xff]  ;;  %v246_v22 = vld [vmem:[%s954_s30 + $0x228] sm:$0xff] }
  0x1c   : > { %817 = vmatpush1.bf16.msra.mxu0 %v816_v20  ;;  %869 = vmatpush1.bf16.msra.mxu1 %v816_v20  ;;  %v243_v20 = vld [vmem:[%s954_s30 + $0x210] sm:$0xff]  ;;  %v245_v24 = vld [vmem:[%s954_s30 + $0x220] sm:$0xff]  ;;  %v198_v25 = vld [vmem:[%s954_s30 + $0xa8] sm:$0xff] }
  0x1d   : > { %818 = vmatprep.subr.bf16.mxu0 %v897_v3  ;;  %854 = vmatprep.subr.bf16.mxu1 %v897_v3  ;;  %v197_v27 = vld [vmem:[%s954_s30 + $0xa0] sm:$0xff]  ;;  %v247_v28 = vld [vmem:[%s954_s30 + $0x230] sm:$0xff]  ;;  %v250_v30 = vld [vmem:[%s954_s30 + $0x248] sm:$0xff] }
  0x1e   : > { %v199_v31 = vld [vmem:[%s954_s30 + $0xb0] sm:$0xff]  ;;  %v202_v33 = vld [vmem:[%s954_s30 + $0xc8] sm:$0xff]  ;;  %v252_v34 = vld [vmem:[%s954_s30 + $0x258] sm:$0xff] }
  0x1f   : > { %v251_v36 = vld [vmem:[%s954_s30 + $0x250] sm:$0xff]  ;;  %v204_v37 = vld [vmem:[%s954_s30 + $0xd8] sm:$0xff]  ;;  %v253_v40 = vld [vmem:[%s954_s30 + $0x260] sm:$0xff] }
  0x20   : > { %820 = vmatpush1.bf16.msra.mxu0 %v819_v23  ;;  %870 = vmatpush1.bf16.msra.mxu1 %v819_v23  ;;  %v195_v23 = vld [vmem:[%s954_s30 + $0x90] sm:$0xff]  ;;  %v256_v42 = vld [vmem:[%s954_s30 + $0x278] sm:$0xff]  ;;  %v205_v43 = vld [vmem:[%s954_s30 + $0xe0] sm:$0xff] }
  0x21   : > { %821 = vmatprep.subr.bf16.mxu0 %v897_v3  ;;  %855 = vmatprep.subr.bf16.mxu1 %v897_v3  ;;  %v203_v39 = vld [vmem:[%s954_s30 + $0xd0] sm:$0xff]  ;;  %v208_v45 = vld [vmem:[%s954_s30 + $0xf8] sm:$0xff]  ;;  %v258_v46 = vld [vmem:[%s954_s30 + $0x288] sm:$0xff] }
  0x22   : > { %v257_v48 = vld [vmem:[%s954_s30 + $0x280] sm:$0xff]  ;;  %v210_v49 = vld [vmem:[%s954_s30 + $0x108] sm:$0xff] }
  0x24   : > { %823 = vmatpush1.bf16.msra.mxu0 %v822_v26  ;;  %871 = vmatpush1.bf16.msra.mxu1 %v822_v26  ;;  %v248_v26 = vld [vmem:[%s954_s30 + $0x238] sm:$0xff] }
  0x25   : > { %824 = vmatprep.subr.bf16.mxu0 %v897_v3  ;;  %856 = vmatprep.subr.bf16.mxu1 %v897_v3 }
  0x28   : > { %826 = vmatpush1.bf16.msra.mxu0 %v825_v29  ;;  %872 = vmatpush1.bf16.msra.mxu1 %v825_v29  ;;  %v200_v29 = vld [vmem:[%s954_s30 + $0xb8] sm:$0xff] }
  0x29   : > { %827 = vmatprep.subr.bf16.mxu0 %v897_v3  ;;  %857 = vmatprep.subr.bf16.mxu1 %v897_v3 }
  0x2c   : > { %829 = vmatpush1.bf16.msra.mxu0 %v828_v32  ;;  %873 = vmatpush1.bf16.msra.mxu1 %v828_v32  ;;  %v249_v32 = vld [vmem:[%s954_s30 + $0x240] sm:$0xff] }
  0x2d   : > { %830 = vmatprep.subr.bf16.mxu0 %v897_v3  ;;  %858 = vmatprep.subr.bf16.mxu1 %v897_v3 }
  0x30   : > { %832 = vmatpush1.bf16.msra.mxu0 %v831_v35  ;;  %874 = vmatpush1.bf16.msra.mxu1 %v831_v35  ;;  %v201_v35 = vld [vmem:[%s954_s30 + $0xc0] sm:$0xff] }
  0x31   : > { %833 = vmatprep.subr.bf16.mxu0 %v897_v3  ;;  %859 = vmatprep.subr.bf16.mxu1 %v897_v3 }
  0x34   : > { %835 = vmatpush1.bf16.msra.mxu0 %v834_v38  ;;  %875 = vmatpush1.bf16.msra.mxu1 %v834_v38  ;;  %v254_v38 = vld [vmem:[%s954_s30 + $0x268] sm:$0xff] }
  0x35   : > { %836 = vmatprep.subr.bf16.mxu0 %v897_v3  ;;  %860 = vmatprep.subr.bf16.mxu1 %v897_v3 }
  0x38   : > { %838 = vmatpush1.bf16.msra.mxu0 %v837_v41  ;;  %876 = vmatpush1.bf16.msra.mxu1 %v837_v41  ;;  %v206_v41 = vld [vmem:[%s954_s30 + $0xe8] sm:$0xff] }
  0x39   : > { %839 = vmatprep.subr.bf16.mxu0 %v897_v3  ;;  %861 = vmatprep.subr.bf16.mxu1 %v897_v3 }
  0x3c   : > { %841 = vmatpush1.bf16.msra.mxu0 %v840_v44  ;;  %877 = vmatpush1.bf16.msra.mxu1 %v840_v44  ;;  %v255_v44 = vld [vmem:[%s954_s30 + $0x270] sm:$0xff] }
  0x3d   : > { %842 = vmatprep.subr.bf16.mxu0 %v897_v3  ;;  %862 = vmatprep.subr.bf16.mxu1 %v897_v3 }
  0x40   : > { %844 = vmatpush1.bf16.msra.mxu0 %v843_v47  ;;  %878 = vmatpush1.bf16.msra.mxu1 %v843_v47  ;;  %v207_v47 = vld [vmem:[%s954_s30 + $0xf0] sm:$0xff] }
  0x41   : > { %845 = vmatprep.subr.bf16.mxu0 %v897_v3  ;;  %863 = vmatprep.subr.bf16.mxu1 %v897_v3  ;;  %v185_v3 = vld [vmem:[%s954_s30 + $0x40] sm:$0xff] }
  0x44   : > { %847 = vmatpush1.bf16.msra.mxu0 %v846_v50  ;;  %879 = vmatpush1.bf16.msra.mxu1 %v846_v50  ;;  %v260_v50 = vld [vmem:[%s954_s30 + $0x298] sm:$0xff] }
  0x47   : > { %381 = vmatmul.mubr.f32.vlgmr.msra.gmra.mrb[0].mxu0 %v177_v51  ;;  %506 = vmatmul.mubr.f32.vlgmr.msra.gmra.mrb[0].mxu1 %v227_v52  ;;  %v209_v51 = vld [vmem:[%s954_s30 + $0x100] sm:$0xff]  ;;  %v259_v52 = vld [vmem:[%s954_s30 + $0x290] sm:$0xff] }
  0x48   : > { %385 = vmatprep.mubr.f32.mxu0 %v180_v53  ;;  %510 = vmatprep.mubr.f32.mxu1 %v230_v54  ;;  %v212_v53 = vld [vmem:[%s954_s30 + $0x118] sm:$0xff]  ;;  %v262_v54 = vld [vmem:[%s954_s30 + $0x2a8] sm:$0xff] }
  0x4b   : > { %386 = vmatmul.mubr.f32.gmra.mrb[2].mxu0 %v179_v55  ;;  %511 = vmatmul.mubr.f32.gmra.mrb[2].mxu1 %v229_v56  ;;  %v211_v55 = vld [vmem:[%s954_s30 + $0x110] sm:$0xff]  ;;  %v261_v56 = vld [vmem:[%s954_s30 + $0x2a0] sm:$0xff] }
  0x4c   : > { %390 = vmatprep.mubr.f32.mxu0 %v182_v57  ;;  %515 = vmatprep.mubr.f32.mxu1 %v232_v58  ;;  %v214_v57 = vld [vmem:[%s954_s30 + $0x128] sm:$0xff]  ;;  %v264_v58 = vld [vmem:[%s954_s30 + $0x2b8] sm:$0xff] }
  0x4f   : > { %391 = vmatmul.mubr.f32.gmra.mrb[4].mxu0 %v181_v59  ;;  %516 = vmatmul.mubr.f32.gmra.mrb[4].mxu1 %v231_v60  ;;  %v213_v59 = vld [vmem:[%s954_s30 + $0x120] sm:$0xff]  ;;  %v263_v60 = vld [vmem:[%s954_s30 + $0x2b0] sm:$0xff] }
  0x50   : > { %395 = vmatprep.mubr.f32.mxu0 %v184_v61  ;;  %520 = vmatprep.mubr.f32.mxu1 %v234_v62  ;;  %v216_v61 = vld [vmem:[%s954_s30 + $0x138] sm:$0xff]  ;;  %v266_v62 = vld [vmem:[%s954_s30 + $0x2c8] sm:$0xff] }
  0x53   : > { %396 = vmatmul.mubr.f32.gmra.mrb[6].mxu0 %v183_v63  ;;  %521 = vmatmul.mubr.f32.gmra.mrb[6].mxu1 %v233_v0  ;;  %v215_v63 = vld [vmem:[%s954_s30 + $0x130] sm:$0xff]  ;;  %v265_v0 = vld [vmem:[%s954_s30 + $0x2c0] sm:$0xff] }
  0x54   : > { %400 = vmatprep.mubr.f32.mxu0 %v186_v1  ;;  %525 = vmatprep.mubr.f32.mxu1 %v236_v2  ;;  %v218_v1 = vld [vmem:[%s954_s30 + $0x148] sm:$0xff]  ;;  %v268_v2 = vld [vmem:[%s954_s30 + $0x2d8] sm:$0xff] }
  0x57   : > { %401 = vmatmul.mubr.f32.gmra.mrb[8].mxu0 %v185_v3  ;;  %526 = vmatmul.mubr.f32.gmra.mrb[8].mxu1 %v235_v4  ;;  %v217_v3 = vld [vmem:[%s954_s30 + $0x140] sm:$0xff]  ;;  %v267_v4 = vld [vmem:[%s954_s30 + $0x2d0] sm:$0xff] }
  0x58   : > { %405 = vmatprep.mubr.f32.mxu0 %v188_v5  ;;  %530 = vmatprep.mubr.f32.mxu1 %v238_v6  ;;  %v220_v5 = vld [vmem:[%s954_s30 + $0x158] sm:$0xff]  ;;  %v270_v6 = vld [vmem:[%s954_s30 + $0x2e8] sm:$0xff] }
  0x5b   : > { %406 = vmatmul.mubr.f32.gmra.mrb[10].mxu0 %v187_v7  ;;  %531 = vmatmul.mubr.f32.gmra.mrb[10].mxu1 %v237_v8  ;;  %v219_v7 = vld [vmem:[%s954_s30 + $0x150] sm:$0xff]  ;;  %v269_v8 = vld [vmem:[%s954_s30 + $0x2e0] sm:$0xff] }
  0x5c   : > { %410 = vmatprep.mubr.f32.mxu0 %v190_v9  ;;  %535 = vmatprep.mubr.f32.mxu1 %v240_v10  ;;  %v222_v9 = vld [vmem:[%s954_s30 + $0x168] sm:$0xff]  ;;  %v272_v10 = vld [vmem:[%s954_s30 + $0x2f8] sm:$0xff] }
  0x5f   : > { %411 = vmatmul.mubr.f32.gmra.mrb[12].mxu0 %v189_v11  ;;  %536 = vmatmul.mubr.f32.gmra.mrb[12].mxu1 %v239_v12  ;;  %v221_v11 = vld [vmem:[%s954_s30 + $0x160] sm:$0xff]  ;;  %v271_v12 = vld [vmem:[%s954_s30 + $0x2f0] sm:$0xff] }
  0x60   : > { %415 = vmatprep.mubr.f32.mxu0 %v192_v13  ;;  %540 = vmatprep.mubr.f32.mxu1 %v242_v14  ;;  %v224_v13 = vld [vmem:[%s954_s30 + $0x178] sm:$0xff]  ;;  %v274_v14 = vld [vmem:[%s954_s30 + $0x308] sm:$0xff] }
  0x63   : > { %416 = vmatmul.mubr.f32.gmra.mrb[14].mxu0 %v191_v15  ;;  %541 = vmatmul.mubr.f32.gmra.mrb[14].mxu1 %v241_v16  ;;  %v223_v15 = vld [vmem:[%s954_s30 + $0x170] sm:$0xff]  ;;  %v273_v16 = vld [vmem:[%s954_s30 + $0x300] sm:$0xff] }
  0x64   : > { %420 = vmatprep.mubr.f32.mxu0 %v194_v17  ;;  %545 = vmatprep.mubr.f32.mxu1 %v244_v18  ;;  %v226_v17 = vld [vmem:[%s954_s30 + $0x188] sm:$0xff]  ;;  %v276_v18 = vld [vmem:[%s954_s30 + $0x318] sm:$0xff] }
  0x67   : > { %421 = vmatmul.mubr.f32.gmra.mrb[16].mxu0 %v193_v19  ;;  %546 = vmatmul.mubr.f32.gmra.mrb[16].mxu1 %v243_v20  ;;  %v225_v19 = vld [vmem:[%s954_s30 + $0x180] sm:$0xff]  ;;  %v275_v20 = vld [vmem:[%s954_s30 + $0x310] sm:$0xff]  ;;  %s1173_s30 = scalar_lea.vmem %s1329_s3, %s795_s10 }
  0x68   : > { %425 = vmatprep.mubr.f32.mxu0 %v196_v21  ;;  %550 = vmatprep.mubr.f32.mxu1 %v246_v22  ;;  %v1165_v21 = vld [vmem:[%s1328_s2] ss:$0 sm:$0xff] }
  0x6b   : > { %426 = vmatmul.mubr.f32.gmra.mrb[18].mxu0 %v195_v23  ;;  %551 = vmatmul.mubr.f32.gmra.mrb[18].mxu1 %v245_v24 }
  0x6c   : > { %430 = vmatprep.mubr.f32.mxu0 %v198_v25  ;;  %555 = vmatprep.mubr.f32.mxu1 %v248_v26 }
  0x6f   : > { %431 = vmatmul.mubr.f32.gmra.mrb[20].mxu0 %v197_v27  ;;  %556 = vmatmul.mubr.f32.gmra.mrb[20].mxu1 %v247_v28 }
  0x70   : > { %435 = vmatprep.mubr.f32.mxu0 %v200_v29  ;;  %560 = vmatprep.mubr.f32.mxu1 %v250_v30 }
  0x73   : > { %436 = vmatmul.mubr.f32.gmra.mrb[22].mxu0 %v199_v31  ;;  %561 = vmatmul.mubr.f32.gmra.mrb[22].mxu1 %v249_v32 }
  0x74   : > { %440 = vmatprep.mubr.f32.mxu0 %v202_v33  ;;  %565 = vmatprep.mubr.f32.mxu1 %v252_v34 }
  0x77   : > { %441 = vmatmul.mubr.f32.gmra.mrb[24].mxu0 %v201_v35  ;;  %566 = vmatmul.mubr.f32.gmra.mrb[24].mxu1 %v251_v36 }
  0x78   : > { %445 = vmatprep.mubr.f32.mxu0 %v204_v37  ;;  %570 = vmatprep.mubr.f32.mxu1 %v254_v38 }
  0x7b   : > { %446 = vmatmul.mubr.f32.gmra.mrb[26].mxu0 %v203_v39  ;;  %571 = vmatmul.mubr.f32.gmra.mrb[26].mxu1 %v253_v40 }
  0x7c   : > { %450 = vmatprep.mubr.f32.mxu0 %v206_v41  ;;  %575 = vmatprep.mubr.f32.mxu1 %v256_v42 }
  0x7f   : > { %451 = vmatmul.mubr.f32.gmra.mrb[28].mxu0 %v205_v43  ;;  %576 = vmatmul.mubr.f32.gmra.mrb[28].mxu1 %v255_v44 }
  0x80   : > { %455 = vmatprep.mubr.f32.mxu0 %v208_v45  ;;  %580 = vmatprep.mubr.f32.mxu1 %v258_v46 }
  0x83   : > { %456 = vmatmul.mubr.f32.gmra.mrb[30].mxu0 %v207_v47  ;;  %581 = vmatmul.mubr.f32.gmra.mrb[30].mxu1 %v257_v48 }
  0x84   : > { %460 = vmatprep.mubr.f32.mxu0 %v210_v49  ;;  %585 = vmatprep.mubr.f32.mxu1 %v260_v50 }
  0x87   : > { %461 = vmatmul.mubr.f32.gmra.mrb[32].mxu0 %v209_v51  ;;  %586 = vmatmul.mubr.f32.gmra.mrb[32].mxu1 %v259_v52 }
  0x88   : > { %465 = vmatprep.mubr.f32.mxu0 %v212_v53  ;;  %590 = vmatprep.mubr.f32.mxu1 %v262_v54 }
  0x8b   : > { %466 = vmatmul.mubr.f32.gmra.mrb[34].mxu0 %v211_v55  ;;  %591 = vmatmul.mubr.f32.gmra.mrb[34].mxu1 %v261_v56 }
  0x8c   : > { %470 = vmatprep.mubr.f32.mxu0 %v214_v57  ;;  %595 = vmatprep.mubr.f32.mxu1 %v264_v58 }
  0x8f   : > { %471 = vmatmul.mubr.f32.gmra.mrb[36].mxu0 %v213_v59  ;;  %596 = vmatmul.mubr.f32.gmra.mrb[36].mxu1 %v263_v60 }
  0x90   : > { %475 = vmatprep.mubr.f32.mxu0 %v216_v61  ;;  %600 = vmatprep.mubr.f32.mxu1 %v266_v62 }
  0x93   : > { %476 = vmatmul.mubr.f32.gmra.mrb[38].mxu0 %v215_v63  ;;  %601 = vmatmul.mubr.f32.gmra.mrb[38].mxu1 %v265_v0 }
  0x94   : > { %480 = vmatprep.mubr.f32.mxu0 %v218_v1  ;;  %605 = vmatprep.mubr.f32.mxu1 %v268_v2 }
  0x97   : > { %481 = vmatmul.mubr.f32.gmra.mrb[40].mxu0 %v217_v3  ;;  %606 = vmatmul.mubr.f32.gmra.mrb[40].mxu1 %v267_v4 }
  0x98   : > { %485 = vmatprep.mubr.f32.mxu0 %v220_v5  ;;  %610 = vmatprep.mubr.f32.mxu1 %v270_v6 }
  0x9b   : > { %486 = vmatmul.mubr.f32.gmra.mrb[42].mxu0 %v219_v7  ;;  %611 = vmatmul.mubr.f32.gmra.mrb[42].mxu1 %v269_v8 }
  0x9c   : > { %490 = vmatprep.mubr.f32.mxu0 %v222_v9  ;;  %615 = vmatprep.mubr.f32.mxu1 %v272_v10 }
  0x9f   : > { %491 = vmatmul.mubr.f32.gmra.mrb[44].mxu0 %v221_v11  ;;  %616 = vmatmul.mubr.f32.gmra.mrb[44].mxu1 %v271_v12 }
  0xa0   : > { %495 = vmatprep.mubr.f32.mxu0 %v224_v13  ;;  %620 = vmatprep.mubr.f32.mxu1 %v274_v14 }
  0xa3   : > { %496 = vmatmul.mubr.f32.gmra.mrb[46].mxu0 %v223_v15  ;;  %621 = vmatmul.mubr.f32.gmra.mrb[46].mxu1 %v273_v16 }
  0xa4   : > { %500 = vmatprep.mubr.f32.mxu0 %v226_v17  ;;  %625 = vmatprep.mubr.f32.mxu1 %v276_v18 }
  0xa7   : > { %501 = vmatmul.mubr.f32.gmra.mrb[48].mxu0 %v225_v19  ;;  %626 = vmatmul.mubr.f32.gmra.mrb[48].mxu1 %v275_v20 }
 0x11a   : > { %v382_v22 = vpop.f32.mrb[0].mxu0  ;;  %v507_v23 = vpop.f32.mrb[0].mxu1 }
 0x11b   : > { %v383_v24 = vadd.f32 %v1165_v21, %v382_v22  ;;  %v508_v25 = vadd.f32 %v1165_v21, %v507_v23  ;;  %v384_v26 = vpop.f32.mrb[1].mxu0  ;;  %v509_v27 = vpop.f32.mrb[1].mxu1 }
 0x11d   : > { %v631_v28 = vmax.f32 %v383_v24, 0.0  ;;  %v656_v29 = vmax.f32 %v508_v25, 0.0 }
 0x11e   : > { %v387_v30 = vpop.f32.mrb[2].mxu0  ;;  %v512_v31 = vpop.f32.mrb[2].mxu1 }
 0x11f   : > { %682 = vst.msk [vmem:[%s1173_s30] sm:$0xff] %vm681_vm0, %v631_v28  ;;  %707 = vst.msk [vmem:[%s1173_s30 + $0xc8] sm:$0xff] %vm681_vm0, %v656_v29  ;;  %v388_v32 = vadd.f32 %v1165_v21, %v387_v30  ;;  %v513_v33 = vadd.f32 %v1165_v21, %v512_v31  ;;  %v389_v34 = vpop.f32.mrb[3].mxu0  ;;  %v514_v35 = vpop.f32.mrb[3].mxu1 }
 0x121   : > { %v632_v36 = vmax.f32 %v388_v32, 0.0  ;;  %v657_v37 = vmax.f32 %v513_v33, 0.0 }
 0x122   : > { %v392_v38 = vpop.f32.mrb[4].mxu0  ;;  %v517_v39 = vpop.f32.mrb[4].mxu1 }
 0x123   : > { %683 = vst.msk [vmem:[%s1173_s30 + $0x8] sm:$0xff] %vm681_vm0, %v632_v36  ;;  %708 = vst.msk [vmem:[%s1173_s30 + $0xd0] sm:$0xff] %vm681_vm0, %v657_v37  ;;  %v393_v40 = vadd.f32 %v1165_v21, %v392_v38  ;;  %v518_v41 = vadd.f32 %v1165_v21, %v517_v39  ;;  %v394_v42 = vpop.f32.mrb[5].mxu0  ;;  %v519_v43 = vpop.f32.mrb[5].mxu1 }
 0x125   : > { %v633_v44 = vmax.f32 %v393_v40, 0.0  ;;  %v658_v45 = vmax.f32 %v518_v41, 0.0 }
 0x126   : > { %v397_v46 = vpop.f32.mrb[6].mxu0  ;;  %v522_v47 = vpop.f32.mrb[6].mxu1 }
 0x127   : > { %684 = vst.msk [vmem:[%s1173_s30 + $0x10] sm:$0xff] %vm681_vm0, %v633_v44  ;;  %709 = vst.msk [vmem:[%s1173_s30 + $0xd8] sm:$0xff] %vm681_vm0, %v658_v45  ;;  %v398_v48 = vadd.f32 %v1165_v21, %v397_v46  ;;  %v523_v49 = vadd.f32 %v1165_v21, %v522_v47  ;;  %v399_v50 = vpop.f32.mrb[7].mxu0  ;;  %v524_v51 = vpop.f32.mrb[7].mxu1 }
 0x129   : > { %v634_v52 = vmax.f32 %v398_v48, 0.0  ;;  %v659_v53 = vmax.f32 %v523_v49, 0.0 }
 0x12a   : > { %v402_v54 = vpop.f32.mrb[8].mxu0  ;;  %v527_v55 = vpop.f32.mrb[8].mxu1 }
 0x12b   : > { %685 = vst.msk [vmem:[%s1173_s30 + $0x18] sm:$0xff] %vm681_vm0, %v634_v52  ;;  %710 = vst.msk [vmem:[%s1173_s30 + $0xe0] sm:$0xff] %vm681_vm0, %v659_v53  ;;  %v403_v56 = vadd.f32 %v1165_v21, %v402_v54  ;;  %v528_v57 = vadd.f32 %v1165_v21, %v527_v55  ;;  %v404_v58 = vpop.f32.mrb[9].mxu0  ;;  %v529_v59 = vpop.f32.mrb[9].mxu1 }
 0x12d   : > { %v635_v60 = vmax.f32 %v403_v56, 0.0  ;;  %v660_v61 = vmax.f32 %v528_v57, 0.0 }
 0x12e   : > { %v407_v62 = vpop.f32.mrb[10].mxu0  ;;  %v532_v63 = vpop.f32.mrb[10].mxu1 }
 0x12f   : > { %686 = vst.msk [vmem:[%s1173_s30 + $0x20] sm:$0xff] %vm681_vm0, %v635_v60  ;;  %711 = vst.msk [vmem:[%s1173_s30 + $0xe8] sm:$0xff] %vm681_vm0, %v660_v61  ;;  %v408_v0 = vadd.f32 %v1165_v21, %v407_v62  ;;  %v533_v1 = vadd.f32 %v1165_v21, %v532_v63  ;;  %v409_v2 = vpop.f32.mrb[11].mxu0  ;;  %v534_v3 = vpop.f32.mrb[11].mxu1 }
 0x131   : > { %v636_v4 = vmax.f32 %v408_v0, 0.0  ;;  %v661_v5 = vmax.f32 %v533_v1, 0.0 }
 0x132   : > { %v412_v6 = vpop.f32.mrb[12].mxu0  ;;  %v537_v7 = vpop.f32.mrb[12].mxu1 }
 0x133   : > { %687 = vst.msk [vmem:[%s1173_s30 + $0x28] sm:$0xff] %vm681_vm0, %v636_v4  ;;  %712 = vst.msk [vmem:[%s1173_s30 + $0xf0] sm:$0xff] %vm681_vm0, %v661_v5  ;;  %v413_v8 = vadd.f32 %v1165_v21, %v412_v6  ;;  %v538_v9 = vadd.f32 %v1165_v21, %v537_v7  ;;  %v414_v10 = vpop.f32.mrb[13].mxu0  ;;  %v539_v11 = vpop.f32.mrb[13].mxu1 }
 0x135   : > { %v637_v12 = vmax.f32 %v413_v8, 0.0  ;;  %v662_v13 = vmax.f32 %v538_v9, 0.0 }
 0x136   : > { %v417_v14 = vpop.f32.mrb[14].mxu0  ;;  %v542_v15 = vpop.f32.mrb[14].mxu1 }
 0x137   : > { %688 = vst.msk [vmem:[%s1173_s30 + $0x30] sm:$0xff] %vm681_vm0, %v637_v12  ;;  %713 = vst.msk [vmem:[%s1173_s30 + $0xf8] sm:$0xff] %vm681_vm0, %v662_v13  ;;  %v418_v16 = vadd.f32 %v1165_v21, %v417_v14  ;;  %v543_v17 = vadd.f32 %v1165_v21, %v542_v15  ;;  %v419_v18 = vpop.f32.mrb[15].mxu0  ;;  %v544_v19 = vpop.f32.mrb[15].mxu1 }
 0x139   : > { %v638_v20 = vmax.f32 %v418_v16, 0.0  ;;  %v663_v22 = vmax.f32 %v543_v17, 0.0 }
 0x13a   : > { %v422_v23 = vpop.f32.mrb[16].mxu0  ;;  %v547_v24 = vpop.f32.mrb[16].mxu1 }
 0x13b   : > { %689 = vst.msk [vmem:[%s1173_s30 + $0x38] sm:$0xff] %vm681_vm0, %v638_v20  ;;  %714 = vst.msk [vmem:[%s1173_s30 + $0x100] sm:$0xff] %vm681_vm0, %v663_v22  ;;  %v423_v25 = vadd.f32 %v1165_v21, %v422_v23  ;;  %v548_v26 = vadd.f32 %v1165_v21, %v547_v24  ;;  %v424_v27 = vpop.f32.mrb[17].mxu0  ;;  %v549_v28 = vpop.f32.mrb[17].mxu1 }
 0x13d   : > { %v639_v29 = vmax.f32 %v423_v25, 0.0  ;;  %v664_v30 = vmax.f32 %v548_v26, 0.0 }
 0x13e   : > { %v427_v31 = vpop.f32.mrb[18].mxu0  ;;  %v552_v32 = vpop.f32.mrb[18].mxu1 }
 0x13f   : > { %690 = vst.msk [vmem:[%s1173_s30 + $0x40] sm:$0xff] %vm681_vm0, %v639_v29  ;;  %715 = vst.msk [vmem:[%s1173_s30 + $0x108] sm:$0xff] %vm681_vm0, %v664_v30  ;;  %v428_v33 = vadd.f32 %v1165_v21, %v427_v31  ;;  %v553_v34 = vadd.f32 %v1165_v21, %v552_v32  ;;  %v429_v35 = vpop.f32.mrb[19].mxu0  ;;  %v554_v36 = vpop.f32.mrb[19].mxu1 }
 0x141   : > { %v640_v37 = vmax.f32 %v428_v33, 0.0  ;;  %v665_v38 = vmax.f32 %v553_v34, 0.0 }
 0x142   : > { %v432_v39 = vpop.f32.mrb[20].mxu0  ;;  %v557_v40 = vpop.f32.mrb[20].mxu1 }
 0x143   : > { %691 = vst.msk [vmem:[%s1173_s30 + $0x48] sm:$0xff] %vm681_vm0, %v640_v37  ;;  %716 = vst.msk [vmem:[%s1173_s30 + $0x110] sm:$0xff] %vm681_vm0, %v665_v38  ;;  %v433_v41 = vadd.f32 %v1165_v21, %v432_v39  ;;  %v558_v42 = vadd.f32 %v1165_v21, %v557_v40  ;;  %v434_v43 = vpop.f32.mrb[21].mxu0  ;;  %v559_v44 = vpop.f32.mrb[21].mxu1 }
 0x145   : > { %v641_v45 = vmax.f32 %v433_v41, 0.0  ;;  %v666_v46 = vmax.f32 %v558_v42, 0.0 }
 0x146   : > { %v437_v47 = vpop.f32.mrb[22].mxu0  ;;  %v562_v48 = vpop.f32.mrb[22].mxu1 }
 0x147   : > { %692 = vst.msk [vmem:[%s1173_s30 + $0x50] sm:$0xff] %vm681_vm0, %v641_v45  ;;  %717 = vst.msk [vmem:[%s1173_s30 + $0x118] sm:$0xff] %vm681_vm0, %v666_v46  ;;  %v438_v49 = vadd.f32 %v1165_v21, %v437_v47  ;;  %v563_v50 = vadd.f32 %v1165_v21, %v562_v48  ;;  %v439_v51 = vpop.f32.mrb[23].mxu0  ;;  %v564_v52 = vpop.f32.mrb[23].mxu1 }
 0x149   : > { %v642_v53 = vmax.f32 %v438_v49, 0.0  ;;  %v667_v54 = vmax.f32 %v563_v50, 0.0 }
 0x14a   : > { %v442_v55 = vpop.f32.mrb[24].mxu0  ;;  %v567_v56 = vpop.f32.mrb[24].mxu1 }
 0x14b   : > { %693 = vst.msk [vmem:[%s1173_s30 + $0x58] sm:$0xff] %vm681_vm0, %v642_v53  ;;  %718 = vst.msk [vmem:[%s1173_s30 + $0x120] sm:$0xff] %vm681_vm0, %v667_v54  ;;  %v443_v57 = vadd.f32 %v1165_v21, %v442_v55  ;;  %v568_v58 = vadd.f32 %v1165_v21, %v567_v56  ;;  %v444_v59 = vpop.f32.mrb[25].mxu0  ;;  %v569_v60 = vpop.f32.mrb[25].mxu1 }
 0x14d   : > { %v643_v61 = vmax.f32 %v443_v57, 0.0  ;;  %v668_v62 = vmax.f32 %v568_v58, 0.0 }
 0x14e   : > { %v447_v63 = vpop.f32.mrb[26].mxu0  ;;  %v572_v0 = vpop.f32.mrb[26].mxu1 }
 0x14f   : > { %694 = vst.msk [vmem:[%s1173_s30 + $0x60] sm:$0xff] %vm681_vm0, %v643_v61  ;;  %719 = vst.msk [vmem:[%s1173_s30 + $0x128] sm:$0xff] %vm681_vm0, %v668_v62  ;;  %v448_v1 = vadd.f32 %v1165_v21, %v447_v63  ;;  %v573_v2 = vadd.f32 %v1165_v21, %v572_v0  ;;  %v449_v3 = vpop.f32.mrb[27].mxu0  ;;  %v574_v4 = vpop.f32.mrb[27].mxu1 }
 0x151   : > { %v644_v5 = vmax.f32 %v448_v1, 0.0  ;;  %v669_v6 = vmax.f32 %v573_v2, 0.0 }
 0x152   : > { %v452_v7 = vpop.f32.mrb[28].mxu0  ;;  %v577_v8 = vpop.f32.mrb[28].mxu1 }
 0x153   : > { %695 = vst.msk [vmem:[%s1173_s30 + $0x68] sm:$0xff] %vm681_vm0, %v644_v5  ;;  %720 = vst.msk [vmem:[%s1173_s30 + $0x130] sm:$0xff] %vm681_vm0, %v669_v6  ;;  %v453_v9 = vadd.f32 %v1165_v21, %v452_v7  ;;  %v578_v10 = vadd.f32 %v1165_v21, %v577_v8  ;;  %v454_v11 = vpop.f32.mrb[29].mxu0  ;;  %v579_v12 = vpop.f32.mrb[29].mxu1 }
 0x155   : > { %v645_v13 = vmax.f32 %v453_v9, 0.0  ;;  %v670_v14 = vmax.f32 %v578_v10, 0.0 }
 0x156   : > { %v457_v15 = vpop.f32.mrb[30].mxu0  ;;  %v582_v16 = vpop.f32.mrb[30].mxu1 }
 0x157   : > { %696 = vst.msk [vmem:[%s1173_s30 + $0x70] sm:$0xff] %vm681_vm0, %v645_v13  ;;  %721 = vst.msk [vmem:[%s1173_s30 + $0x138] sm:$0xff] %vm681_vm0, %v670_v14  ;;  %v458_v17 = vadd.f32 %v1165_v21, %v457_v15  ;;  %v583_v18 = vadd.f32 %v1165_v21, %v582_v16  ;;  %v459_v19 = vpop.f32.mrb[31].mxu0  ;;  %v584_v20 = vpop.f32.mrb[31].mxu1 }
 0x159   : > { %v646_v22 = vmax.f32 %v458_v17, 0.0  ;;  %v671_v23 = vmax.f32 %v583_v18, 0.0 }
 0x15a   : > { %v462_v24 = vpop.f32.mrb[32].mxu0  ;;  %v587_v25 = vpop.f32.mrb[32].mxu1 }
 0x15b   : > { %697 = vst.msk [vmem:[%s1173_s30 + $0x78] sm:$0xff] %vm681_vm0, %v646_v22  ;;  %722 = vst.msk [vmem:[%s1173_s30 + $0x140] sm:$0xff] %vm681_vm0, %v671_v23  ;;  %v463_v26 = vadd.f32 %v1165_v21, %v462_v24  ;;  %v588_v27 = vadd.f32 %v1165_v21, %v587_v25  ;;  %v464_v28 = vpop.f32.mrb[33].mxu0  ;;  %v589_v29 = vpop.f32.mrb[33].mxu1 }
 0x15d   : > { %v647_v30 = vmax.f32 %v463_v26, 0.0  ;;  %v672_v31 = vmax.f32 %v588_v27, 0.0 }
 0x15e   : > { %v467_v32 = vpop.f32.mrb[34].mxu0  ;;  %v592_v33 = vpop.f32.mrb[34].mxu1 }
 0x15f   : > { %698 = vst.msk [vmem:[%s1173_s30 + $0x80] sm:$0xff] %vm681_vm0, %v647_v30  ;;  %723 = vst.msk [vmem:[%s1173_s30 + $0x148] sm:$0xff] %vm681_vm0, %v672_v31  ;;  %v468_v34 = vadd.f32 %v1165_v21, %v467_v32  ;;  %v593_v35 = vadd.f32 %v1165_v21, %v592_v33  ;;  %v469_v36 = vpop.f32.mrb[35].mxu0  ;;  %v594_v37 = vpop.f32.mrb[35].mxu1 }
 0x161   : > { %v648_v38 = vmax.f32 %v468_v34, 0.0  ;;  %v673_v39 = vmax.f32 %v593_v35, 0.0 }
 0x162   : > { %v472_v40 = vpop.f32.mrb[36].mxu0  ;;  %v597_v41 = vpop.f32.mrb[36].mxu1 }
 0x163   : > { %699 = vst.msk [vmem:[%s1173_s30 + $0x88] sm:$0xff] %vm681_vm0, %v648_v38  ;;  %724 = vst.msk [vmem:[%s1173_s30 + $0x150] sm:$0xff] %vm681_vm0, %v673_v39  ;;  %v473_v42 = vadd.f32 %v1165_v21, %v472_v40  ;;  %v598_v43 = vadd.f32 %v1165_v21, %v597_v41  ;;  %v474_v44 = vpop.f32.mrb[37].mxu0  ;;  %v599_v45 = vpop.f32.mrb[37].mxu1 }
 0x165   : > { %v649_v46 = vmax.f32 %v473_v42, 0.0  ;;  %v674_v47 = vmax.f32 %v598_v43, 0.0 }
 0x166   : > { %v477_v48 = vpop.f32.mrb[38].mxu0  ;;  %v602_v49 = vpop.f32.mrb[38].mxu1 }
 0x167   : > { %700 = vst.msk [vmem:[%s1173_s30 + $0x90] sm:$0xff] %vm681_vm0, %v649_v46  ;;  %725 = vst.msk [vmem:[%s1173_s30 + $0x158] sm:$0xff] %vm681_vm0, %v674_v47  ;;  %v478_v50 = vadd.f32 %v1165_v21, %v477_v48  ;;  %v603_v51 = vadd.f32 %v1165_v21, %v602_v49  ;;  %v479_v52 = vpop.f32.mrb[39].mxu0  ;;  %v604_v53 = vpop.f32.mrb[39].mxu1 }
 0x169   : > { %v650_v54 = vmax.f32 %v478_v50, 0.0  ;;  %v675_v55 = vmax.f32 %v603_v51, 0.0 }
 0x16a   : > { %v482_v56 = vpop.f32.mrb[40].mxu0  ;;  %v607_v57 = vpop.f32.mrb[40].mxu1 }
 0x16b   : > { %701 = vst.msk [vmem:[%s1173_s30 + $0x98] sm:$0xff] %vm681_vm0, %v650_v54  ;;  %726 = vst.msk [vmem:[%s1173_s30 + $0x160] sm:$0xff] %vm681_vm0, %v675_v55  ;;  %v483_v58 = vadd.f32 %v1165_v21, %v482_v56  ;;  %v608_v59 = vadd.f32 %v1165_v21, %v607_v57  ;;  %v484_v60 = vpop.f32.mrb[41].mxu0  ;;  %v609_v61 = vpop.f32.mrb[41].mxu1 }
 0x16d   : > { %v651_v62 = vmax.f32 %v483_v58, 0.0  ;;  %v676_v63 = vmax.f32 %v608_v59, 0.0 }
 0x16e   : > { %v487_v0 = vpop.f32.mrb[42].mxu0  ;;  %v612_v1 = vpop.f32.mrb[42].mxu1 }
 0x16f   : > { %702 = vst.msk [vmem:[%s1173_s30 + $0xa0] sm:$0xff] %vm681_vm0, %v651_v62  ;;  %727 = vst.msk [vmem:[%s1173_s30 + $0x168] sm:$0xff] %vm681_vm0, %v676_v63  ;;  %v488_v2 = vadd.f32 %v1165_v21, %v487_v0  ;;  %v613_v3 = vadd.f32 %v1165_v21, %v612_v1  ;;  %v489_v4 = vpop.f32.mrb[43].mxu0  ;;  %v614_v5 = vpop.f32.mrb[43].mxu1 }
 0x171   : > { %v652_v6 = vmax.f32 %v488_v2, 0.0  ;;  %v677_v7 = vmax.f32 %v613_v3, 0.0 }
 0x172   : > { %v492_v8 = vpop.f32.mrb[44].mxu0  ;;  %v617_v9 = vpop.f32.mrb[44].mxu1 }
 0x173   : > { %703 = vst.msk [vmem:[%s1173_s30 + $0xa8] sm:$0xff] %vm681_vm0, %v652_v6  ;;  %728 = vst.msk [vmem:[%s1173_s30 + $0x170] sm:$0xff] %vm681_vm0, %v677_v7  ;;  %v493_v10 = vadd.f32 %v1165_v21, %v492_v8  ;;  %v618_v11 = vadd.f32 %v1165_v21, %v617_v9  ;;  %v494_v12 = vpop.f32.mrb[45].mxu0  ;;  %v619_v13 = vpop.f32.mrb[45].mxu1 }
 0x175   : > { %v653_v14 = vmax.f32 %v493_v10, 0.0  ;;  %v678_v15 = vmax.f32 %v618_v11, 0.0 }
 0x176   : > { %v497_v16 = vpop.f32.mrb[46].mxu0  ;;  %v622_v17 = vpop.f32.mrb[46].mxu1 }
 0x177   : > { %704 = vst.msk [vmem:[%s1173_s30 + $0xb0] sm:$0xff] %vm681_vm0, %v653_v14  ;;  %729 = vst.msk [vmem:[%s1173_s30 + $0x178] sm:$0xff] %vm681_vm0, %v678_v15  ;;  %v498_v18 = vadd.f32 %v1165_v21, %v497_v16  ;;  %v623_v19 = vadd.f32 %v1165_v21, %v622_v17  ;;  %v499_v20 = vpop.f32.mrb[47].mxu0  ;;  %v624_v22 = vpop.f32.mrb[47].mxu1 }
 0x179   : > { %v654_v23 = vmax.f32 %v498_v18, 0.0  ;;  %v679_v24 = vmax.f32 %v623_v19, 0.0 }
 0x17a   : > { %v502_v25 = vpop.f32.mrb[48].mxu0  ;;  %v627_v26 = vpop.f32.mrb[48].mxu1 }
 0x17b   : > { %705 = vst.msk [vmem:[%s1173_s30 + $0xb8] sm:$0xff] %vm681_vm0, %v654_v23  ;;  %730 = vst.msk [vmem:[%s1173_s30 + $0x180] sm:$0xff] %vm681_vm0, %v679_v24  ;;  %v503_v27 = vadd.f32 %v1165_v21, %v502_v25  ;;  %v628_v28 = vadd.f32 %v1165_v21, %v627_v26  ;;  %v504_v29 = vpop.f32.mrb[49].mxu0  ;;  %v629_v30 = vpop.f32.mrb[49].mxu1 }
 0x17d   : > { %v655_v31 = vmax.f32 %v503_v27, 0.0  ;;  %v680_v32 = vmax.f32 %v628_v28, 0.0 }
 0x17f   : > { %706 = vst.msk [vmem:[%s1173_s30 + $0xc0] sm:$0xff] %vm681_vm0, %v655_v31  ;;  %731 = vst.msk [vmem:[%s1173_s30 + $0x188] sm:$0xff] %vm681_vm0, %v680_v32 }
 0x180 PF: > { %s13_s12 = sadd.s32 1, %s895_s12  }
 0x181   : > { %p10_p4 = scmp.ge.s32.totalorder %s13_s12, 4  }
 0x183   :  { %12 = sbr.rel (!%p10_p4) target bundleno = 1 (0x1), region = 62 }

// kernel: dqn_forward.5
= control target key start
LH: loop header
LB: loop body
LE: loop exit
PB: predicated region body
PF: predicated region fallthrough
CT: control target
= control target key end

     0   :  { %v696_v0 = vmov 0.0|0.0   ;;  %vm530_vm0 = vcmask 523264   ;;  %s1303_s1 = inlined_call_operand.vmem [shape: f32[512,64], index: 1, kind: input, shape index: {}]   ;;  %s1304_s0 = inlined_call_operand.vmem [shape: f32[168,512], index: 0, kind: input, shape index: {}]   ;;  %s1305_s2 = inlined_call_operand.vmem [shape: f32[1,64], index: 2, kind: input, shape index: {}]   ;;  %s1306_s3 = inlined_call_operand.vmem [shape: f32[168,64], index: 3, kind: output, shape index: {}]  }
   0x1   :  { %557 = vmatprep.subr.bf16.mxu1 %v696_v0  ;;  %v98_v1 = vld [vmem:[%s1303_s1] sm:$0xff]  ;;  %v99_v2 = vld [vmem:[%s1303_s1 + $0x8] sm:$0xff]  ;;  %605 = vmatprep.subr.bf16.mxu0 %v696_v0  ;;  %v100_v6 = vld [vmem:[%s1303_s1 + $0x10] sm:$0xff] }
   0x2   :  { %v130_v3 = vld [vmem:[%s1303_s1 + $0x100] sm:$0xff]  ;;  %v558_v4 = vpack.c.bf16 %v99_v2, %v98_v1  ;;  %v131_v5 = vld [vmem:[%s1303_s1 + $0x108] sm:$0xff]  ;;  %v101_v7 = vld [vmem:[%s1303_s1 + $0x18] sm:$0xff] }
   0x3   :  { %v606_v8 = vpack.c.bf16 %v131_v5, %v130_v3  ;;  %v132_v9 = vld [vmem:[%s1303_s1 + $0x110] sm:$0xff]  ;;  %v133_v10 = vld [vmem:[%s1303_s1 + $0x118] sm:$0xff]  ;;  %v561_v11 = vpack.c.bf16 %v101_v7, %v100_v6  ;;  %v102_v13 = vld [vmem:[%s1303_s1 + $0x20] sm:$0xff] }
   0x4   :  { %559 = vmatpush1.bf16.msra.mxu1 %v558_v4  ;;  %v609_v12 = vpack.c.bf16 %v133_v10, %v132_v9  ;;  %v103_v14 = vld [vmem:[%s1303_s1 + $0x28] sm:$0xff]  ;;  %v134_v15 = vld [vmem:[%s1303_s1 + $0x120] sm:$0xff]  ;;  %v104_v19 = vld [vmem:[%s1303_s1 + $0x30] sm:$0xff] }
   0x5   :  { %607 = vmatpush1.bf16.msra.mxu0 %v606_v8  ;;  %560 = vmatprep.subr.bf16.mxu1 %v696_v0  ;;  %v135_v16 = vld [vmem:[%s1303_s1 + $0x128] sm:$0xff]  ;;  %v564_v17 = vpack.c.bf16 %v103_v14, %v102_v13  ;;  %v105_v20 = vld [vmem:[%s1303_s1 + $0x38] sm:$0xff]  ;;  %v136_v21 = vld [vmem:[%s1303_s1 + $0x130] sm:$0xff] }
   0x6   :  { %608 = vmatprep.subr.bf16.mxu0 %v696_v0  ;;  %v612_v18 = vpack.c.bf16 %v135_v16, %v134_v15  ;;  %v137_v22 = vld [vmem:[%s1303_s1 + $0x138] sm:$0xff]  ;;  %v567_v23 = vpack.c.bf16 %v105_v20, %v104_v19  ;;  %v106_v25 = vld [vmem:[%s1303_s1 + $0x40] sm:$0xff]  ;;  %v107_v26 = vld [vmem:[%s1303_s1 + $0x48] sm:$0xff] }
   0x7   :  { %v615_v24 = vpack.c.bf16 %v137_v22, %v136_v21  ;;  %v138_v27 = vld [vmem:[%s1303_s1 + $0x140] sm:$0xff]  ;;  %v139_v28 = vld [vmem:[%s1303_s1 + $0x148] sm:$0xff]  ;;  %v570_v29 = vpack.c.bf16 %v107_v26, %v106_v25  ;;  %v108_v31 = vld [vmem:[%s1303_s1 + $0x50] sm:$0xff] }
   0x8   :  { %562 = vmatpush1.bf16.msra.mxu1 %v561_v11  ;;  %v618_v30 = vpack.c.bf16 %v139_v28, %v138_v27  ;;  %v109_v32 = vld [vmem:[%s1303_s1 + $0x58] sm:$0xff]  ;;  %v140_v33 = vld [vmem:[%s1303_s1 + $0x150] sm:$0xff]  ;;  %v110_v37 = vld [vmem:[%s1303_s1 + $0x60] sm:$0xff] }
   0x9   :  { %610 = vmatpush1.bf16.msra.mxu0 %v609_v12  ;;  %563 = vmatprep.subr.bf16.mxu1 %v696_v0  ;;  %v141_v34 = vld [vmem:[%s1303_s1 + $0x158] sm:$0xff]  ;;  %v573_v35 = vpack.c.bf16 %v109_v32, %v108_v31  ;;  %v111_v38 = vld [vmem:[%s1303_s1 + $0x68] sm:$0xff]  ;;  %v142_v39 = vld [vmem:[%s1303_s1 + $0x160] sm:$0xff] }
   0xa   :  { %611 = vmatprep.subr.bf16.mxu0 %v696_v0  ;;  %v621_v36 = vpack.c.bf16 %v141_v34, %v140_v33  ;;  %v143_v40 = vld [vmem:[%s1303_s1 + $0x168] sm:$0xff]  ;;  %v17_v42 = vld [vmem:[%s1304_s0 + $0x18] sm:$0xff]  ;;  %v576_v43 = vpack.c.bf16 %v111_v38, %v110_v37  ;;  %v112_v45 = vld [vmem:[%s1303_s1 + $0x70] sm:$0xff] }
   0xb   :  { %v15_v41 = vld [vmem:[%s1304_s0 + $0x8] sm:$0xff]  ;;  %403 = vmatprep.mubr.f32.mxu0 %v17_v42  ;;  %v624_v44 = vpack.c.bf16 %v143_v40, %v142_v39  ;;  %v113_v46 = vld [vmem:[%s1303_s1 + $0x78] sm:$0xff]  ;;  %v144_v47 = vld [vmem:[%s1303_s1 + $0x170] sm:$0xff] }
   0xc   :  { %565 = vmatpush1.bf16.msra.mxu1 %v564_v17  ;;  %233 = vmatprep.mubr.f32.mxu1 %v15_v41  ;;  %v145_v48 = vld [vmem:[%s1303_s1 + $0x178] sm:$0xff]  ;;  %v579_v49 = vpack.c.bf16 %v113_v46, %v112_v45  ;;  %v114_v51 = vld [vmem:[%s1303_s1 + $0x80] sm:$0xff]  ;;  %v115_v52 = vld [vmem:[%s1303_s1 + $0x88] sm:$0xff] }
   0xd   :  { %613 = vmatpush1.bf16.msra.mxu0 %v612_v18  ;;  %566 = vmatprep.subr.bf16.mxu1 %v696_v0  ;;  %v627_v50 = vpack.c.bf16 %v145_v48, %v144_v47  ;;  %v146_v53 = vld [vmem:[%s1303_s1 + $0x180] sm:$0xff]  ;;  %v147_v54 = vld [vmem:[%s1303_s1 + $0x188] sm:$0xff]  ;;  %v582_v55 = vpack.c.bf16 %v115_v52, %v114_v51  ;;  %v116_v57 = vld [vmem:[%s1303_s1 + $0x90] sm:$0xff] }
   0xe   :  { %614 = vmatprep.subr.bf16.mxu0 %v696_v0  ;;  %v630_v56 = vpack.c.bf16 %v147_v54, %v146_v53  ;;  %v117_v58 = vld [vmem:[%s1303_s1 + $0x98] sm:$0xff]  ;;  %v148_v59 = vld [vmem:[%s1303_s1 + $0x190] sm:$0xff]  ;;  %v118_v63 = vld [vmem:[%s1303_s1 + $0xa0] sm:$0xff] }
   0xf   :  { %v149_v60 = vld [vmem:[%s1303_s1 + $0x198] sm:$0xff]  ;;  %v585_v61 = vpack.c.bf16 %v117_v58, %v116_v57  ;;  %v119_v1 = vld [vmem:[%s1303_s1 + $0xa8] sm:$0xff]  ;;  %v150_v2 = vld [vmem:[%s1303_s1 + $0x1a0] sm:$0xff] }
  0x10   :  { %568 = vmatpush1.bf16.msra.mxu1 %v567_v23  ;;  %v633_v62 = vpack.c.bf16 %v149_v60, %v148_v59  ;;  %v151_v3 = vld [vmem:[%s1303_s1 + $0x1a8] sm:$0xff]  ;;  %v588_v4 = vpack.c.bf16 %v119_v1, %v118_v63  ;;  %v120_v6 = vld [vmem:[%s1303_s1 + $0xb0] sm:$0xff]  ;;  %v121_v7 = vld [vmem:[%s1303_s1 + $0xb8] sm:$0xff] }
  0x11   :  { %616 = vmatpush1.bf16.msra.mxu0 %v615_v24  ;;  %569 = vmatprep.subr.bf16.mxu1 %v696_v0  ;;  %v636_v5 = vpack.c.bf16 %v151_v3, %v150_v2  ;;  %v152_v8 = vld [vmem:[%s1303_s1 + $0x1b0] sm:$0xff]  ;;  %v153_v9 = vld [vmem:[%s1303_s1 + $0x1b8] sm:$0xff]  ;;  %v591_v10 = vpack.c.bf16 %v121_v7, %v120_v6  ;;  %v122_v12 = vld [vmem:[%s1303_s1 + $0xc0] sm:$0xff] }
  0x12   :  { %617 = vmatprep.subr.bf16.mxu0 %v696_v0  ;;  %v639_v11 = vpack.c.bf16 %v153_v9, %v152_v8  ;;  %v123_v13 = vld [vmem:[%s1303_s1 + $0xc8] sm:$0xff]  ;;  %v154_v14 = vld [vmem:[%s1303_s1 + $0x1c0] sm:$0xff]  ;;  %v124_v18 = vld [vmem:[%s1303_s1 + $0xd0] sm:$0xff] }
  0x13   :  { %v155_v15 = vld [vmem:[%s1303_s1 + $0x1c8] sm:$0xff]  ;;  %v594_v16 = vpack.c.bf16 %v123_v13, %v122_v12  ;;  %v125_v19 = vld [vmem:[%s1303_s1 + $0xd8] sm:$0xff]  ;;  %v156_v20 = vld [vmem:[%s1303_s1 + $0x1d0] sm:$0xff] }
  0x14   :  { %571 = vmatpush1.bf16.msra.mxu1 %v570_v29  ;;  %v642_v17 = vpack.c.bf16 %v155_v15, %v154_v14  ;;  %v157_v21 = vld [vmem:[%s1303_s1 + $0x1d8] sm:$0xff]  ;;  %v597_v22 = vpack.c.bf16 %v125_v19, %v124_v18  ;;  %v126_v24 = vld [vmem:[%s1303_s1 + $0xe0] sm:$0xff]  ;;  %v127_v25 = vld [vmem:[%s1303_s1 + $0xe8] sm:$0xff] }
  0x15   :  { %619 = vmatpush1.bf16.msra.mxu0 %v618_v30  ;;  %572 = vmatprep.subr.bf16.mxu1 %v696_v0  ;;  %v645_v23 = vpack.c.bf16 %v157_v21, %v156_v20  ;;  %v158_v26 = vld [vmem:[%s1303_s1 + $0x1e0] sm:$0xff]  ;;  %v159_v27 = vld [vmem:[%s1303_s1 + $0x1e8] sm:$0xff]  ;;  %v600_v28 = vpack.c.bf16 %v127_v25, %v126_v24  ;;  %v128_v30 = vld [vmem:[%s1303_s1 + $0xf0] sm:$0xff] }
  0x16   :  { %620 = vmatprep.subr.bf16.mxu0 %v696_v0  ;;  %v648_v29 = vpack.c.bf16 %v159_v27, %v158_v26  ;;  %v129_v31 = vld [vmem:[%s1303_s1 + $0xf8] sm:$0xff]  ;;  %v160_v32 = vld [vmem:[%s1303_s1 + $0x1f0] sm:$0xff]  ;;  %v19_v38 = vld [vmem:[%s1304_s0 + $0x28] sm:$0xff] }
  0x17   :  { %v161_v33 = vld [vmem:[%s1303_s1 + $0x1f8] sm:$0xff]  ;;  %v603_v34 = vpack.c.bf16 %v129_v31, %v128_v30  ;;  %v16_v37 = vld [vmem:[%s1304_s0 + $0x10] sm:$0xff]  ;;  %v23_v41 = vld [vmem:[%s1304_s0 + $0x48] sm:$0xff] }
  0x18   :  { %574 = vmatpush1.bf16.msra.mxu1 %v573_v35  ;;  %v651_v35 = vpack.c.bf16 %v161_v33, %v160_v32  ;;  %v21_v39 = vld [vmem:[%s1304_s0 + $0x38] sm:$0xff]  ;;  %v20_v40 = vld [vmem:[%s1304_s0 + $0x30] sm:$0xff]  ;;  %v27_v45 = vld [vmem:[%s1304_s0 + $0x68] sm:$0xff] }
  0x19   :  { %622 = vmatpush1.bf16.msra.mxu0 %v621_v36  ;;  %575 = vmatprep.subr.bf16.mxu1 %v696_v0  ;;  %v14_v36 = vld [vmem:[%s1304_s0] sm:$0xff]  ;;  %v25_v42 = vld [vmem:[%s1304_s0 + $0x58] sm:$0xff]  ;;  %v28_v48 = vld [vmem:[%s1304_s0 + $0x70] sm:$0xff] }
  0x1a   :  { %623 = vmatprep.subr.bf16.mxu0 %v696_v0  ;;  %v29_v46 = vld [vmem:[%s1304_s0 + $0x78] sm:$0xff]  ;;  %v26_v47 = vld [vmem:[%s1304_s0 + $0x60] sm:$0xff]  ;;  %v32_v52 = vld [vmem:[%s1304_s0 + $0x90] sm:$0xff] }
  0x1b   :  { %v30_v51 = vld [vmem:[%s1304_s0 + $0x80] sm:$0xff]  ;;  %v35_v53 = vld [vmem:[%s1304_s0 + $0xa8] sm:$0xff]  ;;  %v37_v54 = vld [vmem:[%s1304_s0 + $0xb8] sm:$0xff] }
  0x1c   :  { %577 = vmatpush1.bf16.msra.mxu1 %v576_v43  ;;  %v22_v43 = vld [vmem:[%s1304_s0 + $0x40] sm:$0xff]  ;;  %v39_v57 = vld [vmem:[%s1304_s0 + $0xc8] sm:$0xff]  ;;  %v41_v58 = vld [vmem:[%s1304_s0 + $0xd8] sm:$0xff] }
  0x1d   :  { %625 = vmatpush1.bf16.msra.mxu0 %v624_v44  ;;  %578 = vmatprep.subr.bf16.mxu1 %v696_v0  ;;  %v24_v44 = vld [vmem:[%s1304_s0 + $0x50] sm:$0xff]  ;;  %v38_v59 = vld [vmem:[%s1304_s0 + $0xc0] sm:$0xff]  ;;  %v47_v2 = vld [vmem:[%s1304_s0 + $0x108] sm:$0xff] }
  0x1e   :  { %626 = vmatprep.subr.bf16.mxu0 %v696_v0  ;;  %v40_v60 = vld [vmem:[%s1304_s0 + $0xd0] sm:$0xff]  ;;  %v42_v63 = vld [vmem:[%s1304_s0 + $0xe0] sm:$0xff]  ;;  %v49_v3 = vld [vmem:[%s1304_s0 + $0x118] sm:$0xff] }
  0x1f   :  { %v44_v1 = vld [vmem:[%s1304_s0 + $0xf0] sm:$0xff]  ;;  %v51_v6 = vld [vmem:[%s1304_s0 + $0x128] sm:$0xff]  ;;  %v53_v7 = vld [vmem:[%s1304_s0 + $0x138] sm:$0xff] }
  0x20   :  { %580 = vmatpush1.bf16.msra.mxu1 %v579_v49  ;;  %v31_v49 = vld [vmem:[%s1304_s0 + $0x88] sm:$0xff]  ;;  %v50_v8 = vld [vmem:[%s1304_s0 + $0x120] sm:$0xff]  ;;  %v52_v9 = vld [vmem:[%s1304_s0 + $0x130] sm:$0xff] }
  0x21   :  { %628 = vmatpush1.bf16.msra.mxu0 %v627_v50  ;;  %581 = vmatprep.subr.bf16.mxu1 %v696_v0  ;;  %v33_v50 = vld [vmem:[%s1304_s0 + $0x98] sm:$0xff]  ;;  %v54_v12 = vld [vmem:[%s1304_s0 + $0x140] sm:$0xff]  ;;  %v56_v13 = vld [vmem:[%s1304_s0 + $0x150] sm:$0xff] }
  0x22   :  { %629 = vmatprep.subr.bf16.mxu0 %v696_v0  ;;  %v59_v14 = vld [vmem:[%s1304_s0 + $0x168] sm:$0xff]  ;;  %v61_v15 = vld [vmem:[%s1304_s0 + $0x178] sm:$0xff]  ;;  %v62_v20 = vld [vmem:[%s1304_s0 + $0x180] sm:$0xff] }
  0x23   :  { %v63_v18 = vld [vmem:[%s1304_s0 + $0x188] sm:$0xff]  ;;  %v65_v19 = vld [vmem:[%s1304_s0 + $0x198] sm:$0xff]  ;;  %v64_v21 = vld [vmem:[%s1304_s0 + $0x190] sm:$0xff] }
  0x24   :  { %583 = vmatpush1.bf16.msra.mxu1 %v582_v55  ;;  %v34_v55 = vld [vmem:[%s1304_s0 + $0xa0] sm:$0xff]  ;;  %v68_v25 = vld [vmem:[%s1304_s0 + $0x1b0] sm:$0xff]  ;;  %v71_v26 = vld [vmem:[%s1304_s0 + $0x1c8] sm:$0xff] }
  0x25   :  { %631 = vmatpush1.bf16.msra.mxu0 %v630_v56  ;;  %584 = vmatprep.subr.bf16.mxu1 %v696_v0  ;;  %v36_v56 = vld [vmem:[%s1304_s0 + $0xb0] sm:$0xff]  ;;  %v66_v24 = vld [vmem:[%s1304_s0 + $0x1a0] sm:$0xff]  ;;  %v73_v27 = vld [vmem:[%s1304_s0 + $0x1d8] sm:$0xff] }
  0x26   :  { %632 = vmatprep.subr.bf16.mxu0 %v696_v0  ;;  %v75_v30 = vld [vmem:[%s1304_s0 + $0x1e8] sm:$0xff]  ;;  %v77_v31 = vld [vmem:[%s1304_s0 + $0x1f8] sm:$0xff]  ;;  %v74_v32 = vld [vmem:[%s1304_s0 + $0x1e0] sm:$0xff] }
  0x27   :  { %v76_v33 = vld [vmem:[%s1304_s0 + $0x1f0] sm:$0xff] }
  0x28   :  { %586 = vmatpush1.bf16.msra.mxu1 %v585_v61  ;;  %v43_v61 = vld [vmem:[%s1304_s0 + $0xe8] sm:$0xff] }
  0x29   :  { %634 = vmatpush1.bf16.msra.mxu0 %v633_v62  ;;  %587 = vmatprep.subr.bf16.mxu1 %v696_v0  ;;  %v45_v62 = vld [vmem:[%s1304_s0 + $0xf8] sm:$0xff] }
  0x2a   :  { %635 = vmatprep.subr.bf16.mxu0 %v696_v0 }
  0x2c   :  { %589 = vmatpush1.bf16.msra.mxu1 %v588_v4  ;;  %v46_v4 = vld [vmem:[%s1304_s0 + $0x100] sm:$0xff] }
  0x2d   :  { %637 = vmatpush1.bf16.msra.mxu0 %v636_v5  ;;  %590 = vmatprep.subr.bf16.mxu1 %v696_v0  ;;  %v48_v5 = vld [vmem:[%s1304_s0 + $0x110] sm:$0xff] }
  0x2e   :  { %638 = vmatprep.subr.bf16.mxu0 %v696_v0 }
  0x30   :  { %592 = vmatpush1.bf16.msra.mxu1 %v591_v10  ;;  %v55_v10 = vld [vmem:[%s1304_s0 + $0x148] sm:$0xff] }
  0x31   :  { %640 = vmatpush1.bf16.msra.mxu0 %v639_v11  ;;  %593 = vmatprep.subr.bf16.mxu1 %v696_v0  ;;  %v57_v11 = vld [vmem:[%s1304_s0 + $0x158] sm:$0xff] }
  0x32   :  { %641 = vmatprep.subr.bf16.mxu0 %v696_v0 }
  0x34   :  { %595 = vmatpush1.bf16.msra.mxu1 %v594_v16  ;;  %v58_v16 = vld [vmem:[%s1304_s0 + $0x160] sm:$0xff] }
  0x35   :  { %643 = vmatpush1.bf16.msra.mxu0 %v642_v17  ;;  %596 = vmatprep.subr.bf16.mxu1 %v696_v0  ;;  %v60_v17 = vld [vmem:[%s1304_s0 + $0x170] sm:$0xff] }
  0x36   :  { %644 = vmatprep.subr.bf16.mxu0 %v696_v0 }
  0x38   :  { %598 = vmatpush1.bf16.msra.mxu1 %v597_v22  ;;  %v67_v22 = vld [vmem:[%s1304_s0 + $0x1a8] sm:$0xff] }
  0x39   :  { %646 = vmatpush1.bf16.msra.mxu0 %v645_v23  ;;  %599 = vmatprep.subr.bf16.mxu1 %v696_v0  ;;  %v69_v23 = vld [vmem:[%s1304_s0 + $0x1b8] sm:$0xff] }
  0x3a   :  { %647 = vmatprep.subr.bf16.mxu0 %v696_v0 }
  0x3c   :  { %601 = vmatpush1.bf16.msra.mxu1 %v600_v28  ;;  %v70_v28 = vld [vmem:[%s1304_s0 + $0x1c0] sm:$0xff] }
  0x3d   :  { %649 = vmatpush1.bf16.msra.mxu0 %v648_v29  ;;  %602 = vmatprep.subr.bf16.mxu1 %v696_v0  ;;  %v72_v29 = vld [vmem:[%s1304_s0 + $0x1d0] sm:$0xff] }
  0x3e   :  { %650 = vmatprep.subr.bf16.mxu0 %v696_v0  ;;  %v18_v0 = vld [vmem:[%s1304_s0 + $0x20] sm:$0xff] }
  0x40   :  { %604 = vmatpush1.bf16.msra.mxu1 %v603_v34  ;;  %v79_v34 = vld [vmem:[%s1304_s0 + $0x208] sm:$0xff] }
  0x41   :  { %652 = vmatpush1.bf16.msra.mxu0 %v651_v35  ;;  %v81_v35 = vld [vmem:[%s1304_s0 + $0x218] sm:$0xff] }
  0x43   :  { %234 = vmatmul.mubr.f32.vlgmr.msra.gmra.mrb[0].mxu1 %v14_v36  ;;  %v78_v36 = vld [vmem:[%s1304_s0 + $0x200] sm:$0xff] }
  0x44   :  { %404 = vmatmul.mubr.f32.vlgmr.msra.gmra.mrb[0].mxu0 %v16_v37  ;;  %238 = vmatprep.mubr.f32.mxu1 %v19_v38  ;;  %v80_v37 = vld [vmem:[%s1304_s0 + $0x210] sm:$0xff]  ;;  %v83_v38 = vld [vmem:[%s1304_s0 + $0x228] sm:$0xff] }
  0x45   :  { %408 = vmatprep.mubr.f32.mxu0 %v21_v39  ;;  %v85_v39 = vld [vmem:[%s1304_s0 + $0x238] sm:$0xff] }
  0x47   :  { %239 = vmatmul.mubr.f32.gmra.mrb[2].mxu1 %v18_v0  ;;  %v82_v0 = vld [vmem:[%s1304_s0 + $0x220] sm:$0xff] }
  0x48   :  { %409 = vmatmul.mubr.f32.gmra.mrb[2].mxu0 %v20_v40  ;;  %243 = vmatprep.mubr.f32.mxu1 %v23_v41  ;;  %v84_v40 = vld [vmem:[%s1304_s0 + $0x230] sm:$0xff]  ;;  %v87_v41 = vld [vmem:[%s1304_s0 + $0x248] sm:$0xff] }
  0x49   :  { %413 = vmatprep.mubr.f32.mxu0 %v25_v42  ;;  %v89_v42 = vld [vmem:[%s1304_s0 + $0x258] sm:$0xff] }
  0x4b   :  { %244 = vmatmul.mubr.f32.gmra.mrb[4].mxu1 %v22_v43  ;;  %v86_v43 = vld [vmem:[%s1304_s0 + $0x240] sm:$0xff] }
  0x4c   :  { %414 = vmatmul.mubr.f32.gmra.mrb[4].mxu0 %v24_v44  ;;  %248 = vmatprep.mubr.f32.mxu1 %v27_v45  ;;  %v88_v44 = vld [vmem:[%s1304_s0 + $0x250] sm:$0xff]  ;;  %v91_v45 = vld [vmem:[%s1304_s0 + $0x268] sm:$0xff] }
  0x4d   :  { %418 = vmatprep.mubr.f32.mxu0 %v29_v46  ;;  %v93_v46 = vld [vmem:[%s1304_s0 + $0x278] sm:$0xff] }
  0x4f   :  { %249 = vmatmul.mubr.f32.gmra.mrb[6].mxu1 %v26_v47  ;;  %v90_v47 = vld [vmem:[%s1304_s0 + $0x260] sm:$0xff] }
  0x50   :  { %419 = vmatmul.mubr.f32.gmra.mrb[6].mxu0 %v28_v48  ;;  %253 = vmatprep.mubr.f32.mxu1 %v31_v49  ;;  %v92_v48 = vld [vmem:[%s1304_s0 + $0x270] sm:$0xff]  ;;  %v95_v49 = vld [vmem:[%s1304_s0 + $0x288] sm:$0xff] }
  0x51   :  { %423 = vmatprep.mubr.f32.mxu0 %v33_v50  ;;  %v97_v50 = vld [vmem:[%s1304_s0 + $0x298] sm:$0xff] }
  0x53   :  { %254 = vmatmul.mubr.f32.gmra.mrb[8].mxu1 %v30_v51  ;;  %v94_v51 = vld [vmem:[%s1304_s0 + $0x280] sm:$0xff] }
  0x54   :  { %424 = vmatmul.mubr.f32.gmra.mrb[8].mxu0 %v32_v52  ;;  %258 = vmatprep.mubr.f32.mxu1 %v35_v53  ;;  %v96_v52 = vld [vmem:[%s1304_s0 + $0x290] sm:$0xff]  ;;  %v1196_v53 = vld [vmem:[%s1305_s2] ss:$0 sm:$0xff] }
  0x55   :  { %428 = vmatprep.mubr.f32.mxu0 %v37_v54 }
  0x57   :  { %259 = vmatmul.mubr.f32.gmra.mrb[10].mxu1 %v34_v55 }
  0x58   :  { %429 = vmatmul.mubr.f32.gmra.mrb[10].mxu0 %v36_v56  ;;  %263 = vmatprep.mubr.f32.mxu1 %v39_v57 }
  0x59   :  { %433 = vmatprep.mubr.f32.mxu0 %v41_v58 }
  0x5b   :  { %264 = vmatmul.mubr.f32.gmra.mrb[12].mxu1 %v38_v59 }
  0x5c   :  { %434 = vmatmul.mubr.f32.gmra.mrb[12].mxu0 %v40_v60  ;;  %268 = vmatprep.mubr.f32.mxu1 %v43_v61 }
  0x5d   :  { %438 = vmatprep.mubr.f32.mxu0 %v45_v62 }
  0x5f   :  { %269 = vmatmul.mubr.f32.gmra.mrb[14].mxu1 %v42_v63 }
  0x60   :  { %439 = vmatmul.mubr.f32.gmra.mrb[14].mxu0 %v44_v1  ;;  %273 = vmatprep.mubr.f32.mxu1 %v47_v2 }
  0x61   :  { %443 = vmatprep.mubr.f32.mxu0 %v49_v3 }
  0x63   :  { %274 = vmatmul.mubr.f32.gmra.mrb[16].mxu1 %v46_v4 }
  0x64   :  { %444 = vmatmul.mubr.f32.gmra.mrb[16].mxu0 %v48_v5  ;;  %278 = vmatprep.mubr.f32.mxu1 %v51_v6 }
  0x65   :  { %448 = vmatprep.mubr.f32.mxu0 %v53_v7 }
  0x67   :  { %279 = vmatmul.mubr.f32.gmra.mrb[18].mxu1 %v50_v8 }
  0x68   :  { %449 = vmatmul.mubr.f32.gmra.mrb[18].mxu0 %v52_v9  ;;  %283 = vmatprep.mubr.f32.mxu1 %v55_v10 }
  0x69   :  { %453 = vmatprep.mubr.f32.mxu0 %v57_v11 }
  0x6b   :  { %284 = vmatmul.mubr.f32.gmra.mrb[20].mxu1 %v54_v12 }
  0x6c   :  { %454 = vmatmul.mubr.f32.gmra.mrb[20].mxu0 %v56_v13  ;;  %288 = vmatprep.mubr.f32.mxu1 %v59_v14 }
  0x6d   :  { %458 = vmatprep.mubr.f32.mxu0 %v61_v15 }
  0x6f   :  { %289 = vmatmul.mubr.f32.gmra.mrb[22].mxu1 %v58_v16 }
  0x70   :  { %459 = vmatmul.mubr.f32.gmra.mrb[22].mxu0 %v60_v17  ;;  %293 = vmatprep.mubr.f32.mxu1 %v63_v18 }
  0x71   :  { %463 = vmatprep.mubr.f32.mxu0 %v65_v19 }
  0x73   :  { %294 = vmatmul.mubr.f32.gmra.mrb[24].mxu1 %v62_v20 }
  0x74   :  { %464 = vmatmul.mubr.f32.gmra.mrb[24].mxu0 %v64_v21  ;;  %298 = vmatprep.mubr.f32.mxu1 %v67_v22 }
  0x75   :  { %468 = vmatprep.mubr.f32.mxu0 %v69_v23 }
  0x77   :  { %299 = vmatmul.mubr.f32.gmra.mrb[26].mxu1 %v66_v24 }
  0x78   :  { %469 = vmatmul.mubr.f32.gmra.mrb[26].mxu0 %v68_v25  ;;  %303 = vmatprep.mubr.f32.mxu1 %v71_v26 }
  0x79   :  { %473 = vmatprep.mubr.f32.mxu0 %v73_v27 }
  0x7b   :  { %304 = vmatmul.mubr.f32.gmra.mrb[28].mxu1 %v70_v28 }
  0x7c   :  { %474 = vmatmul.mubr.f32.gmra.mrb[28].mxu0 %v72_v29  ;;  %308 = vmatprep.mubr.f32.mxu1 %v75_v30 }
  0x7d   :  { %478 = vmatprep.mubr.f32.mxu0 %v77_v31 }
  0x7f   :  { %309 = vmatmul.mubr.f32.gmra.mrb[30].mxu1 %v74_v32 }
  0x80   :  { %479 = vmatmul.mubr.f32.gmra.mrb[30].mxu0 %v76_v33  ;;  %313 = vmatprep.mubr.f32.mxu1 %v79_v34 }
  0x81   :  { %483 = vmatprep.mubr.f32.mxu0 %v81_v35 }
  0x83   :  { %314 = vmatmul.mubr.f32.gmra.mrb[32].mxu1 %v78_v36 }
  0x84   :  { %484 = vmatmul.mubr.f32.gmra.mrb[32].mxu0 %v80_v37  ;;  %318 = vmatprep.mubr.f32.mxu1 %v83_v38 }
  0x85   :  { %488 = vmatprep.mubr.f32.mxu0 %v85_v39 }
  0x87   :  { %319 = vmatmul.mubr.f32.gmra.mrb[34].mxu1 %v82_v0 }
  0x88   :  { %489 = vmatmul.mubr.f32.gmra.mrb[34].mxu0 %v84_v40  ;;  %323 = vmatprep.mubr.f32.mxu1 %v87_v41 }
  0x89   :  { %493 = vmatprep.mubr.f32.mxu0 %v89_v42 }
  0x8b   :  { %324 = vmatmul.mubr.f32.gmra.mrb[36].mxu1 %v86_v43 }
  0x8c   :  { %494 = vmatmul.mubr.f32.gmra.mrb[36].mxu0 %v88_v44  ;;  %328 = vmatprep.mubr.f32.mxu1 %v91_v45 }
  0x8d   :  { %498 = vmatprep.mubr.f32.mxu0 %v93_v46 }
  0x8f   :  { %329 = vmatmul.mubr.f32.gmra.mrb[38].mxu1 %v90_v47 }
  0x90   :  { %499 = vmatmul.mubr.f32.gmra.mrb[38].mxu0 %v92_v48  ;;  %333 = vmatprep.mubr.f32.mxu1 %v95_v49 }
  0x91   :  { %503 = vmatprep.mubr.f32.mxu0 %v97_v50 }
  0x93   :  { %334 = vmatmul.mubr.f32.gmra.mrb[40].mxu1 %v94_v51 }
  0x94   :  { %504 = vmatmul.mubr.f32.gmra.mrb[40].mxu0 %v96_v52 }
 0x116   :  { %v235_v54 = vpop.f32.mrb[0].mxu1 }
 0x117   :  { %v236_v55 = vadd.f32 %v1196_v53, %v235_v54  ;;  %v237_v56 = vpop.f32.mrb[1].mxu1  ;;  %v405_v57 = vpop.f32.mrb[0].mxu0 }
 0x118   :  { %v407_v58 = vpop.f32.mrb[1].mxu0 }
 0x119   :  { %v406_v59 = vadd.f32 %v405_v57, %v236_v55 }
 0x11a   :  { %v240_v60 = vpop.f32.mrb[2].mxu1 }
 0x11b   :  { %v509_v61 = vmax.f32 %v406_v59, 0.0  ;;  %v241_v62 = vadd.f32 %v1196_v53, %v240_v60  ;;  %v242_v63 = vpop.f32.mrb[3].mxu1  ;;  %v410_v1 = vpop.f32.mrb[2].mxu0 }
 0x11c   :  { %v412_v2 = vpop.f32.mrb[3].mxu0 }
 0x11d   :  { %531 = vst.msk [vmem:[%s1306_s3] sm:$0xff] %vm530_vm0, %v509_v61  ;;  %v411_v3 = vadd.f32 %v410_v1, %v241_v62 }
 0x11e   :  { %v245_v4 = vpop.f32.mrb[4].mxu1 }
 0x11f   :  { %v510_v5 = vmax.f32 %v411_v3, 0.0  ;;  %v246_v6 = vadd.f32 %v1196_v53, %v245_v4  ;;  %v247_v7 = vpop.f32.mrb[5].mxu1  ;;  %v415_v8 = vpop.f32.mrb[4].mxu0 }
 0x120   :  { %v417_v9 = vpop.f32.mrb[5].mxu0 }
 0x121   :  { %532 = vst.msk [vmem:[%s1306_s3 + $0x8] sm:$0xff] %vm530_vm0, %v510_v5  ;;  %v416_v10 = vadd.f32 %v415_v8, %v246_v6 }
 0x122   :  { %v250_v11 = vpop.f32.mrb[6].mxu1 }
 0x123   :  { %v511_v12 = vmax.f32 %v416_v10, 0.0  ;;  %v251_v13 = vadd.f32 %v1196_v53, %v250_v11  ;;  %v252_v14 = vpop.f32.mrb[7].mxu1  ;;  %v420_v15 = vpop.f32.mrb[6].mxu0 }
 0x124   :  { %v422_v16 = vpop.f32.mrb[7].mxu0 }
 0x125   :  { %533 = vst.msk [vmem:[%s1306_s3 + $0x10] sm:$0xff] %vm530_vm0, %v511_v12  ;;  %v421_v17 = vadd.f32 %v420_v15, %v251_v13 }
 0x126   :  { %v255_v18 = vpop.f32.mrb[8].mxu1 }
 0x127   :  { %v512_v19 = vmax.f32 %v421_v17, 0.0  ;;  %v256_v20 = vadd.f32 %v1196_v53, %v255_v18  ;;  %v257_v21 = vpop.f32.mrb[9].mxu1  ;;  %v425_v22 = vpop.f32.mrb[8].mxu0 }
 0x128   :  { %v427_v23 = vpop.f32.mrb[9].mxu0 }
 0x129   :  { %534 = vst.msk [vmem:[%s1306_s3 + $0x18] sm:$0xff] %vm530_vm0, %v512_v19  ;;  %v426_v24 = vadd.f32 %v425_v22, %v256_v20 }
 0x12a   :  { %v260_v25 = vpop.f32.mrb[10].mxu1 }
 0x12b   :  { %v513_v26 = vmax.f32 %v426_v24, 0.0  ;;  %v261_v27 = vadd.f32 %v1196_v53, %v260_v25  ;;  %v262_v28 = vpop.f32.mrb[11].mxu1  ;;  %v430_v29 = vpop.f32.mrb[10].mxu0 }
 0x12c   :  { %v432_v30 = vpop.f32.mrb[11].mxu0 }
 0x12d   :  { %535 = vst.msk [vmem:[%s1306_s3 + $0x20] sm:$0xff] %vm530_vm0, %v513_v26  ;;  %v431_v31 = vadd.f32 %v430_v29, %v261_v27 }
 0x12e   :  { %v265_v32 = vpop.f32.mrb[12].mxu1 }
 0x12f   :  { %v514_v33 = vmax.f32 %v431_v31, 0.0  ;;  %v266_v34 = vadd.f32 %v1196_v53, %v265_v32  ;;  %v267_v35 = vpop.f32.mrb[13].mxu1  ;;  %v435_v36 = vpop.f32.mrb[12].mxu0 }
 0x130   :  { %v437_v37 = vpop.f32.mrb[13].mxu0 }
 0x131   :  { %536 = vst.msk [vmem:[%s1306_s3 + $0x28] sm:$0xff] %vm530_vm0, %v514_v33  ;;  %v436_v38 = vadd.f32 %v435_v36, %v266_v34 }
 0x132   :  { %v270_v39 = vpop.f32.mrb[14].mxu1 }
 0x133   :  { %v515_v0 = vmax.f32 %v436_v38, 0.0  ;;  %v271_v40 = vadd.f32 %v1196_v53, %v270_v39  ;;  %v272_v41 = vpop.f32.mrb[15].mxu1  ;;  %v440_v42 = vpop.f32.mrb[14].mxu0 }
 0x134   :  { %v442_v43 = vpop.f32.mrb[15].mxu0 }
 0x135   :  { %537 = vst.msk [vmem:[%s1306_s3 + $0x30] sm:$0xff] %vm530_vm0, %v515_v0  ;;  %v441_v44 = vadd.f32 %v440_v42, %v271_v40 }
 0x136   :  { %v275_v45 = vpop.f32.mrb[16].mxu1 }
 0x137   :  { %v516_v46 = vmax.f32 %v441_v44, 0.0  ;;  %v276_v47 = vadd.f32 %v1196_v53, %v275_v45  ;;  %v277_v48 = vpop.f32.mrb[17].mxu1  ;;  %v445_v49 = vpop.f32.mrb[16].mxu0 }
 0x138   :  { %v447_v50 = vpop.f32.mrb[17].mxu0 }
 0x139   :  { %538 = vst.msk [vmem:[%s1306_s3 + $0x38] sm:$0xff] %vm530_vm0, %v516_v46  ;;  %v446_v51 = vadd.f32 %v445_v49, %v276_v47 }
 0x13a   :  { %v280_v52 = vpop.f32.mrb[18].mxu1 }
 0x13b   :  { %v517_v54 = vmax.f32 %v446_v51, 0.0  ;;  %v281_v55 = vadd.f32 %v1196_v53, %v280_v52  ;;  %v282_v56 = vpop.f32.mrb[19].mxu1  ;;  %v450_v57 = vpop.f32.mrb[18].mxu0 }
 0x13c   :  { %v452_v58 = vpop.f32.mrb[19].mxu0 }
 0x13d   :  { %539 = vst.msk [vmem:[%s1306_s3 + $0x40] sm:$0xff] %vm530_vm0, %v517_v54  ;;  %v451_v59 = vadd.f32 %v450_v57, %v281_v55 }
 0x13e   :  { %v285_v60 = vpop.f32.mrb[20].mxu1 }
 0x13f   :  { %v518_v61 = vmax.f32 %v451_v59, 0.0  ;;  %v286_v62 = vadd.f32 %v1196_v53, %v285_v60  ;;  %v287_v63 = vpop.f32.mrb[21].mxu1  ;;  %v455_v1 = vpop.f32.mrb[20].mxu0 }
 0x140   :  { %v457_v2 = vpop.f32.mrb[21].mxu0 }
 0x141   :  { %540 = vst.msk [vmem:[%s1306_s3 + $0x48] sm:$0xff] %vm530_vm0, %v518_v61  ;;  %v456_v3 = vadd.f32 %v455_v1, %v286_v62 }
 0x142   :  { %v290_v4 = vpop.f32.mrb[22].mxu1 }
 0x143   :  { %v519_v5 = vmax.f32 %v456_v3, 0.0  ;;  %v291_v6 = vadd.f32 %v1196_v53, %v290_v4  ;;  %v292_v7 = vpop.f32.mrb[23].mxu1  ;;  %v460_v8 = vpop.f32.mrb[22].mxu0 }
 0x144   :  { %v462_v9 = vpop.f32.mrb[23].mxu0 }
 0x145   :  { %541 = vst.msk [vmem:[%s1306_s3 + $0x50] sm:$0xff] %vm530_vm0, %v519_v5  ;;  %v461_v10 = vadd.f32 %v460_v8, %v291_v6 }
 0x146   :  { %v295_v11 = vpop.f32.mrb[24].mxu1 }
 0x147   :  { %v520_v12 = vmax.f32 %v461_v10, 0.0  ;;  %v296_v13 = vadd.f32 %v1196_v53, %v295_v11  ;;  %v297_v14 = vpop.f32.mrb[25].mxu1  ;;  %v465_v15 = vpop.f32.mrb[24].mxu0 }
 0x148   :  { %v467_v16 = vpop.f32.mrb[25].mxu0 }
 0x149   :  { %542 = vst.msk [vmem:[%s1306_s3 + $0x58] sm:$0xff] %vm530_vm0, %v520_v12  ;;  %v466_v17 = vadd.f32 %v465_v15, %v296_v13 }
 0x14a   :  { %v300_v18 = vpop.f32.mrb[26].mxu1 }
 0x14b   :  { %v521_v19 = vmax.f32 %v466_v17, 0.0  ;;  %v301_v20 = vadd.f32 %v1196_v53, %v300_v18  ;;  %v302_v21 = vpop.f32.mrb[27].mxu1  ;;  %v470_v22 = vpop.f32.mrb[26].mxu0 }
 0x14c   :  { %v472_v23 = vpop.f32.mrb[27].mxu0 }
 0x14d   :  { %543 = vst.msk [vmem:[%s1306_s3 + $0x60] sm:$0xff] %vm530_vm0, %v521_v19  ;;  %v471_v24 = vadd.f32 %v470_v22, %v301_v20 }
 0x14e   :  { %v305_v25 = vpop.f32.mrb[28].mxu1 }
 0x14f   :  { %v522_v26 = vmax.f32 %v471_v24, 0.0  ;;  %v306_v27 = vadd.f32 %v1196_v53, %v305_v25  ;;  %v307_v28 = vpop.f32.mrb[29].mxu1  ;;  %v475_v29 = vpop.f32.mrb[28].mxu0 }
 0x150   :  { %v477_v30 = vpop.f32.mrb[29].mxu0 }
 0x151   :  { %544 = vst.msk [vmem:[%s1306_s3 + $0x68] sm:$0xff] %vm530_vm0, %v522_v26  ;;  %v476_v31 = vadd.f32 %v475_v29, %v306_v27 }
 0x152   :  { %v310_v32 = vpop.f32.mrb[30].mxu1 }
 0x153   :  { %v523_v33 = vmax.f32 %v476_v31, 0.0  ;;  %v311_v34 = vadd.f32 %v1196_v53, %v310_v32  ;;  %v312_v35 = vpop.f32.mrb[31].mxu1  ;;  %v480_v36 = vpop.f32.mrb[30].mxu0 }
 0x154   :  { %v482_v37 = vpop.f32.mrb[31].mxu0 }
 0x155   :  { %545 = vst.msk [vmem:[%s1306_s3 + $0x70] sm:$0xff] %vm530_vm0, %v523_v33  ;;  %v481_v38 = vadd.f32 %v480_v36, %v311_v34 }
 0x156   :  { %v315_v39 = vpop.f32.mrb[32].mxu1 }
 0x157   :  { %v524_v0 = vmax.f32 %v481_v38, 0.0  ;;  %v316_v40 = vadd.f32 %v1196_v53, %v315_v39  ;;  %v317_v41 = vpop.f32.mrb[33].mxu1  ;;  %v485_v42 = vpop.f32.mrb[32].mxu0 }
 0x158   :  { %v487_v43 = vpop.f32.mrb[33].mxu0 }
 0x159   :  { %546 = vst.msk [vmem:[%s1306_s3 + $0x78] sm:$0xff] %vm530_vm0, %v524_v0  ;;  %v486_v44 = vadd.f32 %v485_v42, %v316_v40 }
 0x15a   :  { %v320_v45 = vpop.f32.mrb[34].mxu1 }
 0x15b   :  { %v525_v46 = vmax.f32 %v486_v44, 0.0  ;;  %v321_v47 = vadd.f32 %v1196_v53, %v320_v45  ;;  %v322_v48 = vpop.f32.mrb[35].mxu1  ;;  %v490_v49 = vpop.f32.mrb[34].mxu0 }
 0x15c   :  { %v492_v50 = vpop.f32.mrb[35].mxu0 }
 0x15d   :  { %547 = vst.msk [vmem:[%s1306_s3 + $0x80] sm:$0xff] %vm530_vm0, %v525_v46  ;;  %v491_v51 = vadd.f32 %v490_v49, %v321_v47 }
 0x15e   :  { %v325_v52 = vpop.f32.mrb[36].mxu1 }
 0x15f   :  { %v526_v54 = vmax.f32 %v491_v51, 0.0  ;;  %v326_v55 = vadd.f32 %v1196_v53, %v325_v52  ;;  %v327_v56 = vpop.f32.mrb[37].mxu1  ;;  %v495_v57 = vpop.f32.mrb[36].mxu0 }
 0x160   :  { %v497_v58 = vpop.f32.mrb[37].mxu0 }
 0x161   :  { %548 = vst.msk [vmem:[%s1306_s3 + $0x88] sm:$0xff] %vm530_vm0, %v526_v54  ;;  %v496_v59 = vadd.f32 %v495_v57, %v326_v55 }
 0x162   :  { %v330_v60 = vpop.f32.mrb[38].mxu1 }
 0x163   :  { %v527_v61 = vmax.f32 %v496_v59, 0.0  ;;  %v331_v62 = vadd.f32 %v1196_v53, %v330_v60  ;;  %v332_v63 = vpop.f32.mrb[39].mxu1  ;;  %v500_v1 = vpop.f32.mrb[38].mxu0 }
 0x164   :  { %v502_v2 = vpop.f32.mrb[39].mxu0 }
 0x165   :  { %549 = vst.msk [vmem:[%s1306_s3 + $0x90] sm:$0xff] %vm530_vm0, %v527_v61  ;;  %v501_v3 = vadd.f32 %v500_v1, %v331_v62 }
 0x166   :  { %v335_v4 = vpop.f32.mrb[40].mxu1 }
 0x167   :  { %v528_v5 = vmax.f32 %v501_v3, 0.0  ;;  %v336_v6 = vadd.f32 %v1196_v53, %v335_v4  ;;  %v337_v7 = vpop.f32.mrb[41].mxu1  ;;  %v505_v8 = vpop.f32.mrb[40].mxu0 }
 0x168   :  { %v507_v9 = vpop.f32.mrb[41].mxu0 }
 0x169   :  { %550 = vst.msk [vmem:[%s1306_s3 + $0x98] sm:$0xff] %vm530_vm0, %v528_v5  ;;  %v506_v10 = vadd.f32 %v505_v8, %v336_v6 }
 0x16b   :  { %v529_v11 = vmax.f32 %v506_v10, 0.0 }
 0x16d   :  { %551 = vst.msk [vmem:[%s1306_s3 + $0xa0] sm:$0xff] %vm530_vm0, %v529_v11 }

// kernel: dqn_forward.6
= control target key start
LH: loop header
LB: loop body
LE: loop exit
PB: predicated region body
PF: predicated region fallthrough
CT: control target
= control target key end

     0   :  { %vm938_vm0 = vmmov 0   ;;  %vm158_vm1 = vcmask 523264   ;;  %s1488_s1 = inlined_call_operand.vmem [shape: f32[576,64], index: 1, kind: input, shape index: {}]   ;;  %s1489_s0 = inlined_call_operand.vmem [shape: f32[104,576], index: 0, kind: input, shape index: {}]   ;;  %s1490_s2 = inlined_call_operand.vmem [shape: f32[1,64], index: 2, kind: input, shape index: {}]   ;;  %s1491_s3 = inlined_call_operand.vmem [shape: f32[104,64], index: 3, kind: output, shape index: {}]  }
   0x1   :  { %v95_v0 = vld [vmem:[%s1488_s1 + $0x80] sm:$0xff]  ;;  %v96_v1 = vld [vmem:[%s1488_s1 + $0x88] sm:$0xff]  ;;  %v97_v11 = vld [vmem:[%s1488_s1 + $0x90] sm:$0xff] }
   0x2   :  { %v127_v2 = vld [vmem:[%s1488_s1 + $0x180] sm:$0xff]  ;;  %v850_v3 = vpack.c.bf16 %v96_v1, %v95_v0  ;;  %v128_v4 = vld [vmem:[%s1488_s1 + $0x188] sm:$0xff]  ;;  %v98_v13 = vld [vmem:[%s1488_s1 + $0x98] sm:$0xff] }
   0x3   :  { %v79_v5 = vld [vmem:[%s1488_s1] sm:$0xff]  ;;  %v80_v6 = vld [vmem:[%s1488_s1 + $0x8] sm:$0xff]  ;;  %v882_v7 = vpack.c.bf16 %v128_v4, %v127_v2  ;;  %v129_v14 = vld [vmem:[%s1488_s1 + $0x190] sm:$0xff]  ;;  %v854_v16 = vpack.c.bf16 %v98_v13, %v97_v11 }
   0x4   :  { %v852_v8 = vpack.c.bf16 %v80_v6, %v79_v5  ;;  %v111_v9 = vld [vmem:[%s1488_s1 + $0x100] sm:$0xff]  ;;  %v112_v10 = vld [vmem:[%s1488_s1 + $0x108] sm:$0xff]  ;;  %851 = vmatprep.subr.bf16.mxu0 %v850_v3  ;;  %v130_v15 = vld [vmem:[%s1488_s1 + $0x198] sm:$0xff] }
   0x5   :  { %v884_v12 = vpack.c.bf16 %v112_v10, %v111_v9  ;;  %883 = vmatprep.subr.bf16.mxu1 %v882_v7  ;;  %v886_v17 = vpack.c.bf16 %v130_v15, %v129_v14  ;;  %v81_v18 = vld [vmem:[%s1488_s1 + $0x10] sm:$0xff]  ;;  %v82_v19 = vld [vmem:[%s1488_s1 + $0x18] sm:$0xff]  ;;  %v99_v23 = vld [vmem:[%s1488_s1 + $0xa0] sm:$0xff] }
   0x6   :  { %853 = vmatpush3.bf16.msra.mxu0 %v852_v8  ;;  %v113_v20 = vld [vmem:[%s1488_s1 + $0x110] sm:$0xff]  ;;  %v856_v21 = vpack.c.bf16 %v82_v19, %v81_v18  ;;  %v114_v22 = vld [vmem:[%s1488_s1 + $0x118] sm:$0xff]  ;;  %v100_v24 = vld [vmem:[%s1488_s1 + $0xa8] sm:$0xff] }
   0x7   :  { %885 = vmatpush3.bf16.msra.mxu1 %v884_v12  ;;  %855 = vmatprep.subr.bf16.mxu0 %v854_v16  ;;  %v888_v25 = vpack.c.bf16 %v114_v22, %v113_v20  ;;  %v858_v26 = vpack.c.bf16 %v100_v24, %v99_v23  ;;  %v131_v27 = vld [vmem:[%s1488_s1 + $0x1a0] sm:$0xff]  ;;  %v132_v28 = vld [vmem:[%s1488_s1 + $0x1a8] sm:$0xff]  ;;  %v101_v35 = vld [vmem:[%s1488_s1 + $0xb0] sm:$0xff] }
   0x8   :  { %887 = vmatprep.subr.bf16.mxu1 %v886_v17  ;;  %v83_v29 = vld [vmem:[%s1488_s1 + $0x20] sm:$0xff]  ;;  %v890_v30 = vpack.c.bf16 %v132_v28, %v131_v27  ;;  %v84_v31 = vld [vmem:[%s1488_s1 + $0x28] sm:$0xff]  ;;  %v102_v36 = vld [vmem:[%s1488_s1 + $0xb8] sm:$0xff] }
   0x9   :  { %v115_v32 = vld [vmem:[%s1488_s1 + $0x120] sm:$0xff]  ;;  %v116_v33 = vld [vmem:[%s1488_s1 + $0x128] sm:$0xff]  ;;  %v860_v34 = vpack.c.bf16 %v84_v31, %v83_v29  ;;  %v133_v37 = vld [vmem:[%s1488_s1 + $0x1b0] sm:$0xff]  ;;  %v862_v39 = vpack.c.bf16 %v102_v36, %v101_v35 }
   0xa   :  { %857 = vmatpush3.bf16.msra.mxu0 %v856_v21  ;;  %v892_v38 = vpack.c.bf16 %v116_v33, %v115_v32  ;;  %v134_v40 = vld [vmem:[%s1488_s1 + $0x1b8] sm:$0xff]  ;;  %v85_v41 = vld [vmem:[%s1488_s1 + $0x30] sm:$0xff]  ;;  %v103_v46 = vld [vmem:[%s1488_s1 + $0xc0] sm:$0xff] }
   0xb   :  { %889 = vmatpush3.bf16.msra.mxu1 %v888_v25  ;;  %859 = vmatprep.subr.bf16.mxu0 %v858_v26  ;;  %v86_v42 = vld [vmem:[%s1488_s1 + $0x38] sm:$0xff]  ;;  %v894_v43 = vpack.c.bf16 %v134_v40, %v133_v37  ;;  %v117_v44 = vld [vmem:[%s1488_s1 + $0x130] sm:$0xff]  ;;  %v104_v47 = vld [vmem:[%s1488_s1 + $0xc8] sm:$0xff] }
   0xc   :  { %891 = vmatprep.subr.bf16.mxu1 %v890_v30  ;;  %v118_v45 = vld [vmem:[%s1488_s1 + $0x138] sm:$0xff]  ;;  %v135_v48 = vld [vmem:[%s1488_s1 + $0x1c0] sm:$0xff]  ;;  %v136_v49 = vld [vmem:[%s1488_s1 + $0x1c8] sm:$0xff]  ;;  %v864_v50 = vpack.c.bf16 %v86_v42, %v85_v41  ;;  %v866_v52 = vpack.c.bf16 %v104_v47, %v103_v46 }
   0xd   :  { %v896_v51 = vpack.c.bf16 %v118_v45, %v117_v44  ;;  %v87_v53 = vld [vmem:[%s1488_s1 + $0x40] sm:$0xff]  ;;  %v88_v54 = vld [vmem:[%s1488_s1 + $0x48] sm:$0xff]  ;;  %v898_v56 = vpack.c.bf16 %v136_v49, %v135_v48  ;;  %v105_v58 = vld [vmem:[%s1488_s1 + $0xd0] sm:$0xff] }
   0xe   :  { %861 = vmatpush3.bf16.msra.mxu0 %v860_v34  ;;  %v119_v55 = vld [vmem:[%s1488_s1 + $0x140] sm:$0xff]  ;;  %v120_v57 = vld [vmem:[%s1488_s1 + $0x148] sm:$0xff]  ;;  %v106_v59 = vld [vmem:[%s1488_s1 + $0xd8] sm:$0xff]  ;;  %v868_v62 = vpack.c.bf16 %v88_v54, %v87_v53 }
   0xf   :  { %893 = vmatpush3.bf16.msra.mxu1 %v892_v38  ;;  %863 = vmatprep.subr.bf16.mxu0 %v862_v39  ;;  %v137_v60 = vld [vmem:[%s1488_s1 + $0x1d0] sm:$0xff]  ;;  %v138_v61 = vld [vmem:[%s1488_s1 + $0x1d8] sm:$0xff]  ;;  %v900_v63 = vpack.c.bf16 %v120_v57, %v119_v55  ;;  %v870_v0 = vpack.c.bf16 %v106_v59, %v105_v58  ;;  %v107_v6 = vld [vmem:[%s1488_s1 + $0xe0] sm:$0xff]  ;;  %v937_v39 = vmov 0.0|0.0  }
  0x10   :  { %895 = vmatprep.subr.bf16.mxu1 %v894_v43  ;;  %v89_v1 = vld [vmem:[%s1488_s1 + $0x50] sm:$0xff]  ;;  %v90_v2 = vld [vmem:[%s1488_s1 + $0x58] sm:$0xff]  ;;  %v902_v4 = vpack.c.bf16 %v138_v61, %v137_v60  ;;  %v108_v7 = vld [vmem:[%s1488_s1 + $0xe8] sm:$0xff] }
  0x11   :  { %v121_v3 = vld [vmem:[%s1488_s1 + $0x150] sm:$0xff]  ;;  %v122_v5 = vld [vmem:[%s1488_s1 + $0x158] sm:$0xff]  ;;  %v139_v8 = vld [vmem:[%s1488_s1 + $0x1e0] sm:$0xff]  ;;  %v872_v10 = vpack.c.bf16 %v90_v2, %v89_v1  ;;  %v874_v14 = vpack.c.bf16 %v108_v7, %v107_v6 }
  0x12   :  { %865 = vmatpush3.bf16.msra.mxu0 %v864_v50  ;;  %v140_v9 = vld [vmem:[%s1488_s1 + $0x1e8] sm:$0xff]  ;;  %v91_v11 = vld [vmem:[%s1488_s1 + $0x60] sm:$0xff]  ;;  %v904_v13 = vpack.c.bf16 %v122_v5, %v121_v3  ;;  %v17_v17 = vld [vmem:[%s1489_s0 + $0x18] sm:$0xff] }
  0x13   :  { %897 = vmatpush3.bf16.msra.mxu1 %v896_v51  ;;  %867 = vmatprep.subr.bf16.mxu0 %v866_v52  ;;  %v92_v12 = vld [vmem:[%s1488_s1 + $0x68] sm:$0xff]  ;;  %v123_v15 = vld [vmem:[%s1488_s1 + $0x160] sm:$0xff]  ;;  %v906_v18 = vpack.c.bf16 %v140_v9, %v139_v8  ;;  %v109_v20 = vld [vmem:[%s1488_s1 + $0xf0] sm:$0xff] }
  0x14   :  { %899 = vmatprep.subr.bf16.mxu1 %v898_v56  ;;  %v15_v16 = vld [vmem:[%s1489_s0 + $0x8] sm:$0xff]  ;;  %v110_v21 = vld [vmem:[%s1488_s1 + $0xf8] sm:$0xff]  ;;  %v141_v22 = vld [vmem:[%s1488_s1 + $0x1f0] sm:$0xff]  ;;  %392 = vmatprep.mubr.f32.mxu1 %v17_v17  ;;  %v876_v24 = vpack.c.bf16 %v92_v12, %v91_v11 }
  0x15   :  { %v124_v19 = vld [vmem:[%s1488_s1 + $0x168] sm:$0xff]  ;;  %262 = vmatprep.mubr.f32.mxu0 %v15_v16  ;;  %v142_v23 = vld [vmem:[%s1488_s1 + $0x1f8] sm:$0xff]  ;;  %v878_v26 = vpack.c.bf16 %v110_v21, %v109_v20  ;;  %v93_v27 = vld [vmem:[%s1488_s1 + $0x70] sm:$0xff] }
  0x16   :  { %869 = vmatpush3.bf16.msra.mxu0 %v868_v62  ;;  %v908_v25 = vpack.c.bf16 %v124_v19, %v123_v15  ;;  %v94_v28 = vld [vmem:[%s1488_s1 + $0x78] sm:$0xff]  ;;  %v910_v29 = vpack.c.bf16 %v142_v23, %v141_v22  ;;  %v125_v30 = vld [vmem:[%s1488_s1 + $0x170] sm:$0xff]  ;;  %v143_v34 = vld [vmem:[%s1488_s1 + $0x200] sm:$0xff] }
  0x17   :  { %901 = vmatpush3.bf16.msra.mxu1 %v900_v63  ;;  %871 = vmatprep.subr.bf16.mxu0 %v870_v0  ;;  %v126_v31 = vld [vmem:[%s1488_s1 + $0x178] sm:$0xff]  ;;  %v880_v32 = vpack.c.bf16 %v94_v28, %v93_v27  ;;  %v144_v35 = vld [vmem:[%s1488_s1 + $0x208] sm:$0xff]  ;;  %v14_v36 = vld [vmem:[%s1489_s0] sm:$0xff] }
  0x18   :  { %903 = vmatprep.subr.bf16.mxu1 %v902_v4  ;;  %v912_v33 = vpack.c.bf16 %v126_v31, %v125_v30  ;;  %v915_v37 = vpack.c.bf16 %v144_v35, %v143_v34  ;;  %v16_v38 = vld [vmem:[%s1489_s0 + $0x10] sm:$0xff]  ;;  %v22_v41 = vld [vmem:[%s1489_s0 + $0x40] sm:$0xff]  ;;  %v146_v43 = vld [vmem:[%s1488_s1 + $0x218] sm:$0xff] }
  0x19   :  { %v20_v40 = vld [vmem:[%s1489_s0 + $0x30] sm:$0xff]  ;;  %v19_v44 = vld [vmem:[%s1489_s0 + $0x28] sm:$0xff]  ;;  %v21_v45 = vld [vmem:[%s1489_s0 + $0x38] sm:$0xff] }
  0x1a   :  { %873 = vmatpush3.bf16.msra.mxu0 %v872_v10  ;;  %v145_v42 = vld [vmem:[%s1488_s1 + $0x210] sm:$0xff]  ;;  %v25_v46 = vld [vmem:[%s1489_s0 + $0x58] sm:$0xff]  ;;  %v27_v48 = vld [vmem:[%s1489_s0 + $0x68] sm:$0xff] }
  0x1b   :  { %905 = vmatpush3.bf16.msra.mxu1 %v904_v13  ;;  %875 = vmatprep.subr.bf16.mxu0 %v874_v14  ;;  %v918_v47 = vpack.c.bf16 %v146_v43, %v145_v42  ;;  %v147_v49 = vld [vmem:[%s1488_s1 + $0x220] sm:$0xff]  ;;  %v148_v50 = vld [vmem:[%s1488_s1 + $0x228] sm:$0xff]  ;;  %v24_v51 = vld [vmem:[%s1489_s0 + $0x50] sm:$0xff] }
  0x1c   :  { %907 = vmatprep.subr.bf16.mxu1 %v906_v18  ;;  %v26_v52 = vld [vmem:[%s1489_s0 + $0x60] sm:$0xff]  ;;  %v921_v54 = vpack.c.bf16 %v148_v50, %v147_v49  ;;  %v32_v55 = vld [vmem:[%s1489_s0 + $0x90] sm:$0xff]  ;;  %v150_v57 = vld [vmem:[%s1488_s1 + $0x238] sm:$0xff] }
  0x1d   :  { %v30_v53 = vld [vmem:[%s1489_s0 + $0x80] sm:$0xff]  ;;  %v149_v56 = vld [vmem:[%s1488_s1 + $0x230] sm:$0xff]  ;;  %v29_v58 = vld [vmem:[%s1489_s0 + $0x78] sm:$0xff] }
  0x1e   :  { %877 = vmatpush3.bf16.msra.mxu0 %v876_v24  ;;  %v31_v59 = vld [vmem:[%s1489_s0 + $0x88] sm:$0xff]  ;;  %v924_v61 = vpack.c.bf16 %v150_v57, %v149_v56  ;;  %v37_v62 = vld [vmem:[%s1489_s0 + $0xb8] sm:$0xff]  ;;  %v34_v63 = vld [vmem:[%s1489_s0 + $0xa0] sm:$0xff] }
  0x1f   :  { %909 = vmatpush3.bf16.msra.mxu1 %v908_v25  ;;  %879 = vmatprep.subr.bf16.mxu0 %v878_v26  ;;  %v35_v60 = vld [vmem:[%s1489_s0 + $0xa8] sm:$0xff]  ;;  %v36_v0 = vld [vmem:[%s1489_s0 + $0xb0] sm:$0xff]  ;;  %v42_v2 = vld [vmem:[%s1489_s0 + $0xe0] sm:$0xff] }
  0x20   :  { %911 = vmatprep.subr.bf16.mxu1 %v910_v29  ;;  %v40_v1 = vld [vmem:[%s1489_s0 + $0xd0] sm:$0xff]  ;;  %v39_v3 = vld [vmem:[%s1489_s0 + $0xc8] sm:$0xff]  ;;  %v41_v4 = vld [vmem:[%s1489_s0 + $0xd8] sm:$0xff] }
  0x21   :  { %v45_v5 = vld [vmem:[%s1489_s0 + $0xf8] sm:$0xff]  ;;  %v47_v6 = vld [vmem:[%s1489_s0 + $0x108] sm:$0xff]  ;;  %v44_v7 = vld [vmem:[%s1489_s0 + $0xf0] sm:$0xff] }
  0x22   :  { %881 = vmatpush3.bf16.msra.mxu0 %v880_v32  ;;  %v46_v8 = vld [vmem:[%s1489_s0 + $0x100] sm:$0xff]  ;;  %v52_v10 = vld [vmem:[%s1489_s0 + $0x130] sm:$0xff]  ;;  %v49_v11 = vld [vmem:[%s1489_s0 + $0x118] sm:$0xff] }
  0x23   :  { %913 = vmatpush3.bf16.msra.mxu1 %v912_v33  ;;  %914 = vmatprep.subr.bf16.mxu0 %v937_v39  ;;  %v50_v9 = vld [vmem:[%s1489_s0 + $0x120] sm:$0xff]  ;;  %v51_v12 = vld [vmem:[%s1489_s0 + $0x128] sm:$0xff]  ;;  %v57_v14 = vld [vmem:[%s1489_s0 + $0x158] sm:$0xff]  ;;  %v939_v33 = vmov 0.0  }
  0x24   :  { %926 = vmatprep.subr.bf16.mxu1 %v937_v39  ;;  %v55_v13 = vld [vmem:[%s1489_s0 + $0x148] sm:$0xff]  ;;  %v54_v15 = vld [vmem:[%s1489_s0 + $0x140] sm:$0xff]  ;;  %v56_v16 = vld [vmem:[%s1489_s0 + $0x150] sm:$0xff] }
  0x25   :  { %263 = vmatmul.mubr.f32.vlgmr.msra.gmra.mrb[0].mxu0 %v14_v36  ;;  %v60_v17 = vld [vmem:[%s1489_s0 + $0x170] sm:$0xff]  ;;  %v62_v18 = vld [vmem:[%s1489_s0 + $0x180] sm:$0xff]  ;;  %v59_v19 = vld [vmem:[%s1489_s0 + $0x168] sm:$0xff] }
  0x26   :  { %393 = vmatmul.mubr.f32.vlgmr.msra.gmra.mrb[0].mxu1 %v16_v38  ;;  %916 = vmatpush3.bf16.msra.mxu0 %v915_v37  ;;  %v61_v20 = vld [vmem:[%s1489_s0 + $0x178] sm:$0xff]  ;;  %v67_v22 = vld [vmem:[%s1489_s0 + $0x1a8] sm:$0xff]  ;;  %v64_v23 = vld [vmem:[%s1489_s0 + $0x190] sm:$0xff] }
  0x27   :  { %267 = vmatprep.mubr.f32.mxu0 %v20_v40  ;;  %397 = vmatprep.mubr.f32.mxu1 %v22_v41  ;;  %v65_v21 = vld [vmem:[%s1489_s0 + $0x198] sm:$0xff]  ;;  %v66_v24 = vld [vmem:[%s1489_s0 + $0x1a0] sm:$0xff]  ;;  %v72_v26 = vld [vmem:[%s1489_s0 + $0x1d0] sm:$0xff] }
  0x28   :  { %930 = vmatpush3.bf16.msra.mxu1 %v915_v37  ;;  %917 = vmatprep.subr.bf16.mxu0 %v937_v39  ;;  %v70_v25 = vld [vmem:[%s1489_s0 + $0x1c0] sm:$0xff]  ;;  %v69_v27 = vld [vmem:[%s1489_s0 + $0x1b8] sm:$0xff]  ;;  %v71_v28 = vld [vmem:[%s1489_s0 + $0x1c8] sm:$0xff] }
  0x29   :  { %268 = vmatmul.mubr.f32.gmra.mrb[2].mxu0 %v19_v44  ;;  %927 = vmatprep.subr.bf16.mxu1 %v937_v39  ;;  %v75_v29 = vld [vmem:[%s1489_s0 + $0x1e8] sm:$0xff]  ;;  %v77_v30 = vld [vmem:[%s1489_s0 + $0x1f8] sm:$0xff]  ;;  %v74_v31 = vld [vmem:[%s1489_s0 + $0x1e0] sm:$0xff] }
  0x2a   :  { %398 = vmatmul.mubr.f32.gmra.mrb[2].mxu1 %v21_v45  ;;  %272 = vmatprep.mubr.f32.mxu0 %v25_v46  ;;  %v76_v32 = vld [vmem:[%s1489_s0 + $0x1f0] sm:$0xff]  ;;  %v18_v34 = vld [vmem:[%s1489_s0 + $0x20] sm:$0xff]  ;;  %v53_v35 = vld [vmem:[%s1489_s0 + $0x138] sm:$0xff] }
  0x2b   :  { %402 = vmatprep.mubr.f32.mxu1 %v27_v48  ;;  %919 = vmatpush3.bf16.msra.mxu0 %v918_v47  ;;  %v23_v36 = vld [vmem:[%s1489_s0 + $0x48] sm:$0xff]  ;;  %v58_v37 = vld [vmem:[%s1489_s0 + $0x160] sm:$0xff]  ;;  %v28_v38 = vld [vmem:[%s1489_s0 + $0x70] sm:$0xff] }
  0x2c   :  { %931 = vmatpush3.bf16.msra.mxu1 %v918_v47  ;;  %920 = vmatprep.subr.bf16.mxu0 %v937_v39  ;;  %v33_v40 = vld [vmem:[%s1489_s0 + $0x98] sm:$0xff]  ;;  %v68_v41 = vld [vmem:[%s1489_s0 + $0x1b0] sm:$0xff]  ;;  %v38_v42 = vld [vmem:[%s1489_s0 + $0xc0] sm:$0xff] }
  0x2d   :  { %273 = vmatmul.mubr.f32.gmra.mrb[4].mxu0 %v24_v51  ;;  %928 = vmatprep.subr.bf16.mxu1 %v937_v39  ;;  %v73_v43 = vld [vmem:[%s1489_s0 + $0x1d8] sm:$0xff]  ;;  %v43_v44 = vld [vmem:[%s1489_s0 + $0xe8] sm:$0xff]  ;;  %v78_v45 = vld [vmem:[%s1489_s0 + $0x200] sm:$0xff] }
  0x2e   :  { %403 = vmatmul.mubr.f32.gmra.mrb[4].mxu1 %v26_v52  ;;  %277 = vmatprep.mubr.f32.mxu0 %v30_v53  ;;  %v48_v46 = vld [vmem:[%s1489_s0 + $0x110] sm:$0xff]  ;;  %v1400_v48 = vld [vmem:[%s1490_s2] ss:$0 sm:$0xff] }
  0x2f   :  { %407 = vmatprep.mubr.f32.mxu1 %v32_v55  ;;  %922 = vmatpush3.bf16.msra.mxu0 %v921_v54 }
  0x30   :  { %932 = vmatpush3.bf16.msra.mxu1 %v921_v54  ;;  %923 = vmatprep.subr.bf16.mxu0 %v937_v39 }
  0x31   :  { %278 = vmatmul.mubr.f32.gmra.mrb[6].mxu0 %v29_v58  ;;  %929 = vmatprep.subr.bf16.mxu1 %v937_v39  ;;  %v63_v39 = vld [vmem:[%s1489_s0 + $0x188] sm:$0xff] }
  0x32   :  { %408 = vmatmul.mubr.f32.gmra.mrb[6].mxu1 %v31_v59  ;;  %282 = vmatprep.mubr.f32.mxu0 %v35_v60 }
  0x33   :  { %412 = vmatprep.mubr.f32.mxu1 %v37_v62  ;;  %925 = vmatpush3.bf16.msra.mxu0 %v924_v61 }
  0x34   :  { %933 = vmatpush3.bf16.msra.mxu1 %v924_v61 }
  0x35   :  { %283 = vmatmul.mubr.f32.gmra.mrb[8].mxu0 %v34_v63 }
  0x36   :  { %413 = vmatmul.mubr.f32.gmra.mrb[8].mxu1 %v36_v0  ;;  %287 = vmatprep.mubr.f32.mxu0 %v40_v1 }
  0x37   :  { %417 = vmatprep.mubr.f32.mxu1 %v42_v2 }
  0x39   :  { %288 = vmatmul.mubr.f32.gmra.mrb[10].mxu0 %v39_v3 }
  0x3a   :  { %418 = vmatmul.mubr.f32.gmra.mrb[10].mxu1 %v41_v4  ;;  %292 = vmatprep.mubr.f32.mxu0 %v45_v5 }
  0x3b   :  { %422 = vmatprep.mubr.f32.mxu1 %v47_v6 }
  0x3d   :  { %293 = vmatmul.mubr.f32.gmra.mrb[12].mxu0 %v44_v7 }
  0x3e   :  { %423 = vmatmul.mubr.f32.gmra.mrb[12].mxu1 %v46_v8  ;;  %297 = vmatprep.mubr.f32.mxu0 %v50_v9 }
  0x3f   :  { %427 = vmatprep.mubr.f32.mxu1 %v52_v10 }
  0x41   :  { %298 = vmatmul.mubr.f32.gmra.mrb[14].mxu0 %v49_v11 }
  0x42   :  { %428 = vmatmul.mubr.f32.gmra.mrb[14].mxu1 %v51_v12  ;;  %302 = vmatprep.mubr.f32.mxu0 %v55_v13 }
  0x43   :  { %432 = vmatprep.mubr.f32.mxu1 %v57_v14 }
  0x45   :  { %303 = vmatmul.mubr.f32.gmra.mrb[16].mxu0 %v54_v15 }
  0x46   :  { %433 = vmatmul.mubr.f32.gmra.mrb[16].mxu1 %v56_v16  ;;  %307 = vmatprep.mubr.f32.mxu0 %v60_v17 }
  0x47   :  { %437 = vmatprep.mubr.f32.mxu1 %v62_v18 }
  0x49   :  { %308 = vmatmul.mubr.f32.gmra.mrb[18].mxu0 %v59_v19 }
  0x4a   :  { %438 = vmatmul.mubr.f32.gmra.mrb[18].mxu1 %v61_v20  ;;  %312 = vmatprep.mubr.f32.mxu0 %v65_v21 }
  0x4b   :  { %442 = vmatprep.mubr.f32.mxu1 %v67_v22 }
  0x4d   :  { %313 = vmatmul.mubr.f32.gmra.mrb[20].mxu0 %v64_v23 }
  0x4e   :  { %443 = vmatmul.mubr.f32.gmra.mrb[20].mxu1 %v66_v24  ;;  %317 = vmatprep.mubr.f32.mxu0 %v70_v25 }
  0x4f   :  { %447 = vmatprep.mubr.f32.mxu1 %v72_v26 }
  0x51   :  { %318 = vmatmul.mubr.f32.gmra.mrb[22].mxu0 %v69_v27 }
  0x52   :  { %448 = vmatmul.mubr.f32.gmra.mrb[22].mxu1 %v71_v28  ;;  %322 = vmatprep.mubr.f32.mxu0 %v75_v29 }
  0x53   :  { %452 = vmatprep.mubr.f32.mxu1 %v77_v30 }
  0x55   :  { %323 = vmatmul.mubr.f32.gmra.mrb[24].mxu0 %v74_v31 }
  0x56   :  { %453 = vmatmul.mubr.f32.gmra.mrb[24].mxu1 %v76_v32  ;;  %811 = vmatprep.mubr.msk.f32.mxu0 %vm938_vm0, %v939_v33 }
  0x57   :  { %832 = vmatprep.mubr.msk.f32.mxu1 %vm938_vm0, %v939_v33 }
  0x59   :  { %812 = vmatmul.mubr.msk.f32.vlgmr.msra.gmra.mrb[26].mxu0 %vm158_vm1, %v18_v34 }
  0x5a   :  { %833 = vmatmul.mubr.msk.f32.vlgmr.msra.gmra.mrb[26].mxu1 %vm158_vm1, %v53_v35  ;;  %814 = vmatprep.mubr.msk.f32.mxu0 %vm938_vm0, %v939_v33 }
  0x5b   :  { %835 = vmatprep.mubr.msk.f32.mxu1 %vm938_vm0, %v939_v33 }
  0x5d   :  { %815 = vmatmul.mubr.msk.f32.gmra.mrb[28].mxu0 %vm158_vm1, %v23_v36 }
  0x5e   :  { %836 = vmatmul.mubr.msk.f32.gmra.mrb[28].mxu1 %vm158_vm1, %v58_v37  ;;  %817 = vmatprep.mubr.msk.f32.mxu0 %vm938_vm0, %v939_v33 }
  0x5f   :  { %838 = vmatprep.mubr.msk.f32.mxu1 %vm938_vm0, %v939_v33 }
  0x61   :  { %818 = vmatmul.mubr.msk.f32.gmra.mrb[30].mxu0 %vm158_vm1, %v28_v38 }
  0x62   :  { %839 = vmatmul.mubr.msk.f32.gmra.mrb[30].mxu1 %vm158_vm1, %v63_v39  ;;  %820 = vmatprep.mubr.msk.f32.mxu0 %vm938_vm0, %v939_v33 }
  0x63   :  { %841 = vmatprep.mubr.msk.f32.mxu1 %vm938_vm0, %v939_v33 }
  0x65   :  { %821 = vmatmul.mubr.msk.f32.gmra.mrb[32].mxu0 %vm158_vm1, %v33_v40 }
  0x66   :  { %842 = vmatmul.mubr.msk.f32.gmra.mrb[32].mxu1 %vm158_vm1, %v68_v41  ;;  %823 = vmatprep.mubr.msk.f32.mxu0 %vm938_vm0, %v939_v33 }
  0x67   :  { %844 = vmatprep.mubr.msk.f32.mxu1 %vm938_vm0, %v939_v33 }
  0x69   :  { %824 = vmatmul.mubr.msk.f32.gmra.mrb[34].mxu0 %vm158_vm1, %v38_v42 }
  0x6a   :  { %845 = vmatmul.mubr.msk.f32.gmra.mrb[34].mxu1 %vm158_vm1, %v73_v43  ;;  %826 = vmatprep.mubr.msk.f32.mxu0 %vm938_vm0, %v939_v33 }
  0x6b   :  { %847 = vmatprep.mubr.msk.f32.mxu1 %vm938_vm0, %v939_v33 }
  0x6d   :  { %827 = vmatmul.mubr.msk.f32.gmra.mrb[36].mxu0 %vm158_vm1, %v43_v44 }
  0x6e   :  { %848 = vmatmul.mubr.msk.f32.gmra.mrb[36].mxu1 %vm158_vm1, %v78_v45  ;;  %829 = vmatprep.mubr.msk.f32.mxu0 %vm938_vm0, %v939_v33 }
  0x71   :  { %830 = vmatmul.mubr.msk.f32.gmra.mrb[38].mxu0 %vm158_vm1, %v48_v46 }
  0xf8   :  { %v664_v47 = vpop.f32.mrb[0].mxu0 }
  0xf9   :  { %v665_v49 = vpop.f32.mrb[1].mxu0  ;;  %v735_v50 = vpop.f32.mrb[0].mxu1 }
  0xfa   :  { %v666_v51 = vadd.f32 %v665_v49, %v664_v47  ;;  %v736_v52 = vpop.f32.mrb[1].mxu1 }
  0xfb   :  { %v737_v53 = vadd.f32 %v736_v52, %v735_v50 }
  0xfc   :  { %v265_v54 = vadd.f32 %v666_v51, %v1400_v48  ;;  %v667_v55 = vpop.f32.mrb[2].mxu0 }
  0xfd   :  { %v668_v56 = vpop.f32.mrb[3].mxu0  ;;  %v738_v57 = vpop.f32.mrb[2].mxu1 }
  0xfe   :  { %v669_v58 = vadd.f32 %v668_v56, %v667_v55  ;;  %v739_v59 = vpop.f32.mrb[3].mxu1  ;;  %v1403_v60 = vadd.f32 %v737_v53, %v265_v54 }
  0xff   :  { %v740_v61 = vadd.f32 %v739_v59, %v738_v57 }
 0x100   :  { %v270_v62 = vadd.f32 %v669_v58, %v1400_v48  ;;  %v670_v63 = vpop.f32.mrb[4].mxu0 }
 0x101   :  { %v671_v0 = vpop.f32.mrb[5].mxu0  ;;  %v741_v1 = vpop.f32.mrb[4].mxu1 }
 0x102   :  { %v672_v2 = vadd.f32 %v671_v0, %v670_v63  ;;  %v742_v3 = vpop.f32.mrb[5].mxu1  ;;  %v1406_v4 = vadd.f32 %v740_v61, %v270_v62 }
 0x103   :  { %v743_v5 = vadd.f32 %v742_v3, %v741_v1 }
 0x104   :  { %v275_v6 = vadd.f32 %v672_v2, %v1400_v48  ;;  %v673_v7 = vpop.f32.mrb[6].mxu0 }
 0x105   :  { %v674_v8 = vpop.f32.mrb[7].mxu0  ;;  %v744_v9 = vpop.f32.mrb[6].mxu1 }
 0x106   :  { %v675_v10 = vadd.f32 %v674_v8, %v673_v7  ;;  %v745_v11 = vpop.f32.mrb[7].mxu1  ;;  %v1409_v12 = vadd.f32 %v743_v5, %v275_v6 }
 0x107   :  { %v746_v13 = vadd.f32 %v745_v11, %v744_v9 }
 0x108   :  { %v280_v14 = vadd.f32 %v675_v10, %v1400_v48  ;;  %v676_v15 = vpop.f32.mrb[8].mxu0 }
 0x109   :  { %v677_v16 = vpop.f32.mrb[9].mxu0  ;;  %v747_v17 = vpop.f32.mrb[8].mxu1 }
 0x10a   :  { %v678_v18 = vadd.f32 %v677_v16, %v676_v15  ;;  %v748_v19 = vpop.f32.mrb[9].mxu1  ;;  %v1412_v20 = vadd.f32 %v746_v13, %v280_v14 }
 0x10b   :  { %v749_v21 = vadd.f32 %v748_v19, %v747_v17 }
 0x10c   :  { %v285_v22 = vadd.f32 %v678_v18, %v1400_v48  ;;  %v679_v23 = vpop.f32.mrb[10].mxu0 }
 0x10d   :  { %v680_v24 = vpop.f32.mrb[11].mxu0  ;;  %v750_v25 = vpop.f32.mrb[10].mxu1 }
 0x10e   :  { %v681_v26 = vadd.f32 %v680_v24, %v679_v23  ;;  %v751_v27 = vpop.f32.mrb[11].mxu1  ;;  %v1415_v28 = vadd.f32 %v749_v21, %v285_v22 }
 0x10f   :  { %v752_v29 = vadd.f32 %v751_v27, %v750_v25 }
 0x110   :  { %v290_v30 = vadd.f32 %v681_v26, %v1400_v48  ;;  %v682_v31 = vpop.f32.mrb[12].mxu0 }
 0x111   :  { %v683_v32 = vpop.f32.mrb[13].mxu0  ;;  %v753_v33 = vpop.f32.mrb[12].mxu1 }
 0x112   :  { %v684_v34 = vadd.f32 %v683_v32, %v682_v31  ;;  %v754_v35 = vpop.f32.mrb[13].mxu1  ;;  %v1418_v36 = vadd.f32 %v752_v29, %v290_v30 }
 0x113   :  { %v755_v37 = vadd.f32 %v754_v35, %v753_v33 }
 0x114   :  { %v295_v38 = vadd.f32 %v684_v34, %v1400_v48  ;;  %v685_v39 = vpop.f32.mrb[14].mxu0 }
 0x115   :  { %v686_v40 = vpop.f32.mrb[15].mxu0  ;;  %v756_v41 = vpop.f32.mrb[14].mxu1 }
 0x116   :  { %v687_v42 = vadd.f32 %v686_v40, %v685_v39  ;;  %v757_v43 = vpop.f32.mrb[15].mxu1  ;;  %v1421_v44 = vadd.f32 %v755_v37, %v295_v38 }
 0x117   :  { %v758_v45 = vadd.f32 %v757_v43, %v756_v41 }
 0x118   :  { %v300_v46 = vadd.f32 %v687_v42, %v1400_v48  ;;  %v688_v47 = vpop.f32.mrb[16].mxu0 }
 0x119   :  { %v689_v49 = vpop.f32.mrb[17].mxu0  ;;  %v759_v50 = vpop.f32.mrb[16].mxu1 }
 0x11a   :  { %v690_v51 = vadd.f32 %v689_v49, %v688_v47  ;;  %v760_v52 = vpop.f32.mrb[17].mxu1  ;;  %v430_v53 = vadd.f32 %v758_v45, %v300_v46 }
 0x11b   :  { %v761_v54 = vadd.f32 %v760_v52, %v759_v50 }
 0x11c   :  { %v305_v55 = vadd.f32 %v690_v51, %v1400_v48  ;;  %v691_v56 = vpop.f32.mrb[18].mxu0 }
 0x11d   :  { %v692_v57 = vpop.f32.mrb[19].mxu0  ;;  %v762_v58 = vpop.f32.mrb[18].mxu1 }
 0x11e   :  { %v693_v59 = vadd.f32 %v692_v57, %v691_v56  ;;  %v763_v61 = vpop.f32.mrb[19].mxu1  ;;  %v435_v62 = vadd.f32 %v761_v54, %v305_v55 }
 0x11f   :  { %v764_v63 = vadd.f32 %v763_v61, %v762_v58 }
 0x120   :  { %v310_v0 = vadd.f32 %v693_v59, %v1400_v48  ;;  %v694_v1 = vpop.f32.mrb[20].mxu0 }
 0x121   :  { %v695_v2 = vpop.f32.mrb[21].mxu0  ;;  %v765_v3 = vpop.f32.mrb[20].mxu1 }
 0x122   :  { %v696_v5 = vadd.f32 %v695_v2, %v694_v1  ;;  %v766_v6 = vpop.f32.mrb[21].mxu1  ;;  %v440_v7 = vadd.f32 %v764_v63, %v310_v0 }
 0x123   :  { %v767_v8 = vadd.f32 %v766_v6, %v765_v3 }
 0x124   :  { %v315_v9 = vadd.f32 %v696_v5, %v1400_v48  ;;  %v697_v10 = vpop.f32.mrb[22].mxu0 }
 0x125   :  { %v698_v11 = vpop.f32.mrb[23].mxu0  ;;  %v768_v13 = vpop.f32.mrb[22].mxu1 }
 0x126   :  { %v699_v14 = vadd.f32 %v698_v11, %v697_v10  ;;  %v769_v15 = vpop.f32.mrb[23].mxu1  ;;  %v445_v16 = vadd.f32 %v767_v8, %v315_v9 }
 0x127   :  { %v770_v17 = vadd.f32 %v769_v15, %v768_v13 }
 0x128   :  { %v320_v18 = vadd.f32 %v699_v14, %v1400_v48  ;;  %v700_v19 = vpop.f32.mrb[24].mxu0 }
 0x129   :  { %v701_v21 = vpop.f32.mrb[25].mxu0  ;;  %v771_v22 = vpop.f32.mrb[24].mxu1 }
 0x12a   :  { %v702_v23 = vadd.f32 %v701_v21, %v700_v19  ;;  %v772_v24 = vpop.f32.mrb[25].mxu1  ;;  %v450_v25 = vadd.f32 %v770_v17, %v320_v18 }
 0x12b   :  { %v773_v26 = vadd.f32 %v772_v24, %v771_v22 }
 0x12c   :  { %v325_v27 = vadd.f32 %v702_v23, %v1400_v48  ;;  %v524_v29 = vpop.f32.mrb[26].mxu0 }
 0x12d   :  { %v525_v30 = vadd.f32 %v524_v29, %v1403_v60  ;;  %v559_v31 = vpop.f32.mrb[26].mxu1  ;;  %v813_v32 = vpop.f32.mrb[27].mxu0 }
 0x12e   :  { %v560_v33 = vadd.f32 %v559_v31, %v430_v53  ;;  %v834_v34 = vpop.f32.mrb[27].mxu1  ;;  %v455_v35 = vadd.f32 %v773_v26, %v325_v27 }
 0x12f   :  { %v588_v37 = vmax.f32 %v525_v30, 0.0 }
 0x130   :  { %v595_v38 = vmax.f32 %v560_v33, 0.0  ;;  %v529_v39 = vpop.f32.mrb[28].mxu0 }
 0x131   :  { %601 = vst.msk [vmem:[%s1491_s3] sm:$0xff] %vm158_vm1, %v588_v37  ;;  %v530_v40 = vadd.f32 %v529_v39, %v1406_v4  ;;  %v564_v41 = vpop.f32.mrb[28].mxu1  ;;  %v816_v48 = vpop.f32.mrb[29].mxu0 }
 0x132   :  { %608 = vst.msk [vmem:[%s1491_s3 + $0x38] sm:$0xff] %vm158_vm1, %v595_v38  ;;  %v565_v60 = vadd.f32 %v564_v41, %v435_v62  ;;  %v837_v42 = vpop.f32.mrb[29].mxu1 }
 0x133   :  { %v589_v43 = vmax.f32 %v530_v40, 0.0 }
 0x134   :  { %v596_v45 = vmax.f32 %v565_v60, 0.0  ;;  %v534_v46 = vpop.f32.mrb[30].mxu0 }
 0x135   :  { %602 = vst.msk [vmem:[%s1491_s3 + $0x8] sm:$0xff] %vm158_vm1, %v589_v43  ;;  %v535_v47 = vadd.f32 %v534_v46, %v1409_v12  ;;  %v569_v4 = vpop.f32.mrb[30].mxu1  ;;  %v819_v49 = vpop.f32.mrb[31].mxu0 }
 0x136   :  { %609 = vst.msk [vmem:[%s1491_s3 + $0x40] sm:$0xff] %vm158_vm1, %v596_v45  ;;  %v570_v50 = vadd.f32 %v569_v4, %v440_v7  ;;  %v840_v51 = vpop.f32.mrb[31].mxu1 }
 0x137   :  { %v590_v52 = vmax.f32 %v535_v47, 0.0 }
 0x138   :  { %v597_v53 = vmax.f32 %v570_v50, 0.0  ;;  %v539_v54 = vpop.f32.mrb[32].mxu0 }
 0x139   :  { %603 = vst.msk [vmem:[%s1491_s3 + $0x10] sm:$0xff] %vm158_vm1, %v590_v52  ;;  %v540_v55 = vadd.f32 %v539_v54, %v1412_v20  ;;  %v574_v12 = vpop.f32.mrb[32].mxu1  ;;  %v822_v56 = vpop.f32.mrb[33].mxu0 }
 0x13a   :  { %610 = vst.msk [vmem:[%s1491_s3 + $0x48] sm:$0xff] %vm158_vm1, %v597_v53  ;;  %v575_v57 = vadd.f32 %v574_v12, %v445_v16  ;;  %v843_v58 = vpop.f32.mrb[33].mxu1 }
 0x13b   :  { %v591_v59 = vmax.f32 %v540_v55, 0.0 }
 0x13c   :  { %v598_v61 = vmax.f32 %v575_v57, 0.0  ;;  %v544_v62 = vpop.f32.mrb[34].mxu0 }
 0x13d   :  { %604 = vst.msk [vmem:[%s1491_s3 + $0x18] sm:$0xff] %vm158_vm1, %v591_v59  ;;  %v545_v63 = vadd.f32 %v544_v62, %v1415_v28  ;;  %v579_v20 = vpop.f32.mrb[34].mxu1  ;;  %v825_v0 = vpop.f32.mrb[35].mxu0 }
 0x13e   :  { %611 = vst.msk [vmem:[%s1491_s3 + $0x50] sm:$0xff] %vm158_vm1, %v598_v61  ;;  %v580_v1 = vadd.f32 %v579_v20, %v450_v25  ;;  %v846_v2 = vpop.f32.mrb[35].mxu1 }
 0x13f   :  { %v592_v3 = vmax.f32 %v545_v63, 0.0 }
 0x140   :  { %v599_v5 = vmax.f32 %v580_v1, 0.0  ;;  %v549_v6 = vpop.f32.mrb[36].mxu0 }
 0x141   :  { %605 = vst.msk [vmem:[%s1491_s3 + $0x20] sm:$0xff] %vm158_vm1, %v592_v3  ;;  %v550_v7 = vadd.f32 %v549_v6, %v1418_v36  ;;  %v584_v28 = vpop.f32.mrb[36].mxu1  ;;  %v828_v8 = vpop.f32.mrb[37].mxu0 }
 0x142   :  { %612 = vst.msk [vmem:[%s1491_s3 + $0x58] sm:$0xff] %vm158_vm1, %v599_v5  ;;  %v585_v9 = vadd.f32 %v584_v28, %v455_v35  ;;  %v849_v10 = vpop.f32.mrb[37].mxu1 }
 0x143   :  { %v593_v11 = vmax.f32 %v550_v7, 0.0 }
 0x144   :  { %v600_v13 = vmax.f32 %v585_v9, 0.0  ;;  %v554_v14 = vpop.f32.mrb[38].mxu0 }
 0x145   :  { %606 = vst.msk [vmem:[%s1491_s3 + $0x28] sm:$0xff] %vm158_vm1, %v593_v11  ;;  %v555_v15 = vadd.f32 %v554_v14, %v1421_v44  ;;  %v831_v36 = vpop.f32.mrb[39].mxu0 }
 0x146   :  { %613 = vst.msk [vmem:[%s1491_s3 + $0x60] sm:$0xff] %vm158_vm1, %v600_v13 }
 0x147   :  { %v594_v16 = vmax.f32 %v555_v15, 0.0 }
 0x149   :  { %607 = vst.msk [vmem:[%s1491_s3 + $0x30] sm:$0xff] %vm158_vm1, %v594_v16 }

// kernel: dqn_forward.7
= control target key start
LH: loop header
LB: loop body
LE: loop exit
PB: predicated region body
PF: predicated region fallthrough
CT: control target
= control target key end

     0   :  { %vm1635_vm0 = vcmask 523264   ;;  %vm3700_vm1 = vcmask 48128   ;;  %s10477_s1 = inlined_call_operand.vmem [shape: f32[3136,512], index: 1, kind: input, shape index: {}]   ;;  %s10478_s0 = inlined_call_operand.vmem [shape: f32[8,3136], index: 0, kind: input, shape index: {}]   ;;  %s10479_s3 = inlined_call_operand.vmem [shape: f32[512,6], index: 3, kind: input, shape index: {}]   ;;  %s10480_s2 = inlined_call_operand.vmem [shape: f32[1,512], index: 2, kind: input, shape index: {}]   ;;  %s10481_s4 = inlined_call_operand.vmem [shape: f32[1,6], index: 4, kind: input, shape index: {}]   ;;  %s10482_s5 = inlined_call_operand.vmem [shape: f32[8,6], index: 5, kind: output, shape index: {}]  }
   0x1   :  { %v46_v0 = vld [vmem:[%s10477_s1 + $0x8] sm:$0xff]  ;;  %v48_v2 = vld [vmem:[%s10477_s1 + $0x18] sm:$0xff]  ;;  %v45_v5 = vld [vmem:[%s10477_s1] sm:$0xff] }
   0x2   :  { %v50_v1 = vld [vmem:[%s10477_s1 + $0x28] sm:$0xff]  ;;  %v52_v4 = vld [vmem:[%s10477_s1 + $0x38] sm:$0xff]  ;;  %v49_v6 = vld [vmem:[%s10477_s1 + $0x20] sm:$0xff] }
   0x3   :  { %v3779_v3 = vpack.c.bf16 %v50_v1, %v46_v0  ;;  %v4563_v7 = vpack.c.bf16 %v52_v4, %v48_v2  ;;  %v3781_v8 = vpack.c.bf16 %v49_v6, %v45_v5  ;;  %v47_v9 = vld [vmem:[%s10477_s1 + $0x10] sm:$0xff]  ;;  %v54_v11 = vld [vmem:[%s10477_s1 + $0x48] sm:$0xff]  ;;  %v56_v14 = vld [vmem:[%s10477_s1 + $0x58] sm:$0xff] }
   0x4   :  { %v51_v10 = vld [vmem:[%s10477_s1 + $0x30] sm:$0xff]  ;;  %v58_v13 = vld [vmem:[%s10477_s1 + $0x68] sm:$0xff]  ;;  %v60_v15 = vld [vmem:[%s10477_s1 + $0x78] sm:$0xff] }
   0x5   :  { %3780 = vmatprep.subr.bf16.mxu0 %v3779_v3  ;;  %v4565_v12 = vpack.c.bf16 %v51_v10, %v47_v9  ;;  %4564 = vmatprep.subr.bf16.mxu1 %v4563_v7  ;;  %v3783_v16 = vpack.c.bf16 %v58_v13, %v54_v11  ;;  %v4567_v17 = vpack.c.bf16 %v60_v15, %v56_v14  ;;  %v53_v18 = vld [vmem:[%s10477_s1 + $0x40] sm:$0xff]  ;;  %v55_v20 = vld [vmem:[%s10477_s1 + $0x50] sm:$0xff]  ;;  %v62_v23 = vld [vmem:[%s10477_s1 + $0x88] sm:$0xff] }
   0x6   :  { %3782 = vmatpush1.bf16.msra.mxu0 %v3781_v8  ;;  %v57_v19 = vld [vmem:[%s10477_s1 + $0x60] sm:$0xff]  ;;  %v59_v22 = vld [vmem:[%s10477_s1 + $0x70] sm:$0xff]  ;;  %v66_v24 = vld [vmem:[%s10477_s1 + $0xa8] sm:$0xff] }
   0x7   :  { %4566 = vmatpush1.bf16.msra.mxu1 %v4565_v12  ;;  %v3785_v21 = vpack.c.bf16 %v57_v19, %v53_v18  ;;  %3784 = vmatprep.subr.bf16.mxu0 %v3783_v16  ;;  %v4569_v25 = vpack.c.bf16 %v59_v22, %v55_v20  ;;  %v3787_v26 = vpack.c.bf16 %v66_v24, %v62_v23  ;;  %v64_v27 = vld [vmem:[%s10477_s1 + $0x98] sm:$0xff]  ;;  %v61_v29 = vld [vmem:[%s10477_s1 + $0x80] sm:$0xff]  ;;  %v63_v32 = vld [vmem:[%s10477_s1 + $0x90] sm:$0xff] }
   0x8   :  { %4568 = vmatprep.subr.bf16.mxu1 %v4567_v17  ;;  %v68_v28 = vld [vmem:[%s10477_s1 + $0xb8] sm:$0xff]  ;;  %v65_v31 = vld [vmem:[%s10477_s1 + $0xa0] sm:$0xff]  ;;  %v67_v33 = vld [vmem:[%s10477_s1 + $0xb0] sm:$0xff] }
   0x9   :  { %v4571_v30 = vpack.c.bf16 %v68_v28, %v64_v27  ;;  %v3789_v34 = vpack.c.bf16 %v65_v31, %v61_v29  ;;  %v70_v35 = vld [vmem:[%s10477_s1 + $0xc8] sm:$0xff]  ;;  %v72_v37 = vld [vmem:[%s10477_s1 + $0xd8] sm:$0xff]  ;;  %v4573_v38 = vpack.c.bf16 %v67_v33, %v63_v32  ;;  %v69_v41 = vld [vmem:[%s10477_s1 + $0xc0] sm:$0xff] }
   0xa   :  { %3786 = vmatpush1.bf16.msra.mxu0 %v3785_v21  ;;  %v74_v36 = vld [vmem:[%s10477_s1 + $0xe8] sm:$0xff]  ;;  %v76_v40 = vld [vmem:[%s10477_s1 + $0xf8] sm:$0xff]  ;;  %v73_v42 = vld [vmem:[%s10477_s1 + $0xe0] sm:$0xff] }
   0xb   :  { %4570 = vmatpush1.bf16.msra.mxu1 %v4569_v25  ;;  %3788 = vmatprep.subr.bf16.mxu0 %v3787_v26  ;;  %v3791_v39 = vpack.c.bf16 %v74_v36, %v70_v35  ;;  %v4575_v43 = vpack.c.bf16 %v76_v40, %v72_v37  ;;  %v71_v44 = vld [vmem:[%s10477_s1 + $0xd0] sm:$0xff]  ;;  %v78_v46 = vld [vmem:[%s10477_s1 + $0x108] sm:$0xff]  ;;  %v80_v48 = vld [vmem:[%s10477_s1 + $0x118] sm:$0xff]  ;;  %v3793_v50 = vpack.c.bf16 %v73_v42, %v69_v41 }
   0xc   :  { %4572 = vmatprep.subr.bf16.mxu1 %v4571_v30  ;;  %v75_v45 = vld [vmem:[%s10477_s1 + $0xf0] sm:$0xff]  ;;  %v82_v47 = vld [vmem:[%s10477_s1 + $0x128] sm:$0xff]  ;;  %v84_v49 = vld [vmem:[%s10477_s1 + $0x138] sm:$0xff] }
   0xd   :  { %v4577_v51 = vpack.c.bf16 %v75_v45, %v71_v44  ;;  %v3795_v52 = vpack.c.bf16 %v82_v47, %v78_v46  ;;  %v77_v53 = vld [vmem:[%s10477_s1 + $0x100] sm:$0xff]  ;;  %v79_v55 = vld [vmem:[%s10477_s1 + $0x110] sm:$0xff]  ;;  %v4579_v56 = vpack.c.bf16 %v84_v49, %v80_v48  ;;  %v86_v58 = vld [vmem:[%s10477_s1 + $0x148] sm:$0xff] }
   0xe   :  { %3790 = vmatpush1.bf16.msra.mxu0 %v3789_v34  ;;  %v81_v54 = vld [vmem:[%s10477_s1 + $0x120] sm:$0xff]  ;;  %v83_v57 = vld [vmem:[%s10477_s1 + $0x130] sm:$0xff]  ;;  %v90_v59 = vld [vmem:[%s10477_s1 + $0x168] sm:$0xff] }
   0xf   :  { %4574 = vmatpush1.bf16.msra.mxu1 %v4573_v38  ;;  %3792 = vmatprep.subr.bf16.mxu0 %v3791_v39  ;;  %v88_v60 = vld [vmem:[%s10477_s1 + $0x158] sm:$0xff]  ;;  %v3797_v62 = vpack.c.bf16 %v81_v54, %v77_v53  ;;  %v4581_v63 = vpack.c.bf16 %v83_v57, %v79_v55  ;;  %v3799_v0 = vpack.c.bf16 %v90_v59, %v86_v58  ;;  %v85_v1 = vld [vmem:[%s10477_s1 + $0x140] sm:$0xff]  ;;  %v87_v3 = vld [vmem:[%s10477_s1 + $0x150] sm:$0xff] }
  0x10   :  { %4576 = vmatprep.subr.bf16.mxu1 %v4575_v43  ;;  %v92_v61 = vld [vmem:[%s10477_s1 + $0x178] sm:$0xff]  ;;  %v89_v2 = vld [vmem:[%s10477_s1 + $0x160] sm:$0xff]  ;;  %v91_v5 = vld [vmem:[%s10477_s1 + $0x170] sm:$0xff] }
  0x11   :  { %v4583_v4 = vpack.c.bf16 %v92_v61, %v88_v60  ;;  %v94_v6 = vld [vmem:[%s10477_s1 + $0x188] sm:$0xff]  ;;  %v96_v8 = vld [vmem:[%s10477_s1 + $0x198] sm:$0xff]  ;;  %v3801_v10 = vpack.c.bf16 %v89_v2, %v85_v1  ;;  %v4585_v11 = vpack.c.bf16 %v91_v5, %v87_v3  ;;  %v93_v13 = vld [vmem:[%s10477_s1 + $0x180] sm:$0xff] }
  0x12   :  { %3794 = vmatpush1.bf16.msra.mxu0 %v3793_v50  ;;  %v98_v7 = vld [vmem:[%s10477_s1 + $0x1a8] sm:$0xff]  ;;  %v100_v9 = vld [vmem:[%s10477_s1 + $0x1b8] sm:$0xff]  ;;  %v97_v14 = vld [vmem:[%s10477_s1 + $0x1a0] sm:$0xff] }
  0x13   :  { %4578 = vmatpush1.bf16.msra.mxu1 %v4577_v51  ;;  %3796 = vmatprep.subr.bf16.mxu0 %v3795_v52  ;;  %v3803_v12 = vpack.c.bf16 %v98_v7, %v94_v6  ;;  %v95_v15 = vld [vmem:[%s10477_s1 + $0x190] sm:$0xff]  ;;  %v4587_v16 = vpack.c.bf16 %v100_v9, %v96_v8  ;;  %v102_v18 = vld [vmem:[%s10477_s1 + $0x1c8] sm:$0xff]  ;;  %v104_v20 = vld [vmem:[%s10477_s1 + $0x1d8] sm:$0xff]  ;;  %v3805_v22 = vpack.c.bf16 %v97_v14, %v93_v13 }
  0x14   :  { %4580 = vmatprep.subr.bf16.mxu1 %v4579_v56  ;;  %v99_v17 = vld [vmem:[%s10477_s1 + $0x1b0] sm:$0xff]  ;;  %v106_v19 = vld [vmem:[%s10477_s1 + $0x1e8] sm:$0xff]  ;;  %v108_v21 = vld [vmem:[%s10477_s1 + $0x1f8] sm:$0xff] }
  0x15   :  { %v4589_v23 = vpack.c.bf16 %v99_v17, %v95_v15  ;;  %v3807_v24 = vpack.c.bf16 %v106_v19, %v102_v18  ;;  %v101_v25 = vld [vmem:[%s10477_s1 + $0x1c0] sm:$0xff]  ;;  %v103_v27 = vld [vmem:[%s10477_s1 + $0x1d0] sm:$0xff]  ;;  %v4591_v28 = vpack.c.bf16 %v108_v21, %v104_v20  ;;  %v110_v30 = vld [vmem:[%s10477_s1 + $0x208] sm:$0xff] }
  0x16   :  { %3798 = vmatpush1.bf16.msra.mxu0 %v3797_v62  ;;  %v105_v26 = vld [vmem:[%s10477_s1 + $0x1e0] sm:$0xff]  ;;  %v107_v29 = vld [vmem:[%s10477_s1 + $0x1f0] sm:$0xff]  ;;  %v114_v31 = vld [vmem:[%s10477_s1 + $0x228] sm:$0xff] }
  0x17   :  { %4582 = vmatpush1.bf16.msra.mxu1 %v4581_v63  ;;  %3800 = vmatprep.subr.bf16.mxu0 %v3799_v0  ;;  %v112_v32 = vld [vmem:[%s10477_s1 + $0x218] sm:$0xff]  ;;  %v3809_v34 = vpack.c.bf16 %v105_v26, %v101_v25  ;;  %v4593_v35 = vpack.c.bf16 %v107_v29, %v103_v27  ;;  %v3811_v36 = vpack.c.bf16 %v114_v31, %v110_v30  ;;  %v109_v37 = vld [vmem:[%s10477_s1 + $0x200] sm:$0xff]  ;;  %v111_v39 = vld [vmem:[%s10477_s1 + $0x210] sm:$0xff] }
  0x18   :  { %4584 = vmatprep.subr.bf16.mxu1 %v4583_v4  ;;  %v116_v33 = vld [vmem:[%s10477_s1 + $0x238] sm:$0xff]  ;;  %v113_v38 = vld [vmem:[%s10477_s1 + $0x220] sm:$0xff]  ;;  %v115_v41 = vld [vmem:[%s10477_s1 + $0x230] sm:$0xff] }
  0x19   :  { %v4595_v40 = vpack.c.bf16 %v116_v33, %v112_v32  ;;  %v118_v42 = vld [vmem:[%s10477_s1 + $0x248] sm:$0xff]  ;;  %v120_v44 = vld [vmem:[%s10477_s1 + $0x258] sm:$0xff]  ;;  %v3813_v46 = vpack.c.bf16 %v113_v38, %v109_v37  ;;  %v4597_v47 = vpack.c.bf16 %v115_v41, %v111_v39  ;;  %v117_v49 = vld [vmem:[%s10477_s1 + $0x240] sm:$0xff] }
  0x1a   :  { %3802 = vmatpush1.bf16.msra.mxu0 %v3801_v10  ;;  %v122_v43 = vld [vmem:[%s10477_s1 + $0x268] sm:$0xff]  ;;  %v124_v45 = vld [vmem:[%s10477_s1 + $0x278] sm:$0xff]  ;;  %v121_v50 = vld [vmem:[%s10477_s1 + $0x260] sm:$0xff] }
  0x1b   :  { %4586 = vmatpush1.bf16.msra.mxu1 %v4585_v11  ;;  %3804 = vmatprep.subr.bf16.mxu0 %v3803_v12  ;;  %v3815_v48 = vpack.c.bf16 %v122_v43, %v118_v42  ;;  %v119_v51 = vld [vmem:[%s10477_s1 + $0x250] sm:$0xff]  ;;  %v4599_v52 = vpack.c.bf16 %v124_v45, %v120_v44  ;;  %v126_v54 = vld [vmem:[%s10477_s1 + $0x288] sm:$0xff]  ;;  %v128_v56 = vld [vmem:[%s10477_s1 + $0x298] sm:$0xff]  ;;  %v3817_v58 = vpack.c.bf16 %v121_v50, %v117_v49 }
  0x1c   :  { %4588 = vmatprep.subr.bf16.mxu1 %v4587_v16  ;;  %v123_v53 = vld [vmem:[%s10477_s1 + $0x270] sm:$0xff]  ;;  %v130_v55 = vld [vmem:[%s10477_s1 + $0x2a8] sm:$0xff]  ;;  %v132_v57 = vld [vmem:[%s10477_s1 + $0x2b8] sm:$0xff] }
  0x1d   :  { %v4601_v59 = vpack.c.bf16 %v123_v53, %v119_v51  ;;  %v3819_v60 = vpack.c.bf16 %v130_v55, %v126_v54  ;;  %v125_v61 = vld [vmem:[%s10477_s1 + $0x280] sm:$0xff]  ;;  %v127_v63 = vld [vmem:[%s10477_s1 + $0x290] sm:$0xff]  ;;  %v4603_v0 = vpack.c.bf16 %v132_v57, %v128_v56  ;;  %v134_v2 = vld [vmem:[%s10477_s1 + $0x2c8] sm:$0xff] }
  0x1e   :  { %3806 = vmatpush1.bf16.msra.mxu0 %v3805_v22  ;;  %v129_v62 = vld [vmem:[%s10477_s1 + $0x2a0] sm:$0xff]  ;;  %v131_v1 = vld [vmem:[%s10477_s1 + $0x2b0] sm:$0xff]  ;;  %v138_v3 = vld [vmem:[%s10477_s1 + $0x2e8] sm:$0xff] }
  0x1f   :  { %4590 = vmatpush1.bf16.msra.mxu1 %v4589_v23  ;;  %3808 = vmatprep.subr.bf16.mxu0 %v3807_v24  ;;  %v136_v4 = vld [vmem:[%s10477_s1 + $0x2d8] sm:$0xff]  ;;  %v3821_v6 = vpack.c.bf16 %v129_v62, %v125_v61  ;;  %v133_v7 = vld [vmem:[%s10477_s1 + $0x2c0] sm:$0xff]  ;;  %v4605_v8 = vpack.c.bf16 %v131_v1, %v127_v63  ;;  %v3823_v9 = vpack.c.bf16 %v138_v3, %v134_v2  ;;  %v135_v11 = vld [vmem:[%s10477_s1 + $0x2d0] sm:$0xff] }
  0x20   :  { %4592 = vmatprep.subr.bf16.mxu1 %v4591_v28  ;;  %v140_v5 = vld [vmem:[%s10477_s1 + $0x2f8] sm:$0xff]  ;;  %v137_v10 = vld [vmem:[%s10477_s1 + $0x2e0] sm:$0xff]  ;;  %v139_v12 = vld [vmem:[%s10477_s1 + $0x2f0] sm:$0xff] }
  0x21   :  { %v4607_v13 = vpack.c.bf16 %v140_v5, %v136_v4  ;;  %v142_v14 = vld [vmem:[%s10477_s1 + $0x308] sm:$0xff]  ;;  %v144_v17 = vld [vmem:[%s10477_s1 + $0x318] sm:$0xff]  ;;  %v3825_v19 = vpack.c.bf16 %v137_v10, %v133_v7  ;;  %v4609_v20 = vpack.c.bf16 %v139_v12, %v135_v11  ;;  %v141_v22 = vld [vmem:[%s10477_s1 + $0x300] sm:$0xff] }
  0x22   :  { %3810 = vmatpush1.bf16.msra.mxu0 %v3809_v34  ;;  %v146_v15 = vld [vmem:[%s10477_s1 + $0x328] sm:$0xff]  ;;  %v148_v18 = vld [vmem:[%s10477_s1 + $0x338] sm:$0xff]  ;;  %v145_v23 = vld [vmem:[%s10477_s1 + $0x320] sm:$0xff] }
  0x23   :  { %4594 = vmatpush1.bf16.msra.mxu1 %v4593_v35  ;;  %3812 = vmatprep.subr.bf16.mxu0 %v3811_v36  ;;  %v21_v16 = vld [vmem:[%s10478_s0 + $0x8] sm:$0xff]  ;;  %v3827_v21 = vpack.c.bf16 %v146_v15, %v142_v14  ;;  %v143_v24 = vld [vmem:[%s10477_s1 + $0x310] sm:$0xff]  ;;  %v4611_v25 = vpack.c.bf16 %v148_v18, %v144_v17  ;;  %v152_v29 = vld [vmem:[%s10477_s1 + $0x358] sm:$0xff]  ;;  %v3829_v31 = vpack.c.bf16 %v145_v23, %v141_v22 }
  0x24   :  { %4596 = vmatprep.subr.bf16.mxu1 %v4595_v40  ;;  %1703 = vmatprep.mubr.f32.mxu0 %v21_v16  ;;  %v147_v26 = vld [vmem:[%s10477_s1 + $0x330] sm:$0xff]  ;;  %v150_v27 = vld [vmem:[%s10477_s1 + $0x348] sm:$0xff]  ;;  %v156_v30 = vld [vmem:[%s10477_s1 + $0x378] sm:$0xff] }
  0x25   :  { %2626 = vmatprep.mubr.f32.mxu1 %v21_v16  ;;  %v154_v28 = vld [vmem:[%s10477_s1 + $0x368] sm:$0xff]  ;;  %v4613_v32 = vpack.c.bf16 %v147_v26, %v143_v24  ;;  %v149_v34 = vld [vmem:[%s10477_s1 + $0x340] sm:$0xff]  ;;  %v151_v36 = vld [vmem:[%s10477_s1 + $0x350] sm:$0xff]  ;;  %v4615_v37 = vpack.c.bf16 %v156_v30, %v152_v29 }
  0x26   :  { %3814 = vmatpush1.bf16.msra.mxu0 %v3813_v46  ;;  %v3831_v33 = vpack.c.bf16 %v154_v28, %v150_v27  ;;  %v153_v35 = vld [vmem:[%s10477_s1 + $0x360] sm:$0xff]  ;;  %v155_v38 = vld [vmem:[%s10477_s1 + $0x370] sm:$0xff]  ;;  %v158_v39 = vld [vmem:[%s10477_s1 + $0x388] sm:$0xff] }
  0x27   :  { %4598 = vmatpush1.bf16.msra.mxu1 %v4597_v47  ;;  %3816 = vmatprep.subr.bf16.mxu0 %v3815_v48  ;;  %v162_v40 = vld [vmem:[%s10477_s1 + $0x3a8] sm:$0xff]  ;;  %v160_v41 = vld [vmem:[%s10477_s1 + $0x398] sm:$0xff]  ;;  %v3833_v43 = vpack.c.bf16 %v153_v35, %v149_v34  ;;  %v4617_v44 = vpack.c.bf16 %v155_v38, %v151_v36  ;;  %v157_v46 = vld [vmem:[%s10477_s1 + $0x380] sm:$0xff] }
  0x28   :  { %4600 = vmatprep.subr.bf16.mxu1 %v4599_v52  ;;  %v164_v42 = vld [vmem:[%s10477_s1 + $0x3b8] sm:$0xff]  ;;  %v3835_v45 = vpack.c.bf16 %v162_v40, %v158_v39  ;;  %v161_v47 = vld [vmem:[%s10477_s1 + $0x3a0] sm:$0xff]  ;;  %v159_v48 = vld [vmem:[%s10477_s1 + $0x390] sm:$0xff] }
  0x29   :  { %v4619_v49 = vpack.c.bf16 %v164_v42, %v160_v41  ;;  %v163_v50 = vld [vmem:[%s10477_s1 + $0x3b0] sm:$0xff]  ;;  %v166_v51 = vld [vmem:[%s10477_s1 + $0x3c8] sm:$0xff]  ;;  %v168_v53 = vld [vmem:[%s10477_s1 + $0x3d8] sm:$0xff]  ;;  %v3837_v55 = vpack.c.bf16 %v161_v47, %v157_v46 }
  0x2a   :  { %3818 = vmatpush1.bf16.msra.mxu0 %v3817_v58  ;;  %v170_v52 = vld [vmem:[%s10477_s1 + $0x3e8] sm:$0xff]  ;;  %v172_v54 = vld [vmem:[%s10477_s1 + $0x3f8] sm:$0xff]  ;;  %v4621_v56 = vpack.c.bf16 %v163_v50, %v159_v48  ;;  %v165_v58 = vld [vmem:[%s10477_s1 + $0x3c0] sm:$0xff] }
  0x2b   :  { %4602 = vmatpush1.bf16.msra.mxu1 %v4601_v59  ;;  %3820 = vmatprep.subr.bf16.mxu0 %v3819_v60  ;;  %v3839_v57 = vpack.c.bf16 %v170_v52, %v166_v51  ;;  %v169_v59 = vld [vmem:[%s10477_s1 + $0x3e0] sm:$0xff]  ;;  %v167_v60 = vld [vmem:[%s10477_s1 + $0x3d0] sm:$0xff]  ;;  %v4623_v61 = vpack.c.bf16 %v172_v54, %v168_v53  ;;  %v174_v63 = vld [vmem:[%s10477_s1 + $0x408] sm:$0xff] }
  0x2c   :  { %4604 = vmatprep.subr.bf16.mxu1 %v4603_v0  ;;  %v171_v62 = vld [vmem:[%s10477_s1 + $0x3f0] sm:$0xff]  ;;  %v178_v0 = vld [vmem:[%s10477_s1 + $0x428] sm:$0xff]  ;;  %v176_v1 = vld [vmem:[%s10477_s1 + $0x418] sm:$0xff]  ;;  %v3841_v3 = vpack.c.bf16 %v169_v59, %v165_v58 }
  0x2d   :  { %v180_v2 = vld [vmem:[%s10477_s1 + $0x438] sm:$0xff]  ;;  %v4625_v4 = vpack.c.bf16 %v171_v62, %v167_v60  ;;  %v3843_v5 = vpack.c.bf16 %v178_v0, %v174_v63  ;;  %v177_v7 = vld [vmem:[%s10477_s1 + $0x420] sm:$0xff]  ;;  %v179_v10 = vld [vmem:[%s10477_s1 + $0x430] sm:$0xff] }
  0x2e   :  { %3822 = vmatpush1.bf16.msra.mxu0 %v3821_v6  ;;  %v173_v6 = vld [vmem:[%s10477_s1 + $0x400] sm:$0xff]  ;;  %v182_v11 = vld [vmem:[%s10477_s1 + $0x448] sm:$0xff]  ;;  %v188_v14 = vld [vmem:[%s10477_s1 + $0x478] sm:$0xff] }
  0x2f   :  { %4606 = vmatpush1.bf16.msra.mxu1 %v4605_v8  ;;  %3824 = vmatprep.subr.bf16.mxu0 %v3823_v9  ;;  %v175_v8 = vld [vmem:[%s10477_s1 + $0x410] sm:$0xff]  ;;  %v4627_v9 = vpack.c.bf16 %v180_v2, %v176_v1  ;;  %v186_v12 = vld [vmem:[%s10477_s1 + $0x468] sm:$0xff]  ;;  %v20_v15 = vld [vmem:[%s10478_s0] sm:$0xff]  ;;  %v3845_v16 = vpack.c.bf16 %v177_v7, %v173_v6 }
  0x30   :  { %4608 = vmatprep.subr.bf16.mxu1 %v4607_v13  ;;  %v184_v13 = vld [vmem:[%s10477_s1 + $0x458] sm:$0xff]  ;;  %v4629_v17 = vpack.c.bf16 %v179_v10, %v175_v8  ;;  %v3847_v18 = vpack.c.bf16 %v186_v12, %v182_v11  ;;  %v187_v23 = vld [vmem:[%s10477_s1 + $0x470] sm:$0xff]  ;;  %v190_v24 = vld [vmem:[%s10477_s1 + $0x488] sm:$0xff] }
  0x31   :  { %v4631_v22 = vpack.c.bf16 %v188_v14, %v184_v13  ;;  %v192_v26 = vld [vmem:[%s10477_s1 + $0x498] sm:$0xff]  ;;  %v195_v35 = vld [vmem:[%s10477_s1 + $0x4b0] sm:$0xff]  ;;  %v198_v36 = vld [vmem:[%s10477_s1 + $0x4c8] sm:$0xff] }
  0x32   :  { %3826 = vmatpush1.bf16.msra.mxu0 %v3825_v19  ;;  %v181_v19 = vld [vmem:[%s10477_s1 + $0x440] sm:$0xff]  ;;  %v196_v27 = vld [vmem:[%s10477_s1 + $0x4b8] sm:$0xff]  ;;  %v203_v47 = vld [vmem:[%s10477_s1 + $0x4f0] sm:$0xff] }
  0x33   :  { %4610 = vmatpush1.bf16.msra.mxu1 %v4609_v20  ;;  %3828 = vmatprep.subr.bf16.mxu0 %v3827_v21  ;;  %v185_v20 = vld [vmem:[%s10477_s1 + $0x460] sm:$0xff]  ;;  %v183_v21 = vld [vmem:[%s10477_s1 + $0x450] sm:$0xff]  ;;  %v4635_v34 = vpack.c.bf16 %v196_v27, %v192_v26  ;;  %v200_v38 = vld [vmem:[%s10477_s1 + $0x4d8] sm:$0xff] }
  0x34   :  { %4612 = vmatprep.subr.bf16.mxu1 %v4611_v25  ;;  %v194_v25 = vld [vmem:[%s10477_s1 + $0x4a8] sm:$0xff]  ;;  %v3849_v28 = vpack.c.bf16 %v185_v20, %v181_v19  ;;  %v4633_v29 = vpack.c.bf16 %v187_v23, %v183_v21  ;;  %v204_v39 = vld [vmem:[%s10477_s1 + $0x4f8] sm:$0xff]  ;;  %v211_v59 = vld [vmem:[%s10477_s1 + $0x530] sm:$0xff] }
  0x35   :  { %v3851_v30 = vpack.c.bf16 %v194_v25, %v190_v24  ;;  %v4639_v46 = vpack.c.bf16 %v204_v39, %v200_v38  ;;  %v206_v48 = vld [vmem:[%s10477_s1 + $0x508] sm:$0xff]  ;;  %v208_v50 = vld [vmem:[%s10477_s1 + $0x518] sm:$0xff]  ;;  %v219_v7 = vld [vmem:[%s10477_s1 + $0x570] sm:$0xff] }
  0x36   :  { %3830 = vmatpush1.bf16.msra.mxu0 %v3829_v31  ;;  %v189_v31 = vld [vmem:[%s10477_s1 + $0x480] sm:$0xff]  ;;  %v212_v51 = vld [vmem:[%s10477_s1 + $0x538] sm:$0xff]  ;;  %v214_v60 = vld [vmem:[%s10477_s1 + $0x548] sm:$0xff] }
  0x37   :  { %4614 = vmatpush1.bf16.msra.mxu1 %v4613_v32  ;;  %3832 = vmatprep.subr.bf16.mxu0 %v3831_v33  ;;  %v193_v32 = vld [vmem:[%s10477_s1 + $0x4a0] sm:$0xff]  ;;  %v191_v33 = vld [vmem:[%s10477_s1 + $0x490] sm:$0xff]  ;;  %v4643_v58 = vpack.c.bf16 %v212_v51, %v208_v50  ;;  %v216_v62 = vld [vmem:[%s10477_s1 + $0x558] sm:$0xff] }
  0x38   :  { %4616 = vmatprep.subr.bf16.mxu1 %v4615_v37  ;;  %v202_v37 = vld [vmem:[%s10477_s1 + $0x4e8] sm:$0xff]  ;;  %v3853_v40 = vpack.c.bf16 %v193_v32, %v189_v31  ;;  %v4637_v41 = vpack.c.bf16 %v195_v35, %v191_v33  ;;  %v220_v63 = vld [vmem:[%s10477_s1 + $0x578] sm:$0xff]  ;;  %v221_v13 = vld [vmem:[%s10477_s1 + $0x580] sm:$0xff] }
  0x39   :  { %v3855_v42 = vpack.c.bf16 %v202_v37, %v198_v36  ;;  %v4647_v6 = vpack.c.bf16 %v220_v63, %v216_v62  ;;  %v222_v8 = vld [vmem:[%s10477_s1 + $0x588] sm:$0xff]  ;;  %v224_v10 = vld [vmem:[%s10477_s1 + $0x598] sm:$0xff]  ;;  %v235_v32 = vld [vmem:[%s10477_s1 + $0x5f0] sm:$0xff] }
  0x3a   :  { %3834 = vmatpush1.bf16.msra.mxu0 %v3833_v43  ;;  %v197_v43 = vld [vmem:[%s10477_s1 + $0x4c0] sm:$0xff]  ;;  %v228_v11 = vld [vmem:[%s10477_s1 + $0x5b8] sm:$0xff]  ;;  %v230_v20 = vld [vmem:[%s10477_s1 + $0x5c8] sm:$0xff] }
  0x3b   :  { %4618 = vmatpush1.bf16.msra.mxu1 %v4617_v44  ;;  %3836 = vmatprep.subr.bf16.mxu0 %v3835_v45  ;;  %v201_v44 = vld [vmem:[%s10477_s1 + $0x4e0] sm:$0xff]  ;;  %v199_v45 = vld [vmem:[%s10477_s1 + $0x4d0] sm:$0xff]  ;;  %v4651_v19 = vpack.c.bf16 %v228_v11, %v224_v10  ;;  %v234_v21 = vld [vmem:[%s10477_s1 + $0x5e8] sm:$0xff] }
  0x3c   :  { %4620 = vmatprep.subr.bf16.mxu1 %v4619_v49  ;;  %v210_v49 = vld [vmem:[%s10477_s1 + $0x528] sm:$0xff]  ;;  %v3857_v52 = vpack.c.bf16 %v201_v44, %v197_v43  ;;  %v4641_v53 = vpack.c.bf16 %v203_v47, %v199_v45  ;;  %v232_v23 = vld [vmem:[%s10477_s1 + $0x5d8] sm:$0xff]  ;;  %v3871_v27 = vpack.c.bf16 %v234_v21, %v230_v20  ;;  %v243_v44 = vld [vmem:[%s10477_s1 + $0x630] sm:$0xff] }
  0x3d   :  { %v3859_v54 = vpack.c.bf16 %v210_v49, %v206_v48  ;;  %v236_v24 = vld [vmem:[%s10477_s1 + $0x5f8] sm:$0xff]  ;;  %v238_v33 = vld [vmem:[%s10477_s1 + $0x608] sm:$0xff] }
  0x3e   :  { %3838 = vmatpush1.bf16.msra.mxu0 %v3837_v55  ;;  %v205_v55 = vld [vmem:[%s10477_s1 + $0x500] sm:$0xff]  ;;  %v4655_v31 = vpack.c.bf16 %v236_v24, %v232_v23  ;;  %v240_v35 = vld [vmem:[%s10477_s1 + $0x618] sm:$0xff]  ;;  %v246_v45 = vld [vmem:[%s10477_s1 + $0x648] sm:$0xff] }
  0x3f   :  { %4622 = vmatpush1.bf16.msra.mxu1 %v4621_v56  ;;  %3840 = vmatprep.subr.bf16.mxu0 %v3839_v57  ;;  %v209_v56 = vld [vmem:[%s10477_s1 + $0x520] sm:$0xff]  ;;  %v207_v57 = vld [vmem:[%s10477_s1 + $0x510] sm:$0xff]  ;;  %v244_v36 = vld [vmem:[%s10477_s1 + $0x638] sm:$0xff] }
  0x40   :  { %4624 = vmatprep.subr.bf16.mxu1 %v4623_v61  ;;  %v218_v61 = vld [vmem:[%s10477_s1 + $0x568] sm:$0xff]  ;;  %v3861_v0 = vpack.c.bf16 %v209_v56, %v205_v55  ;;  %v4645_v1 = vpack.c.bf16 %v211_v59, %v207_v57  ;;  %v4659_v43 = vpack.c.bf16 %v244_v36, %v240_v35  ;;  %v248_v47 = vld [vmem:[%s10477_s1 + $0x658] sm:$0xff]  ;;  %v251_v56 = vld [vmem:[%s10477_s1 + $0x670] sm:$0xff] }
  0x41   :  { %v3863_v2 = vpack.c.bf16 %v218_v61, %v214_v60  ;;  %v252_v48 = vld [vmem:[%s10477_s1 + $0x678] sm:$0xff]  ;;  %v254_v57 = vld [vmem:[%s10477_s1 + $0x688] sm:$0xff]  ;;  %v269_v24 = vld [vmem:[%s10477_s1 + $0x700] sm:$0xff] }
  0x42   :  { %3842 = vmatpush1.bf16.msra.mxu0 %v3841_v3  ;;  %v213_v3 = vld [vmem:[%s10477_s1 + $0x540] sm:$0xff]  ;;  %v4663_v55 = vpack.c.bf16 %v252_v48, %v248_v47  ;;  %v256_v59 = vld [vmem:[%s10477_s1 + $0x698] sm:$0xff] }
  0x43   :  { %4626 = vmatpush1.bf16.msra.mxu1 %v4625_v4  ;;  %3844 = vmatprep.subr.bf16.mxu0 %v3843_v5  ;;  %v217_v4 = vld [vmem:[%s10477_s1 + $0x560] sm:$0xff]  ;;  %v215_v5 = vld [vmem:[%s10477_s1 + $0x550] sm:$0xff]  ;;  %v260_v60 = vld [vmem:[%s10477_s1 + $0x6b8] sm:$0xff] }
  0x44   :  { %4628 = vmatprep.subr.bf16.mxu1 %v4627_v9  ;;  %v226_v9 = vld [vmem:[%s10477_s1 + $0x5a8] sm:$0xff]  ;;  %v3865_v12 = vpack.c.bf16 %v217_v4, %v213_v3  ;;  %v4649_v14 = vpack.c.bf16 %v219_v7, %v215_v5  ;;  %v4667_v3 = vpack.c.bf16 %v260_v60, %v256_v59  ;;  %v259_v4 = vld [vmem:[%s10477_s1 + $0x6b0] sm:$0xff]  ;;  %v264_v7 = vld [vmem:[%s10477_s1 + $0x6d8] sm:$0xff] }
  0x45   :  { %1704 = vmatmul.mubr.f32.vlgmr.msra.gmra.mrb[0].mxu0 %v20_v15  ;;  %v262_v5 = vld [vmem:[%s10477_s1 + $0x6c8] sm:$0xff]  ;;  %v276_v20 = vld [vmem:[%s10477_s1 + $0x738] sm:$0xff]  ;;  %v277_v36 = vld [vmem:[%s10477_s1 + $0x740] sm:$0xff] }
  0x46   :  { %3846 = vmatpush1.bf16.msra.mxu0 %v3845_v16  ;;  %2627 = vmatmul.mubr.f32.vlgmr.msra.gmra.mrb[0].mxu1 %v20_v15  ;;  %v3867_v15 = vpack.c.bf16 %v226_v9, %v222_v8  ;;  %v225_v16 = vld [vmem:[%s10477_s1 + $0x5a0] sm:$0xff]  ;;  %v268_v8 = vld [vmem:[%s10477_s1 + $0x6f8] sm:$0xff] }
  0x47   :  { %4630 = vmatpush1.bf16.msra.mxu1 %v4629_v17  ;;  %3848 = vmatprep.subr.bf16.mxu0 %v3847_v18  ;;  %v223_v17 = vld [vmem:[%s10477_s1 + $0x590] sm:$0xff]  ;;  %v3869_v25 = vpack.c.bf16 %v225_v16, %v221_v13  ;;  %v265_v13 = vld [vmem:[%s10477_s1 + $0x6e0] sm:$0xff] }
  0x48   :  { %4632 = vmatprep.subr.bf16.mxu1 %v4631_v22  ;;  %v227_v18 = vld [vmem:[%s10477_s1 + $0x5b0] sm:$0xff]  ;;  %v23_v22 = vld [vmem:[%s10478_s0 + $0x18] sm:$0xff]  ;;  %v285_v48 = vld [vmem:[%s10477_s1 + $0x780] sm:$0xff] }
  0x49   :  { %1774 = vmatprep.mubr.f32.mxu0 %v23_v22  ;;  %2697 = vmatprep.mubr.f32.mxu1 %v23_v22  ;;  %v4653_v26 = vpack.c.bf16 %v227_v18, %v223_v17  ;;  %v267_v16 = vld [vmem:[%s10477_s1 + $0x6f0] sm:$0xff]  ;;  %v270_v17 = vld [vmem:[%s10477_s1 + $0x708] sm:$0xff]  ;;  %v293_v60 = vld [vmem:[%s10477_s1 + $0x7c0] sm:$0xff] }
  0x4a   :  { %3850 = vmatpush1.bf16.msra.mxu0 %v3849_v28  ;;  %v229_v28 = vld [vmem:[%s10477_s1 + $0x5c0] sm:$0xff]  ;;  %v274_v18 = vld [vmem:[%s10477_s1 + $0x728] sm:$0xff] }
  0x4b   :  { %4634 = vmatpush1.bf16.msra.mxu1 %v4633_v29  ;;  %3852 = vmatprep.subr.bf16.mxu0 %v3851_v30  ;;  %v233_v29 = vld [vmem:[%s10477_s1 + $0x5e0] sm:$0xff]  ;;  %v231_v30 = vld [vmem:[%s10477_s1 + $0x5d0] sm:$0xff]  ;;  %v3891_v23 = vpack.c.bf16 %v274_v18, %v270_v17 }
  0x4c   :  { %4636 = vmatprep.subr.bf16.mxu1 %v4635_v34  ;;  %v242_v34 = vld [vmem:[%s10477_s1 + $0x628] sm:$0xff]  ;;  %v3873_v37 = vpack.c.bf16 %v233_v29, %v229_v28  ;;  %v4657_v38 = vpack.c.bf16 %v235_v32, %v231_v30  ;;  %v275_v28 = vld [vmem:[%s10477_s1 + $0x730] sm:$0xff]  ;;  %v284_v32 = vld [vmem:[%s10477_s1 + $0x778] sm:$0xff] }
  0x4d   :  { %v3875_v39 = vpack.c.bf16 %v242_v34, %v238_v33  ;;  %v278_v29 = vld [vmem:[%s10477_s1 + $0x748] sm:$0xff]  ;;  %v22_v17 = vld [vmem:[%s10478_s0 + $0x10] sm:$0xff] }
  0x4e   :  { %3854 = vmatpush1.bf16.msra.mxu0 %v3853_v40  ;;  %v237_v40 = vld [vmem:[%s10477_s1 + $0x600] sm:$0xff]  ;;  %v282_v30 = vld [vmem:[%s10477_s1 + $0x768] sm:$0xff] }
  0x4f   :  { %4638 = vmatpush1.bf16.msra.mxu1 %v4637_v41  ;;  %3856 = vmatprep.subr.bf16.mxu0 %v3855_v42  ;;  %v241_v41 = vld [vmem:[%s10477_s1 + $0x620] sm:$0xff]  ;;  %v239_v42 = vld [vmem:[%s10477_s1 + $0x610] sm:$0xff]  ;;  %v3895_v35 = vpack.c.bf16 %v282_v30, %v278_v29  ;;  %v324_v29 = vld [vmem:[%s10477_s1 + $0x8b8] sm:$0xff] }
  0x50   :  { %4640 = vmatprep.subr.bf16.mxu1 %v4639_v46  ;;  %v250_v46 = vld [vmem:[%s10477_s1 + $0x668] sm:$0xff]  ;;  %v3877_v49 = vpack.c.bf16 %v241_v41, %v237_v40  ;;  %v4661_v50 = vpack.c.bf16 %v243_v44, %v239_v42  ;;  %v283_v40 = vld [vmem:[%s10477_s1 + $0x770] sm:$0xff]  ;;  %v292_v44 = vld [vmem:[%s10477_s1 + $0x7b8] sm:$0xff] }
  0x51   :  { %v3879_v51 = vpack.c.bf16 %v250_v46, %v246_v45  ;;  %v286_v41 = vld [vmem:[%s10477_s1 + $0x788] sm:$0xff] }
  0x52   :  { %3858 = vmatpush1.bf16.msra.mxu0 %v3857_v52  ;;  %v245_v52 = vld [vmem:[%s10477_s1 + $0x640] sm:$0xff]  ;;  %v290_v42 = vld [vmem:[%s10477_s1 + $0x7a8] sm:$0xff] }
  0x53   :  { %4642 = vmatpush1.bf16.msra.mxu1 %v4641_v53  ;;  %3860 = vmatprep.subr.bf16.mxu0 %v3859_v54  ;;  %v249_v53 = vld [vmem:[%s10477_s1 + $0x660] sm:$0xff]  ;;  %v247_v54 = vld [vmem:[%s10477_s1 + $0x650] sm:$0xff]  ;;  %v3899_v47 = vpack.c.bf16 %v290_v42, %v286_v41  ;;  %v25_v30 = vld [vmem:[%s10478_s0 + $0x28] sm:$0xff] }
  0x54   :  { %4644 = vmatprep.subr.bf16.mxu1 %v4643_v58  ;;  %v258_v58 = vld [vmem:[%s10477_s1 + $0x6a8] sm:$0xff]  ;;  %v3881_v61 = vpack.c.bf16 %v249_v53, %v245_v52  ;;  %v4665_v62 = vpack.c.bf16 %v251_v56, %v247_v54  ;;  %v291_v52 = vld [vmem:[%s10477_s1 + $0x7b0] sm:$0xff]  ;;  %v300_v56 = vld [vmem:[%s10477_s1 + $0x7f8] sm:$0xff] }
  0x55   :  { %v3883_v63 = vpack.c.bf16 %v258_v58, %v254_v57  ;;  %v294_v53 = vld [vmem:[%s10477_s1 + $0x7c8] sm:$0xff]  ;;  %v328_v41 = vld [vmem:[%s10477_s1 + $0x8d8] sm:$0xff] }
  0x56   :  { %3862 = vmatpush1.bf16.msra.mxu0 %v3861_v0  ;;  %v253_v0 = vld [vmem:[%s10477_s1 + $0x680] sm:$0xff]  ;;  %v298_v54 = vld [vmem:[%s10477_s1 + $0x7e8] sm:$0xff]  ;;  %v332_v42 = vld [vmem:[%s10477_s1 + $0x8f8] sm:$0xff] }
  0x57   :  { %4646 = vmatpush1.bf16.msra.mxu1 %v4645_v1  ;;  %3864 = vmatprep.subr.bf16.mxu0 %v3863_v2  ;;  %v257_v1 = vld [vmem:[%s10477_s1 + $0x6a0] sm:$0xff]  ;;  %v255_v2 = vld [vmem:[%s10477_s1 + $0x690] sm:$0xff]  ;;  %v3903_v59 = vpack.c.bf16 %v298_v54, %v294_v53  ;;  %v336_v53 = vld [vmem:[%s10477_s1 + $0x918] sm:$0xff] }
  0x58   :  { %4648 = vmatprep.subr.bf16.mxu1 %v4647_v6  ;;  %v266_v6 = vld [vmem:[%s10477_s1 + $0x6e8] sm:$0xff]  ;;  %v3885_v9 = vpack.c.bf16 %v257_v1, %v253_v0  ;;  %v4669_v10 = vpack.c.bf16 %v259_v4, %v255_v2  ;;  %v299_v0 = vld [vmem:[%s10477_s1 + $0x7f0] sm:$0xff]  ;;  %v308_v4 = vld [vmem:[%s10477_s1 + $0x838] sm:$0xff] }
  0x59   :  { %v3887_v11 = vpack.c.bf16 %v266_v6, %v262_v5  ;;  %v302_v1 = vld [vmem:[%s10477_s1 + $0x808] sm:$0xff]  ;;  %v340_v54 = vld [vmem:[%s10477_s1 + $0x938] sm:$0xff] }
  0x5a   :  { %3866 = vmatpush1.bf16.msra.mxu0 %v3865_v12  ;;  %v261_v12 = vld [vmem:[%s10477_s1 + $0x6c0] sm:$0xff]  ;;  %v306_v2 = vld [vmem:[%s10477_s1 + $0x828] sm:$0xff] }
  0x5b   :  { %4650 = vmatpush1.bf16.msra.mxu1 %v4649_v14  ;;  %3868 = vmatprep.subr.bf16.mxu0 %v3867_v15  ;;  %v263_v14 = vld [vmem:[%s10477_s1 + $0x6d0] sm:$0xff]  ;;  %v4671_v15 = vpack.c.bf16 %v268_v8, %v264_v7  ;;  %v3889_v21 = vpack.c.bf16 %v265_v13, %v261_v12  ;;  %v3907_v7 = vpack.c.bf16 %v306_v2, %v302_v1  ;;  %v301_v8 = vld [vmem:[%s10477_s1 + $0x800] sm:$0xff]  ;;  %v310_v13 = vld [vmem:[%s10477_s1 + $0x848] sm:$0xff] }
  0x5c   :  { %4652 = vmatprep.subr.bf16.mxu1 %v4651_v19  ;;  %v272_v19 = vld [vmem:[%s10477_s1 + $0x718] sm:$0xff]  ;;  %v4673_v22 = vpack.c.bf16 %v267_v16, %v263_v14  ;;  %v307_v12 = vld [vmem:[%s10477_s1 + $0x830] sm:$0xff]  ;;  %v314_v14 = vld [vmem:[%s10477_s1 + $0x868] sm:$0xff] }
  0x5d   :  { %v316_v16 = vld [vmem:[%s10477_s1 + $0x878] sm:$0xff] }
  0x5e   :  { %3870 = vmatpush1.bf16.msra.mxu0 %v3869_v25  ;;  %v273_v25 = vld [vmem:[%s10477_s1 + $0x720] sm:$0xff]  ;;  %v344_v1 = vld [vmem:[%s10477_s1 + $0x958] sm:$0xff] }
  0x5f   :  { %4654 = vmatpush1.bf16.msra.mxu1 %v4653_v26  ;;  %3872 = vmatprep.subr.bf16.mxu0 %v3871_v27  ;;  %v271_v26 = vld [vmem:[%s10477_s1 + $0x710] sm:$0xff]  ;;  %v4675_v27 = vpack.c.bf16 %v276_v20, %v272_v19  ;;  %v3893_v33 = vpack.c.bf16 %v273_v25, %v269_v24  ;;  %v3911_v20 = vpack.c.bf16 %v314_v14, %v310_v13  ;;  %v348_v2 = vld [vmem:[%s10477_s1 + $0x978] sm:$0xff] }
  0x60   :  { %4656 = vmatprep.subr.bf16.mxu1 %v4655_v31  ;;  %v280_v31 = vld [vmem:[%s10477_s1 + $0x758] sm:$0xff]  ;;  %v4677_v34 = vpack.c.bf16 %v275_v28, %v271_v26  ;;  %v315_v25 = vld [vmem:[%s10477_s1 + $0x870] sm:$0xff]  ;;  %v318_v26 = vld [vmem:[%s10477_s1 + $0x888] sm:$0xff] }
  0x61   :  { %v320_v28 = vld [vmem:[%s10477_s1 + $0x898] sm:$0xff] }
  0x62   :  { %3874 = vmatpush1.bf16.msra.mxu0 %v3873_v37  ;;  %v281_v37 = vld [vmem:[%s10477_s1 + $0x760] sm:$0xff]  ;;  %v352_v13 = vld [vmem:[%s10477_s1 + $0x998] sm:$0xff] }
  0x63   :  { %4658 = vmatpush1.bf16.msra.mxu1 %v4657_v38  ;;  %3876 = vmatprep.subr.bf16.mxu0 %v3875_v39  ;;  %v279_v38 = vld [vmem:[%s10477_s1 + $0x750] sm:$0xff]  ;;  %v4679_v39 = vpack.c.bf16 %v284_v32, %v280_v31  ;;  %v3897_v45 = vpack.c.bf16 %v281_v37, %v277_v36  ;;  %v4699_v37 = vpack.c.bf16 %v324_v29, %v320_v28  ;;  %v356_v14 = vld [vmem:[%s10477_s1 + $0x9b8] sm:$0xff] }
  0x64   :  { %4660 = vmatprep.subr.bf16.mxu1 %v4659_v43  ;;  %v288_v43 = vld [vmem:[%s10477_s1 + $0x798] sm:$0xff]  ;;  %v4681_v46 = vpack.c.bf16 %v283_v40, %v279_v38  ;;  %v319_v36 = vld [vmem:[%s10477_s1 + $0x890] sm:$0xff]  ;;  %v330_v40 = vld [vmem:[%s10477_s1 + $0x8e8] sm:$0xff] }
  0x65   :  { %v323_v38 = vld [vmem:[%s10477_s1 + $0x8b0] sm:$0xff] }
  0x66   :  { %3878 = vmatpush1.bf16.msra.mxu0 %v3877_v49  ;;  %v289_v49 = vld [vmem:[%s10477_s1 + $0x7a0] sm:$0xff] }
  0x67   :  { %4662 = vmatpush1.bf16.msra.mxu1 %v4661_v50  ;;  %3880 = vmatprep.subr.bf16.mxu0 %v3879_v51  ;;  %v287_v50 = vld [vmem:[%s10477_s1 + $0x790] sm:$0xff]  ;;  %v4683_v51 = vpack.c.bf16 %v292_v44, %v288_v43  ;;  %v3901_v57 = vpack.c.bf16 %v289_v49, %v285_v48  ;;  %v4701_v44 = vpack.c.bf16 %v323_v38, %v319_v36  ;;  %v370_v36 = vld [vmem:[%s10477_s1 + $0xa28] sm:$0xff]  ;;  %v372_v38 = vld [vmem:[%s10477_s1 + $0xa38] sm:$0xff] }
  0x68   :  { %4664 = vmatprep.subr.bf16.mxu1 %v4663_v55  ;;  %v296_v55 = vld [vmem:[%s10477_s1 + $0x7d8] sm:$0xff]  ;;  %v4685_v58 = vpack.c.bf16 %v291_v52, %v287_v50  ;;  %v327_v48 = vld [vmem:[%s10477_s1 + $0x8d0] sm:$0xff]  ;;  %v4703_v49 = vpack.c.bf16 %v332_v42, %v328_v41  ;;  %v338_v52 = vld [vmem:[%s10477_s1 + $0x928] sm:$0xff] }
  0x69   :  { %v331_v50 = vld [vmem:[%s10477_s1 + $0x8f0] sm:$0xff]  ;;  %v365_v42 = vld [vmem:[%s10477_s1 + $0xa00] sm:$0xff] }
  0x6a   :  { %3882 = vmatpush1.bf16.msra.mxu0 %v3881_v61  ;;  %v297_v61 = vld [vmem:[%s10477_s1 + $0x7e0] sm:$0xff] }
  0x6b   :  { %4666 = vmatpush1.bf16.msra.mxu1 %v4665_v62  ;;  %3884 = vmatprep.subr.bf16.mxu0 %v3883_v63  ;;  %v295_v62 = vld [vmem:[%s10477_s1 + $0x7d0] sm:$0xff]  ;;  %v4687_v63 = vpack.c.bf16 %v300_v56, %v296_v55  ;;  %v3905_v5 = vpack.c.bf16 %v297_v61, %v293_v60  ;;  %v4705_v56 = vpack.c.bf16 %v331_v50, %v327_v48  ;;  %v378_v48 = vld [vmem:[%s10477_s1 + $0xa68] sm:$0xff]  ;;  %v380_v50 = vld [vmem:[%s10477_s1 + $0xa78] sm:$0xff] }
  0x6c   :  { %4668 = vmatprep.subr.bf16.mxu1 %v4667_v3  ;;  %v304_v3 = vld [vmem:[%s10477_s1 + $0x818] sm:$0xff]  ;;  %v4689_v6 = vpack.c.bf16 %v299_v0, %v295_v62  ;;  %v335_v60 = vld [vmem:[%s10477_s1 + $0x910] sm:$0xff]  ;;  %v4707_v61 = vpack.c.bf16 %v340_v54, %v336_v53  ;;  %v346_v0 = vld [vmem:[%s10477_s1 + $0x968] sm:$0xff] }
  0x6d   :  { %v339_v62 = vld [vmem:[%s10477_s1 + $0x930] sm:$0xff]  ;;  %v373_v54 = vld [vmem:[%s10477_s1 + $0xa40] sm:$0xff] }
  0x6e   :  { %3886 = vmatpush1.bf16.msra.mxu0 %v3885_v9  ;;  %v305_v9 = vld [vmem:[%s10477_s1 + $0x820] sm:$0xff] }
  0x6f   :  { %4670 = vmatpush1.bf16.msra.mxu1 %v4669_v10  ;;  %3888 = vmatprep.subr.bf16.mxu0 %v3887_v11  ;;  %v303_v10 = vld [vmem:[%s10477_s1 + $0x810] sm:$0xff]  ;;  %v4691_v11 = vpack.c.bf16 %v308_v4, %v304_v3  ;;  %v3909_v18 = vpack.c.bf16 %v305_v9, %v301_v8  ;;  %v4709_v4 = vpack.c.bf16 %v339_v62, %v335_v60  ;;  %v386_v60 = vld [vmem:[%s10477_s1 + $0xaa8] sm:$0xff]  ;;  %v388_v62 = vld [vmem:[%s10477_s1 + $0xab8] sm:$0xff] }
  0x70   :  { %4672 = vmatprep.subr.bf16.mxu1 %v4671_v15  ;;  %v312_v15 = vld [vmem:[%s10477_s1 + $0x858] sm:$0xff]  ;;  %v4693_v19 = vpack.c.bf16 %v307_v12, %v303_v10  ;;  %v343_v8 = vld [vmem:[%s10477_s1 + $0x950] sm:$0xff]  ;;  %v4711_v9 = vpack.c.bf16 %v348_v2, %v344_v1  ;;  %v354_v12 = vld [vmem:[%s10477_s1 + $0x9a8] sm:$0xff] }
  0x71   :  { %v4695_v24 = vpack.c.bf16 %v316_v16, %v312_v15  ;;  %v347_v10 = vld [vmem:[%s10477_s1 + $0x970] sm:$0xff]  ;;  %v381_v2 = vld [vmem:[%s10477_s1 + $0xa80] sm:$0xff] }
  0x72   :  { %3890 = vmatpush1.bf16.msra.mxu0 %v3889_v21  ;;  %v309_v21 = vld [vmem:[%s10477_s1 + $0x840] sm:$0xff]  ;;  %v4713_v16 = vpack.c.bf16 %v347_v10, %v343_v8  ;;  %v394_v8 = vld [vmem:[%s10477_s1 + $0xae8] sm:$0xff]  ;;  %v396_v10 = vld [vmem:[%s10477_s1 + $0xaf8] sm:$0xff] }
  0x73   :  { %4674 = vmatpush1.bf16.msra.mxu1 %v4673_v22  ;;  %3892 = vmatprep.subr.bf16.mxu0 %v3891_v23  ;;  %v313_v22 = vld [vmem:[%s10477_s1 + $0x860] sm:$0xff]  ;;  %v311_v23 = vld [vmem:[%s10477_s1 + $0x850] sm:$0xff] }
  0x74   :  { %4676 = vmatprep.subr.bf16.mxu1 %v4675_v27  ;;  %v322_v27 = vld [vmem:[%s10477_s1 + $0x8a8] sm:$0xff]  ;;  %v3913_v31 = vpack.c.bf16 %v313_v22, %v309_v21  ;;  %v4697_v32 = vpack.c.bf16 %v315_v25, %v311_v23  ;;  %v4715_v21 = vpack.c.bf16 %v356_v14, %v352_v13  ;;  %v355_v22 = vld [vmem:[%s10477_s1 + $0x9b0] sm:$0xff]  ;;  %v360_v25 = vld [vmem:[%s10477_s1 + $0x9d8] sm:$0xff] }
  0x75   :  { %v358_v23 = vld [vmem:[%s10477_s1 + $0x9c8] sm:$0xff]  ;;  %v389_v14 = vld [vmem:[%s10477_s1 + $0xac0] sm:$0xff] }
  0x76   :  { %3894 = vmatpush1.bf16.msra.mxu0 %v3893_v33  ;;  %v3915_v33 = vpack.c.bf16 %v322_v27, %v318_v26  ;;  %v364_v26 = vld [vmem:[%s10477_s1 + $0x9f8] sm:$0xff] }
  0x77   :  { %4678 = vmatpush1.bf16.msra.mxu1 %v4677_v34  ;;  %3896 = vmatprep.subr.bf16.mxu0 %v3895_v35  ;;  %v317_v34 = vld [vmem:[%s10477_s1 + $0x880] sm:$0xff] }
  0x78   :  { %4680 = vmatprep.subr.bf16.mxu1 %v4679_v39  ;;  %v321_v35 = vld [vmem:[%s10477_s1 + $0x8a0] sm:$0xff]  ;;  %v326_v39 = vld [vmem:[%s10477_s1 + $0x8c8] sm:$0xff] }
  0x79   :  { %v3917_v43 = vpack.c.bf16 %v321_v35, %v317_v34  ;;  %v363_v34 = vld [vmem:[%s10477_s1 + $0x9f0] sm:$0xff]  ;;  %v366_v35 = vld [vmem:[%s10477_s1 + $0xa08] sm:$0xff] }
  0x7a   :  { %3898 = vmatpush1.bf16.msra.mxu0 %v3897_v45  ;;  %v3919_v45 = vpack.c.bf16 %v330_v40, %v326_v39  ;;  %v3939_v41 = vpack.c.bf16 %v370_v36, %v366_v35 }
  0x7b   :  { %4682 = vmatpush1.bf16.msra.mxu1 %v4681_v46  ;;  %3900 = vmatprep.subr.bf16.mxu0 %v3899_v47  ;;  %v325_v46 = vld [vmem:[%s10477_s1 + $0x8c0] sm:$0xff] }
  0x7c   :  { %4684 = vmatprep.subr.bf16.mxu1 %v4683_v51  ;;  %v329_v47 = vld [vmem:[%s10477_s1 + $0x8e0] sm:$0xff]  ;;  %v334_v51 = vld [vmem:[%s10477_s1 + $0x908] sm:$0xff] }
  0x7d   :  { %v3921_v55 = vpack.c.bf16 %v329_v47, %v325_v46  ;;  %v371_v46 = vld [vmem:[%s10477_s1 + $0xa30] sm:$0xff]  ;;  %v374_v47 = vld [vmem:[%s10477_s1 + $0xa48] sm:$0xff] }
  0x7e   :  { %3902 = vmatpush1.bf16.msra.mxu0 %v3901_v57  ;;  %v3923_v57 = vpack.c.bf16 %v338_v52, %v334_v51  ;;  %v3943_v53 = vpack.c.bf16 %v378_v48, %v374_v47 }
  0x7f   :  { %4686 = vmatpush1.bf16.msra.mxu1 %v4685_v58  ;;  %3904 = vmatprep.subr.bf16.mxu0 %v3903_v59  ;;  %v333_v58 = vld [vmem:[%s10477_s1 + $0x900] sm:$0xff] }
  0x80   :  { %4688 = vmatprep.subr.bf16.mxu1 %v4687_v63  ;;  %v337_v59 = vld [vmem:[%s10477_s1 + $0x920] sm:$0xff]  ;;  %v342_v63 = vld [vmem:[%s10477_s1 + $0x948] sm:$0xff] }
  0x81   :  { %v3925_v3 = vpack.c.bf16 %v337_v59, %v333_v58  ;;  %v379_v58 = vld [vmem:[%s10477_s1 + $0xa70] sm:$0xff]  ;;  %v382_v59 = vld [vmem:[%s10477_s1 + $0xa88] sm:$0xff] }
  0x82   :  { %3906 = vmatpush1.bf16.msra.mxu0 %v3905_v5  ;;  %v3927_v5 = vpack.c.bf16 %v346_v0, %v342_v63  ;;  %v3947_v1 = vpack.c.bf16 %v386_v60, %v382_v59 }
  0x83   :  { %4690 = vmatpush1.bf16.msra.mxu1 %v4689_v6  ;;  %3908 = vmatprep.subr.bf16.mxu0 %v3907_v7  ;;  %v341_v6 = vld [vmem:[%s10477_s1 + $0x940] sm:$0xff] }
  0x84   :  { %4692 = vmatprep.subr.bf16.mxu1 %v4691_v11  ;;  %v345_v7 = vld [vmem:[%s10477_s1 + $0x960] sm:$0xff]  ;;  %v350_v11 = vld [vmem:[%s10477_s1 + $0x988] sm:$0xff] }
  0x85   :  { %1775 = vmatmul.mubr.f32.vlgmr.msra.gmra.mrb[0].mxu0 %v22_v17  ;;  %v3929_v15 = vpack.c.bf16 %v345_v7, %v341_v6  ;;  %v387_v6 = vld [vmem:[%s10477_s1 + $0xab0] sm:$0xff]  ;;  %v390_v7 = vld [vmem:[%s10477_s1 + $0xac8] sm:$0xff] }
  0x86   :  { %3910 = vmatpush1.bf16.msra.mxu0 %v3909_v18  ;;  %2698 = vmatmul.mubr.f32.vlgmr.msra.gmra.mrb[0].mxu1 %v22_v17  ;;  %v3931_v17 = vpack.c.bf16 %v354_v12, %v350_v11  ;;  %v349_v18 = vld [vmem:[%s10477_s1 + $0x980] sm:$0xff]  ;;  %v3951_v13 = vpack.c.bf16 %v394_v8, %v390_v7 }
  0x87   :  { %4694 = vmatpush1.bf16.msra.mxu1 %v4693_v19  ;;  %3912 = vmatprep.subr.bf16.mxu0 %v3911_v20  ;;  %v353_v19 = vld [vmem:[%s10477_s1 + $0x9a0] sm:$0xff]  ;;  %v351_v20 = vld [vmem:[%s10477_s1 + $0x990] sm:$0xff] }
  0x88   :  { %4696 = vmatprep.subr.bf16.mxu1 %v4695_v24  ;;  %1845 = vmatprep.mubr.f32.mxu0 %v25_v30  ;;  %v362_v24 = vld [vmem:[%s10477_s1 + $0x9e8] sm:$0xff]  ;;  %v3933_v27 = vpack.c.bf16 %v353_v19, %v349_v18  ;;  %v4717_v28 = vpack.c.bf16 %v355_v22, %v351_v20  ;;  %v395_v18 = vld [vmem:[%s10477_s1 + $0xaf0] sm:$0xff]  ;;  %v404_v22 = vld [vmem:[%s10477_s1 + $0xb38] sm:$0xff] }
  0x89   :  { %2768 = vmatprep.mubr.f32.mxu1 %v25_v30  ;;  %v3935_v29 = vpack.c.bf16 %v362_v24, %v358_v23  ;;  %v357_v30 = vld [vmem:[%s10477_s1 + $0x9c0] sm:$0xff]  ;;  %v398_v19 = vld [vmem:[%s10477_s1 + $0xb08] sm:$0xff] }
  0x8a   :  { %3914 = vmatpush1.bf16.msra.mxu0 %v3913_v31  ;;  %v361_v31 = vld [vmem:[%s10477_s1 + $0x9e0] sm:$0xff]  ;;  %v402_v20 = vld [vmem:[%s10477_s1 + $0xb28] sm:$0xff] }
  0x8b   :  { %4698 = vmatpush1.bf16.msra.mxu1 %v4697_v32  ;;  %3916 = vmatprep.subr.bf16.mxu0 %v3915_v33  ;;  %v359_v32 = vld [vmem:[%s10477_s1 + $0x9d0] sm:$0xff]  ;;  %v4719_v33 = vpack.c.bf16 %v364_v26, %v360_v25  ;;  %v3937_v39 = vpack.c.bf16 %v361_v31, %v357_v30  ;;  %v3955_v25 = vpack.c.bf16 %v402_v20, %v398_v19  ;;  %v397_v26 = vld [vmem:[%s10477_s1 + $0xb00] sm:$0xff]  ;;  %v406_v31 = vld [vmem:[%s10477_s1 + $0xb48] sm:$0xff] }
  0x8c   :  { %4700 = vmatprep.subr.bf16.mxu1 %v4699_v37  ;;  %v368_v37 = vld [vmem:[%s10477_s1 + $0xa18] sm:$0xff]  ;;  %v4721_v40 = vpack.c.bf16 %v363_v34, %v359_v32  ;;  %v403_v30 = vld [vmem:[%s10477_s1 + $0xb30] sm:$0xff]  ;;  %v410_v32 = vld [vmem:[%s10477_s1 + $0xb68] sm:$0xff] }
  0x8d   :  { %v412_v34 = vld [vmem:[%s10477_s1 + $0xb78] sm:$0xff]  ;;  %v24_v19 = vld [vmem:[%s10478_s0 + $0x20] sm:$0xff] }
  0x8e   :  { %3918 = vmatpush1.bf16.msra.mxu0 %v3917_v43  ;;  %v369_v43 = vld [vmem:[%s10477_s1 + $0xa20] sm:$0xff] }
  0x8f   :  { %4702 = vmatpush1.bf16.msra.mxu1 %v4701_v44  ;;  %3920 = vmatprep.subr.bf16.mxu0 %v3919_v45  ;;  %v367_v44 = vld [vmem:[%s10477_s1 + $0xa10] sm:$0xff]  ;;  %v4723_v45 = vpack.c.bf16 %v372_v38, %v368_v37  ;;  %v3941_v51 = vpack.c.bf16 %v369_v43, %v365_v42  ;;  %v3959_v37 = vpack.c.bf16 %v410_v32, %v406_v31  ;;  %v405_v38 = vld [vmem:[%s10477_s1 + $0xb40] sm:$0xff]  ;;  %v414_v43 = vld [vmem:[%s10477_s1 + $0xb88] sm:$0xff] }
  0x90   :  { %4704 = vmatprep.subr.bf16.mxu1 %v4703_v49  ;;  %v376_v49 = vld [vmem:[%s10477_s1 + $0xa58] sm:$0xff]  ;;  %v4725_v52 = vpack.c.bf16 %v371_v46, %v367_v44  ;;  %v411_v42 = vld [vmem:[%s10477_s1 + $0xb70] sm:$0xff]  ;;  %v418_v44 = vld [vmem:[%s10477_s1 + $0xba8] sm:$0xff] }
  0x91   :  { %v420_v46 = vld [vmem:[%s10477_s1 + $0xbb8] sm:$0xff] }
  0x92   :  { %3922 = vmatpush1.bf16.msra.mxu0 %v3921_v55  ;;  %v377_v55 = vld [vmem:[%s10477_s1 + $0xa60] sm:$0xff]  ;;  %v452_v31 = vld [vmem:[%s10477_s1 + $0xcb8] sm:$0xff] }
  0x93   :  { %4706 = vmatpush1.bf16.msra.mxu1 %v4705_v56  ;;  %3924 = vmatprep.subr.bf16.mxu0 %v3923_v57  ;;  %v375_v56 = vld [vmem:[%s10477_s1 + $0xa50] sm:$0xff]  ;;  %v4727_v57 = vpack.c.bf16 %v380_v50, %v376_v49  ;;  %v3945_v63 = vpack.c.bf16 %v377_v55, %v373_v54  ;;  %v3963_v49 = vpack.c.bf16 %v418_v44, %v414_v43  ;;  %v413_v50 = vld [vmem:[%s10477_s1 + $0xb80] sm:$0xff]  ;;  %v422_v55 = vld [vmem:[%s10477_s1 + $0xbc8] sm:$0xff] }
  0x94   :  { %4708 = vmatprep.subr.bf16.mxu1 %v4707_v61  ;;  %v384_v61 = vld [vmem:[%s10477_s1 + $0xa98] sm:$0xff]  ;;  %v4729_v0 = vpack.c.bf16 %v379_v58, %v375_v56  ;;  %v419_v54 = vld [vmem:[%s10477_s1 + $0xbb0] sm:$0xff]  ;;  %v426_v56 = vld [vmem:[%s10477_s1 + $0xbe8] sm:$0xff] }
  0x95   :  { %v428_v58 = vld [vmem:[%s10477_s1 + $0xbf8] sm:$0xff] }
  0x96   :  { %3926 = vmatpush1.bf16.msra.mxu0 %v3925_v3  ;;  %v385_v3 = vld [vmem:[%s10477_s1 + $0xaa0] sm:$0xff]  ;;  %v27_v32 = vld [vmem:[%s10478_s0 + $0x38] sm:$0xff] }
  0x97   :  { %4710 = vmatpush1.bf16.msra.mxu1 %v4709_v4  ;;  %3928 = vmatprep.subr.bf16.mxu0 %v3927_v5  ;;  %v383_v4 = vld [vmem:[%s10477_s1 + $0xa90] sm:$0xff]  ;;  %v4731_v5 = vpack.c.bf16 %v388_v62, %v384_v61  ;;  %v3949_v11 = vpack.c.bf16 %v385_v3, %v381_v2  ;;  %v3967_v61 = vpack.c.bf16 %v426_v56, %v422_v55  ;;  %v421_v62 = vld [vmem:[%s10477_s1 + $0xbc0] sm:$0xff]  ;;  %v430_v3 = vld [vmem:[%s10477_s1 + $0xc08] sm:$0xff] }
  0x98   :  { %4712 = vmatprep.subr.bf16.mxu1 %v4711_v9  ;;  %v392_v9 = vld [vmem:[%s10477_s1 + $0xad8] sm:$0xff]  ;;  %v4733_v12 = vpack.c.bf16 %v387_v6, %v383_v4  ;;  %v427_v2 = vld [vmem:[%s10477_s1 + $0xbf0] sm:$0xff]  ;;  %v434_v4 = vld [vmem:[%s10477_s1 + $0xc28] sm:$0xff] }
  0x99   :  { %v436_v6 = vld [vmem:[%s10477_s1 + $0xc38] sm:$0xff] }
  0x9a   :  { %3930 = vmatpush1.bf16.msra.mxu0 %v3929_v15  ;;  %v393_v15 = vld [vmem:[%s10477_s1 + $0xae0] sm:$0xff]  ;;  %v456_v43 = vld [vmem:[%s10477_s1 + $0xcd8] sm:$0xff] }
  0x9b   :  { %4714 = vmatpush1.bf16.msra.mxu1 %v4713_v16  ;;  %3932 = vmatprep.subr.bf16.mxu0 %v3931_v17  ;;  %v391_v16 = vld [vmem:[%s10477_s1 + $0xad0] sm:$0xff]  ;;  %v4735_v17 = vpack.c.bf16 %v396_v10, %v392_v9  ;;  %v3953_v23 = vpack.c.bf16 %v393_v15, %v389_v14  ;;  %v3971_v9 = vpack.c.bf16 %v434_v4, %v430_v3  ;;  %v429_v10 = vld [vmem:[%s10477_s1 + $0xc00] sm:$0xff]  ;;  %v438_v15 = vld [vmem:[%s10477_s1 + $0xc48] sm:$0xff] }
  0x9c   :  { %4716 = vmatprep.subr.bf16.mxu1 %v4715_v21  ;;  %v400_v21 = vld [vmem:[%s10477_s1 + $0xb18] sm:$0xff]  ;;  %v4737_v24 = vpack.c.bf16 %v395_v18, %v391_v16  ;;  %v435_v14 = vld [vmem:[%s10477_s1 + $0xc30] sm:$0xff]  ;;  %v442_v16 = vld [vmem:[%s10477_s1 + $0xc68] sm:$0xff] }
  0x9d   :  { %v444_v18 = vld [vmem:[%s10477_s1 + $0xc78] sm:$0xff] }
  0x9e   :  { %3934 = vmatpush1.bf16.msra.mxu0 %v3933_v27  ;;  %v401_v27 = vld [vmem:[%s10477_s1 + $0xb20] sm:$0xff]  ;;  %v460_v44 = vld [vmem:[%s10477_s1 + $0xcf8] sm:$0xff] }
  0x9f   :  { %4718 = vmatpush1.bf16.msra.mxu1 %v4717_v28  ;;  %3936 = vmatprep.subr.bf16.mxu0 %v3935_v29  ;;  %v399_v28 = vld [vmem:[%s10477_s1 + $0xb10] sm:$0xff]  ;;  %v4739_v29 = vpack.c.bf16 %v404_v22, %v400_v21  ;;  %v3957_v35 = vpack.c.bf16 %v401_v27, %v397_v26  ;;  %v3975_v22 = vpack.c.bf16 %v442_v16, %v438_v15  ;;  %v464_v55 = vld [vmem:[%s10477_s1 + $0xd18] sm:$0xff] }
  0xa0   :  { %4720 = vmatprep.subr.bf16.mxu1 %v4719_v33  ;;  %v408_v33 = vld [vmem:[%s10477_s1 + $0xb58] sm:$0xff]  ;;  %v4741_v36 = vpack.c.bf16 %v403_v30, %v399_v28  ;;  %v443_v27 = vld [vmem:[%s10477_s1 + $0xc70] sm:$0xff]  ;;  %v446_v28 = vld [vmem:[%s10477_s1 + $0xc88] sm:$0xff] }
  0xa1   :  { %v448_v30 = vld [vmem:[%s10477_s1 + $0xc98] sm:$0xff] }
  0xa2   :  { %3938 = vmatpush1.bf16.msra.mxu0 %v3937_v39  ;;  %v409_v39 = vld [vmem:[%s10477_s1 + $0xb60] sm:$0xff]  ;;  %v468_v56 = vld [vmem:[%s10477_s1 + $0xd38] sm:$0xff] }
  0xa3   :  { %4722 = vmatpush1.bf16.msra.mxu1 %v4721_v40  ;;  %3940 = vmatprep.subr.bf16.mxu0 %v3939_v41  ;;  %v407_v40 = vld [vmem:[%s10477_s1 + $0xb50] sm:$0xff]  ;;  %v4743_v41 = vpack.c.bf16 %v412_v34, %v408_v33  ;;  %v3961_v47 = vpack.c.bf16 %v409_v39, %v405_v38  ;;  %v4763_v39 = vpack.c.bf16 %v452_v31, %v448_v30  ;;  %v472_v3 = vld [vmem:[%s10477_s1 + $0xd58] sm:$0xff] }
  0xa4   :  { %4724 = vmatprep.subr.bf16.mxu1 %v4723_v45  ;;  %v416_v45 = vld [vmem:[%s10477_s1 + $0xb98] sm:$0xff]  ;;  %v4745_v48 = vpack.c.bf16 %v411_v42, %v407_v40  ;;  %v447_v38 = vld [vmem:[%s10477_s1 + $0xc90] sm:$0xff]  ;;  %v458_v42 = vld [vmem:[%s10477_s1 + $0xce8] sm:$0xff] }
  0xa5   :  { %v451_v40 = vld [vmem:[%s10477_s1 + $0xcb0] sm:$0xff]  ;;  %v476_v4 = vld [vmem:[%s10477_s1 + $0xd78] sm:$0xff] }
  0xa6   :  { %3942 = vmatpush1.bf16.msra.mxu0 %v3941_v51  ;;  %v417_v51 = vld [vmem:[%s10477_s1 + $0xba0] sm:$0xff]  ;;  %v480_v15 = vld [vmem:[%s10477_s1 + $0xd98] sm:$0xff] }
  0xa7   :  { %4726 = vmatpush1.bf16.msra.mxu1 %v4725_v52  ;;  %3944 = vmatprep.subr.bf16.mxu0 %v3943_v53  ;;  %v415_v52 = vld [vmem:[%s10477_s1 + $0xb90] sm:$0xff]  ;;  %v4747_v53 = vpack.c.bf16 %v420_v46, %v416_v45  ;;  %v3965_v59 = vpack.c.bf16 %v417_v51, %v413_v50  ;;  %v4765_v46 = vpack.c.bf16 %v451_v40, %v447_v38  ;;  %v484_v16 = vld [vmem:[%s10477_s1 + $0xdb8] sm:$0xff]  ;;  %v498_v38 = vld [vmem:[%s10477_s1 + $0xe28] sm:$0xff] }
  0xa8   :  { %4728 = vmatprep.subr.bf16.mxu1 %v4727_v57  ;;  %v424_v57 = vld [vmem:[%s10477_s1 + $0xbd8] sm:$0xff]  ;;  %v4749_v60 = vpack.c.bf16 %v419_v54, %v415_v52  ;;  %v455_v50 = vld [vmem:[%s10477_s1 + $0xcd0] sm:$0xff]  ;;  %v4767_v51 = vpack.c.bf16 %v460_v44, %v456_v43  ;;  %v466_v54 = vld [vmem:[%s10477_s1 + $0xd28] sm:$0xff] }
  0xa9   :  { %v459_v52 = vld [vmem:[%s10477_s1 + $0xcf0] sm:$0xff]  ;;  %v500_v40 = vld [vmem:[%s10477_s1 + $0xe38] sm:$0xff]  ;;  %v493_v44 = vld [vmem:[%s10477_s1 + $0xe00] sm:$0xff] }
  0xaa   :  { %3946 = vmatpush1.bf16.msra.mxu0 %v3945_v63  ;;  %v425_v63 = vld [vmem:[%s10477_s1 + $0xbe0] sm:$0xff] }
  0xab   :  { %4730 = vmatpush1.bf16.msra.mxu1 %v4729_v0  ;;  %3948 = vmatprep.subr.bf16.mxu0 %v3947_v1  ;;  %v423_v0 = vld [vmem:[%s10477_s1 + $0xbd0] sm:$0xff]  ;;  %v4751_v1 = vpack.c.bf16 %v428_v58, %v424_v57  ;;  %v3969_v7 = vpack.c.bf16 %v425_v63, %v421_v62  ;;  %v4769_v58 = vpack.c.bf16 %v459_v52, %v455_v50  ;;  %v506_v50 = vld [vmem:[%s10477_s1 + $0xe68] sm:$0xff]  ;;  %v508_v52 = vld [vmem:[%s10477_s1 + $0xe78] sm:$0xff] }
  0xac   :  { %4732 = vmatprep.subr.bf16.mxu1 %v4731_v5  ;;  %v432_v5 = vld [vmem:[%s10477_s1 + $0xc18] sm:$0xff]  ;;  %v4753_v8 = vpack.c.bf16 %v427_v2, %v423_v0  ;;  %v463_v62 = vld [vmem:[%s10477_s1 + $0xd10] sm:$0xff]  ;;  %v4771_v63 = vpack.c.bf16 %v468_v56, %v464_v55  ;;  %v474_v2 = vld [vmem:[%s10477_s1 + $0xd68] sm:$0xff] }
  0xad   :  { %v467_v0 = vld [vmem:[%s10477_s1 + $0xd30] sm:$0xff]  ;;  %v501_v56 = vld [vmem:[%s10477_s1 + $0xe40] sm:$0xff] }
  0xae   :  { %3950 = vmatpush1.bf16.msra.mxu0 %v3949_v11  ;;  %v433_v11 = vld [vmem:[%s10477_s1 + $0xc20] sm:$0xff] }
  0xaf   :  { %4734 = vmatpush1.bf16.msra.mxu1 %v4733_v12  ;;  %3952 = vmatprep.subr.bf16.mxu0 %v3951_v13  ;;  %v431_v12 = vld [vmem:[%s10477_s1 + $0xc10] sm:$0xff]  ;;  %v4755_v13 = vpack.c.bf16 %v436_v6, %v432_v5  ;;  %v3973_v20 = vpack.c.bf16 %v433_v11, %v429_v10  ;;  %v4773_v6 = vpack.c.bf16 %v467_v0, %v463_v62  ;;  %v514_v62 = vld [vmem:[%s10477_s1 + $0xea8] sm:$0xff]  ;;  %v516_v0 = vld [vmem:[%s10477_s1 + $0xeb8] sm:$0xff] }
  0xb0   :  { %4736 = vmatprep.subr.bf16.mxu1 %v4735_v17  ;;  %v440_v17 = vld [vmem:[%s10477_s1 + $0xc58] sm:$0xff]  ;;  %v4757_v21 = vpack.c.bf16 %v435_v14, %v431_v12  ;;  %v471_v10 = vld [vmem:[%s10477_s1 + $0xd50] sm:$0xff]  ;;  %v4775_v11 = vpack.c.bf16 %v476_v4, %v472_v3  ;;  %v482_v14 = vld [vmem:[%s10477_s1 + $0xda8] sm:$0xff] }
  0xb1   :  { %v4759_v26 = vpack.c.bf16 %v444_v18, %v440_v17  ;;  %v475_v12 = vld [vmem:[%s10477_s1 + $0xd70] sm:$0xff]  ;;  %v509_v4 = vld [vmem:[%s10477_s1 + $0xe80] sm:$0xff] }
  0xb2   :  { %3954 = vmatpush1.bf16.msra.mxu0 %v3953_v23  ;;  %v437_v23 = vld [vmem:[%s10477_s1 + $0xc40] sm:$0xff]  ;;  %v4777_v18 = vpack.c.bf16 %v475_v12, %v471_v10  ;;  %v522_v10 = vld [vmem:[%s10477_s1 + $0xee8] sm:$0xff]  ;;  %v524_v12 = vld [vmem:[%s10477_s1 + $0xef8] sm:$0xff] }
  0xb3   :  { %4738 = vmatpush1.bf16.msra.mxu1 %v4737_v24  ;;  %3956 = vmatprep.subr.bf16.mxu0 %v3955_v25  ;;  %v441_v24 = vld [vmem:[%s10477_s1 + $0xc60] sm:$0xff]  ;;  %v439_v25 = vld [vmem:[%s10477_s1 + $0xc50] sm:$0xff] }
  0xb4   :  { %4740 = vmatprep.subr.bf16.mxu1 %v4739_v29  ;;  %v450_v29 = vld [vmem:[%s10477_s1 + $0xca8] sm:$0xff]  ;;  %v3977_v33 = vpack.c.bf16 %v441_v24, %v437_v23  ;;  %v4761_v34 = vpack.c.bf16 %v443_v27, %v439_v25  ;;  %v4779_v23 = vpack.c.bf16 %v484_v16, %v480_v15  ;;  %v483_v24 = vld [vmem:[%s10477_s1 + $0xdb0] sm:$0xff]  ;;  %v488_v27 = vld [vmem:[%s10477_s1 + $0xdd8] sm:$0xff] }
  0xb5   :  { %v486_v25 = vld [vmem:[%s10477_s1 + $0xdc8] sm:$0xff]  ;;  %v517_v16 = vld [vmem:[%s10477_s1 + $0xec0] sm:$0xff] }
  0xb6   :  { %3958 = vmatpush1.bf16.msra.mxu0 %v3957_v35  ;;  %v3979_v35 = vpack.c.bf16 %v450_v29, %v446_v28  ;;  %v492_v28 = vld [vmem:[%s10477_s1 + $0xdf8] sm:$0xff] }
  0xb7   :  { %4742 = vmatpush1.bf16.msra.mxu1 %v4741_v36  ;;  %3960 = vmatprep.subr.bf16.mxu0 %v3959_v37  ;;  %v445_v36 = vld [vmem:[%s10477_s1 + $0xc80] sm:$0xff] }
  0xb8   :  { %4744 = vmatprep.subr.bf16.mxu1 %v4743_v41  ;;  %v449_v37 = vld [vmem:[%s10477_s1 + $0xca0] sm:$0xff]  ;;  %v454_v41 = vld [vmem:[%s10477_s1 + $0xcc8] sm:$0xff] }
  0xb9   :  { %v3981_v45 = vpack.c.bf16 %v449_v37, %v445_v36  ;;  %v491_v36 = vld [vmem:[%s10477_s1 + $0xdf0] sm:$0xff]  ;;  %v494_v37 = vld [vmem:[%s10477_s1 + $0xe08] sm:$0xff] }
  0xba   :  { %3962 = vmatpush1.bf16.msra.mxu0 %v3961_v47  ;;  %v3983_v47 = vpack.c.bf16 %v458_v42, %v454_v41  ;;  %v4003_v43 = vpack.c.bf16 %v498_v38, %v494_v37 }
  0xbb   :  { %4746 = vmatpush1.bf16.msra.mxu1 %v4745_v48  ;;  %3964 = vmatprep.subr.bf16.mxu0 %v3963_v49  ;;  %v453_v48 = vld [vmem:[%s10477_s1 + $0xcc0] sm:$0xff] }
  0xbc   :  { %4748 = vmatprep.subr.bf16.mxu1 %v4747_v53  ;;  %v457_v49 = vld [vmem:[%s10477_s1 + $0xce0] sm:$0xff]  ;;  %v462_v53 = vld [vmem:[%s10477_s1 + $0xd08] sm:$0xff] }
  0xbd   :  { %v3985_v57 = vpack.c.bf16 %v457_v49, %v453_v48  ;;  %v499_v48 = vld [vmem:[%s10477_s1 + $0xe30] sm:$0xff]  ;;  %v502_v49 = vld [vmem:[%s10477_s1 + $0xe48] sm:$0xff] }
  0xbe   :  { %3966 = vmatpush1.bf16.msra.mxu0 %v3965_v59  ;;  %v3987_v59 = vpack.c.bf16 %v466_v54, %v462_v53  ;;  %v4007_v55 = vpack.c.bf16 %v506_v50, %v502_v49 }
  0xbf   :  { %4750 = vmatpush1.bf16.msra.mxu1 %v4749_v60  ;;  %3968 = vmatprep.subr.bf16.mxu0 %v3967_v61  ;;  %v461_v60 = vld [vmem:[%s10477_s1 + $0xd00] sm:$0xff] }
  0xc0   :  { %4752 = vmatprep.subr.bf16.mxu1 %v4751_v1  ;;  %v465_v61 = vld [vmem:[%s10477_s1 + $0xd20] sm:$0xff]  ;;  %v470_v1 = vld [vmem:[%s10477_s1 + $0xd48] sm:$0xff] }
  0xc1   :  { %v3989_v5 = vpack.c.bf16 %v465_v61, %v461_v60  ;;  %v507_v60 = vld [vmem:[%s10477_s1 + $0xe70] sm:$0xff]  ;;  %v510_v61 = vld [vmem:[%s10477_s1 + $0xe88] sm:$0xff] }
  0xc2   :  { %3970 = vmatpush1.bf16.msra.mxu0 %v3969_v7  ;;  %v3991_v7 = vpack.c.bf16 %v474_v2, %v470_v1  ;;  %v4011_v3 = vpack.c.bf16 %v514_v62, %v510_v61 }
  0xc3   :  { %4754 = vmatpush1.bf16.msra.mxu1 %v4753_v8  ;;  %3972 = vmatprep.subr.bf16.mxu0 %v3971_v9  ;;  %v469_v8 = vld [vmem:[%s10477_s1 + $0xd40] sm:$0xff] }
  0xc4   :  { %4756 = vmatprep.subr.bf16.mxu1 %v4755_v13  ;;  %v473_v9 = vld [vmem:[%s10477_s1 + $0xd60] sm:$0xff]  ;;  %v478_v13 = vld [vmem:[%s10477_s1 + $0xd88] sm:$0xff] }
  0xc5   :  { %1846 = vmatmul.mubr.f32.vlgmr.msra.gmra.mrb[0].mxu0 %v24_v19  ;;  %v3993_v17 = vpack.c.bf16 %v473_v9, %v469_v8  ;;  %v515_v8 = vld [vmem:[%s10477_s1 + $0xeb0] sm:$0xff]  ;;  %v518_v9 = vld [vmem:[%s10477_s1 + $0xec8] sm:$0xff] }
  0xc6   :  { %3974 = vmatpush1.bf16.msra.mxu0 %v3973_v20  ;;  %2769 = vmatmul.mubr.f32.vlgmr.msra.gmra.mrb[0].mxu1 %v24_v19  ;;  %v3995_v19 = vpack.c.bf16 %v482_v14, %v478_v13  ;;  %v477_v20 = vld [vmem:[%s10477_s1 + $0xd80] sm:$0xff]  ;;  %v4015_v15 = vpack.c.bf16 %v522_v10, %v518_v9 }
  0xc7   :  { %4758 = vmatpush1.bf16.msra.mxu1 %v4757_v21  ;;  %3976 = vmatprep.subr.bf16.mxu0 %v3975_v22  ;;  %v481_v21 = vld [vmem:[%s10477_s1 + $0xda0] sm:$0xff]  ;;  %v479_v22 = vld [vmem:[%s10477_s1 + $0xd90] sm:$0xff] }
  0xc8   :  { %4760 = vmatprep.subr.bf16.mxu1 %v4759_v26  ;;  %1916 = vmatprep.mubr.f32.mxu0 %v27_v32  ;;  %v490_v26 = vld [vmem:[%s10477_s1 + $0xde8] sm:$0xff]  ;;  %v3997_v29 = vpack.c.bf16 %v481_v21, %v477_v20  ;;  %v4781_v30 = vpack.c.bf16 %v483_v24, %v479_v22  ;;  %v523_v20 = vld [vmem:[%s10477_s1 + $0xef0] sm:$0xff]  ;;  %v532_v24 = vld [vmem:[%s10477_s1 + $0xf38] sm:$0xff] }
  0xc9   :  { %2839 = vmatprep.mubr.f32.mxu1 %v27_v32  ;;  %v3999_v31 = vpack.c.bf16 %v490_v26, %v486_v25  ;;  %v485_v32 = vld [vmem:[%s10477_s1 + $0xdc0] sm:$0xff]  ;;  %v526_v21 = vld [vmem:[%s10477_s1 + $0xf08] sm:$0xff] }
  0xca   :  { %3978 = vmatpush1.bf16.msra.mxu0 %v3977_v33  ;;  %v489_v33 = vld [vmem:[%s10477_s1 + $0xde0] sm:$0xff]  ;;  %v530_v22 = vld [vmem:[%s10477_s1 + $0xf28] sm:$0xff] }
  0xcb   :  { %4762 = vmatpush1.bf16.msra.mxu1 %v4761_v34  ;;  %3980 = vmatprep.subr.bf16.mxu0 %v3979_v35  ;;  %v487_v34 = vld [vmem:[%s10477_s1 + $0xdd0] sm:$0xff]  ;;  %v4783_v35 = vpack.c.bf16 %v492_v28, %v488_v27  ;;  %v4001_v41 = vpack.c.bf16 %v489_v33, %v485_v32  ;;  %v4019_v27 = vpack.c.bf16 %v530_v22, %v526_v21  ;;  %v525_v28 = vld [vmem:[%s10477_s1 + $0xf00] sm:$0xff]  ;;  %v534_v33 = vld [vmem:[%s10477_s1 + $0xf48] sm:$0xff] }
  0xcc   :  { %4764 = vmatprep.subr.bf16.mxu1 %v4763_v39  ;;  %v496_v39 = vld [vmem:[%s10477_s1 + $0xe18] sm:$0xff]  ;;  %v4785_v42 = vpack.c.bf16 %v491_v36, %v487_v34  ;;  %v531_v32 = vld [vmem:[%s10477_s1 + $0xf30] sm:$0xff]  ;;  %v538_v34 = vld [vmem:[%s10477_s1 + $0xf68] sm:$0xff] }
  0xcd   :  { %v540_v36 = vld [vmem:[%s10477_s1 + $0xf78] sm:$0xff]  ;;  %v26_v21 = vld [vmem:[%s10478_s0 + $0x30] sm:$0xff] }
  0xce   :  { %3982 = vmatpush1.bf16.msra.mxu0 %v3981_v45  ;;  %v497_v45 = vld [vmem:[%s10477_s1 + $0xe20] sm:$0xff] }
  0xcf   :  { %4766 = vmatpush1.bf16.msra.mxu1 %v4765_v46  ;;  %3984 = vmatprep.subr.bf16.mxu0 %v3983_v47  ;;  %v495_v46 = vld [vmem:[%s10477_s1 + $0xe10] sm:$0xff]  ;;  %v4787_v47 = vpack.c.bf16 %v500_v40, %v496_v39  ;;  %v4005_v53 = vpack.c.bf16 %v497_v45, %v493_v44  ;;  %v4023_v39 = vpack.c.bf16 %v538_v34, %v534_v33  ;;  %v533_v40 = vld [vmem:[%s10477_s1 + $0xf40] sm:$0xff]  ;;  %v542_v45 = vld [vmem:[%s10477_s1 + $0xf88] sm:$0xff] }
  0xd0   :  { %4768 = vmatprep.subr.bf16.mxu1 %v4767_v51  ;;  %v504_v51 = vld [vmem:[%s10477_s1 + $0xe58] sm:$0xff]  ;;  %v4789_v54 = vpack.c.bf16 %v499_v48, %v495_v46  ;;  %v539_v44 = vld [vmem:[%s10477_s1 + $0xf70] sm:$0xff]  ;;  %v546_v46 = vld [vmem:[%s10477_s1 + $0xfa8] sm:$0xff] }
  0xd1   :  { %v548_v48 = vld [vmem:[%s10477_s1 + $0xfb8] sm:$0xff]  ;;  %v29_v34 = vld [vmem:[%s10478_s0 + $0x48] sm:$0xff] }
  0xd2   :  { %3986 = vmatpush1.bf16.msra.mxu0 %v3985_v57  ;;  %v505_v57 = vld [vmem:[%s10477_s1 + $0xe60] sm:$0xff]  ;;  %v580_v33 = vld [vmem:[%s10477_s1 + $0x10b8] sm:$0xff] }
  0xd3   :  { %4770 = vmatpush1.bf16.msra.mxu1 %v4769_v58  ;;  %3988 = vmatprep.subr.bf16.mxu0 %v3987_v59  ;;  %v503_v58 = vld [vmem:[%s10477_s1 + $0xe50] sm:$0xff]  ;;  %v4791_v59 = vpack.c.bf16 %v508_v52, %v504_v51  ;;  %v4009_v1 = vpack.c.bf16 %v505_v57, %v501_v56  ;;  %v4027_v51 = vpack.c.bf16 %v546_v46, %v542_v45  ;;  %v541_v52 = vld [vmem:[%s10477_s1 + $0xf80] sm:$0xff]  ;;  %v550_v57 = vld [vmem:[%s10477_s1 + $0xfc8] sm:$0xff] }
  0xd4   :  { %4772 = vmatprep.subr.bf16.mxu1 %v4771_v63  ;;  %v512_v63 = vld [vmem:[%s10477_s1 + $0xe98] sm:$0xff]  ;;  %v4793_v2 = vpack.c.bf16 %v507_v60, %v503_v58  ;;  %v547_v56 = vld [vmem:[%s10477_s1 + $0xfb0] sm:$0xff]  ;;  %v554_v58 = vld [vmem:[%s10477_s1 + $0xfe8] sm:$0xff] }
  0xd5   :  { %v556_v60 = vld [vmem:[%s10477_s1 + $0xff8] sm:$0xff] }
  0xd6   :  { %3990 = vmatpush1.bf16.msra.mxu0 %v3989_v5  ;;  %v513_v5 = vld [vmem:[%s10477_s1 + $0xea0] sm:$0xff]  ;;  %v584_v45 = vld [vmem:[%s10477_s1 + $0x10d8] sm:$0xff] }
  0xd7   :  { %4774 = vmatpush1.bf16.msra.mxu1 %v4773_v6  ;;  %3992 = vmatprep.subr.bf16.mxu0 %v3991_v7  ;;  %v511_v6 = vld [vmem:[%s10477_s1 + $0xe90] sm:$0xff]  ;;  %v4795_v7 = vpack.c.bf16 %v516_v0, %v512_v63  ;;  %v4013_v13 = vpack.c.bf16 %v513_v5, %v509_v4  ;;  %v4031_v63 = vpack.c.bf16 %v554_v58, %v550_v57  ;;  %v549_v0 = vld [vmem:[%s10477_s1 + $0xfc0] sm:$0xff]  ;;  %v558_v5 = vld [vmem:[%s10477_s1 + $0x1008] sm:$0xff] }
  0xd8   :  { %4776 = vmatprep.subr.bf16.mxu1 %v4775_v11  ;;  %v520_v11 = vld [vmem:[%s10477_s1 + $0xed8] sm:$0xff]  ;;  %v4797_v14 = vpack.c.bf16 %v515_v8, %v511_v6  ;;  %v555_v4 = vld [vmem:[%s10477_s1 + $0xff0] sm:$0xff]  ;;  %v562_v6 = vld [vmem:[%s10477_s1 + $0x1028] sm:$0xff] }
  0xd9   :  { %v564_v8 = vld [vmem:[%s10477_s1 + $0x1038] sm:$0xff] }
  0xda   :  { %3994 = vmatpush1.bf16.msra.mxu0 %v3993_v17  ;;  %v521_v17 = vld [vmem:[%s10477_s1 + $0xee0] sm:$0xff]  ;;  %v588_v46 = vld [vmem:[%s10477_s1 + $0x10f8] sm:$0xff] }
  0xdb   :  { %4778 = vmatpush1.bf16.msra.mxu1 %v4777_v18  ;;  %3996 = vmatprep.subr.bf16.mxu0 %v3995_v19  ;;  %v519_v18 = vld [vmem:[%s10477_s1 + $0xed0] sm:$0xff]  ;;  %v4799_v19 = vpack.c.bf16 %v524_v12, %v520_v11  ;;  %v4017_v25 = vpack.c.bf16 %v521_v17, %v517_v16  ;;  %v4035_v11 = vpack.c.bf16 %v562_v6, %v558_v5  ;;  %v557_v12 = vld [vmem:[%s10477_s1 + $0x1000] sm:$0xff]  ;;  %v566_v17 = vld [vmem:[%s10477_s1 + $0x1048] sm:$0xff] }
  0xdc   :  { %4780 = vmatprep.subr.bf16.mxu1 %v4779_v23  ;;  %v528_v23 = vld [vmem:[%s10477_s1 + $0xf18] sm:$0xff]  ;;  %v4801_v26 = vpack.c.bf16 %v523_v20, %v519_v18  ;;  %v563_v16 = vld [vmem:[%s10477_s1 + $0x1030] sm:$0xff]  ;;  %v570_v18 = vld [vmem:[%s10477_s1 + $0x1068] sm:$0xff] }
  0xdd   :  { %v572_v20 = vld [vmem:[%s10477_s1 + $0x1078] sm:$0xff] }
  0xde   :  { %3998 = vmatpush1.bf16.msra.mxu0 %v3997_v29  ;;  %v529_v29 = vld [vmem:[%s10477_s1 + $0xf20] sm:$0xff]  ;;  %v592_v57 = vld [vmem:[%s10477_s1 + $0x1118] sm:$0xff] }
  0xdf   :  { %4782 = vmatpush1.bf16.msra.mxu1 %v4781_v30  ;;  %4000 = vmatprep.subr.bf16.mxu0 %v3999_v31  ;;  %v527_v30 = vld [vmem:[%s10477_s1 + $0xf10] sm:$0xff]  ;;  %v4803_v31 = vpack.c.bf16 %v532_v24, %v528_v23  ;;  %v4021_v37 = vpack.c.bf16 %v529_v29, %v525_v28  ;;  %v4039_v24 = vpack.c.bf16 %v570_v18, %v566_v17  ;;  %v596_v58 = vld [vmem:[%s10477_s1 + $0x1138] sm:$0xff] }
  0xe0   :  { %4784 = vmatprep.subr.bf16.mxu1 %v4783_v35  ;;  %v536_v35 = vld [vmem:[%s10477_s1 + $0xf58] sm:$0xff]  ;;  %v4805_v38 = vpack.c.bf16 %v531_v32, %v527_v30  ;;  %v571_v29 = vld [vmem:[%s10477_s1 + $0x1070] sm:$0xff]  ;;  %v574_v30 = vld [vmem:[%s10477_s1 + $0x1088] sm:$0xff] }
  0xe1   :  { %v576_v32 = vld [vmem:[%s10477_s1 + $0x1098] sm:$0xff] }
  0xe2   :  { %4002 = vmatpush1.bf16.msra.mxu0 %v4001_v41  ;;  %v537_v41 = vld [vmem:[%s10477_s1 + $0xf60] sm:$0xff]  ;;  %v600_v5 = vld [vmem:[%s10477_s1 + $0x1158] sm:$0xff] }
  0xe3   :  { %4786 = vmatpush1.bf16.msra.mxu1 %v4785_v42  ;;  %4004 = vmatprep.subr.bf16.mxu0 %v4003_v43  ;;  %v535_v42 = vld [vmem:[%s10477_s1 + $0xf50] sm:$0xff]  ;;  %v4807_v43 = vpack.c.bf16 %v540_v36, %v536_v35  ;;  %v4025_v49 = vpack.c.bf16 %v537_v41, %v533_v40  ;;  %v4827_v41 = vpack.c.bf16 %v580_v33, %v576_v32  ;;  %v604_v6 = vld [vmem:[%s10477_s1 + $0x1178] sm:$0xff] }
  0xe4   :  { %4788 = vmatprep.subr.bf16.mxu1 %v4787_v47  ;;  %v544_v47 = vld [vmem:[%s10477_s1 + $0xf98] sm:$0xff]  ;;  %v4809_v50 = vpack.c.bf16 %v539_v44, %v535_v42  ;;  %v575_v40 = vld [vmem:[%s10477_s1 + $0x1090] sm:$0xff]  ;;  %v586_v44 = vld [vmem:[%s10477_s1 + $0x10e8] sm:$0xff] }
  0xe5   :  { %v579_v42 = vld [vmem:[%s10477_s1 + $0x10b0] sm:$0xff]  ;;  %v608_v17 = vld [vmem:[%s10477_s1 + $0x1198] sm:$0xff] }
  0xe6   :  { %4006 = vmatpush1.bf16.msra.mxu0 %v4005_v53  ;;  %v545_v53 = vld [vmem:[%s10477_s1 + $0xfa0] sm:$0xff]  ;;  %v612_v18 = vld [vmem:[%s10477_s1 + $0x11b8] sm:$0xff] }
  0xe7   :  { %4790 = vmatpush1.bf16.msra.mxu1 %v4789_v54  ;;  %4008 = vmatprep.subr.bf16.mxu0 %v4007_v55  ;;  %v543_v54 = vld [vmem:[%s10477_s1 + $0xf90] sm:$0xff]  ;;  %v4811_v55 = vpack.c.bf16 %v548_v48, %v544_v47  ;;  %v4029_v61 = vpack.c.bf16 %v545_v53, %v541_v52  ;;  %v4829_v48 = vpack.c.bf16 %v579_v42, %v575_v40  ;;  %v626_v40 = vld [vmem:[%s10477_s1 + $0x1228] sm:$0xff]  ;;  %v628_v42 = vld [vmem:[%s10477_s1 + $0x1238] sm:$0xff] }
  0xe8   :  { %4792 = vmatprep.subr.bf16.mxu1 %v4791_v59  ;;  %v552_v59 = vld [vmem:[%s10477_s1 + $0xfd8] sm:$0xff]  ;;  %v4813_v62 = vpack.c.bf16 %v547_v56, %v543_v54  ;;  %v583_v52 = vld [vmem:[%s10477_s1 + $0x10d0] sm:$0xff]  ;;  %v4831_v53 = vpack.c.bf16 %v588_v46, %v584_v45  ;;  %v594_v56 = vld [vmem:[%s10477_s1 + $0x1128] sm:$0xff] }
  0xe9   :  { %v587_v54 = vld [vmem:[%s10477_s1 + $0x10f0] sm:$0xff]  ;;  %v621_v46 = vld [vmem:[%s10477_s1 + $0x1200] sm:$0xff] }
  0xea   :  { %4010 = vmatpush1.bf16.msra.mxu0 %v4009_v1  ;;  %v553_v1 = vld [vmem:[%s10477_s1 + $0xfe0] sm:$0xff] }
  0xeb   :  { %4794 = vmatpush1.bf16.msra.mxu1 %v4793_v2  ;;  %4012 = vmatprep.subr.bf16.mxu0 %v4011_v3  ;;  %v551_v2 = vld [vmem:[%s10477_s1 + $0xfd0] sm:$0xff]  ;;  %v4815_v3 = vpack.c.bf16 %v556_v60, %v552_v59  ;;  %v4033_v9 = vpack.c.bf16 %v553_v1, %v549_v0  ;;  %v4833_v60 = vpack.c.bf16 %v587_v54, %v583_v52  ;;  %v634_v52 = vld [vmem:[%s10477_s1 + $0x1268] sm:$0xff]  ;;  %v636_v54 = vld [vmem:[%s10477_s1 + $0x1278] sm:$0xff] }
  0xec   :  { %4796 = vmatprep.subr.bf16.mxu1 %v4795_v7  ;;  %v560_v7 = vld [vmem:[%s10477_s1 + $0x1018] sm:$0xff]  ;;  %v4817_v10 = vpack.c.bf16 %v555_v4, %v551_v2  ;;  %v591_v0 = vld [vmem:[%s10477_s1 + $0x1110] sm:$0xff]  ;;  %v4835_v1 = vpack.c.bf16 %v596_v58, %v592_v57  ;;  %v602_v4 = vld [vmem:[%s10477_s1 + $0x1168] sm:$0xff] }
  0xed   :  { %v595_v2 = vld [vmem:[%s10477_s1 + $0x1130] sm:$0xff]  ;;  %v629_v58 = vld [vmem:[%s10477_s1 + $0x1240] sm:$0xff] }
  0xee   :  { %4014 = vmatpush1.bf16.msra.mxu0 %v4013_v13  ;;  %v561_v13 = vld [vmem:[%s10477_s1 + $0x1020] sm:$0xff] }
  0xef   :  { %4798 = vmatpush1.bf16.msra.mxu1 %v4797_v14  ;;  %4016 = vmatprep.subr.bf16.mxu0 %v4015_v15  ;;  %v559_v14 = vld [vmem:[%s10477_s1 + $0x1010] sm:$0xff]  ;;  %v4819_v15 = vpack.c.bf16 %v564_v8, %v560_v7  ;;  %v4037_v22 = vpack.c.bf16 %v561_v13, %v557_v12  ;;  %v4837_v8 = vpack.c.bf16 %v595_v2, %v591_v0  ;;  %v642_v0 = vld [vmem:[%s10477_s1 + $0x12a8] sm:$0xff]  ;;  %v644_v2 = vld [vmem:[%s10477_s1 + $0x12b8] sm:$0xff] }
  0xf0   :  { %4800 = vmatprep.subr.bf16.mxu1 %v4799_v19  ;;  %v568_v19 = vld [vmem:[%s10477_s1 + $0x1058] sm:$0xff]  ;;  %v4821_v23 = vpack.c.bf16 %v563_v16, %v559_v14  ;;  %v599_v12 = vld [vmem:[%s10477_s1 + $0x1150] sm:$0xff]  ;;  %v4839_v13 = vpack.c.bf16 %v604_v6, %v600_v5  ;;  %v610_v16 = vld [vmem:[%s10477_s1 + $0x11a8] sm:$0xff] }
  0xf1   :  { %v4823_v28 = vpack.c.bf16 %v572_v20, %v568_v19  ;;  %v603_v14 = vld [vmem:[%s10477_s1 + $0x1170] sm:$0xff]  ;;  %v637_v6 = vld [vmem:[%s10477_s1 + $0x1280] sm:$0xff] }
  0xf2   :  { %4018 = vmatpush1.bf16.msra.mxu0 %v4017_v25  ;;  %v565_v25 = vld [vmem:[%s10477_s1 + $0x1040] sm:$0xff]  ;;  %v4841_v20 = vpack.c.bf16 %v603_v14, %v599_v12  ;;  %v650_v12 = vld [vmem:[%s10477_s1 + $0x12e8] sm:$0xff]  ;;  %v652_v14 = vld [vmem:[%s10477_s1 + $0x12f8] sm:$0xff] }
  0xf3   :  { %4802 = vmatpush1.bf16.msra.mxu1 %v4801_v26  ;;  %4020 = vmatprep.subr.bf16.mxu0 %v4019_v27  ;;  %v569_v26 = vld [vmem:[%s10477_s1 + $0x1060] sm:$0xff]  ;;  %v567_v27 = vld [vmem:[%s10477_s1 + $0x1050] sm:$0xff] }
  0xf4   :  { %4804 = vmatprep.subr.bf16.mxu1 %v4803_v31  ;;  %v578_v31 = vld [vmem:[%s10477_s1 + $0x10a8] sm:$0xff]  ;;  %v4041_v35 = vpack.c.bf16 %v569_v26, %v565_v25  ;;  %v4825_v36 = vpack.c.bf16 %v571_v29, %v567_v27  ;;  %v4843_v25 = vpack.c.bf16 %v612_v18, %v608_v17  ;;  %v611_v26 = vld [vmem:[%s10477_s1 + $0x11b0] sm:$0xff]  ;;  %v616_v29 = vld [vmem:[%s10477_s1 + $0x11d8] sm:$0xff] }
  0xf5   :  { %v614_v27 = vld [vmem:[%s10477_s1 + $0x11c8] sm:$0xff]  ;;  %v645_v18 = vld [vmem:[%s10477_s1 + $0x12c0] sm:$0xff] }
  0xf6   :  { %4022 = vmatpush1.bf16.msra.mxu0 %v4021_v37  ;;  %v4043_v37 = vpack.c.bf16 %v578_v31, %v574_v30  ;;  %v620_v30 = vld [vmem:[%s10477_s1 + $0x11f8] sm:$0xff] }
  0xf7   :  { %4806 = vmatpush1.bf16.msra.mxu1 %v4805_v38  ;;  %4024 = vmatprep.subr.bf16.mxu0 %v4023_v39  ;;  %v573_v38 = vld [vmem:[%s10477_s1 + $0x1080] sm:$0xff] }
  0xf8   :  { %4808 = vmatprep.subr.bf16.mxu1 %v4807_v43  ;;  %v577_v39 = vld [vmem:[%s10477_s1 + $0x10a0] sm:$0xff]  ;;  %v582_v43 = vld [vmem:[%s10477_s1 + $0x10c8] sm:$0xff] }
  0xf9   :  { %v4045_v47 = vpack.c.bf16 %v577_v39, %v573_v38  ;;  %v619_v38 = vld [vmem:[%s10477_s1 + $0x11f0] sm:$0xff]  ;;  %v622_v39 = vld [vmem:[%s10477_s1 + $0x1208] sm:$0xff] }
  0xfa   :  { %4026 = vmatpush1.bf16.msra.mxu0 %v4025_v49  ;;  %v4047_v49 = vpack.c.bf16 %v586_v44, %v582_v43  ;;  %v4067_v45 = vpack.c.bf16 %v626_v40, %v622_v39 }
  0xfb   :  { %4810 = vmatpush1.bf16.msra.mxu1 %v4809_v50  ;;  %4028 = vmatprep.subr.bf16.mxu0 %v4027_v51  ;;  %v581_v50 = vld [vmem:[%s10477_s1 + $0x10c0] sm:$0xff] }
  0xfc   :  { %4812 = vmatprep.subr.bf16.mxu1 %v4811_v55  ;;  %v585_v51 = vld [vmem:[%s10477_s1 + $0x10e0] sm:$0xff]  ;;  %v590_v55 = vld [vmem:[%s10477_s1 + $0x1108] sm:$0xff] }
  0xfd   :  { %v4049_v59 = vpack.c.bf16 %v585_v51, %v581_v50  ;;  %v627_v50 = vld [vmem:[%s10477_s1 + $0x1230] sm:$0xff]  ;;  %v630_v51 = vld [vmem:[%s10477_s1 + $0x1248] sm:$0xff] }
  0xfe   :  { %4030 = vmatpush1.bf16.msra.mxu0 %v4029_v61  ;;  %v4051_v61 = vpack.c.bf16 %v594_v56, %v590_v55  ;;  %v4071_v57 = vpack.c.bf16 %v634_v52, %v630_v51 }
  0xff   :  { %4814 = vmatpush1.bf16.msra.mxu1 %v4813_v62  ;;  %4032 = vmatprep.subr.bf16.mxu0 %v4031_v63  ;;  %v589_v62 = vld [vmem:[%s10477_s1 + $0x1100] sm:$0xff] }
 0x100   :  { %4816 = vmatprep.subr.bf16.mxu1 %v4815_v3  ;;  %v593_v63 = vld [vmem:[%s10477_s1 + $0x1120] sm:$0xff]  ;;  %v598_v3 = vld [vmem:[%s10477_s1 + $0x1148] sm:$0xff] }
 0x101   :  { %v4053_v7 = vpack.c.bf16 %v593_v63, %v589_v62  ;;  %v635_v62 = vld [vmem:[%s10477_s1 + $0x1270] sm:$0xff]  ;;  %v638_v63 = vld [vmem:[%s10477_s1 + $0x1288] sm:$0xff] }
 0x102   :  { %4034 = vmatpush1.bf16.msra.mxu0 %v4033_v9  ;;  %v4055_v9 = vpack.c.bf16 %v602_v4, %v598_v3  ;;  %v4075_v5 = vpack.c.bf16 %v642_v0, %v638_v63 }
 0x103   :  { %4818 = vmatpush1.bf16.msra.mxu1 %v4817_v10  ;;  %4036 = vmatprep.subr.bf16.mxu0 %v4035_v11  ;;  %v597_v10 = vld [vmem:[%s10477_s1 + $0x1140] sm:$0xff] }
 0x104   :  { %4820 = vmatprep.subr.bf16.mxu1 %v4819_v15  ;;  %v601_v11 = vld [vmem:[%s10477_s1 + $0x1160] sm:$0xff]  ;;  %v606_v15 = vld [vmem:[%s10477_s1 + $0x1188] sm:$0xff] }
 0x105   :  { %1917 = vmatmul.mubr.f32.vlgmr.msra.gmra.mrb[0].mxu0 %v26_v21  ;;  %v4057_v19 = vpack.c.bf16 %v601_v11, %v597_v10  ;;  %v643_v10 = vld [vmem:[%s10477_s1 + $0x12b0] sm:$0xff]  ;;  %v646_v11 = vld [vmem:[%s10477_s1 + $0x12c8] sm:$0xff] }
 0x106   :  { %4038 = vmatpush1.bf16.msra.mxu0 %v4037_v22  ;;  %2840 = vmatmul.mubr.f32.vlgmr.msra.gmra.mrb[0].mxu1 %v26_v21  ;;  %v4059_v21 = vpack.c.bf16 %v610_v16, %v606_v15  ;;  %v605_v22 = vld [vmem:[%s10477_s1 + $0x1180] sm:$0xff]  ;;  %v4079_v17 = vpack.c.bf16 %v650_v12, %v646_v11 }
 0x107   :  { %4822 = vmatpush1.bf16.msra.mxu1 %v4821_v23  ;;  %4040 = vmatprep.subr.bf16.mxu0 %v4039_v24  ;;  %v609_v23 = vld [vmem:[%s10477_s1 + $0x11a0] sm:$0xff]  ;;  %v607_v24 = vld [vmem:[%s10477_s1 + $0x1190] sm:$0xff] }
 0x108   :  { %4824 = vmatprep.subr.bf16.mxu1 %v4823_v28  ;;  %1987 = vmatprep.mubr.f32.mxu0 %v29_v34  ;;  %v618_v28 = vld [vmem:[%s10477_s1 + $0x11e8] sm:$0xff]  ;;  %v4061_v31 = vpack.c.bf16 %v609_v23, %v605_v22  ;;  %v4845_v32 = vpack.c.bf16 %v611_v26, %v607_v24  ;;  %v651_v22 = vld [vmem:[%s10477_s1 + $0x12f0] sm:$0xff]  ;;  %v660_v26 = vld [vmem:[%s10477_s1 + $0x1338] sm:$0xff] }
 0x109   :  { %2910 = vmatprep.mubr.f32.mxu1 %v29_v34  ;;  %v4063_v33 = vpack.c.bf16 %v618_v28, %v614_v27  ;;  %v613_v34 = vld [vmem:[%s10477_s1 + $0x11c0] sm:$0xff]  ;;  %v654_v23 = vld [vmem:[%s10477_s1 + $0x1308] sm:$0xff] }
 0x10a   :  { %4042 = vmatpush1.bf16.msra.mxu0 %v4041_v35  ;;  %v617_v35 = vld [vmem:[%s10477_s1 + $0x11e0] sm:$0xff]  ;;  %v658_v24 = vld [vmem:[%s10477_s1 + $0x1328] sm:$0xff] }
 0x10b   :  { %4826 = vmatpush1.bf16.msra.mxu1 %v4825_v36  ;;  %4044 = vmatprep.subr.bf16.mxu0 %v4043_v37  ;;  %v615_v36 = vld [vmem:[%s10477_s1 + $0x11d0] sm:$0xff]  ;;  %v4847_v37 = vpack.c.bf16 %v620_v30, %v616_v29  ;;  %v4065_v43 = vpack.c.bf16 %v617_v35, %v613_v34  ;;  %v4083_v29 = vpack.c.bf16 %v658_v24, %v654_v23  ;;  %v653_v30 = vld [vmem:[%s10477_s1 + $0x1300] sm:$0xff]  ;;  %v662_v35 = vld [vmem:[%s10477_s1 + $0x1348] sm:$0xff] }
 0x10c   :  { %4828 = vmatprep.subr.bf16.mxu1 %v4827_v41  ;;  %v624_v41 = vld [vmem:[%s10477_s1 + $0x1218] sm:$0xff]  ;;  %v4849_v44 = vpack.c.bf16 %v619_v38, %v615_v36  ;;  %v659_v34 = vld [vmem:[%s10477_s1 + $0x1330] sm:$0xff]  ;;  %v666_v36 = vld [vmem:[%s10477_s1 + $0x1368] sm:$0xff] }
 0x10d   :  { %v668_v38 = vld [vmem:[%s10477_s1 + $0x1378] sm:$0xff]  ;;  %v28_v23 = vld [vmem:[%s10478_s0 + $0x40] sm:$0xff] }
 0x10e   :  { %4046 = vmatpush1.bf16.msra.mxu0 %v4045_v47  ;;  %v625_v47 = vld [vmem:[%s10477_s1 + $0x1220] sm:$0xff] }
 0x10f   :  { %4830 = vmatpush1.bf16.msra.mxu1 %v4829_v48  ;;  %4048 = vmatprep.subr.bf16.mxu0 %v4047_v49  ;;  %v623_v48 = vld [vmem:[%s10477_s1 + $0x1210] sm:$0xff]  ;;  %v4851_v49 = vpack.c.bf16 %v628_v42, %v624_v41  ;;  %v4069_v55 = vpack.c.bf16 %v625_v47, %v621_v46  ;;  %v4087_v41 = vpack.c.bf16 %v666_v36, %v662_v35  ;;  %v661_v42 = vld [vmem:[%s10477_s1 + $0x1340] sm:$0xff]  ;;  %v670_v47 = vld [vmem:[%s10477_s1 + $0x1388] sm:$0xff] }
 0x110   :  { %4832 = vmatprep.subr.bf16.mxu1 %v4831_v53  ;;  %v632_v53 = vld [vmem:[%s10477_s1 + $0x1258] sm:$0xff]  ;;  %v4853_v56 = vpack.c.bf16 %v627_v50, %v623_v48  ;;  %v667_v46 = vld [vmem:[%s10477_s1 + $0x1370] sm:$0xff]  ;;  %v674_v48 = vld [vmem:[%s10477_s1 + $0x13a8] sm:$0xff] }
 0x111   :  { %v676_v50 = vld [vmem:[%s10477_s1 + $0x13b8] sm:$0xff] }
 0x112   :  { %4050 = vmatpush1.bf16.msra.mxu0 %v4049_v59  ;;  %v633_v59 = vld [vmem:[%s10477_s1 + $0x1260] sm:$0xff]  ;;  %v708_v35 = vld [vmem:[%s10477_s1 + $0x14b8] sm:$0xff] }
 0x113   :  { %4834 = vmatpush1.bf16.msra.mxu1 %v4833_v60  ;;  %4052 = vmatprep.subr.bf16.mxu0 %v4051_v61  ;;  %v631_v60 = vld [vmem:[%s10477_s1 + $0x1250] sm:$0xff]  ;;  %v4855_v61 = vpack.c.bf16 %v636_v54, %v632_v53  ;;  %v4073_v3 = vpack.c.bf16 %v633_v59, %v629_v58  ;;  %v4091_v53 = vpack.c.bf16 %v674_v48, %v670_v47  ;;  %v669_v54 = vld [vmem:[%s10477_s1 + $0x1380] sm:$0xff]  ;;  %v678_v59 = vld [vmem:[%s10477_s1 + $0x13c8] sm:$0xff] }
 0x114   :  { %4836 = vmatprep.subr.bf16.mxu1 %v4835_v1  ;;  %v640_v1 = vld [vmem:[%s10477_s1 + $0x1298] sm:$0xff]  ;;  %v4857_v4 = vpack.c.bf16 %v635_v62, %v631_v60  ;;  %v675_v58 = vld [vmem:[%s10477_s1 + $0x13b0] sm:$0xff]  ;;  %v682_v60 = vld [vmem:[%s10477_s1 + $0x13e8] sm:$0xff] }
 0x115   :  { %v684_v62 = vld [vmem:[%s10477_s1 + $0x13f8] sm:$0xff] }
 0x116   :  { %4054 = vmatpush1.bf16.msra.mxu0 %v4053_v7  ;;  %v641_v7 = vld [vmem:[%s10477_s1 + $0x12a0] sm:$0xff]  ;;  %v31_v36 = vld [vmem:[%s10478_s0 + $0x58] sm:$0xff] }
 0x117   :  { %4838 = vmatpush1.bf16.msra.mxu1 %v4837_v8  ;;  %4056 = vmatprep.subr.bf16.mxu0 %v4055_v9  ;;  %v639_v8 = vld [vmem:[%s10477_s1 + $0x1290] sm:$0xff]  ;;  %v4859_v9 = vpack.c.bf16 %v644_v2, %v640_v1  ;;  %v4077_v15 = vpack.c.bf16 %v641_v7, %v637_v6  ;;  %v4095_v1 = vpack.c.bf16 %v682_v60, %v678_v59  ;;  %v677_v2 = vld [vmem:[%s10477_s1 + $0x13c0] sm:$0xff]  ;;  %v686_v7 = vld [vmem:[%s10477_s1 + $0x1408] sm:$0xff] }
 0x118   :  { %4840 = vmatprep.subr.bf16.mxu1 %v4839_v13  ;;  %v648_v13 = vld [vmem:[%s10477_s1 + $0x12d8] sm:$0xff]  ;;  %v4861_v16 = vpack.c.bf16 %v643_v10, %v639_v8  ;;  %v683_v6 = vld [vmem:[%s10477_s1 + $0x13f0] sm:$0xff]  ;;  %v690_v8 = vld [vmem:[%s10477_s1 + $0x1428] sm:$0xff] }
 0x119   :  { %v692_v10 = vld [vmem:[%s10477_s1 + $0x1438] sm:$0xff] }
 0x11a   :  { %4058 = vmatpush1.bf16.msra.mxu0 %v4057_v19  ;;  %v649_v19 = vld [vmem:[%s10477_s1 + $0x12e0] sm:$0xff]  ;;  %v712_v47 = vld [vmem:[%s10477_s1 + $0x14d8] sm:$0xff] }
 0x11b   :  { %4842 = vmatpush1.bf16.msra.mxu1 %v4841_v20  ;;  %4060 = vmatprep.subr.bf16.mxu0 %v4059_v21  ;;  %v647_v20 = vld [vmem:[%s10477_s1 + $0x12d0] sm:$0xff]  ;;  %v4863_v21 = vpack.c.bf16 %v652_v14, %v648_v13  ;;  %v4081_v27 = vpack.c.bf16 %v649_v19, %v645_v18  ;;  %v4099_v13 = vpack.c.bf16 %v690_v8, %v686_v7  ;;  %v685_v14 = vld [vmem:[%s10477_s1 + $0x1400] sm:$0xff]  ;;  %v694_v19 = vld [vmem:[%s10477_s1 + $0x1448] sm:$0xff] }
 0x11c   :  { %4844 = vmatprep.subr.bf16.mxu1 %v4843_v25  ;;  %v656_v25 = vld [vmem:[%s10477_s1 + $0x1318] sm:$0xff]  ;;  %v4865_v28 = vpack.c.bf16 %v651_v22, %v647_v20  ;;  %v691_v18 = vld [vmem:[%s10477_s1 + $0x1430] sm:$0xff]  ;;  %v698_v20 = vld [vmem:[%s10477_s1 + $0x1468] sm:$0xff] }
 0x11d   :  { %v700_v22 = vld [vmem:[%s10477_s1 + $0x1478] sm:$0xff] }
 0x11e   :  { %4062 = vmatpush1.bf16.msra.mxu0 %v4061_v31  ;;  %v657_v31 = vld [vmem:[%s10477_s1 + $0x1320] sm:$0xff]  ;;  %v716_v48 = vld [vmem:[%s10477_s1 + $0x14f8] sm:$0xff] }
 0x11f   :  { %4846 = vmatpush1.bf16.msra.mxu1 %v4845_v32  ;;  %4064 = vmatprep.subr.bf16.mxu0 %v4063_v33  ;;  %v655_v32 = vld [vmem:[%s10477_s1 + $0x1310] sm:$0xff]  ;;  %v4867_v33 = vpack.c.bf16 %v660_v26, %v656_v25  ;;  %v4085_v39 = vpack.c.bf16 %v657_v31, %v653_v30  ;;  %v4103_v26 = vpack.c.bf16 %v698_v20, %v694_v19  ;;  %v720_v59 = vld [vmem:[%s10477_s1 + $0x1518] sm:$0xff] }
 0x120   :  { %4848 = vmatprep.subr.bf16.mxu1 %v4847_v37  ;;  %v664_v37 = vld [vmem:[%s10477_s1 + $0x1358] sm:$0xff]  ;;  %v4869_v40 = vpack.c.bf16 %v659_v34, %v655_v32  ;;  %v699_v31 = vld [vmem:[%s10477_s1 + $0x1470] sm:$0xff]  ;;  %v702_v32 = vld [vmem:[%s10477_s1 + $0x1488] sm:$0xff] }
 0x121   :  { %v704_v34 = vld [vmem:[%s10477_s1 + $0x1498] sm:$0xff] }
 0x122   :  { %4066 = vmatpush1.bf16.msra.mxu0 %v4065_v43  ;;  %v665_v43 = vld [vmem:[%s10477_s1 + $0x1360] sm:$0xff]  ;;  %v724_v60 = vld [vmem:[%s10477_s1 + $0x1538] sm:$0xff] }
 0x123   :  { %4850 = vmatpush1.bf16.msra.mxu1 %v4849_v44  ;;  %4068 = vmatprep.subr.bf16.mxu0 %v4067_v45  ;;  %v663_v44 = vld [vmem:[%s10477_s1 + $0x1350] sm:$0xff]  ;;  %v4871_v45 = vpack.c.bf16 %v668_v38, %v664_v37  ;;  %v4089_v51 = vpack.c.bf16 %v665_v43, %v661_v42  ;;  %v4891_v43 = vpack.c.bf16 %v708_v35, %v704_v34  ;;  %v728_v7 = vld [vmem:[%s10477_s1 + $0x1558] sm:$0xff] }
 0x124   :  { %4852 = vmatprep.subr.bf16.mxu1 %v4851_v49  ;;  %v672_v49 = vld [vmem:[%s10477_s1 + $0x1398] sm:$0xff]  ;;  %v4873_v52 = vpack.c.bf16 %v667_v46, %v663_v44  ;;  %v703_v42 = vld [vmem:[%s10477_s1 + $0x1490] sm:$0xff]  ;;  %v714_v46 = vld [vmem:[%s10477_s1 + $0x14e8] sm:$0xff] }
 0x125   :  { %v707_v44 = vld [vmem:[%s10477_s1 + $0x14b0] sm:$0xff]  ;;  %v732_v8 = vld [vmem:[%s10477_s1 + $0x1578] sm:$0xff] }
 0x126   :  { %4070 = vmatpush1.bf16.msra.mxu0 %v4069_v55  ;;  %v673_v55 = vld [vmem:[%s10477_s1 + $0x13a0] sm:$0xff]  ;;  %v736_v19 = vld [vmem:[%s10477_s1 + $0x1598] sm:$0xff] }
 0x127   :  { %4854 = vmatpush1.bf16.msra.mxu1 %v4853_v56  ;;  %4072 = vmatprep.subr.bf16.mxu0 %v4071_v57  ;;  %v671_v56 = vld [vmem:[%s10477_s1 + $0x1390] sm:$0xff]  ;;  %v4875_v57 = vpack.c.bf16 %v676_v50, %v672_v49  ;;  %v4093_v63 = vpack.c.bf16 %v673_v55, %v669_v54  ;;  %v4893_v50 = vpack.c.bf16 %v707_v44, %v703_v42  ;;  %v740_v20 = vld [vmem:[%s10477_s1 + $0x15b8] sm:$0xff]  ;;  %v754_v42 = vld [vmem:[%s10477_s1 + $0x1628] sm:$0xff] }
 0x128   :  { %4856 = vmatprep.subr.bf16.mxu1 %v4855_v61  ;;  %v680_v61 = vld [vmem:[%s10477_s1 + $0x13d8] sm:$0xff]  ;;  %v4877_v0 = vpack.c.bf16 %v675_v58, %v671_v56  ;;  %v711_v54 = vld [vmem:[%s10477_s1 + $0x14d0] sm:$0xff]  ;;  %v4895_v55 = vpack.c.bf16 %v716_v48, %v712_v47  ;;  %v722_v58 = vld [vmem:[%s10477_s1 + $0x1528] sm:$0xff] }
 0x129   :  { %v715_v56 = vld [vmem:[%s10477_s1 + $0x14f0] sm:$0xff]  ;;  %v756_v44 = vld [vmem:[%s10477_s1 + $0x1638] sm:$0xff]  ;;  %v749_v48 = vld [vmem:[%s10477_s1 + $0x1600] sm:$0xff] }
 0x12a   :  { %4074 = vmatpush1.bf16.msra.mxu0 %v4073_v3  ;;  %v681_v3 = vld [vmem:[%s10477_s1 + $0x13e0] sm:$0xff] }
 0x12b   :  { %4858 = vmatpush1.bf16.msra.mxu1 %v4857_v4  ;;  %4076 = vmatprep.subr.bf16.mxu0 %v4075_v5  ;;  %v679_v4 = vld [vmem:[%s10477_s1 + $0x13d0] sm:$0xff]  ;;  %v4879_v5 = vpack.c.bf16 %v684_v62, %v680_v61  ;;  %v4097_v11 = vpack.c.bf16 %v681_v3, %v677_v2  ;;  %v4897_v62 = vpack.c.bf16 %v715_v56, %v711_v54  ;;  %v762_v54 = vld [vmem:[%s10477_s1 + $0x1668] sm:$0xff]  ;;  %v764_v56 = vld [vmem:[%s10477_s1 + $0x1678] sm:$0xff] }
 0x12c   :  { %4860 = vmatprep.subr.bf16.mxu1 %v4859_v9  ;;  %v688_v9 = vld [vmem:[%s10477_s1 + $0x1418] sm:$0xff]  ;;  %v4881_v12 = vpack.c.bf16 %v683_v6, %v679_v4  ;;  %v719_v2 = vld [vmem:[%s10477_s1 + $0x1510] sm:$0xff]  ;;  %v4899_v3 = vpack.c.bf16 %v724_v60, %v720_v59  ;;  %v730_v6 = vld [vmem:[%s10477_s1 + $0x1568] sm:$0xff] }
 0x12d   :  { %v723_v4 = vld [vmem:[%s10477_s1 + $0x1530] sm:$0xff]  ;;  %v757_v60 = vld [vmem:[%s10477_s1 + $0x1640] sm:$0xff] }
 0x12e   :  { %4078 = vmatpush1.bf16.msra.mxu0 %v4077_v15  ;;  %v689_v15 = vld [vmem:[%s10477_s1 + $0x1420] sm:$0xff] }
 0x12f   :  { %4862 = vmatpush1.bf16.msra.mxu1 %v4861_v16  ;;  %4080 = vmatprep.subr.bf16.mxu0 %v4079_v17  ;;  %v687_v16 = vld [vmem:[%s10477_s1 + $0x1410] sm:$0xff]  ;;  %v4883_v17 = vpack.c.bf16 %v692_v10, %v688_v9  ;;  %v4101_v24 = vpack.c.bf16 %v689_v15, %v685_v14  ;;  %v4901_v10 = vpack.c.bf16 %v723_v4, %v719_v2  ;;  %v770_v2 = vld [vmem:[%s10477_s1 + $0x16a8] sm:$0xff]  ;;  %v772_v4 = vld [vmem:[%s10477_s1 + $0x16b8] sm:$0xff] }
 0x130   :  { %4864 = vmatprep.subr.bf16.mxu1 %v4863_v21  ;;  %v696_v21 = vld [vmem:[%s10477_s1 + $0x1458] sm:$0xff]  ;;  %v4885_v25 = vpack.c.bf16 %v691_v18, %v687_v16  ;;  %v727_v14 = vld [vmem:[%s10477_s1 + $0x1550] sm:$0xff]  ;;  %v4903_v15 = vpack.c.bf16 %v732_v8, %v728_v7  ;;  %v738_v18 = vld [vmem:[%s10477_s1 + $0x15a8] sm:$0xff] }
 0x131   :  { %v4887_v30 = vpack.c.bf16 %v700_v22, %v696_v21  ;;  %v731_v16 = vld [vmem:[%s10477_s1 + $0x1570] sm:$0xff]  ;;  %v765_v8 = vld [vmem:[%s10477_s1 + $0x1680] sm:$0xff] }
 0x132   :  { %4082 = vmatpush1.bf16.msra.mxu0 %v4081_v27  ;;  %v693_v27 = vld [vmem:[%s10477_s1 + $0x1440] sm:$0xff]  ;;  %v4905_v22 = vpack.c.bf16 %v731_v16, %v727_v14  ;;  %v778_v14 = vld [vmem:[%s10477_s1 + $0x16e8] sm:$0xff]  ;;  %v780_v16 = vld [vmem:[%s10477_s1 + $0x16f8] sm:$0xff] }
 0x133   :  { %4866 = vmatpush1.bf16.msra.mxu1 %v4865_v28  ;;  %4084 = vmatprep.subr.bf16.mxu0 %v4083_v29  ;;  %v697_v28 = vld [vmem:[%s10477_s1 + $0x1460] sm:$0xff]  ;;  %v695_v29 = vld [vmem:[%s10477_s1 + $0x1450] sm:$0xff] }
 0x134   :  { %4868 = vmatprep.subr.bf16.mxu1 %v4867_v33  ;;  %v706_v33 = vld [vmem:[%s10477_s1 + $0x14a8] sm:$0xff]  ;;  %v4105_v37 = vpack.c.bf16 %v697_v28, %v693_v27  ;;  %v4889_v38 = vpack.c.bf16 %v699_v31, %v695_v29  ;;  %v4907_v27 = vpack.c.bf16 %v740_v20, %v736_v19  ;;  %v739_v28 = vld [vmem:[%s10477_s1 + $0x15b0] sm:$0xff]  ;;  %v744_v31 = vld [vmem:[%s10477_s1 + $0x15d8] sm:$0xff] }
 0x135   :  { %v742_v29 = vld [vmem:[%s10477_s1 + $0x15c8] sm:$0xff]  ;;  %v773_v20 = vld [vmem:[%s10477_s1 + $0x16c0] sm:$0xff] }
 0x136   :  { %4086 = vmatpush1.bf16.msra.mxu0 %v4085_v39  ;;  %v4107_v39 = vpack.c.bf16 %v706_v33, %v702_v32  ;;  %v748_v32 = vld [vmem:[%s10477_s1 + $0x15f8] sm:$0xff] }
 0x137   :  { %4870 = vmatpush1.bf16.msra.mxu1 %v4869_v40  ;;  %4088 = vmatprep.subr.bf16.mxu0 %v4087_v41  ;;  %v701_v40 = vld [vmem:[%s10477_s1 + $0x1480] sm:$0xff] }
 0x138   :  { %4872 = vmatprep.subr.bf16.mxu1 %v4871_v45  ;;  %v705_v41 = vld [vmem:[%s10477_s1 + $0x14a0] sm:$0xff]  ;;  %v710_v45 = vld [vmem:[%s10477_s1 + $0x14c8] sm:$0xff] }
 0x139   :  { %v4109_v49 = vpack.c.bf16 %v705_v41, %v701_v40  ;;  %v747_v40 = vld [vmem:[%s10477_s1 + $0x15f0] sm:$0xff]  ;;  %v750_v41 = vld [vmem:[%s10477_s1 + $0x1608] sm:$0xff] }
 0x13a   :  { %4090 = vmatpush1.bf16.msra.mxu0 %v4089_v51  ;;  %v4111_v51 = vpack.c.bf16 %v714_v46, %v710_v45  ;;  %v4131_v47 = vpack.c.bf16 %v754_v42, %v750_v41 }
 0x13b   :  { %4874 = vmatpush1.bf16.msra.mxu1 %v4873_v52  ;;  %4092 = vmatprep.subr.bf16.mxu0 %v4091_v53  ;;  %v709_v52 = vld [vmem:[%s10477_s1 + $0x14c0] sm:$0xff] }
 0x13c   :  { %4876 = vmatprep.subr.bf16.mxu1 %v4875_v57  ;;  %v713_v53 = vld [vmem:[%s10477_s1 + $0x14e0] sm:$0xff]  ;;  %v718_v57 = vld [vmem:[%s10477_s1 + $0x1508] sm:$0xff] }
 0x13d   :  { %v4113_v61 = vpack.c.bf16 %v713_v53, %v709_v52  ;;  %v755_v52 = vld [vmem:[%s10477_s1 + $0x1630] sm:$0xff]  ;;  %v758_v53 = vld [vmem:[%s10477_s1 + $0x1648] sm:$0xff] }
 0x13e   :  { %4094 = vmatpush1.bf16.msra.mxu0 %v4093_v63  ;;  %v4115_v63 = vpack.c.bf16 %v722_v58, %v718_v57  ;;  %v4135_v59 = vpack.c.bf16 %v762_v54, %v758_v53 }
 0x13f   :  { %4878 = vmatpush1.bf16.msra.mxu1 %v4877_v0  ;;  %4096 = vmatprep.subr.bf16.mxu0 %v4095_v1  ;;  %v717_v0 = vld [vmem:[%s10477_s1 + $0x1500] sm:$0xff] }
 0x140   :  { %4880 = vmatprep.subr.bf16.mxu1 %v4879_v5  ;;  %v721_v1 = vld [vmem:[%s10477_s1 + $0x1520] sm:$0xff]  ;;  %v726_v5 = vld [vmem:[%s10477_s1 + $0x1548] sm:$0xff] }
 0x141   :  { %v4117_v9 = vpack.c.bf16 %v721_v1, %v717_v0  ;;  %v763_v0 = vld [vmem:[%s10477_s1 + $0x1670] sm:$0xff]  ;;  %v766_v1 = vld [vmem:[%s10477_s1 + $0x1688] sm:$0xff] }
 0x142   :  { %4098 = vmatpush1.bf16.msra.mxu0 %v4097_v11  ;;  %v4119_v11 = vpack.c.bf16 %v730_v6, %v726_v5  ;;  %v4139_v7 = vpack.c.bf16 %v770_v2, %v766_v1 }
 0x143   :  { %4882 = vmatpush1.bf16.msra.mxu1 %v4881_v12  ;;  %4100 = vmatprep.subr.bf16.mxu0 %v4099_v13  ;;  %v725_v12 = vld [vmem:[%s10477_s1 + $0x1540] sm:$0xff] }
 0x144   :  { %4884 = vmatprep.subr.bf16.mxu1 %v4883_v17  ;;  %v729_v13 = vld [vmem:[%s10477_s1 + $0x1560] sm:$0xff]  ;;  %v734_v17 = vld [vmem:[%s10477_s1 + $0x1588] sm:$0xff] }
 0x145   :  { %1988 = vmatmul.mubr.f32.vlgmr.msra.gmra.mrb[0].mxu0 %v28_v23  ;;  %v4121_v21 = vpack.c.bf16 %v729_v13, %v725_v12  ;;  %v771_v12 = vld [vmem:[%s10477_s1 + $0x16b0] sm:$0xff]  ;;  %v774_v13 = vld [vmem:[%s10477_s1 + $0x16c8] sm:$0xff] }
 0x146   :  { %4102 = vmatpush1.bf16.msra.mxu0 %v4101_v24  ;;  %2911 = vmatmul.mubr.f32.vlgmr.msra.gmra.mrb[0].mxu1 %v28_v23  ;;  %v4123_v23 = vpack.c.bf16 %v738_v18, %v734_v17  ;;  %v733_v24 = vld [vmem:[%s10477_s1 + $0x1580] sm:$0xff]  ;;  %v4143_v19 = vpack.c.bf16 %v778_v14, %v774_v13 }
 0x147   :  { %4886 = vmatpush1.bf16.msra.mxu1 %v4885_v25  ;;  %4104 = vmatprep.subr.bf16.mxu0 %v4103_v26  ;;  %v737_v25 = vld [vmem:[%s10477_s1 + $0x15a0] sm:$0xff]  ;;  %v735_v26 = vld [vmem:[%s10477_s1 + $0x1590] sm:$0xff] }
 0x148   :  { %4888 = vmatprep.subr.bf16.mxu1 %v4887_v30  ;;  %2058 = vmatprep.mubr.f32.mxu0 %v31_v36  ;;  %v746_v30 = vld [vmem:[%s10477_s1 + $0x15e8] sm:$0xff]  ;;  %v4125_v33 = vpack.c.bf16 %v737_v25, %v733_v24  ;;  %v4909_v34 = vpack.c.bf16 %v739_v28, %v735_v26  ;;  %v779_v24 = vld [vmem:[%s10477_s1 + $0x16f0] sm:$0xff]  ;;  %v788_v28 = vld [vmem:[%s10477_s1 + $0x1738] sm:$0xff] }
 0x149   :  { %2981 = vmatprep.mubr.f32.mxu1 %v31_v36  ;;  %v4127_v35 = vpack.c.bf16 %v746_v30, %v742_v29  ;;  %v741_v36 = vld [vmem:[%s10477_s1 + $0x15c0] sm:$0xff]  ;;  %v782_v25 = vld [vmem:[%s10477_s1 + $0x1708] sm:$0xff] }
 0x14a   :  { %4106 = vmatpush1.bf16.msra.mxu0 %v4105_v37  ;;  %v745_v37 = vld [vmem:[%s10477_s1 + $0x15e0] sm:$0xff]  ;;  %v786_v26 = vld [vmem:[%s10477_s1 + $0x1728] sm:$0xff] }
 0x14b   :  { %4890 = vmatpush1.bf16.msra.mxu1 %v4889_v38  ;;  %4108 = vmatprep.subr.bf16.mxu0 %v4107_v39  ;;  %v743_v38 = vld [vmem:[%s10477_s1 + $0x15d0] sm:$0xff]  ;;  %v4911_v39 = vpack.c.bf16 %v748_v32, %v744_v31  ;;  %v4129_v45 = vpack.c.bf16 %v745_v37, %v741_v36  ;;  %v4147_v31 = vpack.c.bf16 %v786_v26, %v782_v25  ;;  %v781_v32 = vld [vmem:[%s10477_s1 + $0x1700] sm:$0xff]  ;;  %v790_v37 = vld [vmem:[%s10477_s1 + $0x1748] sm:$0xff] }
 0x14c   :  { %4892 = vmatprep.subr.bf16.mxu1 %v4891_v43  ;;  %v752_v43 = vld [vmem:[%s10477_s1 + $0x1618] sm:$0xff]  ;;  %v4913_v46 = vpack.c.bf16 %v747_v40, %v743_v38  ;;  %v787_v36 = vld [vmem:[%s10477_s1 + $0x1730] sm:$0xff]  ;;  %v794_v38 = vld [vmem:[%s10477_s1 + $0x1768] sm:$0xff] }
 0x14d   :  { %v796_v40 = vld [vmem:[%s10477_s1 + $0x1778] sm:$0xff]  ;;  %v30_v25 = vld [vmem:[%s10478_s0 + $0x50] sm:$0xff] }
 0x14e   :  { %4110 = vmatpush1.bf16.msra.mxu0 %v4109_v49  ;;  %v753_v49 = vld [vmem:[%s10477_s1 + $0x1620] sm:$0xff] }
 0x14f   :  { %4894 = vmatpush1.bf16.msra.mxu1 %v4893_v50  ;;  %4112 = vmatprep.subr.bf16.mxu0 %v4111_v51  ;;  %v751_v50 = vld [vmem:[%s10477_s1 + $0x1610] sm:$0xff]  ;;  %v4915_v51 = vpack.c.bf16 %v756_v44, %v752_v43  ;;  %v4133_v57 = vpack.c.bf16 %v753_v49, %v749_v48  ;;  %v4151_v43 = vpack.c.bf16 %v794_v38, %v790_v37  ;;  %v789_v44 = vld [vmem:[%s10477_s1 + $0x1740] sm:$0xff]  ;;  %v798_v49 = vld [vmem:[%s10477_s1 + $0x1788] sm:$0xff] }
 0x150   :  { %4896 = vmatprep.subr.bf16.mxu1 %v4895_v55  ;;  %v760_v55 = vld [vmem:[%s10477_s1 + $0x1658] sm:$0xff]  ;;  %v4917_v58 = vpack.c.bf16 %v755_v52, %v751_v50  ;;  %v795_v48 = vld [vmem:[%s10477_s1 + $0x1770] sm:$0xff]  ;;  %v802_v50 = vld [vmem:[%s10477_s1 + $0x17a8] sm:$0xff] }
 0x151   :  { %v804_v52 = vld [vmem:[%s10477_s1 + $0x17b8] sm:$0xff]  ;;  %v33_v38 = vld [vmem:[%s10478_s0 + $0x68] sm:$0xff] }
 0x152   :  { %4114 = vmatpush1.bf16.msra.mxu0 %v4113_v61  ;;  %v761_v61 = vld [vmem:[%s10477_s1 + $0x1660] sm:$0xff]  ;;  %v836_v37 = vld [vmem:[%s10477_s1 + $0x18b8] sm:$0xff] }
 0x153   :  { %4898 = vmatpush1.bf16.msra.mxu1 %v4897_v62  ;;  %4116 = vmatprep.subr.bf16.mxu0 %v4115_v63  ;;  %v759_v62 = vld [vmem:[%s10477_s1 + $0x1650] sm:$0xff]  ;;  %v4919_v63 = vpack.c.bf16 %v764_v56, %v760_v55  ;;  %v4137_v5 = vpack.c.bf16 %v761_v61, %v757_v60  ;;  %v4155_v55 = vpack.c.bf16 %v802_v50, %v798_v49  ;;  %v797_v56 = vld [vmem:[%s10477_s1 + $0x1780] sm:$0xff]  ;;  %v806_v61 = vld [vmem:[%s10477_s1 + $0x17c8] sm:$0xff] }
 0x154   :  { %4900 = vmatprep.subr.bf16.mxu1 %v4899_v3  ;;  %v768_v3 = vld [vmem:[%s10477_s1 + $0x1698] sm:$0xff]  ;;  %v4921_v6 = vpack.c.bf16 %v763_v0, %v759_v62  ;;  %v803_v60 = vld [vmem:[%s10477_s1 + $0x17b0] sm:$0xff]  ;;  %v810_v62 = vld [vmem:[%s10477_s1 + $0x17e8] sm:$0xff] }
 0x155   :  { %v812_v0 = vld [vmem:[%s10477_s1 + $0x17f8] sm:$0xff] }
 0x156   :  { %4118 = vmatpush1.bf16.msra.mxu0 %v4117_v9  ;;  %v769_v9 = vld [vmem:[%s10477_s1 + $0x16a0] sm:$0xff]  ;;  %v840_v49 = vld [vmem:[%s10477_s1 + $0x18d8] sm:$0xff] }
 0x157   :  { %4902 = vmatpush1.bf16.msra.mxu1 %v4901_v10  ;;  %4120 = vmatprep.subr.bf16.mxu0 %v4119_v11  ;;  %v767_v10 = vld [vmem:[%s10477_s1 + $0x1690] sm:$0xff]  ;;  %v4923_v11 = vpack.c.bf16 %v772_v4, %v768_v3  ;;  %v4141_v17 = vpack.c.bf16 %v769_v9, %v765_v8  ;;  %v4159_v3 = vpack.c.bf16 %v810_v62, %v806_v61  ;;  %v805_v4 = vld [vmem:[%s10477_s1 + $0x17c0] sm:$0xff]  ;;  %v814_v9 = vld [vmem:[%s10477_s1 + $0x1808] sm:$0xff] }
 0x158   :  { %4904 = vmatprep.subr.bf16.mxu1 %v4903_v15  ;;  %v776_v15 = vld [vmem:[%s10477_s1 + $0x16d8] sm:$0xff]  ;;  %v4925_v18 = vpack.c.bf16 %v771_v12, %v767_v10  ;;  %v811_v8 = vld [vmem:[%s10477_s1 + $0x17f0] sm:$0xff]  ;;  %v818_v10 = vld [vmem:[%s10477_s1 + $0x1828] sm:$0xff] }
 0x159   :  { %v820_v12 = vld [vmem:[%s10477_s1 + $0x1838] sm:$0xff] }
 0x15a   :  { %4122 = vmatpush1.bf16.msra.mxu0 %v4121_v21  ;;  %v777_v21 = vld [vmem:[%s10477_s1 + $0x16e0] sm:$0xff]  ;;  %v844_v50 = vld [vmem:[%s10477_s1 + $0x18f8] sm:$0xff] }
 0x15b   :  { %4906 = vmatpush1.bf16.msra.mxu1 %v4905_v22  ;;  %4124 = vmatprep.subr.bf16.mxu0 %v4123_v23  ;;  %v775_v22 = vld [vmem:[%s10477_s1 + $0x16d0] sm:$0xff]  ;;  %v4927_v23 = vpack.c.bf16 %v780_v16, %v776_v15  ;;  %v4145_v29 = vpack.c.bf16 %v777_v21, %v773_v20  ;;  %v4163_v15 = vpack.c.bf16 %v818_v10, %v814_v9  ;;  %v813_v16 = vld [vmem:[%s10477_s1 + $0x1800] sm:$0xff]  ;;  %v822_v21 = vld [vmem:[%s10477_s1 + $0x1848] sm:$0xff] }
 0x15c   :  { %4908 = vmatprep.subr.bf16.mxu1 %v4907_v27  ;;  %v784_v27 = vld [vmem:[%s10477_s1 + $0x1718] sm:$0xff]  ;;  %v4929_v30 = vpack.c.bf16 %v779_v24, %v775_v22  ;;  %v819_v20 = vld [vmem:[%s10477_s1 + $0x1830] sm:$0xff]  ;;  %v826_v22 = vld [vmem:[%s10477_s1 + $0x1868] sm:$0xff] }
 0x15d   :  { %v828_v24 = vld [vmem:[%s10477_s1 + $0x1878] sm:$0xff] }
 0x15e   :  { %4126 = vmatpush1.bf16.msra.mxu0 %v4125_v33  ;;  %v785_v33 = vld [vmem:[%s10477_s1 + $0x1720] sm:$0xff]  ;;  %v848_v61 = vld [vmem:[%s10477_s1 + $0x1918] sm:$0xff] }
 0x15f   :  { %4910 = vmatpush1.bf16.msra.mxu1 %v4909_v34  ;;  %4128 = vmatprep.subr.bf16.mxu0 %v4127_v35  ;;  %v783_v34 = vld [vmem:[%s10477_s1 + $0x1710] sm:$0xff]  ;;  %v4931_v35 = vpack.c.bf16 %v788_v28, %v784_v27  ;;  %v4149_v41 = vpack.c.bf16 %v785_v33, %v781_v32  ;;  %v4167_v28 = vpack.c.bf16 %v826_v22, %v822_v21  ;;  %v852_v62 = vld [vmem:[%s10477_s1 + $0x1938] sm:$0xff] }
 0x160   :  { %4912 = vmatprep.subr.bf16.mxu1 %v4911_v39  ;;  %v792_v39 = vld [vmem:[%s10477_s1 + $0x1758] sm:$0xff]  ;;  %v4933_v42 = vpack.c.bf16 %v787_v36, %v783_v34  ;;  %v827_v33 = vld [vmem:[%s10477_s1 + $0x1870] sm:$0xff]  ;;  %v830_v34 = vld [vmem:[%s10477_s1 + $0x1888] sm:$0xff] }
 0x161   :  { %v832_v36 = vld [vmem:[%s10477_s1 + $0x1898] sm:$0xff] }
 0x162   :  { %4130 = vmatpush1.bf16.msra.mxu0 %v4129_v45  ;;  %v793_v45 = vld [vmem:[%s10477_s1 + $0x1760] sm:$0xff]  ;;  %v856_v9 = vld [vmem:[%s10477_s1 + $0x1958] sm:$0xff] }
 0x163   :  { %4914 = vmatpush1.bf16.msra.mxu1 %v4913_v46  ;;  %4132 = vmatprep.subr.bf16.mxu0 %v4131_v47  ;;  %v791_v46 = vld [vmem:[%s10477_s1 + $0x1750] sm:$0xff]  ;;  %v4935_v47 = vpack.c.bf16 %v796_v40, %v792_v39  ;;  %v4153_v53 = vpack.c.bf16 %v793_v45, %v789_v44  ;;  %v4955_v45 = vpack.c.bf16 %v836_v37, %v832_v36  ;;  %v860_v10 = vld [vmem:[%s10477_s1 + $0x1978] sm:$0xff] }
 0x164   :  { %4916 = vmatprep.subr.bf16.mxu1 %v4915_v51  ;;  %v800_v51 = vld [vmem:[%s10477_s1 + $0x1798] sm:$0xff]  ;;  %v4937_v54 = vpack.c.bf16 %v795_v48, %v791_v46  ;;  %v831_v44 = vld [vmem:[%s10477_s1 + $0x1890] sm:$0xff]  ;;  %v842_v48 = vld [vmem:[%s10477_s1 + $0x18e8] sm:$0xff] }
 0x165   :  { %v835_v46 = vld [vmem:[%s10477_s1 + $0x18b0] sm:$0xff]  ;;  %v864_v21 = vld [vmem:[%s10477_s1 + $0x1998] sm:$0xff] }
 0x166   :  { %4134 = vmatpush1.bf16.msra.mxu0 %v4133_v57  ;;  %v801_v57 = vld [vmem:[%s10477_s1 + $0x17a0] sm:$0xff]  ;;  %v868_v22 = vld [vmem:[%s10477_s1 + $0x19b8] sm:$0xff] }
 0x167   :  { %4918 = vmatpush1.bf16.msra.mxu1 %v4917_v58  ;;  %4136 = vmatprep.subr.bf16.mxu0 %v4135_v59  ;;  %v799_v58 = vld [vmem:[%s10477_s1 + $0x1790] sm:$0xff]  ;;  %v4939_v59 = vpack.c.bf16 %v804_v52, %v800_v51  ;;  %v4157_v1 = vpack.c.bf16 %v801_v57, %v797_v56  ;;  %v4957_v52 = vpack.c.bf16 %v835_v46, %v831_v44  ;;  %v882_v44 = vld [vmem:[%s10477_s1 + $0x1a28] sm:$0xff]  ;;  %v884_v46 = vld [vmem:[%s10477_s1 + $0x1a38] sm:$0xff] }
 0x168   :  { %4920 = vmatprep.subr.bf16.mxu1 %v4919_v63  ;;  %v808_v63 = vld [vmem:[%s10477_s1 + $0x17d8] sm:$0xff]  ;;  %v4941_v2 = vpack.c.bf16 %v803_v60, %v799_v58  ;;  %v839_v56 = vld [vmem:[%s10477_s1 + $0x18d0] sm:$0xff]  ;;  %v4959_v57 = vpack.c.bf16 %v844_v50, %v840_v49  ;;  %v850_v60 = vld [vmem:[%s10477_s1 + $0x1928] sm:$0xff] }
 0x169   :  { %v843_v58 = vld [vmem:[%s10477_s1 + $0x18f0] sm:$0xff]  ;;  %v877_v50 = vld [vmem:[%s10477_s1 + $0x1a00] sm:$0xff] }
 0x16a   :  { %4138 = vmatpush1.bf16.msra.mxu0 %v4137_v5  ;;  %v809_v5 = vld [vmem:[%s10477_s1 + $0x17e0] sm:$0xff] }
 0x16b   :  { %4922 = vmatpush1.bf16.msra.mxu1 %v4921_v6  ;;  %4140 = vmatprep.subr.bf16.mxu0 %v4139_v7  ;;  %v807_v6 = vld [vmem:[%s10477_s1 + $0x17d0] sm:$0xff]  ;;  %v4943_v7 = vpack.c.bf16 %v812_v0, %v808_v63  ;;  %v4161_v13 = vpack.c.bf16 %v809_v5, %v805_v4  ;;  %v4961_v0 = vpack.c.bf16 %v843_v58, %v839_v56  ;;  %v890_v56 = vld [vmem:[%s10477_s1 + $0x1a68] sm:$0xff]  ;;  %v892_v58 = vld [vmem:[%s10477_s1 + $0x1a78] sm:$0xff] }
 0x16c   :  { %4924 = vmatprep.subr.bf16.mxu1 %v4923_v11  ;;  %v816_v11 = vld [vmem:[%s10477_s1 + $0x1818] sm:$0xff]  ;;  %v4945_v14 = vpack.c.bf16 %v811_v8, %v807_v6  ;;  %v847_v4 = vld [vmem:[%s10477_s1 + $0x1910] sm:$0xff]  ;;  %v4963_v5 = vpack.c.bf16 %v852_v62, %v848_v61  ;;  %v858_v8 = vld [vmem:[%s10477_s1 + $0x1968] sm:$0xff] }
 0x16d   :  { %v851_v6 = vld [vmem:[%s10477_s1 + $0x1930] sm:$0xff]  ;;  %v885_v62 = vld [vmem:[%s10477_s1 + $0x1a40] sm:$0xff] }
 0x16e   :  { %4142 = vmatpush1.bf16.msra.mxu0 %v4141_v17  ;;  %v817_v17 = vld [vmem:[%s10477_s1 + $0x1820] sm:$0xff] }
 0x16f   :  { %4926 = vmatpush1.bf16.msra.mxu1 %v4925_v18  ;;  %4144 = vmatprep.subr.bf16.mxu0 %v4143_v19  ;;  %v815_v18 = vld [vmem:[%s10477_s1 + $0x1810] sm:$0xff]  ;;  %v4947_v19 = vpack.c.bf16 %v820_v12, %v816_v11  ;;  %v4165_v26 = vpack.c.bf16 %v817_v17, %v813_v16  ;;  %v4965_v12 = vpack.c.bf16 %v851_v6, %v847_v4  ;;  %v898_v4 = vld [vmem:[%s10477_s1 + $0x1aa8] sm:$0xff]  ;;  %v900_v6 = vld [vmem:[%s10477_s1 + $0x1ab8] sm:$0xff] }
 0x170   :  { %4928 = vmatprep.subr.bf16.mxu1 %v4927_v23  ;;  %v824_v23 = vld [vmem:[%s10477_s1 + $0x1858] sm:$0xff]  ;;  %v4949_v27 = vpack.c.bf16 %v819_v20, %v815_v18  ;;  %v855_v16 = vld [vmem:[%s10477_s1 + $0x1950] sm:$0xff]  ;;  %v4967_v17 = vpack.c.bf16 %v860_v10, %v856_v9  ;;  %v866_v20 = vld [vmem:[%s10477_s1 + $0x19a8] sm:$0xff] }
 0x171   :  { %v4951_v32 = vpack.c.bf16 %v828_v24, %v824_v23  ;;  %v859_v18 = vld [vmem:[%s10477_s1 + $0x1970] sm:$0xff]  ;;  %v893_v10 = vld [vmem:[%s10477_s1 + $0x1a80] sm:$0xff] }
 0x172   :  { %4146 = vmatpush1.bf16.msra.mxu0 %v4145_v29  ;;  %v821_v29 = vld [vmem:[%s10477_s1 + $0x1840] sm:$0xff]  ;;  %v4969_v24 = vpack.c.bf16 %v859_v18, %v855_v16  ;;  %v906_v16 = vld [vmem:[%s10477_s1 + $0x1ae8] sm:$0xff]  ;;  %v908_v18 = vld [vmem:[%s10477_s1 + $0x1af8] sm:$0xff] }
 0x173   :  { %4930 = vmatpush1.bf16.msra.mxu1 %v4929_v30  ;;  %4148 = vmatprep.subr.bf16.mxu0 %v4147_v31  ;;  %v825_v30 = vld [vmem:[%s10477_s1 + $0x1860] sm:$0xff]  ;;  %v823_v31 = vld [vmem:[%s10477_s1 + $0x1850] sm:$0xff] }
 0x174   :  { %4932 = vmatprep.subr.bf16.mxu1 %v4931_v35  ;;  %v834_v35 = vld [vmem:[%s10477_s1 + $0x18a8] sm:$0xff]  ;;  %v4169_v39 = vpack.c.bf16 %v825_v30, %v821_v29  ;;  %v4953_v40 = vpack.c.bf16 %v827_v33, %v823_v31  ;;  %v4971_v29 = vpack.c.bf16 %v868_v22, %v864_v21  ;;  %v867_v30 = vld [vmem:[%s10477_s1 + $0x19b0] sm:$0xff]  ;;  %v872_v33 = vld [vmem:[%s10477_s1 + $0x19d8] sm:$0xff] }
 0x175   :  { %v870_v31 = vld [vmem:[%s10477_s1 + $0x19c8] sm:$0xff]  ;;  %v901_v22 = vld [vmem:[%s10477_s1 + $0x1ac0] sm:$0xff] }
 0x176   :  { %4150 = vmatpush1.bf16.msra.mxu0 %v4149_v41  ;;  %v4171_v41 = vpack.c.bf16 %v834_v35, %v830_v34  ;;  %v876_v34 = vld [vmem:[%s10477_s1 + $0x19f8] sm:$0xff] }
 0x177   :  { %4934 = vmatpush1.bf16.msra.mxu1 %v4933_v42  ;;  %4152 = vmatprep.subr.bf16.mxu0 %v4151_v43  ;;  %v829_v42 = vld [vmem:[%s10477_s1 + $0x1880] sm:$0xff] }
 0x178   :  { %4936 = vmatprep.subr.bf16.mxu1 %v4935_v47  ;;  %v833_v43 = vld [vmem:[%s10477_s1 + $0x18a0] sm:$0xff]  ;;  %v838_v47 = vld [vmem:[%s10477_s1 + $0x18c8] sm:$0xff] }
 0x179   :  { %v4173_v51 = vpack.c.bf16 %v833_v43, %v829_v42  ;;  %v875_v42 = vld [vmem:[%s10477_s1 + $0x19f0] sm:$0xff]  ;;  %v878_v43 = vld [vmem:[%s10477_s1 + $0x1a08] sm:$0xff] }
 0x17a   :  { %4154 = vmatpush1.bf16.msra.mxu0 %v4153_v53  ;;  %v4175_v53 = vpack.c.bf16 %v842_v48, %v838_v47  ;;  %v4195_v49 = vpack.c.bf16 %v882_v44, %v878_v43 }
 0x17b   :  { %4938 = vmatpush1.bf16.msra.mxu1 %v4937_v54  ;;  %4156 = vmatprep.subr.bf16.mxu0 %v4155_v55  ;;  %v837_v54 = vld [vmem:[%s10477_s1 + $0x18c0] sm:$0xff] }
 0x17c   :  { %4940 = vmatprep.subr.bf16.mxu1 %v4939_v59  ;;  %v841_v55 = vld [vmem:[%s10477_s1 + $0x18e0] sm:$0xff]  ;;  %v846_v59 = vld [vmem:[%s10477_s1 + $0x1908] sm:$0xff] }
 0x17d   :  { %v4177_v63 = vpack.c.bf16 %v841_v55, %v837_v54  ;;  %v883_v54 = vld [vmem:[%s10477_s1 + $0x1a30] sm:$0xff]  ;;  %v886_v55 = vld [vmem:[%s10477_s1 + $0x1a48] sm:$0xff] }
 0x17e   :  { %4158 = vmatpush1.bf16.msra.mxu0 %v4157_v1  ;;  %v4179_v1 = vpack.c.bf16 %v850_v60, %v846_v59  ;;  %v4199_v61 = vpack.c.bf16 %v890_v56, %v886_v55 }
 0x17f   :  { %4942 = vmatpush1.bf16.msra.mxu1 %v4941_v2  ;;  %4160 = vmatprep.subr.bf16.mxu0 %v4159_v3  ;;  %v845_v2 = vld [vmem:[%s10477_s1 + $0x1900] sm:$0xff] }
 0x180   :  { %4944 = vmatprep.subr.bf16.mxu1 %v4943_v7  ;;  %v849_v3 = vld [vmem:[%s10477_s1 + $0x1920] sm:$0xff]  ;;  %v854_v7 = vld [vmem:[%s10477_s1 + $0x1948] sm:$0xff] }
 0x181   :  { %v4181_v11 = vpack.c.bf16 %v849_v3, %v845_v2  ;;  %v891_v2 = vld [vmem:[%s10477_s1 + $0x1a70] sm:$0xff]  ;;  %v894_v3 = vld [vmem:[%s10477_s1 + $0x1a88] sm:$0xff] }
 0x182   :  { %4162 = vmatpush1.bf16.msra.mxu0 %v4161_v13  ;;  %v4183_v13 = vpack.c.bf16 %v858_v8, %v854_v7  ;;  %v4203_v9 = vpack.c.bf16 %v898_v4, %v894_v3 }
 0x183   :  { %4946 = vmatpush1.bf16.msra.mxu1 %v4945_v14  ;;  %4164 = vmatprep.subr.bf16.mxu0 %v4163_v15  ;;  %v853_v14 = vld [vmem:[%s10477_s1 + $0x1940] sm:$0xff] }
 0x184   :  { %4948 = vmatprep.subr.bf16.mxu1 %v4947_v19  ;;  %v857_v15 = vld [vmem:[%s10477_s1 + $0x1960] sm:$0xff]  ;;  %v862_v19 = vld [vmem:[%s10477_s1 + $0x1988] sm:$0xff] }
 0x185   :  { %2059 = vmatmul.mubr.f32.vlgmr.msra.gmra.mrb[0].mxu0 %v30_v25  ;;  %v4185_v23 = vpack.c.bf16 %v857_v15, %v853_v14  ;;  %v899_v14 = vld [vmem:[%s10477_s1 + $0x1ab0] sm:$0xff]  ;;  %v902_v15 = vld [vmem:[%s10477_s1 + $0x1ac8] sm:$0xff] }
 0x186   :  { %4166 = vmatpush1.bf16.msra.mxu0 %v4165_v26  ;;  %2982 = vmatmul.mubr.f32.vlgmr.msra.gmra.mrb[0].mxu1 %v30_v25  ;;  %v4187_v25 = vpack.c.bf16 %v866_v20, %v862_v19  ;;  %v861_v26 = vld [vmem:[%s10477_s1 + $0x1980] sm:$0xff]  ;;  %v4207_v21 = vpack.c.bf16 %v906_v16, %v902_v15 }
 0x187   :  { %4950 = vmatpush1.bf16.msra.mxu1 %v4949_v27  ;;  %4168 = vmatprep.subr.bf16.mxu0 %v4167_v28  ;;  %v865_v27 = vld [vmem:[%s10477_s1 + $0x19a0] sm:$0xff]  ;;  %v863_v28 = vld [vmem:[%s10477_s1 + $0x1990] sm:$0xff] }
 0x188   :  { %4952 = vmatprep.subr.bf16.mxu1 %v4951_v32  ;;  %2129 = vmatprep.mubr.f32.mxu0 %v33_v38  ;;  %v874_v32 = vld [vmem:[%s10477_s1 + $0x19e8] sm:$0xff]  ;;  %v4189_v35 = vpack.c.bf16 %v865_v27, %v861_v26  ;;  %v4973_v36 = vpack.c.bf16 %v867_v30, %v863_v28  ;;  %v907_v26 = vld [vmem:[%s10477_s1 + $0x1af0] sm:$0xff]  ;;  %v916_v30 = vld [vmem:[%s10477_s1 + $0x1b38] sm:$0xff] }
 0x189   :  { %3052 = vmatprep.mubr.f32.mxu1 %v33_v38  ;;  %v4191_v37 = vpack.c.bf16 %v874_v32, %v870_v31  ;;  %v869_v38 = vld [vmem:[%s10477_s1 + $0x19c0] sm:$0xff]  ;;  %v910_v27 = vld [vmem:[%s10477_s1 + $0x1b08] sm:$0xff] }
 0x18a   :  { %4170 = vmatpush1.bf16.msra.mxu0 %v4169_v39  ;;  %v873_v39 = vld [vmem:[%s10477_s1 + $0x19e0] sm:$0xff]  ;;  %v914_v28 = vld [vmem:[%s10477_s1 + $0x1b28] sm:$0xff] }
 0x18b   :  { %4954 = vmatpush1.bf16.msra.mxu1 %v4953_v40  ;;  %4172 = vmatprep.subr.bf16.mxu0 %v4171_v41  ;;  %v871_v40 = vld [vmem:[%s10477_s1 + $0x19d0] sm:$0xff]  ;;  %v4975_v41 = vpack.c.bf16 %v876_v34, %v872_v33  ;;  %v4193_v47 = vpack.c.bf16 %v873_v39, %v869_v38  ;;  %v4211_v33 = vpack.c.bf16 %v914_v28, %v910_v27  ;;  %v909_v34 = vld [vmem:[%s10477_s1 + $0x1b00] sm:$0xff]  ;;  %v918_v39 = vld [vmem:[%s10477_s1 + $0x1b48] sm:$0xff] }
 0x18c   :  { %4956 = vmatprep.subr.bf16.mxu1 %v4955_v45  ;;  %v880_v45 = vld [vmem:[%s10477_s1 + $0x1a18] sm:$0xff]  ;;  %v4977_v48 = vpack.c.bf16 %v875_v42, %v871_v40  ;;  %v915_v38 = vld [vmem:[%s10477_s1 + $0x1b30] sm:$0xff]  ;;  %v922_v40 = vld [vmem:[%s10477_s1 + $0x1b68] sm:$0xff] }
 0x18d   :  { %v924_v42 = vld [vmem:[%s10477_s1 + $0x1b78] sm:$0xff]  ;;  %v32_v27 = vld [vmem:[%s10478_s0 + $0x60] sm:$0xff] }
 0x18e   :  { %4174 = vmatpush1.bf16.msra.mxu0 %v4173_v51  ;;  %v881_v51 = vld [vmem:[%s10477_s1 + $0x1a20] sm:$0xff] }
 0x18f   :  { %4958 = vmatpush1.bf16.msra.mxu1 %v4957_v52  ;;  %4176 = vmatprep.subr.bf16.mxu0 %v4175_v53  ;;  %v879_v52 = vld [vmem:[%s10477_s1 + $0x1a10] sm:$0xff]  ;;  %v4979_v53 = vpack.c.bf16 %v884_v46, %v880_v45  ;;  %v4197_v59 = vpack.c.bf16 %v881_v51, %v877_v50  ;;  %v4215_v45 = vpack.c.bf16 %v922_v40, %v918_v39  ;;  %v917_v46 = vld [vmem:[%s10477_s1 + $0x1b40] sm:$0xff]  ;;  %v926_v51 = vld [vmem:[%s10477_s1 + $0x1b88] sm:$0xff] }
 0x190   :  { %4960 = vmatprep.subr.bf16.mxu1 %v4959_v57  ;;  %v888_v57 = vld [vmem:[%s10477_s1 + $0x1a58] sm:$0xff]  ;;  %v4981_v60 = vpack.c.bf16 %v883_v54, %v879_v52  ;;  %v923_v50 = vld [vmem:[%s10477_s1 + $0x1b70] sm:$0xff]  ;;  %v930_v52 = vld [vmem:[%s10477_s1 + $0x1ba8] sm:$0xff] }
 0x191   :  { %v932_v54 = vld [vmem:[%s10477_s1 + $0x1bb8] sm:$0xff] }
 0x192   :  { %4178 = vmatpush1.bf16.msra.mxu0 %v4177_v63  ;;  %v889_v63 = vld [vmem:[%s10477_s1 + $0x1a60] sm:$0xff]  ;;  %v964_v39 = vld [vmem:[%s10477_s1 + $0x1cb8] sm:$0xff] }
 0x193   :  { %4962 = vmatpush1.bf16.msra.mxu1 %v4961_v0  ;;  %4180 = vmatprep.subr.bf16.mxu0 %v4179_v1  ;;  %v887_v0 = vld [vmem:[%s10477_s1 + $0x1a50] sm:$0xff]  ;;  %v4983_v1 = vpack.c.bf16 %v892_v58, %v888_v57  ;;  %v4201_v7 = vpack.c.bf16 %v889_v63, %v885_v62  ;;  %v4219_v57 = vpack.c.bf16 %v930_v52, %v926_v51  ;;  %v925_v58 = vld [vmem:[%s10477_s1 + $0x1b80] sm:$0xff]  ;;  %v934_v63 = vld [vmem:[%s10477_s1 + $0x1bc8] sm:$0xff] }
 0x194   :  { %4964 = vmatprep.subr.bf16.mxu1 %v4963_v5  ;;  %v896_v5 = vld [vmem:[%s10477_s1 + $0x1a98] sm:$0xff]  ;;  %v4985_v8 = vpack.c.bf16 %v891_v2, %v887_v0  ;;  %v931_v62 = vld [vmem:[%s10477_s1 + $0x1bb0] sm:$0xff]  ;;  %v938_v0 = vld [vmem:[%s10477_s1 + $0x1be8] sm:$0xff] }
 0x195   :  { %v940_v2 = vld [vmem:[%s10477_s1 + $0x1bf8] sm:$0xff] }
 0x196   :  { %4182 = vmatpush1.bf16.msra.mxu0 %v4181_v11  ;;  %v897_v11 = vld [vmem:[%s10477_s1 + $0x1aa0] sm:$0xff]  ;;  %v35_v40 = vld [vmem:[%s10478_s0 + $0x78] sm:$0xff] }
 0x197   :  { %4966 = vmatpush1.bf16.msra.mxu1 %v4965_v12  ;;  %4184 = vmatprep.subr.bf16.mxu0 %v4183_v13  ;;  %v895_v12 = vld [vmem:[%s10477_s1 + $0x1a90] sm:$0xff]  ;;  %v4987_v13 = vpack.c.bf16 %v900_v6, %v896_v5  ;;  %v4205_v19 = vpack.c.bf16 %v897_v11, %v893_v10  ;;  %v4223_v5 = vpack.c.bf16 %v938_v0, %v934_v63  ;;  %v933_v6 = vld [vmem:[%s10477_s1 + $0x1bc0] sm:$0xff]  ;;  %v942_v11 = vld [vmem:[%s10477_s1 + $0x1c08] sm:$0xff] }
 0x198   :  { %4968 = vmatprep.subr.bf16.mxu1 %v4967_v17  ;;  %v904_v17 = vld [vmem:[%s10477_s1 + $0x1ad8] sm:$0xff]  ;;  %v4989_v20 = vpack.c.bf16 %v899_v14, %v895_v12  ;;  %v939_v10 = vld [vmem:[%s10477_s1 + $0x1bf0] sm:$0xff]  ;;  %v946_v12 = vld [vmem:[%s10477_s1 + $0x1c28] sm:$0xff] }
 0x199   :  { %v948_v14 = vld [vmem:[%s10477_s1 + $0x1c38] sm:$0xff] }
 0x19a   :  { %4186 = vmatpush1.bf16.msra.mxu0 %v4185_v23  ;;  %v905_v23 = vld [vmem:[%s10477_s1 + $0x1ae0] sm:$0xff]  ;;  %v968_v51 = vld [vmem:[%s10477_s1 + $0x1cd8] sm:$0xff] }
 0x19b   :  { %4970 = vmatpush1.bf16.msra.mxu1 %v4969_v24  ;;  %4188 = vmatprep.subr.bf16.mxu0 %v4187_v25  ;;  %v903_v24 = vld [vmem:[%s10477_s1 + $0x1ad0] sm:$0xff]  ;;  %v4991_v25 = vpack.c.bf16 %v908_v18, %v904_v17  ;;  %v4209_v31 = vpack.c.bf16 %v905_v23, %v901_v22  ;;  %v4227_v17 = vpack.c.bf16 %v946_v12, %v942_v11  ;;  %v941_v18 = vld [vmem:[%s10477_s1 + $0x1c00] sm:$0xff]  ;;  %v950_v23 = vld [vmem:[%s10477_s1 + $0x1c48] sm:$0xff] }
 0x19c   :  { %4972 = vmatprep.subr.bf16.mxu1 %v4971_v29  ;;  %v912_v29 = vld [vmem:[%s10477_s1 + $0x1b18] sm:$0xff]  ;;  %v4993_v32 = vpack.c.bf16 %v907_v26, %v903_v24  ;;  %v947_v22 = vld [vmem:[%s10477_s1 + $0x1c30] sm:$0xff]  ;;  %v954_v24 = vld [vmem:[%s10477_s1 + $0x1c68] sm:$0xff] }
 0x19d   :  { %v956_v26 = vld [vmem:[%s10477_s1 + $0x1c78] sm:$0xff] }
 0x19e   :  { %4190 = vmatpush1.bf16.msra.mxu0 %v4189_v35  ;;  %v913_v35 = vld [vmem:[%s10477_s1 + $0x1b20] sm:$0xff]  ;;  %v972_v52 = vld [vmem:[%s10477_s1 + $0x1cf8] sm:$0xff] }
 0x19f   :  { %4974 = vmatpush1.bf16.msra.mxu1 %v4973_v36  ;;  %4192 = vmatprep.subr.bf16.mxu0 %v4191_v37  ;;  %v911_v36 = vld [vmem:[%s10477_s1 + $0x1b10] sm:$0xff]  ;;  %v4995_v37 = vpack.c.bf16 %v916_v30, %v912_v29  ;;  %v4213_v43 = vpack.c.bf16 %v913_v35, %v909_v34  ;;  %v4231_v30 = vpack.c.bf16 %v954_v24, %v950_v23  ;;  %v976_v63 = vld [vmem:[%s10477_s1 + $0x1d18] sm:$0xff] }
 0x1a0   :  { %4976 = vmatprep.subr.bf16.mxu1 %v4975_v41  ;;  %v920_v41 = vld [vmem:[%s10477_s1 + $0x1b58] sm:$0xff]  ;;  %v4997_v44 = vpack.c.bf16 %v915_v38, %v911_v36  ;;  %v955_v35 = vld [vmem:[%s10477_s1 + $0x1c70] sm:$0xff]  ;;  %v958_v36 = vld [vmem:[%s10477_s1 + $0x1c88] sm:$0xff] }
 0x1a1   :  { %v960_v38 = vld [vmem:[%s10477_s1 + $0x1c98] sm:$0xff] }
 0x1a2   :  { %4194 = vmatpush1.bf16.msra.mxu0 %v4193_v47  ;;  %v921_v47 = vld [vmem:[%s10477_s1 + $0x1b60] sm:$0xff]  ;;  %v980_v0 = vld [vmem:[%s10477_s1 + $0x1d38] sm:$0xff] }
 0x1a3   :  { %4978 = vmatpush1.bf16.msra.mxu1 %v4977_v48  ;;  %4196 = vmatprep.subr.bf16.mxu0 %v4195_v49  ;;  %v919_v48 = vld [vmem:[%s10477_s1 + $0x1b50] sm:$0xff]  ;;  %v4999_v49 = vpack.c.bf16 %v924_v42, %v920_v41  ;;  %v4217_v55 = vpack.c.bf16 %v921_v47, %v917_v46  ;;  %v5019_v47 = vpack.c.bf16 %v964_v39, %v960_v38  ;;  %v984_v11 = vld [vmem:[%s10477_s1 + $0x1d58] sm:$0xff] }
 0x1a4   :  { %4980 = vmatprep.subr.bf16.mxu1 %v4979_v53  ;;  %v928_v53 = vld [vmem:[%s10477_s1 + $0x1b98] sm:$0xff]  ;;  %v5001_v56 = vpack.c.bf16 %v923_v50, %v919_v48  ;;  %v959_v46 = vld [vmem:[%s10477_s1 + $0x1c90] sm:$0xff]  ;;  %v970_v50 = vld [vmem:[%s10477_s1 + $0x1ce8] sm:$0xff] }
 0x1a5   :  { %v963_v48 = vld [vmem:[%s10477_s1 + $0x1cb0] sm:$0xff]  ;;  %v988_v12 = vld [vmem:[%s10477_s1 + $0x1d78] sm:$0xff] }
 0x1a6   :  { %4198 = vmatpush1.bf16.msra.mxu0 %v4197_v59  ;;  %v929_v59 = vld [vmem:[%s10477_s1 + $0x1ba0] sm:$0xff]  ;;  %v992_v23 = vld [vmem:[%s10477_s1 + $0x1d98] sm:$0xff] }
 0x1a7   :  { %4982 = vmatpush1.bf16.msra.mxu1 %v4981_v60  ;;  %4200 = vmatprep.subr.bf16.mxu0 %v4199_v61  ;;  %v927_v60 = vld [vmem:[%s10477_s1 + $0x1b90] sm:$0xff]  ;;  %v5003_v61 = vpack.c.bf16 %v932_v54, %v928_v53  ;;  %v4221_v3 = vpack.c.bf16 %v929_v59, %v925_v58  ;;  %v5021_v54 = vpack.c.bf16 %v963_v48, %v959_v46  ;;  %v996_v24 = vld [vmem:[%s10477_s1 + $0x1db8] sm:$0xff]  ;;  %v1010_v46 = vld [vmem:[%s10477_s1 + $0x1e28] sm:$0xff] }
 0x1a8   :  { %4984 = vmatprep.subr.bf16.mxu1 %v4983_v1  ;;  %v936_v1 = vld [vmem:[%s10477_s1 + $0x1bd8] sm:$0xff]  ;;  %v5005_v4 = vpack.c.bf16 %v931_v62, %v927_v60  ;;  %v967_v58 = vld [vmem:[%s10477_s1 + $0x1cd0] sm:$0xff]  ;;  %v5023_v59 = vpack.c.bf16 %v972_v52, %v968_v51  ;;  %v978_v62 = vld [vmem:[%s10477_s1 + $0x1d28] sm:$0xff] }
 0x1a9   :  { %v971_v60 = vld [vmem:[%s10477_s1 + $0x1cf0] sm:$0xff]  ;;  %v1012_v48 = vld [vmem:[%s10477_s1 + $0x1e38] sm:$0xff]  ;;  %v1005_v52 = vld [vmem:[%s10477_s1 + $0x1e00] sm:$0xff] }
 0x1aa   :  { %4202 = vmatpush1.bf16.msra.mxu0 %v4201_v7  ;;  %v937_v7 = vld [vmem:[%s10477_s1 + $0x1be0] sm:$0xff] }
 0x1ab   :  { %4986 = vmatpush1.bf16.msra.mxu1 %v4985_v8  ;;  %4204 = vmatprep.subr.bf16.mxu0 %v4203_v9  ;;  %v935_v8 = vld [vmem:[%s10477_s1 + $0x1bd0] sm:$0xff]  ;;  %v5007_v9 = vpack.c.bf16 %v940_v2, %v936_v1  ;;  %v4225_v15 = vpack.c.bf16 %v937_v7, %v933_v6  ;;  %v5025_v2 = vpack.c.bf16 %v971_v60, %v967_v58  ;;  %v1018_v58 = vld [vmem:[%s10477_s1 + $0x1e68] sm:$0xff]  ;;  %v1020_v60 = vld [vmem:[%s10477_s1 + $0x1e78] sm:$0xff] }
 0x1ac   :  { %4988 = vmatprep.subr.bf16.mxu1 %v4987_v13  ;;  %v944_v13 = vld [vmem:[%s10477_s1 + $0x1c18] sm:$0xff]  ;;  %v5009_v16 = vpack.c.bf16 %v939_v10, %v935_v8  ;;  %v975_v6 = vld [vmem:[%s10477_s1 + $0x1d10] sm:$0xff]  ;;  %v5027_v7 = vpack.c.bf16 %v980_v0, %v976_v63  ;;  %v986_v10 = vld [vmem:[%s10477_s1 + $0x1d68] sm:$0xff] }
 0x1ad   :  { %v979_v8 = vld [vmem:[%s10477_s1 + $0x1d30] sm:$0xff]  ;;  %v1013_v0 = vld [vmem:[%s10477_s1 + $0x1e40] sm:$0xff] }
 0x1ae   :  { %4206 = vmatpush1.bf16.msra.mxu0 %v4205_v19  ;;  %v945_v19 = vld [vmem:[%s10477_s1 + $0x1c20] sm:$0xff] }
 0x1af   :  { %4990 = vmatpush1.bf16.msra.mxu1 %v4989_v20  ;;  %4208 = vmatprep.subr.bf16.mxu0 %v4207_v21  ;;  %v943_v20 = vld [vmem:[%s10477_s1 + $0x1c10] sm:$0xff]  ;;  %v5011_v21 = vpack.c.bf16 %v948_v14, %v944_v13  ;;  %v4229_v28 = vpack.c.bf16 %v945_v19, %v941_v18  ;;  %v5029_v14 = vpack.c.bf16 %v979_v8, %v975_v6  ;;  %v1026_v6 = vld [vmem:[%s10477_s1 + $0x1ea8] sm:$0xff]  ;;  %v1028_v8 = vld [vmem:[%s10477_s1 + $0x1eb8] sm:$0xff] }
 0x1b0   :  { %4992 = vmatprep.subr.bf16.mxu1 %v4991_v25  ;;  %v952_v25 = vld [vmem:[%s10477_s1 + $0x1c58] sm:$0xff]  ;;  %v5013_v29 = vpack.c.bf16 %v947_v22, %v943_v20  ;;  %v983_v18 = vld [vmem:[%s10477_s1 + $0x1d50] sm:$0xff]  ;;  %v5031_v19 = vpack.c.bf16 %v988_v12, %v984_v11  ;;  %v994_v22 = vld [vmem:[%s10477_s1 + $0x1da8] sm:$0xff] }
 0x1b1   :  { %v5015_v34 = vpack.c.bf16 %v956_v26, %v952_v25  ;;  %v987_v20 = vld [vmem:[%s10477_s1 + $0x1d70] sm:$0xff]  ;;  %v1021_v12 = vld [vmem:[%s10477_s1 + $0x1e80] sm:$0xff] }
 0x1b2   :  { %4210 = vmatpush1.bf16.msra.mxu0 %v4209_v31  ;;  %v949_v31 = vld [vmem:[%s10477_s1 + $0x1c40] sm:$0xff]  ;;  %v5033_v26 = vpack.c.bf16 %v987_v20, %v983_v18  ;;  %v1034_v18 = vld [vmem:[%s10477_s1 + $0x1ee8] sm:$0xff]  ;;  %v1036_v20 = vld [vmem:[%s10477_s1 + $0x1ef8] sm:$0xff] }
 0x1b3   :  { %4994 = vmatpush1.bf16.msra.mxu1 %v4993_v32  ;;  %4212 = vmatprep.subr.bf16.mxu0 %v4211_v33  ;;  %v953_v32 = vld [vmem:[%s10477_s1 + $0x1c60] sm:$0xff]  ;;  %v951_v33 = vld [vmem:[%s10477_s1 + $0x1c50] sm:$0xff] }
 0x1b4   :  { %4996 = vmatprep.subr.bf16.mxu1 %v4995_v37  ;;  %v962_v37 = vld [vmem:[%s10477_s1 + $0x1ca8] sm:$0xff]  ;;  %v4233_v41 = vpack.c.bf16 %v953_v32, %v949_v31  ;;  %v5017_v42 = vpack.c.bf16 %v955_v35, %v951_v33  ;;  %v5035_v31 = vpack.c.bf16 %v996_v24, %v992_v23  ;;  %v995_v32 = vld [vmem:[%s10477_s1 + $0x1db0] sm:$0xff]  ;;  %v1000_v35 = vld [vmem:[%s10477_s1 + $0x1dd8] sm:$0xff] }
 0x1b5   :  { %v998_v33 = vld [vmem:[%s10477_s1 + $0x1dc8] sm:$0xff]  ;;  %v1029_v24 = vld [vmem:[%s10477_s1 + $0x1ec0] sm:$0xff] }
 0x1b6   :  { %4214 = vmatpush1.bf16.msra.mxu0 %v4213_v43  ;;  %v4235_v43 = vpack.c.bf16 %v962_v37, %v958_v36  ;;  %v1004_v36 = vld [vmem:[%s10477_s1 + $0x1df8] sm:$0xff] }
 0x1b7   :  { %4998 = vmatpush1.bf16.msra.mxu1 %v4997_v44  ;;  %4216 = vmatprep.subr.bf16.mxu0 %v4215_v45  ;;  %v957_v44 = vld [vmem:[%s10477_s1 + $0x1c80] sm:$0xff] }
 0x1b8   :  { %5000 = vmatprep.subr.bf16.mxu1 %v4999_v49  ;;  %v961_v45 = vld [vmem:[%s10477_s1 + $0x1ca0] sm:$0xff]  ;;  %v966_v49 = vld [vmem:[%s10477_s1 + $0x1cc8] sm:$0xff] }
 0x1b9   :  { %v4237_v53 = vpack.c.bf16 %v961_v45, %v957_v44  ;;  %v1003_v44 = vld [vmem:[%s10477_s1 + $0x1df0] sm:$0xff]  ;;  %v1006_v45 = vld [vmem:[%s10477_s1 + $0x1e08] sm:$0xff] }
 0x1ba   :  { %4218 = vmatpush1.bf16.msra.mxu0 %v4217_v55  ;;  %v4239_v55 = vpack.c.bf16 %v970_v50, %v966_v49  ;;  %v4259_v51 = vpack.c.bf16 %v1010_v46, %v1006_v45 }
 0x1bb   :  { %5002 = vmatpush1.bf16.msra.mxu1 %v5001_v56  ;;  %4220 = vmatprep.subr.bf16.mxu0 %v4219_v57  ;;  %v965_v56 = vld [vmem:[%s10477_s1 + $0x1cc0] sm:$0xff] }
 0x1bc   :  { %5004 = vmatprep.subr.bf16.mxu1 %v5003_v61  ;;  %v969_v57 = vld [vmem:[%s10477_s1 + $0x1ce0] sm:$0xff]  ;;  %v974_v61 = vld [vmem:[%s10477_s1 + $0x1d08] sm:$0xff] }
 0x1bd   :  { %v4241_v1 = vpack.c.bf16 %v969_v57, %v965_v56  ;;  %v1011_v56 = vld [vmem:[%s10477_s1 + $0x1e30] sm:$0xff]  ;;  %v1014_v57 = vld [vmem:[%s10477_s1 + $0x1e48] sm:$0xff] }
 0x1be   :  { %4222 = vmatpush1.bf16.msra.mxu0 %v4221_v3  ;;  %v4243_v3 = vpack.c.bf16 %v978_v62, %v974_v61  ;;  %v4263_v63 = vpack.c.bf16 %v1018_v58, %v1014_v57 }
 0x1bf   :  { %5006 = vmatpush1.bf16.msra.mxu1 %v5005_v4  ;;  %4224 = vmatprep.subr.bf16.mxu0 %v4223_v5  ;;  %v973_v4 = vld [vmem:[%s10477_s1 + $0x1d00] sm:$0xff] }
 0x1c0   :  { %5008 = vmatprep.subr.bf16.mxu1 %v5007_v9  ;;  %v977_v5 = vld [vmem:[%s10477_s1 + $0x1d20] sm:$0xff]  ;;  %v982_v9 = vld [vmem:[%s10477_s1 + $0x1d48] sm:$0xff] }
 0x1c1   :  { %v4245_v13 = vpack.c.bf16 %v977_v5, %v973_v4  ;;  %v1019_v4 = vld [vmem:[%s10477_s1 + $0x1e70] sm:$0xff]  ;;  %v1022_v5 = vld [vmem:[%s10477_s1 + $0x1e88] sm:$0xff] }
 0x1c2   :  { %4226 = vmatpush1.bf16.msra.mxu0 %v4225_v15  ;;  %v4247_v15 = vpack.c.bf16 %v986_v10, %v982_v9  ;;  %v4267_v11 = vpack.c.bf16 %v1026_v6, %v1022_v5 }
 0x1c3   :  { %5010 = vmatpush1.bf16.msra.mxu1 %v5009_v16  ;;  %4228 = vmatprep.subr.bf16.mxu0 %v4227_v17  ;;  %v981_v16 = vld [vmem:[%s10477_s1 + $0x1d40] sm:$0xff] }
 0x1c4   :  { %5012 = vmatprep.subr.bf16.mxu1 %v5011_v21  ;;  %v985_v17 = vld [vmem:[%s10477_s1 + $0x1d60] sm:$0xff]  ;;  %v990_v21 = vld [vmem:[%s10477_s1 + $0x1d88] sm:$0xff] }
 0x1c5   :  { %2130 = vmatmul.mubr.f32.vlgmr.msra.gmra.mrb[0].mxu0 %v32_v27  ;;  %v4249_v25 = vpack.c.bf16 %v985_v17, %v981_v16  ;;  %v1027_v16 = vld [vmem:[%s10477_s1 + $0x1eb0] sm:$0xff]  ;;  %v1030_v17 = vld [vmem:[%s10477_s1 + $0x1ec8] sm:$0xff] }
 0x1c6   :  { %4230 = vmatpush1.bf16.msra.mxu0 %v4229_v28  ;;  %3053 = vmatmul.mubr.f32.vlgmr.msra.gmra.mrb[0].mxu1 %v32_v27  ;;  %v4251_v27 = vpack.c.bf16 %v994_v22, %v990_v21  ;;  %v989_v28 = vld [vmem:[%s10477_s1 + $0x1d80] sm:$0xff]  ;;  %v4271_v23 = vpack.c.bf16 %v1034_v18, %v1030_v17 }
 0x1c7   :  { %5014 = vmatpush1.bf16.msra.mxu1 %v5013_v29  ;;  %4232 = vmatprep.subr.bf16.mxu0 %v4231_v30  ;;  %v993_v29 = vld [vmem:[%s10477_s1 + $0x1da0] sm:$0xff]  ;;  %v991_v30 = vld [vmem:[%s10477_s1 + $0x1d90] sm:$0xff] }
 0x1c8   :  { %5016 = vmatprep.subr.bf16.mxu1 %v5015_v34  ;;  %2200 = vmatprep.mubr.f32.mxu0 %v35_v40  ;;  %v1002_v34 = vld [vmem:[%s10477_s1 + $0x1de8] sm:$0xff]  ;;  %v4253_v37 = vpack.c.bf16 %v993_v29, %v989_v28  ;;  %v5037_v38 = vpack.c.bf16 %v995_v32, %v991_v30  ;;  %v1035_v28 = vld [vmem:[%s10477_s1 + $0x1ef0] sm:$0xff]  ;;  %v1044_v32 = vld [vmem:[%s10477_s1 + $0x1f38] sm:$0xff] }
 0x1c9   :  { %3123 = vmatprep.mubr.f32.mxu1 %v35_v40  ;;  %v4255_v39 = vpack.c.bf16 %v1002_v34, %v998_v33  ;;  %v997_v40 = vld [vmem:[%s10477_s1 + $0x1dc0] sm:$0xff]  ;;  %v1038_v29 = vld [vmem:[%s10477_s1 + $0x1f08] sm:$0xff] }
 0x1ca   :  { %4234 = vmatpush1.bf16.msra.mxu0 %v4233_v41  ;;  %v1001_v41 = vld [vmem:[%s10477_s1 + $0x1de0] sm:$0xff]  ;;  %v1042_v30 = vld [vmem:[%s10477_s1 + $0x1f28] sm:$0xff] }
 0x1cb   :  { %5018 = vmatpush1.bf16.msra.mxu1 %v5017_v42  ;;  %4236 = vmatprep.subr.bf16.mxu0 %v4235_v43  ;;  %v999_v42 = vld [vmem:[%s10477_s1 + $0x1dd0] sm:$0xff]  ;;  %v5039_v43 = vpack.c.bf16 %v1004_v36, %v1000_v35  ;;  %v4257_v49 = vpack.c.bf16 %v1001_v41, %v997_v40  ;;  %v4275_v35 = vpack.c.bf16 %v1042_v30, %v1038_v29  ;;  %v1037_v36 = vld [vmem:[%s10477_s1 + $0x1f00] sm:$0xff]  ;;  %v1046_v41 = vld [vmem:[%s10477_s1 + $0x1f48] sm:$0xff] }
 0x1cc   :  { %5020 = vmatprep.subr.bf16.mxu1 %v5019_v47  ;;  %v1008_v47 = vld [vmem:[%s10477_s1 + $0x1e18] sm:$0xff]  ;;  %v5041_v50 = vpack.c.bf16 %v1003_v44, %v999_v42  ;;  %v1043_v40 = vld [vmem:[%s10477_s1 + $0x1f30] sm:$0xff]  ;;  %v1050_v42 = vld [vmem:[%s10477_s1 + $0x1f68] sm:$0xff] }
 0x1cd   :  { %v1052_v44 = vld [vmem:[%s10477_s1 + $0x1f78] sm:$0xff]  ;;  %v34_v29 = vld [vmem:[%s10478_s0 + $0x70] sm:$0xff] }
 0x1ce   :  { %4238 = vmatpush1.bf16.msra.mxu0 %v4237_v53  ;;  %v1009_v53 = vld [vmem:[%s10477_s1 + $0x1e20] sm:$0xff] }
 0x1cf   :  { %5022 = vmatpush1.bf16.msra.mxu1 %v5021_v54  ;;  %4240 = vmatprep.subr.bf16.mxu0 %v4239_v55  ;;  %v1007_v54 = vld [vmem:[%s10477_s1 + $0x1e10] sm:$0xff]  ;;  %v5043_v55 = vpack.c.bf16 %v1012_v48, %v1008_v47  ;;  %v4261_v61 = vpack.c.bf16 %v1009_v53, %v1005_v52  ;;  %v4279_v47 = vpack.c.bf16 %v1050_v42, %v1046_v41  ;;  %v1045_v48 = vld [vmem:[%s10477_s1 + $0x1f40] sm:$0xff]  ;;  %v1054_v53 = vld [vmem:[%s10477_s1 + $0x1f88] sm:$0xff] }
 0x1d0   :  { %5024 = vmatprep.subr.bf16.mxu1 %v5023_v59  ;;  %v1016_v59 = vld [vmem:[%s10477_s1 + $0x1e58] sm:$0xff]  ;;  %v5045_v62 = vpack.c.bf16 %v1011_v56, %v1007_v54  ;;  %v1051_v52 = vld [vmem:[%s10477_s1 + $0x1f70] sm:$0xff]  ;;  %v1058_v54 = vld [vmem:[%s10477_s1 + $0x1fa8] sm:$0xff] }
 0x1d1   :  { %v1060_v56 = vld [vmem:[%s10477_s1 + $0x1fb8] sm:$0xff]  ;;  %v37_v42 = vld [vmem:[%s10478_s0 + $0x88] sm:$0xff] }
 0x1d2   :  { %4242 = vmatpush1.bf16.msra.mxu0 %v4241_v1  ;;  %v1017_v1 = vld [vmem:[%s10477_s1 + $0x1e60] sm:$0xff]  ;;  %v1092_v41 = vld [vmem:[%s10477_s1 + $0x20b8] sm:$0xff] }
 0x1d3   :  { %5026 = vmatpush1.bf16.msra.mxu1 %v5025_v2  ;;  %4244 = vmatprep.subr.bf16.mxu0 %v4243_v3  ;;  %v1015_v2 = vld [vmem:[%s10477_s1 + $0x1e50] sm:$0xff]  ;;  %v5047_v3 = vpack.c.bf16 %v1020_v60, %v1016_v59  ;;  %v4265_v9 = vpack.c.bf16 %v1017_v1, %v1013_v0  ;;  %v4283_v59 = vpack.c.bf16 %v1058_v54, %v1054_v53  ;;  %v1053_v60 = vld [vmem:[%s10477_s1 + $0x1f80] sm:$0xff]  ;;  %v1062_v1 = vld [vmem:[%s10477_s1 + $0x1fc8] sm:$0xff] }
 0x1d4   :  { %5028 = vmatprep.subr.bf16.mxu1 %v5027_v7  ;;  %v1024_v7 = vld [vmem:[%s10477_s1 + $0x1e98] sm:$0xff]  ;;  %v5049_v10 = vpack.c.bf16 %v1019_v4, %v1015_v2  ;;  %v1059_v0 = vld [vmem:[%s10477_s1 + $0x1fb0] sm:$0xff]  ;;  %v1066_v2 = vld [vmem:[%s10477_s1 + $0x1fe8] sm:$0xff] }
 0x1d5   :  { %v1068_v4 = vld [vmem:[%s10477_s1 + $0x1ff8] sm:$0xff] }
 0x1d6   :  { %4246 = vmatpush1.bf16.msra.mxu0 %v4245_v13  ;;  %v1025_v13 = vld [vmem:[%s10477_s1 + $0x1ea0] sm:$0xff]  ;;  %v1096_v53 = vld [vmem:[%s10477_s1 + $0x20d8] sm:$0xff] }
 0x1d7   :  { %5030 = vmatpush1.bf16.msra.mxu1 %v5029_v14  ;;  %4248 = vmatprep.subr.bf16.mxu0 %v4247_v15  ;;  %v1023_v14 = vld [vmem:[%s10477_s1 + $0x1e90] sm:$0xff]  ;;  %v5051_v15 = vpack.c.bf16 %v1028_v8, %v1024_v7  ;;  %v4269_v21 = vpack.c.bf16 %v1025_v13, %v1021_v12  ;;  %v4287_v7 = vpack.c.bf16 %v1066_v2, %v1062_v1  ;;  %v1061_v8 = vld [vmem:[%s10477_s1 + $0x1fc0] sm:$0xff]  ;;  %v1070_v13 = vld [vmem:[%s10477_s1 + $0x2008] sm:$0xff] }
 0x1d8   :  { %5032 = vmatprep.subr.bf16.mxu1 %v5031_v19  ;;  %v1032_v19 = vld [vmem:[%s10477_s1 + $0x1ed8] sm:$0xff]  ;;  %v5053_v22 = vpack.c.bf16 %v1027_v16, %v1023_v14  ;;  %v1067_v12 = vld [vmem:[%s10477_s1 + $0x1ff0] sm:$0xff]  ;;  %v1074_v14 = vld [vmem:[%s10477_s1 + $0x2028] sm:$0xff] }
 0x1d9   :  { %v1076_v16 = vld [vmem:[%s10477_s1 + $0x2038] sm:$0xff] }
 0x1da   :  { %4250 = vmatpush1.bf16.msra.mxu0 %v4249_v25  ;;  %v1033_v25 = vld [vmem:[%s10477_s1 + $0x1ee0] sm:$0xff]  ;;  %v1100_v54 = vld [vmem:[%s10477_s1 + $0x20f8] sm:$0xff] }
 0x1db   :  { %5034 = vmatpush1.bf16.msra.mxu1 %v5033_v26  ;;  %4252 = vmatprep.subr.bf16.mxu0 %v4251_v27  ;;  %v1031_v26 = vld [vmem:[%s10477_s1 + $0x1ed0] sm:$0xff]  ;;  %v5055_v27 = vpack.c.bf16 %v1036_v20, %v1032_v19  ;;  %v4273_v33 = vpack.c.bf16 %v1033_v25, %v1029_v24  ;;  %v4291_v19 = vpack.c.bf16 %v1074_v14, %v1070_v13  ;;  %v1069_v20 = vld [vmem:[%s10477_s1 + $0x2000] sm:$0xff]  ;;  %v1078_v25 = vld [vmem:[%s10477_s1 + $0x2048] sm:$0xff] }
 0x1dc   :  { %5036 = vmatprep.subr.bf16.mxu1 %v5035_v31  ;;  %v1040_v31 = vld [vmem:[%s10477_s1 + $0x1f18] sm:$0xff]  ;;  %v5057_v34 = vpack.c.bf16 %v1035_v28, %v1031_v26  ;;  %v1075_v24 = vld [vmem:[%s10477_s1 + $0x2030] sm:$0xff]  ;;  %v1082_v26 = vld [vmem:[%s10477_s1 + $0x2068] sm:$0xff] }
 0x1dd   :  { %v1084_v28 = vld [vmem:[%s10477_s1 + $0x2078] sm:$0xff] }
 0x1de   :  { %4254 = vmatpush1.bf16.msra.mxu0 %v4253_v37  ;;  %v1041_v37 = vld [vmem:[%s10477_s1 + $0x1f20] sm:$0xff]  ;;  %v1104_v1 = vld [vmem:[%s10477_s1 + $0x2118] sm:$0xff] }
 0x1df   :  { %5038 = vmatpush1.bf16.msra.mxu1 %v5037_v38  ;;  %4256 = vmatprep.subr.bf16.mxu0 %v4255_v39  ;;  %v1039_v38 = vld [vmem:[%s10477_s1 + $0x1f10] sm:$0xff]  ;;  %v5059_v39 = vpack.c.bf16 %v1044_v32, %v1040_v31  ;;  %v4277_v45 = vpack.c.bf16 %v1041_v37, %v1037_v36  ;;  %v4295_v32 = vpack.c.bf16 %v1082_v26, %v1078_v25  ;;  %v1108_v2 = vld [vmem:[%s10477_s1 + $0x2138] sm:$0xff] }
 0x1e0   :  { %5040 = vmatprep.subr.bf16.mxu1 %v5039_v43  ;;  %v1048_v43 = vld [vmem:[%s10477_s1 + $0x1f58] sm:$0xff]  ;;  %v5061_v46 = vpack.c.bf16 %v1043_v40, %v1039_v38  ;;  %v1083_v37 = vld [vmem:[%s10477_s1 + $0x2070] sm:$0xff]  ;;  %v1086_v38 = vld [vmem:[%s10477_s1 + $0x2088] sm:$0xff] }
 0x1e1   :  { %v1088_v40 = vld [vmem:[%s10477_s1 + $0x2098] sm:$0xff] }
 0x1e2   :  { %4258 = vmatpush1.bf16.msra.mxu0 %v4257_v49  ;;  %v1049_v49 = vld [vmem:[%s10477_s1 + $0x1f60] sm:$0xff]  ;;  %v1112_v13 = vld [vmem:[%s10477_s1 + $0x2158] sm:$0xff] }
 0x1e3   :  { %5042 = vmatpush1.bf16.msra.mxu1 %v5041_v50  ;;  %4260 = vmatprep.subr.bf16.mxu0 %v4259_v51  ;;  %v1047_v50 = vld [vmem:[%s10477_s1 + $0x1f50] sm:$0xff]  ;;  %v5063_v51 = vpack.c.bf16 %v1052_v44, %v1048_v43  ;;  %v4281_v57 = vpack.c.bf16 %v1049_v49, %v1045_v48  ;;  %v5083_v49 = vpack.c.bf16 %v1092_v41, %v1088_v40  ;;  %v1116_v14 = vld [vmem:[%s10477_s1 + $0x2178] sm:$0xff] }
 0x1e4   :  { %5044 = vmatprep.subr.bf16.mxu1 %v5043_v55  ;;  %v1056_v55 = vld [vmem:[%s10477_s1 + $0x1f98] sm:$0xff]  ;;  %v5065_v58 = vpack.c.bf16 %v1051_v52, %v1047_v50  ;;  %v1087_v48 = vld [vmem:[%s10477_s1 + $0x2090] sm:$0xff]  ;;  %v1098_v52 = vld [vmem:[%s10477_s1 + $0x20e8] sm:$0xff] }
 0x1e5   :  { %v1091_v50 = vld [vmem:[%s10477_s1 + $0x20b0] sm:$0xff]  ;;  %v1120_v25 = vld [vmem:[%s10477_s1 + $0x2198] sm:$0xff] }
 0x1e6   :  { %4262 = vmatpush1.bf16.msra.mxu0 %v4261_v61  ;;  %v1057_v61 = vld [vmem:[%s10477_s1 + $0x1fa0] sm:$0xff]  ;;  %v1124_v26 = vld [vmem:[%s10477_s1 + $0x21b8] sm:$0xff] }
 0x1e7   :  { %5046 = vmatpush1.bf16.msra.mxu1 %v5045_v62  ;;  %4264 = vmatprep.subr.bf16.mxu0 %v4263_v63  ;;  %v1055_v62 = vld [vmem:[%s10477_s1 + $0x1f90] sm:$0xff]  ;;  %v5067_v63 = vpack.c.bf16 %v1060_v56, %v1056_v55  ;;  %v4285_v5 = vpack.c.bf16 %v1057_v61, %v1053_v60  ;;  %v5085_v56 = vpack.c.bf16 %v1091_v50, %v1087_v48  ;;  %v1138_v48 = vld [vmem:[%s10477_s1 + $0x2228] sm:$0xff]  ;;  %v1140_v50 = vld [vmem:[%s10477_s1 + $0x2238] sm:$0xff] }
 0x1e8   :  { %5048 = vmatprep.subr.bf16.mxu1 %v5047_v3  ;;  %v1064_v3 = vld [vmem:[%s10477_s1 + $0x1fd8] sm:$0xff]  ;;  %v5069_v6 = vpack.c.bf16 %v1059_v0, %v1055_v62  ;;  %v1095_v60 = vld [vmem:[%s10477_s1 + $0x20d0] sm:$0xff]  ;;  %v5087_v61 = vpack.c.bf16 %v1100_v54, %v1096_v53  ;;  %v1106_v0 = vld [vmem:[%s10477_s1 + $0x2128] sm:$0xff] }
 0x1e9   :  { %v1099_v62 = vld [vmem:[%s10477_s1 + $0x20f0] sm:$0xff]  ;;  %v1133_v54 = vld [vmem:[%s10477_s1 + $0x2200] sm:$0xff] }
 0x1ea   :  { %4266 = vmatpush1.bf16.msra.mxu0 %v4265_v9  ;;  %v1065_v9 = vld [vmem:[%s10477_s1 + $0x1fe0] sm:$0xff] }
 0x1eb   :  { %5050 = vmatpush1.bf16.msra.mxu1 %v5049_v10  ;;  %4268 = vmatprep.subr.bf16.mxu0 %v4267_v11  ;;  %v1063_v10 = vld [vmem:[%s10477_s1 + $0x1fd0] sm:$0xff]  ;;  %v5071_v11 = vpack.c.bf16 %v1068_v4, %v1064_v3  ;;  %v4289_v17 = vpack.c.bf16 %v1065_v9, %v1061_v8  ;;  %v5089_v4 = vpack.c.bf16 %v1099_v62, %v1095_v60  ;;  %v1146_v60 = vld [vmem:[%s10477_s1 + $0x2268] sm:$0xff]  ;;  %v1148_v62 = vld [vmem:[%s10477_s1 + $0x2278] sm:$0xff] }
 0x1ec   :  { %5052 = vmatprep.subr.bf16.mxu1 %v5051_v15  ;;  %v1072_v15 = vld [vmem:[%s10477_s1 + $0x2018] sm:$0xff]  ;;  %v5073_v18 = vpack.c.bf16 %v1067_v12, %v1063_v10  ;;  %v1103_v8 = vld [vmem:[%s10477_s1 + $0x2110] sm:$0xff]  ;;  %v5091_v9 = vpack.c.bf16 %v1108_v2, %v1104_v1  ;;  %v1114_v12 = vld [vmem:[%s10477_s1 + $0x2168] sm:$0xff] }
 0x1ed   :  { %v1107_v10 = vld [vmem:[%s10477_s1 + $0x2130] sm:$0xff]  ;;  %v1141_v2 = vld [vmem:[%s10477_s1 + $0x2240] sm:$0xff] }
 0x1ee   :  { %4270 = vmatpush1.bf16.msra.mxu0 %v4269_v21  ;;  %v1073_v21 = vld [vmem:[%s10477_s1 + $0x2020] sm:$0xff] }
 0x1ef   :  { %5054 = vmatpush1.bf16.msra.mxu1 %v5053_v22  ;;  %4272 = vmatprep.subr.bf16.mxu0 %v4271_v23  ;;  %v1071_v22 = vld [vmem:[%s10477_s1 + $0x2010] sm:$0xff]  ;;  %v5075_v23 = vpack.c.bf16 %v1076_v16, %v1072_v15  ;;  %v4293_v30 = vpack.c.bf16 %v1073_v21, %v1069_v20  ;;  %v5093_v16 = vpack.c.bf16 %v1107_v10, %v1103_v8  ;;  %v1154_v8 = vld [vmem:[%s10477_s1 + $0x22a8] sm:$0xff]  ;;  %v1156_v10 = vld [vmem:[%s10477_s1 + $0x22b8] sm:$0xff] }
 0x1f0   :  { %5056 = vmatprep.subr.bf16.mxu1 %v5055_v27  ;;  %v1080_v27 = vld [vmem:[%s10477_s1 + $0x2058] sm:$0xff]  ;;  %v5077_v31 = vpack.c.bf16 %v1075_v24, %v1071_v22  ;;  %v1111_v20 = vld [vmem:[%s10477_s1 + $0x2150] sm:$0xff]  ;;  %v5095_v21 = vpack.c.bf16 %v1116_v14, %v1112_v13  ;;  %v1122_v24 = vld [vmem:[%s10477_s1 + $0x21a8] sm:$0xff] }
 0x1f1   :  { %v5079_v36 = vpack.c.bf16 %v1084_v28, %v1080_v27  ;;  %v1115_v22 = vld [vmem:[%s10477_s1 + $0x2170] sm:$0xff]  ;;  %v1149_v14 = vld [vmem:[%s10477_s1 + $0x2280] sm:$0xff] }
 0x1f2   :  { %4274 = vmatpush1.bf16.msra.mxu0 %v4273_v33  ;;  %v1077_v33 = vld [vmem:[%s10477_s1 + $0x2040] sm:$0xff]  ;;  %v5097_v28 = vpack.c.bf16 %v1115_v22, %v1111_v20  ;;  %v1162_v20 = vld [vmem:[%s10477_s1 + $0x22e8] sm:$0xff]  ;;  %v1164_v22 = vld [vmem:[%s10477_s1 + $0x22f8] sm:$0xff] }
 0x1f3   :  { %5058 = vmatpush1.bf16.msra.mxu1 %v5057_v34  ;;  %4276 = vmatprep.subr.bf16.mxu0 %v4275_v35  ;;  %v1081_v34 = vld [vmem:[%s10477_s1 + $0x2060] sm:$0xff]  ;;  %v1079_v35 = vld [vmem:[%s10477_s1 + $0x2050] sm:$0xff] }
 0x1f4   :  { %5060 = vmatprep.subr.bf16.mxu1 %v5059_v39  ;;  %v1090_v39 = vld [vmem:[%s10477_s1 + $0x20a8] sm:$0xff]  ;;  %v4297_v43 = vpack.c.bf16 %v1081_v34, %v1077_v33  ;;  %v5081_v44 = vpack.c.bf16 %v1083_v37, %v1079_v35  ;;  %v5099_v33 = vpack.c.bf16 %v1124_v26, %v1120_v25  ;;  %v1123_v34 = vld [vmem:[%s10477_s1 + $0x21b0] sm:$0xff]  ;;  %v1128_v37 = vld [vmem:[%s10477_s1 + $0x21d8] sm:$0xff] }
 0x1f5   :  { %v1126_v35 = vld [vmem:[%s10477_s1 + $0x21c8] sm:$0xff]  ;;  %v1157_v26 = vld [vmem:[%s10477_s1 + $0x22c0] sm:$0xff] }
 0x1f6   :  { %4278 = vmatpush1.bf16.msra.mxu0 %v4277_v45  ;;  %v4299_v45 = vpack.c.bf16 %v1090_v39, %v1086_v38  ;;  %v1132_v38 = vld [vmem:[%s10477_s1 + $0x21f8] sm:$0xff] }
 0x1f7   :  { %5062 = vmatpush1.bf16.msra.mxu1 %v5061_v46  ;;  %4280 = vmatprep.subr.bf16.mxu0 %v4279_v47  ;;  %v1085_v46 = vld [vmem:[%s10477_s1 + $0x2080] sm:$0xff] }
 0x1f8   :  { %5064 = vmatprep.subr.bf16.mxu1 %v5063_v51  ;;  %v1089_v47 = vld [vmem:[%s10477_s1 + $0x20a0] sm:$0xff]  ;;  %v1094_v51 = vld [vmem:[%s10477_s1 + $0x20c8] sm:$0xff] }
 0x1f9   :  { %v4301_v55 = vpack.c.bf16 %v1089_v47, %v1085_v46  ;;  %v1131_v46 = vld [vmem:[%s10477_s1 + $0x21f0] sm:$0xff]  ;;  %v1134_v47 = vld [vmem:[%s10477_s1 + $0x2208] sm:$0xff] }
 0x1fa   :  { %4282 = vmatpush1.bf16.msra.mxu0 %v4281_v57  ;;  %v4303_v57 = vpack.c.bf16 %v1098_v52, %v1094_v51  ;;  %v4323_v53 = vpack.c.bf16 %v1138_v48, %v1134_v47 }
 0x1fb   :  { %5066 = vmatpush1.bf16.msra.mxu1 %v5065_v58  ;;  %4284 = vmatprep.subr.bf16.mxu0 %v4283_v59  ;;  %v1093_v58 = vld [vmem:[%s10477_s1 + $0x20c0] sm:$0xff] }
 0x1fc   :  { %5068 = vmatprep.subr.bf16.mxu1 %v5067_v63  ;;  %v1097_v59 = vld [vmem:[%s10477_s1 + $0x20e0] sm:$0xff]  ;;  %v1102_v63 = vld [vmem:[%s10477_s1 + $0x2108] sm:$0xff] }
 0x1fd   :  { %v4305_v3 = vpack.c.bf16 %v1097_v59, %v1093_v58  ;;  %v1139_v58 = vld [vmem:[%s10477_s1 + $0x2230] sm:$0xff]  ;;  %v1142_v59 = vld [vmem:[%s10477_s1 + $0x2248] sm:$0xff] }
 0x1fe   :  { %4286 = vmatpush1.bf16.msra.mxu0 %v4285_v5  ;;  %v4307_v5 = vpack.c.bf16 %v1106_v0, %v1102_v63  ;;  %v4327_v1 = vpack.c.bf16 %v1146_v60, %v1142_v59 }
 0x1ff   :  { %5070 = vmatpush1.bf16.msra.mxu1 %v5069_v6  ;;  %4288 = vmatprep.subr.bf16.mxu0 %v4287_v7  ;;  %v1101_v6 = vld [vmem:[%s10477_s1 + $0x2100] sm:$0xff] }
 0x200   :  { %5072 = vmatprep.subr.bf16.mxu1 %v5071_v11  ;;  %v1105_v7 = vld [vmem:[%s10477_s1 + $0x2120] sm:$0xff]  ;;  %v1110_v11 = vld [vmem:[%s10477_s1 + $0x2148] sm:$0xff] }
 0x201   :  { %v4309_v15 = vpack.c.bf16 %v1105_v7, %v1101_v6  ;;  %v1147_v6 = vld [vmem:[%s10477_s1 + $0x2270] sm:$0xff]  ;;  %v1150_v7 = vld [vmem:[%s10477_s1 + $0x2288] sm:$0xff] }
 0x202   :  { %4290 = vmatpush1.bf16.msra.mxu0 %v4289_v17  ;;  %v4311_v17 = vpack.c.bf16 %v1114_v12, %v1110_v11  ;;  %v4331_v13 = vpack.c.bf16 %v1154_v8, %v1150_v7 }
 0x203   :  { %5074 = vmatpush1.bf16.msra.mxu1 %v5073_v18  ;;  %4292 = vmatprep.subr.bf16.mxu0 %v4291_v19  ;;  %v1109_v18 = vld [vmem:[%s10477_s1 + $0x2140] sm:$0xff] }
 0x204   :  { %5076 = vmatprep.subr.bf16.mxu1 %v5075_v23  ;;  %v1113_v19 = vld [vmem:[%s10477_s1 + $0x2160] sm:$0xff]  ;;  %v1118_v23 = vld [vmem:[%s10477_s1 + $0x2188] sm:$0xff] }
 0x205   :  { %2201 = vmatmul.mubr.f32.vlgmr.msra.gmra.mrb[0].mxu0 %v34_v29  ;;  %v4313_v27 = vpack.c.bf16 %v1113_v19, %v1109_v18  ;;  %v1155_v18 = vld [vmem:[%s10477_s1 + $0x22b0] sm:$0xff]  ;;  %v1158_v19 = vld [vmem:[%s10477_s1 + $0x22c8] sm:$0xff] }
 0x206   :  { %4294 = vmatpush1.bf16.msra.mxu0 %v4293_v30  ;;  %3124 = vmatmul.mubr.f32.vlgmr.msra.gmra.mrb[0].mxu1 %v34_v29  ;;  %v4315_v29 = vpack.c.bf16 %v1122_v24, %v1118_v23  ;;  %v1117_v30 = vld [vmem:[%s10477_s1 + $0x2180] sm:$0xff]  ;;  %v4335_v25 = vpack.c.bf16 %v1162_v20, %v1158_v19 }
 0x207   :  { %5078 = vmatpush1.bf16.msra.mxu1 %v5077_v31  ;;  %4296 = vmatprep.subr.bf16.mxu0 %v4295_v32  ;;  %v1121_v31 = vld [vmem:[%s10477_s1 + $0x21a0] sm:$0xff]  ;;  %v1119_v32 = vld [vmem:[%s10477_s1 + $0x2190] sm:$0xff] }
 0x208   :  { %5080 = vmatprep.subr.bf16.mxu1 %v5079_v36  ;;  %2271 = vmatprep.mubr.f32.mxu0 %v37_v42  ;;  %v1130_v36 = vld [vmem:[%s10477_s1 + $0x21e8] sm:$0xff]  ;;  %v4317_v39 = vpack.c.bf16 %v1121_v31, %v1117_v30  ;;  %v5101_v40 = vpack.c.bf16 %v1123_v34, %v1119_v32  ;;  %v1163_v30 = vld [vmem:[%s10477_s1 + $0x22f0] sm:$0xff]  ;;  %v1172_v34 = vld [vmem:[%s10477_s1 + $0x2338] sm:$0xff] }
 0x209   :  { %3194 = vmatprep.mubr.f32.mxu1 %v37_v42  ;;  %v4319_v41 = vpack.c.bf16 %v1130_v36, %v1126_v35  ;;  %v1125_v42 = vld [vmem:[%s10477_s1 + $0x21c0] sm:$0xff]  ;;  %v1166_v31 = vld [vmem:[%s10477_s1 + $0x2308] sm:$0xff] }
 0x20a   :  { %4298 = vmatpush1.bf16.msra.mxu0 %v4297_v43  ;;  %v1129_v43 = vld [vmem:[%s10477_s1 + $0x21e0] sm:$0xff]  ;;  %v1170_v32 = vld [vmem:[%s10477_s1 + $0x2328] sm:$0xff] }
 0x20b   :  { %5082 = vmatpush1.bf16.msra.mxu1 %v5081_v44  ;;  %4300 = vmatprep.subr.bf16.mxu0 %v4299_v45  ;;  %v1127_v44 = vld [vmem:[%s10477_s1 + $0x21d0] sm:$0xff]  ;;  %v5103_v45 = vpack.c.bf16 %v1132_v38, %v1128_v37  ;;  %v4321_v51 = vpack.c.bf16 %v1129_v43, %v1125_v42  ;;  %v4339_v37 = vpack.c.bf16 %v1170_v32, %v1166_v31  ;;  %v1165_v38 = vld [vmem:[%s10477_s1 + $0x2300] sm:$0xff]  ;;  %v1174_v43 = vld [vmem:[%s10477_s1 + $0x2348] sm:$0xff] }
 0x20c   :  { %5084 = vmatprep.subr.bf16.mxu1 %v5083_v49  ;;  %v1136_v49 = vld [vmem:[%s10477_s1 + $0x2218] sm:$0xff]  ;;  %v5105_v52 = vpack.c.bf16 %v1131_v46, %v1127_v44  ;;  %v1171_v42 = vld [vmem:[%s10477_s1 + $0x2330] sm:$0xff]  ;;  %v1178_v44 = vld [vmem:[%s10477_s1 + $0x2368] sm:$0xff] }
 0x20d   :  { %v1180_v46 = vld [vmem:[%s10477_s1 + $0x2378] sm:$0xff]  ;;  %v36_v31 = vld [vmem:[%s10478_s0 + $0x80] sm:$0xff] }
 0x20e   :  { %4302 = vmatpush1.bf16.msra.mxu0 %v4301_v55  ;;  %v1137_v55 = vld [vmem:[%s10477_s1 + $0x2220] sm:$0xff] }
 0x20f   :  { %5086 = vmatpush1.bf16.msra.mxu1 %v5085_v56  ;;  %4304 = vmatprep.subr.bf16.mxu0 %v4303_v57  ;;  %v1135_v56 = vld [vmem:[%s10477_s1 + $0x2210] sm:$0xff]  ;;  %v5107_v57 = vpack.c.bf16 %v1140_v50, %v1136_v49  ;;  %v4325_v63 = vpack.c.bf16 %v1137_v55, %v1133_v54  ;;  %v4343_v49 = vpack.c.bf16 %v1178_v44, %v1174_v43  ;;  %v1173_v50 = vld [vmem:[%s10477_s1 + $0x2340] sm:$0xff]  ;;  %v1182_v55 = vld [vmem:[%s10477_s1 + $0x2388] sm:$0xff] }
 0x210   :  { %5088 = vmatprep.subr.bf16.mxu1 %v5087_v61  ;;  %v1144_v61 = vld [vmem:[%s10477_s1 + $0x2258] sm:$0xff]  ;;  %v5109_v0 = vpack.c.bf16 %v1139_v58, %v1135_v56  ;;  %v1179_v54 = vld [vmem:[%s10477_s1 + $0x2370] sm:$0xff]  ;;  %v1186_v56 = vld [vmem:[%s10477_s1 + $0x23a8] sm:$0xff] }
 0x211   :  { %v1188_v58 = vld [vmem:[%s10477_s1 + $0x23b8] sm:$0xff] }
 0x212   :  { %4306 = vmatpush1.bf16.msra.mxu0 %v4305_v3  ;;  %v1145_v3 = vld [vmem:[%s10477_s1 + $0x2260] sm:$0xff]  ;;  %v1220_v43 = vld [vmem:[%s10477_s1 + $0x24b8] sm:$0xff] }
 0x213   :  { %5090 = vmatpush1.bf16.msra.mxu1 %v5089_v4  ;;  %4308 = vmatprep.subr.bf16.mxu0 %v4307_v5  ;;  %v1143_v4 = vld [vmem:[%s10477_s1 + $0x2250] sm:$0xff]  ;;  %v5111_v5 = vpack.c.bf16 %v1148_v62, %v1144_v61  ;;  %v4329_v11 = vpack.c.bf16 %v1145_v3, %v1141_v2  ;;  %v4347_v61 = vpack.c.bf16 %v1186_v56, %v1182_v55  ;;  %v1181_v62 = vld [vmem:[%s10477_s1 + $0x2380] sm:$0xff]  ;;  %v1190_v3 = vld [vmem:[%s10477_s1 + $0x23c8] sm:$0xff] }
 0x214   :  { %5092 = vmatprep.subr.bf16.mxu1 %v5091_v9  ;;  %v1152_v9 = vld [vmem:[%s10477_s1 + $0x2298] sm:$0xff]  ;;  %v5113_v12 = vpack.c.bf16 %v1147_v6, %v1143_v4  ;;  %v1187_v2 = vld [vmem:[%s10477_s1 + $0x23b0] sm:$0xff]  ;;  %v1194_v4 = vld [vmem:[%s10477_s1 + $0x23e8] sm:$0xff] }
 0x215   :  { %v1196_v6 = vld [vmem:[%s10477_s1 + $0x23f8] sm:$0xff] }
 0x216   :  { %4310 = vmatpush1.bf16.msra.mxu0 %v4309_v15  ;;  %v1153_v15 = vld [vmem:[%s10477_s1 + $0x22a0] sm:$0xff]  ;;  %v39_v44 = vld [vmem:[%s10478_s0 + $0x98] sm:$0xff] }
 0x217   :  { %5094 = vmatpush1.bf16.msra.mxu1 %v5093_v16  ;;  %4312 = vmatprep.subr.bf16.mxu0 %v4311_v17  ;;  %v1151_v16 = vld [vmem:[%s10477_s1 + $0x2290] sm:$0xff]  ;;  %v5115_v17 = vpack.c.bf16 %v1156_v10, %v1152_v9  ;;  %v4333_v23 = vpack.c.bf16 %v1153_v15, %v1149_v14  ;;  %v4351_v9 = vpack.c.bf16 %v1194_v4, %v1190_v3  ;;  %v1189_v10 = vld [vmem:[%s10477_s1 + $0x23c0] sm:$0xff]  ;;  %v1198_v15 = vld [vmem:[%s10477_s1 + $0x2408] sm:$0xff] }
 0x218   :  { %5096 = vmatprep.subr.bf16.mxu1 %v5095_v21  ;;  %v1160_v21 = vld [vmem:[%s10477_s1 + $0x22d8] sm:$0xff]  ;;  %v5117_v24 = vpack.c.bf16 %v1155_v18, %v1151_v16  ;;  %v1195_v14 = vld [vmem:[%s10477_s1 + $0x23f0] sm:$0xff]  ;;  %v1202_v16 = vld [vmem:[%s10477_s1 + $0x2428] sm:$0xff] }
 0x219   :  { %v1204_v18 = vld [vmem:[%s10477_s1 + $0x2438] sm:$0xff] }
 0x21a   :  { %4314 = vmatpush1.bf16.msra.mxu0 %v4313_v27  ;;  %v1161_v27 = vld [vmem:[%s10477_s1 + $0x22e0] sm:$0xff]  ;;  %v1224_v55 = vld [vmem:[%s10477_s1 + $0x24d8] sm:$0xff] }
 0x21b   :  { %5098 = vmatpush1.bf16.msra.mxu1 %v5097_v28  ;;  %4316 = vmatprep.subr.bf16.mxu0 %v4315_v29  ;;  %v1159_v28 = vld [vmem:[%s10477_s1 + $0x22d0] sm:$0xff]  ;;  %v5119_v29 = vpack.c.bf16 %v1164_v22, %v1160_v21  ;;  %v4337_v35 = vpack.c.bf16 %v1161_v27, %v1157_v26  ;;  %v4355_v21 = vpack.c.bf16 %v1202_v16, %v1198_v15  ;;  %v1197_v22 = vld [vmem:[%s10477_s1 + $0x2400] sm:$0xff]  ;;  %v1206_v27 = vld [vmem:[%s10477_s1 + $0x2448] sm:$0xff] }
 0x21c   :  { %5100 = vmatprep.subr.bf16.mxu1 %v5099_v33  ;;  %v1168_v33 = vld [vmem:[%s10477_s1 + $0x2318] sm:$0xff]  ;;  %v5121_v36 = vpack.c.bf16 %v1163_v30, %v1159_v28  ;;  %v1203_v26 = vld [vmem:[%s10477_s1 + $0x2430] sm:$0xff]  ;;  %v1210_v28 = vld [vmem:[%s10477_s1 + $0x2468] sm:$0xff] }
 0x21d   :  { %v1212_v30 = vld [vmem:[%s10477_s1 + $0x2478] sm:$0xff] }
 0x21e   :  { %4318 = vmatpush1.bf16.msra.mxu0 %v4317_v39  ;;  %v1169_v39 = vld [vmem:[%s10477_s1 + $0x2320] sm:$0xff]  ;;  %v1228_v56 = vld [vmem:[%s10477_s1 + $0x24f8] sm:$0xff] }
 0x21f   :  { %5102 = vmatpush1.bf16.msra.mxu1 %v5101_v40  ;;  %4320 = vmatprep.subr.bf16.mxu0 %v4319_v41  ;;  %v1167_v40 = vld [vmem:[%s10477_s1 + $0x2310] sm:$0xff]  ;;  %v5123_v41 = vpack.c.bf16 %v1172_v34, %v1168_v33  ;;  %v4341_v47 = vpack.c.bf16 %v1169_v39, %v1165_v38  ;;  %v4359_v34 = vpack.c.bf16 %v1210_v28, %v1206_v27  ;;  %v1232_v3 = vld [vmem:[%s10477_s1 + $0x2518] sm:$0xff] }
 0x220   :  { %5104 = vmatprep.subr.bf16.mxu1 %v5103_v45  ;;  %v1176_v45 = vld [vmem:[%s10477_s1 + $0x2358] sm:$0xff]  ;;  %v5125_v48 = vpack.c.bf16 %v1171_v42, %v1167_v40  ;;  %v1211_v39 = vld [vmem:[%s10477_s1 + $0x2470] sm:$0xff]  ;;  %v1214_v40 = vld [vmem:[%s10477_s1 + $0x2488] sm:$0xff] }
 0x221   :  { %v1216_v42 = vld [vmem:[%s10477_s1 + $0x2498] sm:$0xff] }
 0x222   :  { %4322 = vmatpush1.bf16.msra.mxu0 %v4321_v51  ;;  %v1177_v51 = vld [vmem:[%s10477_s1 + $0x2360] sm:$0xff]  ;;  %v1236_v4 = vld [vmem:[%s10477_s1 + $0x2538] sm:$0xff] }
 0x223   :  { %5106 = vmatpush1.bf16.msra.mxu1 %v5105_v52  ;;  %4324 = vmatprep.subr.bf16.mxu0 %v4323_v53  ;;  %v1175_v52 = vld [vmem:[%s10477_s1 + $0x2350] sm:$0xff]  ;;  %v5127_v53 = vpack.c.bf16 %v1180_v46, %v1176_v45  ;;  %v4345_v59 = vpack.c.bf16 %v1177_v51, %v1173_v50  ;;  %v5147_v51 = vpack.c.bf16 %v1220_v43, %v1216_v42  ;;  %v1240_v15 = vld [vmem:[%s10477_s1 + $0x2558] sm:$0xff] }
 0x224   :  { %5108 = vmatprep.subr.bf16.mxu1 %v5107_v57  ;;  %v1184_v57 = vld [vmem:[%s10477_s1 + $0x2398] sm:$0xff]  ;;  %v5129_v60 = vpack.c.bf16 %v1179_v54, %v1175_v52  ;;  %v1215_v50 = vld [vmem:[%s10477_s1 + $0x2490] sm:$0xff]  ;;  %v1226_v54 = vld [vmem:[%s10477_s1 + $0x24e8] sm:$0xff] }
 0x225   :  { %v1219_v52 = vld [vmem:[%s10477_s1 + $0x24b0] sm:$0xff]  ;;  %v1244_v16 = vld [vmem:[%s10477_s1 + $0x2578] sm:$0xff] }
 0x226   :  { %4326 = vmatpush1.bf16.msra.mxu0 %v4325_v63  ;;  %v1185_v63 = vld [vmem:[%s10477_s1 + $0x23a0] sm:$0xff]  ;;  %v1248_v27 = vld [vmem:[%s10477_s1 + $0x2598] sm:$0xff] }
 0x227   :  { %5110 = vmatpush1.bf16.msra.mxu1 %v5109_v0  ;;  %4328 = vmatprep.subr.bf16.mxu0 %v4327_v1  ;;  %v1183_v0 = vld [vmem:[%s10477_s1 + $0x2390] sm:$0xff]  ;;  %v5131_v1 = vpack.c.bf16 %v1188_v58, %v1184_v57  ;;  %v4349_v7 = vpack.c.bf16 %v1185_v63, %v1181_v62  ;;  %v5149_v58 = vpack.c.bf16 %v1219_v52, %v1215_v50  ;;  %v1252_v28 = vld [vmem:[%s10477_s1 + $0x25b8] sm:$0xff]  ;;  %v1266_v50 = vld [vmem:[%s10477_s1 + $0x2628] sm:$0xff] }
 0x228   :  { %5112 = vmatprep.subr.bf16.mxu1 %v5111_v5  ;;  %v1192_v5 = vld [vmem:[%s10477_s1 + $0x23d8] sm:$0xff]  ;;  %v5133_v8 = vpack.c.bf16 %v1187_v2, %v1183_v0  ;;  %v1223_v62 = vld [vmem:[%s10477_s1 + $0x24d0] sm:$0xff]  ;;  %v5151_v63 = vpack.c.bf16 %v1228_v56, %v1224_v55  ;;  %v1234_v2 = vld [vmem:[%s10477_s1 + $0x2528] sm:$0xff] }
 0x229   :  { %v1227_v0 = vld [vmem:[%s10477_s1 + $0x24f0] sm:$0xff]  ;;  %v1268_v52 = vld [vmem:[%s10477_s1 + $0x2638] sm:$0xff]  ;;  %v1261_v56 = vld [vmem:[%s10477_s1 + $0x2600] sm:$0xff] }
 0x22a   :  { %4330 = vmatpush1.bf16.msra.mxu0 %v4329_v11  ;;  %v1193_v11 = vld [vmem:[%s10477_s1 + $0x23e0] sm:$0xff] }
 0x22b   :  { %5114 = vmatpush1.bf16.msra.mxu1 %v5113_v12  ;;  %4332 = vmatprep.subr.bf16.mxu0 %v4331_v13  ;;  %v1191_v12 = vld [vmem:[%s10477_s1 + $0x23d0] sm:$0xff]  ;;  %v5135_v13 = vpack.c.bf16 %v1196_v6, %v1192_v5  ;;  %v4353_v19 = vpack.c.bf16 %v1193_v11, %v1189_v10  ;;  %v5153_v6 = vpack.c.bf16 %v1227_v0, %v1223_v62  ;;  %v1274_v62 = vld [vmem:[%s10477_s1 + $0x2668] sm:$0xff]  ;;  %v1276_v0 = vld [vmem:[%s10477_s1 + $0x2678] sm:$0xff] }
 0x22c   :  { %5116 = vmatprep.subr.bf16.mxu1 %v5115_v17  ;;  %v1200_v17 = vld [vmem:[%s10477_s1 + $0x2418] sm:$0xff]  ;;  %v5137_v20 = vpack.c.bf16 %v1195_v14, %v1191_v12  ;;  %v1231_v10 = vld [vmem:[%s10477_s1 + $0x2510] sm:$0xff]  ;;  %v5155_v11 = vpack.c.bf16 %v1236_v4, %v1232_v3  ;;  %v1242_v14 = vld [vmem:[%s10477_s1 + $0x2568] sm:$0xff] }
 0x22d   :  { %v1235_v12 = vld [vmem:[%s10477_s1 + $0x2530] sm:$0xff]  ;;  %v1269_v4 = vld [vmem:[%s10477_s1 + $0x2640] sm:$0xff] }
 0x22e   :  { %4334 = vmatpush1.bf16.msra.mxu0 %v4333_v23  ;;  %v1201_v23 = vld [vmem:[%s10477_s1 + $0x2420] sm:$0xff] }
 0x22f   :  { %5118 = vmatpush1.bf16.msra.mxu1 %v5117_v24  ;;  %4336 = vmatprep.subr.bf16.mxu0 %v4335_v25  ;;  %v1199_v24 = vld [vmem:[%s10477_s1 + $0x2410] sm:$0xff]  ;;  %v5139_v25 = vpack.c.bf16 %v1204_v18, %v1200_v17  ;;  %v4357_v32 = vpack.c.bf16 %v1201_v23, %v1197_v22  ;;  %v5157_v18 = vpack.c.bf16 %v1235_v12, %v1231_v10  ;;  %v1282_v10 = vld [vmem:[%s10477_s1 + $0x26a8] sm:$0xff]  ;;  %v1284_v12 = vld [vmem:[%s10477_s1 + $0x26b8] sm:$0xff] }
 0x230   :  { %5120 = vmatprep.subr.bf16.mxu1 %v5119_v29  ;;  %v1208_v29 = vld [vmem:[%s10477_s1 + $0x2458] sm:$0xff]  ;;  %v5141_v33 = vpack.c.bf16 %v1203_v26, %v1199_v24  ;;  %v1239_v22 = vld [vmem:[%s10477_s1 + $0x2550] sm:$0xff]  ;;  %v5159_v23 = vpack.c.bf16 %v1244_v16, %v1240_v15  ;;  %v1250_v26 = vld [vmem:[%s10477_s1 + $0x25a8] sm:$0xff] }
 0x231   :  { %v5143_v38 = vpack.c.bf16 %v1212_v30, %v1208_v29  ;;  %v1243_v24 = vld [vmem:[%s10477_s1 + $0x2570] sm:$0xff]  ;;  %v1277_v16 = vld [vmem:[%s10477_s1 + $0x2680] sm:$0xff] }
 0x232   :  { %4338 = vmatpush1.bf16.msra.mxu0 %v4337_v35  ;;  %v1205_v35 = vld [vmem:[%s10477_s1 + $0x2440] sm:$0xff]  ;;  %v5161_v30 = vpack.c.bf16 %v1243_v24, %v1239_v22  ;;  %v1290_v22 = vld [vmem:[%s10477_s1 + $0x26e8] sm:$0xff]  ;;  %v1292_v24 = vld [vmem:[%s10477_s1 + $0x26f8] sm:$0xff] }
 0x233   :  { %5122 = vmatpush1.bf16.msra.mxu1 %v5121_v36  ;;  %4340 = vmatprep.subr.bf16.mxu0 %v4339_v37  ;;  %v1209_v36 = vld [vmem:[%s10477_s1 + $0x2460] sm:$0xff]  ;;  %v1207_v37 = vld [vmem:[%s10477_s1 + $0x2450] sm:$0xff] }
 0x234   :  { %5124 = vmatprep.subr.bf16.mxu1 %v5123_v41  ;;  %v1218_v41 = vld [vmem:[%s10477_s1 + $0x24a8] sm:$0xff]  ;;  %v4361_v45 = vpack.c.bf16 %v1209_v36, %v1205_v35  ;;  %v5145_v46 = vpack.c.bf16 %v1211_v39, %v1207_v37  ;;  %v5163_v35 = vpack.c.bf16 %v1252_v28, %v1248_v27  ;;  %v1251_v36 = vld [vmem:[%s10477_s1 + $0x25b0] sm:$0xff]  ;;  %v1256_v39 = vld [vmem:[%s10477_s1 + $0x25d8] sm:$0xff] }
 0x235   :  { %v1254_v37 = vld [vmem:[%s10477_s1 + $0x25c8] sm:$0xff]  ;;  %v1285_v28 = vld [vmem:[%s10477_s1 + $0x26c0] sm:$0xff] }
 0x236   :  { %4342 = vmatpush1.bf16.msra.mxu0 %v4341_v47  ;;  %v4363_v47 = vpack.c.bf16 %v1218_v41, %v1214_v40  ;;  %v1260_v40 = vld [vmem:[%s10477_s1 + $0x25f8] sm:$0xff] }
 0x237   :  { %5126 = vmatpush1.bf16.msra.mxu1 %v5125_v48  ;;  %4344 = vmatprep.subr.bf16.mxu0 %v4343_v49  ;;  %v1213_v48 = vld [vmem:[%s10477_s1 + $0x2480] sm:$0xff] }
 0x238   :  { %5128 = vmatprep.subr.bf16.mxu1 %v5127_v53  ;;  %v1217_v49 = vld [vmem:[%s10477_s1 + $0x24a0] sm:$0xff]  ;;  %v1222_v53 = vld [vmem:[%s10477_s1 + $0x24c8] sm:$0xff] }
 0x239   :  { %v4365_v57 = vpack.c.bf16 %v1217_v49, %v1213_v48  ;;  %v1259_v48 = vld [vmem:[%s10477_s1 + $0x25f0] sm:$0xff]  ;;  %v1262_v49 = vld [vmem:[%s10477_s1 + $0x2608] sm:$0xff] }
 0x23a   :  { %4346 = vmatpush1.bf16.msra.mxu0 %v4345_v59  ;;  %v4367_v59 = vpack.c.bf16 %v1226_v54, %v1222_v53  ;;  %v4387_v55 = vpack.c.bf16 %v1266_v50, %v1262_v49 }
 0x23b   :  { %5130 = vmatpush1.bf16.msra.mxu1 %v5129_v60  ;;  %4348 = vmatprep.subr.bf16.mxu0 %v4347_v61  ;;  %v1221_v60 = vld [vmem:[%s10477_s1 + $0x24c0] sm:$0xff] }
 0x23c   :  { %5132 = vmatprep.subr.bf16.mxu1 %v5131_v1  ;;  %v1225_v61 = vld [vmem:[%s10477_s1 + $0x24e0] sm:$0xff]  ;;  %v1230_v1 = vld [vmem:[%s10477_s1 + $0x2508] sm:$0xff] }
 0x23d   :  { %v4369_v5 = vpack.c.bf16 %v1225_v61, %v1221_v60  ;;  %v1267_v60 = vld [vmem:[%s10477_s1 + $0x2630] sm:$0xff]  ;;  %v1270_v61 = vld [vmem:[%s10477_s1 + $0x2648] sm:$0xff] }
 0x23e   :  { %4350 = vmatpush1.bf16.msra.mxu0 %v4349_v7  ;;  %v4371_v7 = vpack.c.bf16 %v1234_v2, %v1230_v1  ;;  %v4391_v3 = vpack.c.bf16 %v1274_v62, %v1270_v61 }
 0x23f   :  { %5134 = vmatpush1.bf16.msra.mxu1 %v5133_v8  ;;  %4352 = vmatprep.subr.bf16.mxu0 %v4351_v9  ;;  %v1229_v8 = vld [vmem:[%s10477_s1 + $0x2500] sm:$0xff] }
 0x240   :  { %5136 = vmatprep.subr.bf16.mxu1 %v5135_v13  ;;  %v1233_v9 = vld [vmem:[%s10477_s1 + $0x2520] sm:$0xff]  ;;  %v1238_v13 = vld [vmem:[%s10477_s1 + $0x2548] sm:$0xff] }
 0x241   :  { %v4373_v17 = vpack.c.bf16 %v1233_v9, %v1229_v8  ;;  %v1275_v8 = vld [vmem:[%s10477_s1 + $0x2670] sm:$0xff]  ;;  %v1278_v9 = vld [vmem:[%s10477_s1 + $0x2688] sm:$0xff] }
 0x242   :  { %4354 = vmatpush1.bf16.msra.mxu0 %v4353_v19  ;;  %v4375_v19 = vpack.c.bf16 %v1242_v14, %v1238_v13  ;;  %v4395_v15 = vpack.c.bf16 %v1282_v10, %v1278_v9 }
 0x243   :  { %5138 = vmatpush1.bf16.msra.mxu1 %v5137_v20  ;;  %4356 = vmatprep.subr.bf16.mxu0 %v4355_v21  ;;  %v1237_v20 = vld [vmem:[%s10477_s1 + $0x2540] sm:$0xff] }
 0x244   :  { %5140 = vmatprep.subr.bf16.mxu1 %v5139_v25  ;;  %v1241_v21 = vld [vmem:[%s10477_s1 + $0x2560] sm:$0xff]  ;;  %v1246_v25 = vld [vmem:[%s10477_s1 + $0x2588] sm:$0xff] }
 0x245   :  { %2272 = vmatmul.mubr.f32.vlgmr.msra.gmra.mrb[0].mxu0 %v36_v31  ;;  %v4377_v29 = vpack.c.bf16 %v1241_v21, %v1237_v20  ;;  %v1283_v20 = vld [vmem:[%s10477_s1 + $0x26b0] sm:$0xff]  ;;  %v1286_v21 = vld [vmem:[%s10477_s1 + $0x26c8] sm:$0xff] }
 0x246   :  { %4358 = vmatpush1.bf16.msra.mxu0 %v4357_v32  ;;  %3195 = vmatmul.mubr.f32.vlgmr.msra.gmra.mrb[0].mxu1 %v36_v31  ;;  %v4379_v31 = vpack.c.bf16 %v1250_v26, %v1246_v25  ;;  %v1245_v32 = vld [vmem:[%s10477_s1 + $0x2580] sm:$0xff]  ;;  %v4399_v27 = vpack.c.bf16 %v1290_v22, %v1286_v21 }
 0x247   :  { %5142 = vmatpush1.bf16.msra.mxu1 %v5141_v33  ;;  %4360 = vmatprep.subr.bf16.mxu0 %v4359_v34  ;;  %v1249_v33 = vld [vmem:[%s10477_s1 + $0x25a0] sm:$0xff]  ;;  %v1247_v34 = vld [vmem:[%s10477_s1 + $0x2590] sm:$0xff] }
 0x248   :  { %5144 = vmatprep.subr.bf16.mxu1 %v5143_v38  ;;  %2342 = vmatprep.mubr.f32.mxu0 %v39_v44  ;;  %v1258_v38 = vld [vmem:[%s10477_s1 + $0x25e8] sm:$0xff]  ;;  %v4381_v41 = vpack.c.bf16 %v1249_v33, %v1245_v32  ;;  %v5165_v42 = vpack.c.bf16 %v1251_v36, %v1247_v34  ;;  %v1291_v32 = vld [vmem:[%s10477_s1 + $0x26f0] sm:$0xff]  ;;  %v1300_v36 = vld [vmem:[%s10477_s1 + $0x2738] sm:$0xff] }
 0x249   :  { %3265 = vmatprep.mubr.f32.mxu1 %v39_v44  ;;  %v4383_v43 = vpack.c.bf16 %v1258_v38, %v1254_v37  ;;  %v1253_v44 = vld [vmem:[%s10477_s1 + $0x25c0] sm:$0xff]  ;;  %v1294_v33 = vld [vmem:[%s10477_s1 + $0x2708] sm:$0xff] }
 0x24a   :  { %4362 = vmatpush1.bf16.msra.mxu0 %v4361_v45  ;;  %v1257_v45 = vld [vmem:[%s10477_s1 + $0x25e0] sm:$0xff]  ;;  %v1298_v34 = vld [vmem:[%s10477_s1 + $0x2728] sm:$0xff] }
 0x24b   :  { %5146 = vmatpush1.bf16.msra.mxu1 %v5145_v46  ;;  %4364 = vmatprep.subr.bf16.mxu0 %v4363_v47  ;;  %v1255_v46 = vld [vmem:[%s10477_s1 + $0x25d0] sm:$0xff]  ;;  %v5167_v47 = vpack.c.bf16 %v1260_v40, %v1256_v39  ;;  %v4385_v53 = vpack.c.bf16 %v1257_v45, %v1253_v44  ;;  %v4403_v39 = vpack.c.bf16 %v1298_v34, %v1294_v33  ;;  %v1293_v40 = vld [vmem:[%s10477_s1 + $0x2700] sm:$0xff]  ;;  %v1302_v45 = vld [vmem:[%s10477_s1 + $0x2748] sm:$0xff] }
 0x24c   :  { %5148 = vmatprep.subr.bf16.mxu1 %v5147_v51  ;;  %v1264_v51 = vld [vmem:[%s10477_s1 + $0x2618] sm:$0xff]  ;;  %v5169_v54 = vpack.c.bf16 %v1259_v48, %v1255_v46  ;;  %v1299_v44 = vld [vmem:[%s10477_s1 + $0x2730] sm:$0xff]  ;;  %v1306_v46 = vld [vmem:[%s10477_s1 + $0x2768] sm:$0xff] }
 0x24d   :  { %v1308_v48 = vld [vmem:[%s10477_s1 + $0x2778] sm:$0xff]  ;;  %v38_v33 = vld [vmem:[%s10478_s0 + $0x90] sm:$0xff] }
 0x24e   :  { %4366 = vmatpush1.bf16.msra.mxu0 %v4365_v57  ;;  %v1265_v57 = vld [vmem:[%s10477_s1 + $0x2620] sm:$0xff] }
 0x24f   :  { %5150 = vmatpush1.bf16.msra.mxu1 %v5149_v58  ;;  %4368 = vmatprep.subr.bf16.mxu0 %v4367_v59  ;;  %v1263_v58 = vld [vmem:[%s10477_s1 + $0x2610] sm:$0xff]  ;;  %v5171_v59 = vpack.c.bf16 %v1268_v52, %v1264_v51  ;;  %v4389_v1 = vpack.c.bf16 %v1265_v57, %v1261_v56  ;;  %v4407_v51 = vpack.c.bf16 %v1306_v46, %v1302_v45  ;;  %v1301_v52 = vld [vmem:[%s10477_s1 + $0x2740] sm:$0xff]  ;;  %v1310_v57 = vld [vmem:[%s10477_s1 + $0x2788] sm:$0xff] }
 0x250   :  { %5152 = vmatprep.subr.bf16.mxu1 %v5151_v63  ;;  %v1272_v63 = vld [vmem:[%s10477_s1 + $0x2658] sm:$0xff]  ;;  %v5173_v2 = vpack.c.bf16 %v1267_v60, %v1263_v58  ;;  %v1307_v56 = vld [vmem:[%s10477_s1 + $0x2770] sm:$0xff]  ;;  %v1314_v58 = vld [vmem:[%s10477_s1 + $0x27a8] sm:$0xff] }
 0x251   :  { %v1316_v60 = vld [vmem:[%s10477_s1 + $0x27b8] sm:$0xff]  ;;  %v41_v46 = vld [vmem:[%s10478_s0 + $0xa8] sm:$0xff] }
 0x252   :  { %4370 = vmatpush1.bf16.msra.mxu0 %v4369_v5  ;;  %v1273_v5 = vld [vmem:[%s10477_s1 + $0x2660] sm:$0xff]  ;;  %v1348_v45 = vld [vmem:[%s10477_s1 + $0x28b8] sm:$0xff] }
 0x253   :  { %5154 = vmatpush1.bf16.msra.mxu1 %v5153_v6  ;;  %4372 = vmatprep.subr.bf16.mxu0 %v4371_v7  ;;  %v1271_v6 = vld [vmem:[%s10477_s1 + $0x2650] sm:$0xff]  ;;  %v5175_v7 = vpack.c.bf16 %v1276_v0, %v1272_v63  ;;  %v4393_v13 = vpack.c.bf16 %v1273_v5, %v1269_v4  ;;  %v4411_v63 = vpack.c.bf16 %v1314_v58, %v1310_v57  ;;  %v1309_v0 = vld [vmem:[%s10477_s1 + $0x2780] sm:$0xff]  ;;  %v1318_v5 = vld [vmem:[%s10477_s1 + $0x27c8] sm:$0xff] }
 0x254   :  { %5156 = vmatprep.subr.bf16.mxu1 %v5155_v11  ;;  %v1280_v11 = vld [vmem:[%s10477_s1 + $0x2698] sm:$0xff]  ;;  %v5177_v14 = vpack.c.bf16 %v1275_v8, %v1271_v6  ;;  %v1315_v4 = vld [vmem:[%s10477_s1 + $0x27b0] sm:$0xff]  ;;  %v1322_v6 = vld [vmem:[%s10477_s1 + $0x27e8] sm:$0xff] }
 0x255   :  { %v1324_v8 = vld [vmem:[%s10477_s1 + $0x27f8] sm:$0xff] }
 0x256   :  { %4374 = vmatpush1.bf16.msra.mxu0 %v4373_v17  ;;  %v1281_v17 = vld [vmem:[%s10477_s1 + $0x26a0] sm:$0xff]  ;;  %v1352_v57 = vld [vmem:[%s10477_s1 + $0x28d8] sm:$0xff] }
 0x257   :  { %5158 = vmatpush1.bf16.msra.mxu1 %v5157_v18  ;;  %4376 = vmatprep.subr.bf16.mxu0 %v4375_v19  ;;  %v1279_v18 = vld [vmem:[%s10477_s1 + $0x2690] sm:$0xff]  ;;  %v5179_v19 = vpack.c.bf16 %v1284_v12, %v1280_v11  ;;  %v4397_v25 = vpack.c.bf16 %v1281_v17, %v1277_v16  ;;  %v4415_v11 = vpack.c.bf16 %v1322_v6, %v1318_v5  ;;  %v1317_v12 = vld [vmem:[%s10477_s1 + $0x27c0] sm:$0xff]  ;;  %v1326_v17 = vld [vmem:[%s10477_s1 + $0x2808] sm:$0xff] }
 0x258   :  { %5160 = vmatprep.subr.bf16.mxu1 %v5159_v23  ;;  %v1288_v23 = vld [vmem:[%s10477_s1 + $0x26d8] sm:$0xff]  ;;  %v5181_v26 = vpack.c.bf16 %v1283_v20, %v1279_v18  ;;  %v1323_v16 = vld [vmem:[%s10477_s1 + $0x27f0] sm:$0xff]  ;;  %v1330_v18 = vld [vmem:[%s10477_s1 + $0x2828] sm:$0xff] }
 0x259   :  { %v1332_v20 = vld [vmem:[%s10477_s1 + $0x2838] sm:$0xff] }
 0x25a   :  { %4378 = vmatpush1.bf16.msra.mxu0 %v4377_v29  ;;  %v1289_v29 = vld [vmem:[%s10477_s1 + $0x26e0] sm:$0xff]  ;;  %v1356_v58 = vld [vmem:[%s10477_s1 + $0x28f8] sm:$0xff] }
 0x25b   :  { %5162 = vmatpush1.bf16.msra.mxu1 %v5161_v30  ;;  %4380 = vmatprep.subr.bf16.mxu0 %v4379_v31  ;;  %v1287_v30 = vld [vmem:[%s10477_s1 + $0x26d0] sm:$0xff]  ;;  %v5183_v31 = vpack.c.bf16 %v1292_v24, %v1288_v23  ;;  %v4401_v37 = vpack.c.bf16 %v1289_v29, %v1285_v28  ;;  %v4419_v23 = vpack.c.bf16 %v1330_v18, %v1326_v17  ;;  %v1325_v24 = vld [vmem:[%s10477_s1 + $0x2800] sm:$0xff]  ;;  %v1334_v29 = vld [vmem:[%s10477_s1 + $0x2848] sm:$0xff] }
 0x25c   :  { %5164 = vmatprep.subr.bf16.mxu1 %v5163_v35  ;;  %v1296_v35 = vld [vmem:[%s10477_s1 + $0x2718] sm:$0xff]  ;;  %v5185_v38 = vpack.c.bf16 %v1291_v32, %v1287_v30  ;;  %v1331_v28 = vld [vmem:[%s10477_s1 + $0x2830] sm:$0xff]  ;;  %v1338_v30 = vld [vmem:[%s10477_s1 + $0x2868] sm:$0xff] }
 0x25d   :  { %v1340_v32 = vld [vmem:[%s10477_s1 + $0x2878] sm:$0xff] }
 0x25e   :  { %4382 = vmatpush1.bf16.msra.mxu0 %v4381_v41  ;;  %v1297_v41 = vld [vmem:[%s10477_s1 + $0x2720] sm:$0xff]  ;;  %v1360_v5 = vld [vmem:[%s10477_s1 + $0x2918] sm:$0xff] }
 0x25f   :  { %5166 = vmatpush1.bf16.msra.mxu1 %v5165_v42  ;;  %4384 = vmatprep.subr.bf16.mxu0 %v4383_v43  ;;  %v1295_v42 = vld [vmem:[%s10477_s1 + $0x2710] sm:$0xff]  ;;  %v5187_v43 = vpack.c.bf16 %v1300_v36, %v1296_v35  ;;  %v4405_v49 = vpack.c.bf16 %v1297_v41, %v1293_v40  ;;  %v4423_v36 = vpack.c.bf16 %v1338_v30, %v1334_v29  ;;  %v1364_v6 = vld [vmem:[%s10477_s1 + $0x2938] sm:$0xff] }
 0x260   :  { %5168 = vmatprep.subr.bf16.mxu1 %v5167_v47  ;;  %v1304_v47 = vld [vmem:[%s10477_s1 + $0x2758] sm:$0xff]  ;;  %v5189_v50 = vpack.c.bf16 %v1299_v44, %v1295_v42  ;;  %v1339_v41 = vld [vmem:[%s10477_s1 + $0x2870] sm:$0xff]  ;;  %v1342_v42 = vld [vmem:[%s10477_s1 + $0x2888] sm:$0xff] }
 0x261   :  { %v1344_v44 = vld [vmem:[%s10477_s1 + $0x2898] sm:$0xff] }
 0x262   :  { %4386 = vmatpush1.bf16.msra.mxu0 %v4385_v53  ;;  %v1305_v53 = vld [vmem:[%s10477_s1 + $0x2760] sm:$0xff]  ;;  %v1368_v17 = vld [vmem:[%s10477_s1 + $0x2958] sm:$0xff] }
 0x263   :  { %5170 = vmatpush1.bf16.msra.mxu1 %v5169_v54  ;;  %4388 = vmatprep.subr.bf16.mxu0 %v4387_v55  ;;  %v1303_v54 = vld [vmem:[%s10477_s1 + $0x2750] sm:$0xff]  ;;  %v5191_v55 = vpack.c.bf16 %v1308_v48, %v1304_v47  ;;  %v4409_v61 = vpack.c.bf16 %v1305_v53, %v1301_v52  ;;  %v5211_v53 = vpack.c.bf16 %v1348_v45, %v1344_v44  ;;  %v1372_v18 = vld [vmem:[%s10477_s1 + $0x2978] sm:$0xff] }
 0x264   :  { %5172 = vmatprep.subr.bf16.mxu1 %v5171_v59  ;;  %v1312_v59 = vld [vmem:[%s10477_s1 + $0x2798] sm:$0xff]  ;;  %v5193_v62 = vpack.c.bf16 %v1307_v56, %v1303_v54  ;;  %v1343_v52 = vld [vmem:[%s10477_s1 + $0x2890] sm:$0xff]  ;;  %v1354_v56 = vld [vmem:[%s10477_s1 + $0x28e8] sm:$0xff] }
 0x265   :  { %v1347_v54 = vld [vmem:[%s10477_s1 + $0x28b0] sm:$0xff]  ;;  %v1376_v29 = vld [vmem:[%s10477_s1 + $0x2998] sm:$0xff] }
 0x266   :  { %4390 = vmatpush1.bf16.msra.mxu0 %v4389_v1  ;;  %v1313_v1 = vld [vmem:[%s10477_s1 + $0x27a0] sm:$0xff]  ;;  %v1380_v30 = vld [vmem:[%s10477_s1 + $0x29b8] sm:$0xff] }
 0x267   :  { %5174 = vmatpush1.bf16.msra.mxu1 %v5173_v2  ;;  %4392 = vmatprep.subr.bf16.mxu0 %v4391_v3  ;;  %v1311_v2 = vld [vmem:[%s10477_s1 + $0x2790] sm:$0xff]  ;;  %v5195_v3 = vpack.c.bf16 %v1316_v60, %v1312_v59  ;;  %v4413_v9 = vpack.c.bf16 %v1313_v1, %v1309_v0  ;;  %v5213_v60 = vpack.c.bf16 %v1347_v54, %v1343_v52  ;;  %v1394_v52 = vld [vmem:[%s10477_s1 + $0x2a28] sm:$0xff]  ;;  %v1396_v54 = vld [vmem:[%s10477_s1 + $0x2a38] sm:$0xff] }
 0x268   :  { %5176 = vmatprep.subr.bf16.mxu1 %v5175_v7  ;;  %v1320_v7 = vld [vmem:[%s10477_s1 + $0x27d8] sm:$0xff]  ;;  %v5197_v10 = vpack.c.bf16 %v1315_v4, %v1311_v2  ;;  %v1351_v0 = vld [vmem:[%s10477_s1 + $0x28d0] sm:$0xff]  ;;  %v5215_v1 = vpack.c.bf16 %v1356_v58, %v1352_v57  ;;  %v1362_v4 = vld [vmem:[%s10477_s1 + $0x2928] sm:$0xff] }
 0x269   :  { %v1355_v2 = vld [vmem:[%s10477_s1 + $0x28f0] sm:$0xff]  ;;  %v1389_v58 = vld [vmem:[%s10477_s1 + $0x2a00] sm:$0xff] }
 0x26a   :  { %4394 = vmatpush1.bf16.msra.mxu0 %v4393_v13  ;;  %v1321_v13 = vld [vmem:[%s10477_s1 + $0x27e0] sm:$0xff] }
 0x26b   :  { %5178 = vmatpush1.bf16.msra.mxu1 %v5177_v14  ;;  %4396 = vmatprep.subr.bf16.mxu0 %v4395_v15  ;;  %v1319_v14 = vld [vmem:[%s10477_s1 + $0x27d0] sm:$0xff]  ;;  %v5199_v15 = vpack.c.bf16 %v1324_v8, %v1320_v7  ;;  %v4417_v21 = vpack.c.bf16 %v1321_v13, %v1317_v12  ;;  %v5217_v8 = vpack.c.bf16 %v1355_v2, %v1351_v0  ;;  %v1402_v0 = vld [vmem:[%s10477_s1 + $0x2a68] sm:$0xff]  ;;  %v1404_v2 = vld [vmem:[%s10477_s1 + $0x2a78] sm:$0xff] }
 0x26c   :  { %5180 = vmatprep.subr.bf16.mxu1 %v5179_v19  ;;  %v1328_v19 = vld [vmem:[%s10477_s1 + $0x2818] sm:$0xff]  ;;  %v5201_v22 = vpack.c.bf16 %v1323_v16, %v1319_v14  ;;  %v1359_v12 = vld [vmem:[%s10477_s1 + $0x2910] sm:$0xff]  ;;  %v5219_v13 = vpack.c.bf16 %v1364_v6, %v1360_v5  ;;  %v1370_v16 = vld [vmem:[%s10477_s1 + $0x2968] sm:$0xff] }
 0x26d   :  { %v1363_v14 = vld [vmem:[%s10477_s1 + $0x2930] sm:$0xff]  ;;  %v1397_v6 = vld [vmem:[%s10477_s1 + $0x2a40] sm:$0xff] }
 0x26e   :  { %4398 = vmatpush1.bf16.msra.mxu0 %v4397_v25  ;;  %v1329_v25 = vld [vmem:[%s10477_s1 + $0x2820] sm:$0xff] }
 0x26f   :  { %5182 = vmatpush1.bf16.msra.mxu1 %v5181_v26  ;;  %4400 = vmatprep.subr.bf16.mxu0 %v4399_v27  ;;  %v1327_v26 = vld [vmem:[%s10477_s1 + $0x2810] sm:$0xff]  ;;  %v5203_v27 = vpack.c.bf16 %v1332_v20, %v1328_v19  ;;  %v4421_v34 = vpack.c.bf16 %v1329_v25, %v1325_v24  ;;  %v5221_v20 = vpack.c.bf16 %v1363_v14, %v1359_v12  ;;  %v1410_v12 = vld [vmem:[%s10477_s1 + $0x2aa8] sm:$0xff]  ;;  %v1412_v14 = vld [vmem:[%s10477_s1 + $0x2ab8] sm:$0xff] }
 0x270   :  { %5184 = vmatprep.subr.bf16.mxu1 %v5183_v31  ;;  %v1336_v31 = vld [vmem:[%s10477_s1 + $0x2858] sm:$0xff]  ;;  %v5205_v35 = vpack.c.bf16 %v1331_v28, %v1327_v26  ;;  %v1367_v24 = vld [vmem:[%s10477_s1 + $0x2950] sm:$0xff]  ;;  %v5223_v25 = vpack.c.bf16 %v1372_v18, %v1368_v17  ;;  %v1378_v28 = vld [vmem:[%s10477_s1 + $0x29a8] sm:$0xff] }
 0x271   :  { %v5207_v40 = vpack.c.bf16 %v1340_v32, %v1336_v31  ;;  %v1371_v26 = vld [vmem:[%s10477_s1 + $0x2970] sm:$0xff]  ;;  %v1405_v18 = vld [vmem:[%s10477_s1 + $0x2a80] sm:$0xff] }
 0x272   :  { %4402 = vmatpush1.bf16.msra.mxu0 %v4401_v37  ;;  %v1333_v37 = vld [vmem:[%s10477_s1 + $0x2840] sm:$0xff]  ;;  %v5225_v32 = vpack.c.bf16 %v1371_v26, %v1367_v24  ;;  %v1418_v24 = vld [vmem:[%s10477_s1 + $0x2ae8] sm:$0xff]  ;;  %v1420_v26 = vld [vmem:[%s10477_s1 + $0x2af8] sm:$0xff] }
 0x273   :  { %5186 = vmatpush1.bf16.msra.mxu1 %v5185_v38  ;;  %4404 = vmatprep.subr.bf16.mxu0 %v4403_v39  ;;  %v1337_v38 = vld [vmem:[%s10477_s1 + $0x2860] sm:$0xff]  ;;  %v1335_v39 = vld [vmem:[%s10477_s1 + $0x2850] sm:$0xff] }
 0x274   :  { %5188 = vmatprep.subr.bf16.mxu1 %v5187_v43  ;;  %v1346_v43 = vld [vmem:[%s10477_s1 + $0x28a8] sm:$0xff]  ;;  %v4425_v47 = vpack.c.bf16 %v1337_v38, %v1333_v37  ;;  %v5209_v48 = vpack.c.bf16 %v1339_v41, %v1335_v39  ;;  %v5227_v37 = vpack.c.bf16 %v1380_v30, %v1376_v29  ;;  %v1379_v38 = vld [vmem:[%s10477_s1 + $0x29b0] sm:$0xff]  ;;  %v1384_v41 = vld [vmem:[%s10477_s1 + $0x29d8] sm:$0xff] }
 0x275   :  { %v1382_v39 = vld [vmem:[%s10477_s1 + $0x29c8] sm:$0xff]  ;;  %v1413_v30 = vld [vmem:[%s10477_s1 + $0x2ac0] sm:$0xff] }
 0x276   :  { %4406 = vmatpush1.bf16.msra.mxu0 %v4405_v49  ;;  %v4427_v49 = vpack.c.bf16 %v1346_v43, %v1342_v42  ;;  %v1388_v42 = vld [vmem:[%s10477_s1 + $0x29f8] sm:$0xff] }
 0x277   :  { %5190 = vmatpush1.bf16.msra.mxu1 %v5189_v50  ;;  %4408 = vmatprep.subr.bf16.mxu0 %v4407_v51  ;;  %v1341_v50 = vld [vmem:[%s10477_s1 + $0x2880] sm:$0xff] }
 0x278   :  { %5192 = vmatprep.subr.bf16.mxu1 %v5191_v55  ;;  %v1345_v51 = vld [vmem:[%s10477_s1 + $0x28a0] sm:$0xff]  ;;  %v1350_v55 = vld [vmem:[%s10477_s1 + $0x28c8] sm:$0xff] }
 0x279   :  { %v4429_v59 = vpack.c.bf16 %v1345_v51, %v1341_v50  ;;  %v1387_v50 = vld [vmem:[%s10477_s1 + $0x29f0] sm:$0xff]  ;;  %v1390_v51 = vld [vmem:[%s10477_s1 + $0x2a08] sm:$0xff] }
 0x27a   :  { %4410 = vmatpush1.bf16.msra.mxu0 %v4409_v61  ;;  %v4431_v61 = vpack.c.bf16 %v1354_v56, %v1350_v55  ;;  %v4451_v57 = vpack.c.bf16 %v1394_v52, %v1390_v51 }
 0x27b   :  { %5194 = vmatpush1.bf16.msra.mxu1 %v5193_v62  ;;  %4412 = vmatprep.subr.bf16.mxu0 %v4411_v63  ;;  %v1349_v62 = vld [vmem:[%s10477_s1 + $0x28c0] sm:$0xff] }
 0x27c   :  { %5196 = vmatprep.subr.bf16.mxu1 %v5195_v3  ;;  %v1353_v63 = vld [vmem:[%s10477_s1 + $0x28e0] sm:$0xff]  ;;  %v1358_v3 = vld [vmem:[%s10477_s1 + $0x2908] sm:$0xff] }
 0x27d   :  { %v4433_v7 = vpack.c.bf16 %v1353_v63, %v1349_v62  ;;  %v1395_v62 = vld [vmem:[%s10477_s1 + $0x2a30] sm:$0xff]  ;;  %v1398_v63 = vld [vmem:[%s10477_s1 + $0x2a48] sm:$0xff] }
 0x27e   :  { %4414 = vmatpush1.bf16.msra.mxu0 %v4413_v9  ;;  %v4435_v9 = vpack.c.bf16 %v1362_v4, %v1358_v3  ;;  %v4455_v5 = vpack.c.bf16 %v1402_v0, %v1398_v63 }
 0x27f   :  { %5198 = vmatpush1.bf16.msra.mxu1 %v5197_v10  ;;  %4416 = vmatprep.subr.bf16.mxu0 %v4415_v11  ;;  %v1357_v10 = vld [vmem:[%s10477_s1 + $0x2900] sm:$0xff] }
 0x280   :  { %5200 = vmatprep.subr.bf16.mxu1 %v5199_v15  ;;  %v1361_v11 = vld [vmem:[%s10477_s1 + $0x2920] sm:$0xff]  ;;  %v1366_v15 = vld [vmem:[%s10477_s1 + $0x2948] sm:$0xff] }
 0x281   :  { %v4437_v19 = vpack.c.bf16 %v1361_v11, %v1357_v10  ;;  %v1403_v10 = vld [vmem:[%s10477_s1 + $0x2a70] sm:$0xff]  ;;  %v1406_v11 = vld [vmem:[%s10477_s1 + $0x2a88] sm:$0xff] }
 0x282   :  { %4418 = vmatpush1.bf16.msra.mxu0 %v4417_v21  ;;  %v4439_v21 = vpack.c.bf16 %v1370_v16, %v1366_v15  ;;  %v4459_v17 = vpack.c.bf16 %v1410_v12, %v1406_v11 }
 0x283   :  { %5202 = vmatpush1.bf16.msra.mxu1 %v5201_v22  ;;  %4420 = vmatprep.subr.bf16.mxu0 %v4419_v23  ;;  %v1365_v22 = vld [vmem:[%s10477_s1 + $0x2940] sm:$0xff] }
 0x284   :  { %5204 = vmatprep.subr.bf16.mxu1 %v5203_v27  ;;  %v1369_v23 = vld [vmem:[%s10477_s1 + $0x2960] sm:$0xff]  ;;  %v1374_v27 = vld [vmem:[%s10477_s1 + $0x2988] sm:$0xff] }
 0x285   :  { %2343 = vmatmul.mubr.f32.vlgmr.msra.gmra.mrb[0].mxu0 %v38_v33  ;;  %v4441_v31 = vpack.c.bf16 %v1369_v23, %v1365_v22  ;;  %v1411_v22 = vld [vmem:[%s10477_s1 + $0x2ab0] sm:$0xff]  ;;  %v1414_v23 = vld [vmem:[%s10477_s1 + $0x2ac8] sm:$0xff] }
 0x286   :  { %4422 = vmatpush1.bf16.msra.mxu0 %v4421_v34  ;;  %3266 = vmatmul.mubr.f32.vlgmr.msra.gmra.mrb[0].mxu1 %v38_v33  ;;  %v4443_v33 = vpack.c.bf16 %v1378_v28, %v1374_v27  ;;  %v1373_v34 = vld [vmem:[%s10477_s1 + $0x2980] sm:$0xff]  ;;  %v4463_v29 = vpack.c.bf16 %v1418_v24, %v1414_v23 }
 0x287   :  { %5206 = vmatpush1.bf16.msra.mxu1 %v5205_v35  ;;  %4424 = vmatprep.subr.bf16.mxu0 %v4423_v36  ;;  %v1377_v35 = vld [vmem:[%s10477_s1 + $0x29a0] sm:$0xff]  ;;  %v1375_v36 = vld [vmem:[%s10477_s1 + $0x2990] sm:$0xff] }
 0x288   :  { %5208 = vmatprep.subr.bf16.mxu1 %v5207_v40  ;;  %2413 = vmatprep.mubr.f32.mxu0 %v41_v46  ;;  %v1386_v40 = vld [vmem:[%s10477_s1 + $0x29e8] sm:$0xff]  ;;  %v4445_v43 = vpack.c.bf16 %v1377_v35, %v1373_v34  ;;  %v5229_v44 = vpack.c.bf16 %v1379_v38, %v1375_v36  ;;  %v1419_v34 = vld [vmem:[%s10477_s1 + $0x2af0] sm:$0xff]  ;;  %v1428_v38 = vld [vmem:[%s10477_s1 + $0x2b38] sm:$0xff] }
 0x289   :  { %3336 = vmatprep.mubr.f32.mxu1 %v41_v46  ;;  %v4447_v45 = vpack.c.bf16 %v1386_v40, %v1382_v39  ;;  %v1381_v46 = vld [vmem:[%s10477_s1 + $0x29c0] sm:$0xff]  ;;  %v1422_v35 = vld [vmem:[%s10477_s1 + $0x2b08] sm:$0xff] }
 0x28a   :  { %4426 = vmatpush1.bf16.msra.mxu0 %v4425_v47  ;;  %v1385_v47 = vld [vmem:[%s10477_s1 + $0x29e0] sm:$0xff]  ;;  %v1426_v36 = vld [vmem:[%s10477_s1 + $0x2b28] sm:$0xff] }
 0x28b   :  { %5210 = vmatpush1.bf16.msra.mxu1 %v5209_v48  ;;  %4428 = vmatprep.subr.bf16.mxu0 %v4427_v49  ;;  %v1383_v48 = vld [vmem:[%s10477_s1 + $0x29d0] sm:$0xff]  ;;  %v5231_v49 = vpack.c.bf16 %v1388_v42, %v1384_v41  ;;  %v4449_v55 = vpack.c.bf16 %v1385_v47, %v1381_v46  ;;  %v4467_v41 = vpack.c.bf16 %v1426_v36, %v1422_v35  ;;  %v1421_v42 = vld [vmem:[%s10477_s1 + $0x2b00] sm:$0xff]  ;;  %v1430_v47 = vld [vmem:[%s10477_s1 + $0x2b48] sm:$0xff] }
 0x28c   :  { %5212 = vmatprep.subr.bf16.mxu1 %v5211_v53  ;;  %v1392_v53 = vld [vmem:[%s10477_s1 + $0x2a18] sm:$0xff]  ;;  %v5233_v56 = vpack.c.bf16 %v1387_v50, %v1383_v48  ;;  %v1427_v46 = vld [vmem:[%s10477_s1 + $0x2b30] sm:$0xff]  ;;  %v1434_v48 = vld [vmem:[%s10477_s1 + $0x2b68] sm:$0xff] }
 0x28d   :  { %v1436_v50 = vld [vmem:[%s10477_s1 + $0x2b78] sm:$0xff]  ;;  %v40_v35 = vld [vmem:[%s10478_s0 + $0xa0] sm:$0xff] }
 0x28e   :  { %4430 = vmatpush1.bf16.msra.mxu0 %v4429_v59  ;;  %v1393_v59 = vld [vmem:[%s10477_s1 + $0x2a20] sm:$0xff] }
 0x28f   :  { %5214 = vmatpush1.bf16.msra.mxu1 %v5213_v60  ;;  %4432 = vmatprep.subr.bf16.mxu0 %v4431_v61  ;;  %v1391_v60 = vld [vmem:[%s10477_s1 + $0x2a10] sm:$0xff]  ;;  %v5235_v61 = vpack.c.bf16 %v1396_v54, %v1392_v53  ;;  %v4453_v3 = vpack.c.bf16 %v1393_v59, %v1389_v58  ;;  %v4471_v53 = vpack.c.bf16 %v1434_v48, %v1430_v47  ;;  %v1429_v54 = vld [vmem:[%s10477_s1 + $0x2b40] sm:$0xff]  ;;  %v1438_v59 = vld [vmem:[%s10477_s1 + $0x2b88] sm:$0xff] }
 0x290   :  { %5216 = vmatprep.subr.bf16.mxu1 %v5215_v1  ;;  %v1400_v1 = vld [vmem:[%s10477_s1 + $0x2a58] sm:$0xff]  ;;  %v5237_v4 = vpack.c.bf16 %v1395_v62, %v1391_v60  ;;  %v1435_v58 = vld [vmem:[%s10477_s1 + $0x2b70] sm:$0xff]  ;;  %v1442_v60 = vld [vmem:[%s10477_s1 + $0x2ba8] sm:$0xff] }
 0x291   :  { %v1444_v62 = vld [vmem:[%s10477_s1 + $0x2bb8] sm:$0xff] }
 0x292   :  { %4434 = vmatpush1.bf16.msra.mxu0 %v4433_v7  ;;  %v1401_v7 = vld [vmem:[%s10477_s1 + $0x2a60] sm:$0xff]  ;;  %v1476_v47 = vld [vmem:[%s10477_s1 + $0x2cb8] sm:$0xff] }
 0x293   :  { %5218 = vmatpush1.bf16.msra.mxu1 %v5217_v8  ;;  %4436 = vmatprep.subr.bf16.mxu0 %v4435_v9  ;;  %v1399_v8 = vld [vmem:[%s10477_s1 + $0x2a50] sm:$0xff]  ;;  %v5239_v9 = vpack.c.bf16 %v1404_v2, %v1400_v1  ;;  %v4457_v15 = vpack.c.bf16 %v1401_v7, %v1397_v6  ;;  %v4475_v1 = vpack.c.bf16 %v1442_v60, %v1438_v59  ;;  %v1437_v2 = vld [vmem:[%s10477_s1 + $0x2b80] sm:$0xff]  ;;  %v1446_v7 = vld [vmem:[%s10477_s1 + $0x2bc8] sm:$0xff] }
 0x294   :  { %5220 = vmatprep.subr.bf16.mxu1 %v5219_v13  ;;  %v1408_v13 = vld [vmem:[%s10477_s1 + $0x2a98] sm:$0xff]  ;;  %v5241_v16 = vpack.c.bf16 %v1403_v10, %v1399_v8  ;;  %v1443_v6 = vld [vmem:[%s10477_s1 + $0x2bb0] sm:$0xff]  ;;  %v1450_v8 = vld [vmem:[%s10477_s1 + $0x2be8] sm:$0xff] }
 0x295   :  { %v1452_v10 = vld [vmem:[%s10477_s1 + $0x2bf8] sm:$0xff] }
 0x296   :  { %4438 = vmatpush1.bf16.msra.mxu0 %v4437_v19  ;;  %v1409_v19 = vld [vmem:[%s10477_s1 + $0x2aa0] sm:$0xff]  ;;  %v43_v48 = vld [vmem:[%s10478_s0 + $0xb8] sm:$0xff] }
 0x297   :  { %5222 = vmatpush1.bf16.msra.mxu1 %v5221_v20  ;;  %4440 = vmatprep.subr.bf16.mxu0 %v4439_v21  ;;  %v1407_v20 = vld [vmem:[%s10477_s1 + $0x2a90] sm:$0xff]  ;;  %v5243_v21 = vpack.c.bf16 %v1412_v14, %v1408_v13  ;;  %v4461_v27 = vpack.c.bf16 %v1409_v19, %v1405_v18  ;;  %v4479_v13 = vpack.c.bf16 %v1450_v8, %v1446_v7  ;;  %v1445_v14 = vld [vmem:[%s10477_s1 + $0x2bc0] sm:$0xff]  ;;  %v1454_v19 = vld [vmem:[%s10477_s1 + $0x2c08] sm:$0xff] }
 0x298   :  { %5224 = vmatprep.subr.bf16.mxu1 %v5223_v25  ;;  %v1416_v25 = vld [vmem:[%s10477_s1 + $0x2ad8] sm:$0xff]  ;;  %v5245_v28 = vpack.c.bf16 %v1411_v22, %v1407_v20  ;;  %v1451_v18 = vld [vmem:[%s10477_s1 + $0x2bf0] sm:$0xff]  ;;  %v1458_v20 = vld [vmem:[%s10477_s1 + $0x2c28] sm:$0xff] }
 0x299   :  { %v1460_v22 = vld [vmem:[%s10477_s1 + $0x2c38] sm:$0xff] }
 0x29a   :  { %4442 = vmatpush1.bf16.msra.mxu0 %v4441_v31  ;;  %v1417_v31 = vld [vmem:[%s10477_s1 + $0x2ae0] sm:$0xff]  ;;  %v1480_v59 = vld [vmem:[%s10477_s1 + $0x2cd8] sm:$0xff] }
 0x29b   :  { %5226 = vmatpush1.bf16.msra.mxu1 %v5225_v32  ;;  %4444 = vmatprep.subr.bf16.mxu0 %v4443_v33  ;;  %v1415_v32 = vld [vmem:[%s10477_s1 + $0x2ad0] sm:$0xff]  ;;  %v5247_v33 = vpack.c.bf16 %v1420_v26, %v1416_v25  ;;  %v4465_v39 = vpack.c.bf16 %v1417_v31, %v1413_v30  ;;  %v4483_v25 = vpack.c.bf16 %v1458_v20, %v1454_v19  ;;  %v1453_v26 = vld [vmem:[%s10477_s1 + $0x2c00] sm:$0xff]  ;;  %v1462_v31 = vld [vmem:[%s10477_s1 + $0x2c48] sm:$0xff] }
 0x29c   :  { %5228 = vmatprep.subr.bf16.mxu1 %v5227_v37  ;;  %v1424_v37 = vld [vmem:[%s10477_s1 + $0x2b18] sm:$0xff]  ;;  %v5249_v40 = vpack.c.bf16 %v1419_v34, %v1415_v32  ;;  %v1459_v30 = vld [vmem:[%s10477_s1 + $0x2c30] sm:$0xff]  ;;  %v1466_v32 = vld [vmem:[%s10477_s1 + $0x2c68] sm:$0xff] }
 0x29d   :  { %v1468_v34 = vld [vmem:[%s10477_s1 + $0x2c78] sm:$0xff] }
 0x29e   :  { %4446 = vmatpush1.bf16.msra.mxu0 %v4445_v43  ;;  %v1425_v43 = vld [vmem:[%s10477_s1 + $0x2b20] sm:$0xff]  ;;  %v1484_v60 = vld [vmem:[%s10477_s1 + $0x2cf8] sm:$0xff] }
 0x29f   :  { %5230 = vmatpush1.bf16.msra.mxu1 %v5229_v44  ;;  %4448 = vmatprep.subr.bf16.mxu0 %v4447_v45  ;;  %v1423_v44 = vld [vmem:[%s10477_s1 + $0x2b10] sm:$0xff]  ;;  %v5251_v45 = vpack.c.bf16 %v1428_v38, %v1424_v37  ;;  %v4469_v51 = vpack.c.bf16 %v1425_v43, %v1421_v42  ;;  %v4487_v38 = vpack.c.bf16 %v1466_v32, %v1462_v31  ;;  %v1488_v7 = vld [vmem:[%s10477_s1 + $0x2d18] sm:$0xff] }
 0x2a0   :  { %5232 = vmatprep.subr.bf16.mxu1 %v5231_v49  ;;  %v1432_v49 = vld [vmem:[%s10477_s1 + $0x2b58] sm:$0xff]  ;;  %v5253_v52 = vpack.c.bf16 %v1427_v46, %v1423_v44  ;;  %v1467_v43 = vld [vmem:[%s10477_s1 + $0x2c70] sm:$0xff]  ;;  %v1470_v44 = vld [vmem:[%s10477_s1 + $0x2c88] sm:$0xff] }
 0x2a1   :  { %v1472_v46 = vld [vmem:[%s10477_s1 + $0x2c98] sm:$0xff] }
 0x2a2   :  { %4450 = vmatpush1.bf16.msra.mxu0 %v4449_v55  ;;  %v1433_v55 = vld [vmem:[%s10477_s1 + $0x2b60] sm:$0xff]  ;;  %v1492_v8 = vld [vmem:[%s10477_s1 + $0x2d38] sm:$0xff] }
 0x2a3   :  { %5234 = vmatpush1.bf16.msra.mxu1 %v5233_v56  ;;  %4452 = vmatprep.subr.bf16.mxu0 %v4451_v57  ;;  %v1431_v56 = vld [vmem:[%s10477_s1 + $0x2b50] sm:$0xff]  ;;  %v5255_v57 = vpack.c.bf16 %v1436_v50, %v1432_v49  ;;  %v4473_v63 = vpack.c.bf16 %v1433_v55, %v1429_v54  ;;  %v5275_v55 = vpack.c.bf16 %v1476_v47, %v1472_v46  ;;  %v1496_v19 = vld [vmem:[%s10477_s1 + $0x2d58] sm:$0xff] }
 0x2a4   :  { %5236 = vmatprep.subr.bf16.mxu1 %v5235_v61  ;;  %v1440_v61 = vld [vmem:[%s10477_s1 + $0x2b98] sm:$0xff]  ;;  %v5257_v0 = vpack.c.bf16 %v1435_v58, %v1431_v56  ;;  %v1471_v54 = vld [vmem:[%s10477_s1 + $0x2c90] sm:$0xff]  ;;  %v1482_v58 = vld [vmem:[%s10477_s1 + $0x2ce8] sm:$0xff] }
 0x2a5   :  { %v1475_v56 = vld [vmem:[%s10477_s1 + $0x2cb0] sm:$0xff]  ;;  %v1500_v20 = vld [vmem:[%s10477_s1 + $0x2d78] sm:$0xff] }
 0x2a6   :  { %4454 = vmatpush1.bf16.msra.mxu0 %v4453_v3  ;;  %v1441_v3 = vld [vmem:[%s10477_s1 + $0x2ba0] sm:$0xff]  ;;  %v1504_v31 = vld [vmem:[%s10477_s1 + $0x2d98] sm:$0xff] }
 0x2a7   :  { %5238 = vmatpush1.bf16.msra.mxu1 %v5237_v4  ;;  %4456 = vmatprep.subr.bf16.mxu0 %v4455_v5  ;;  %v1439_v4 = vld [vmem:[%s10477_s1 + $0x2b90] sm:$0xff]  ;;  %v5259_v5 = vpack.c.bf16 %v1444_v62, %v1440_v61  ;;  %v4477_v11 = vpack.c.bf16 %v1441_v3, %v1437_v2  ;;  %v5277_v62 = vpack.c.bf16 %v1475_v56, %v1471_v54  ;;  %v1508_v32 = vld [vmem:[%s10477_s1 + $0x2db8] sm:$0xff]  ;;  %v1522_v54 = vld [vmem:[%s10477_s1 + $0x2e28] sm:$0xff] }
 0x2a8   :  { %5240 = vmatprep.subr.bf16.mxu1 %v5239_v9  ;;  %v1448_v9 = vld [vmem:[%s10477_s1 + $0x2bd8] sm:$0xff]  ;;  %v5261_v12 = vpack.c.bf16 %v1443_v6, %v1439_v4  ;;  %v1479_v2 = vld [vmem:[%s10477_s1 + $0x2cd0] sm:$0xff]  ;;  %v5279_v3 = vpack.c.bf16 %v1484_v60, %v1480_v59  ;;  %v1490_v6 = vld [vmem:[%s10477_s1 + $0x2d28] sm:$0xff] }
 0x2a9   :  { %v1483_v4 = vld [vmem:[%s10477_s1 + $0x2cf0] sm:$0xff]  ;;  %v1524_v56 = vld [vmem:[%s10477_s1 + $0x2e38] sm:$0xff]  ;;  %v1517_v60 = vld [vmem:[%s10477_s1 + $0x2e00] sm:$0xff] }
 0x2aa   :  { %4458 = vmatpush1.bf16.msra.mxu0 %v4457_v15  ;;  %v1449_v15 = vld [vmem:[%s10477_s1 + $0x2be0] sm:$0xff] }
 0x2ab   :  { %5242 = vmatpush1.bf16.msra.mxu1 %v5241_v16  ;;  %4460 = vmatprep.subr.bf16.mxu0 %v4459_v17  ;;  %v1447_v16 = vld [vmem:[%s10477_s1 + $0x2bd0] sm:$0xff]  ;;  %v5263_v17 = vpack.c.bf16 %v1452_v10, %v1448_v9  ;;  %v4481_v23 = vpack.c.bf16 %v1449_v15, %v1445_v14  ;;  %v5281_v10 = vpack.c.bf16 %v1483_v4, %v1479_v2  ;;  %v1530_v2 = vld [vmem:[%s10477_s1 + $0x2e68] sm:$0xff]  ;;  %v1532_v4 = vld [vmem:[%s10477_s1 + $0x2e78] sm:$0xff] }
 0x2ac   :  { %5244 = vmatprep.subr.bf16.mxu1 %v5243_v21  ;;  %v1456_v21 = vld [vmem:[%s10477_s1 + $0x2c18] sm:$0xff]  ;;  %v5265_v24 = vpack.c.bf16 %v1451_v18, %v1447_v16  ;;  %v1487_v14 = vld [vmem:[%s10477_s1 + $0x2d10] sm:$0xff]  ;;  %v5283_v15 = vpack.c.bf16 %v1492_v8, %v1488_v7  ;;  %v1498_v18 = vld [vmem:[%s10477_s1 + $0x2d68] sm:$0xff] }
 0x2ad   :  { %v1491_v16 = vld [vmem:[%s10477_s1 + $0x2d30] sm:$0xff]  ;;  %v1525_v8 = vld [vmem:[%s10477_s1 + $0x2e40] sm:$0xff] }
 0x2ae   :  { %4462 = vmatpush1.bf16.msra.mxu0 %v4461_v27  ;;  %v1457_v27 = vld [vmem:[%s10477_s1 + $0x2c20] sm:$0xff] }
 0x2af   :  { %5246 = vmatpush1.bf16.msra.mxu1 %v5245_v28  ;;  %4464 = vmatprep.subr.bf16.mxu0 %v4463_v29  ;;  %v1455_v28 = vld [vmem:[%s10477_s1 + $0x2c10] sm:$0xff]  ;;  %v5267_v29 = vpack.c.bf16 %v1460_v22, %v1456_v21  ;;  %v4485_v36 = vpack.c.bf16 %v1457_v27, %v1453_v26  ;;  %v5285_v22 = vpack.c.bf16 %v1491_v16, %v1487_v14  ;;  %v1538_v14 = vld [vmem:[%s10477_s1 + $0x2ea8] sm:$0xff]  ;;  %v1540_v16 = vld [vmem:[%s10477_s1 + $0x2eb8] sm:$0xff] }
 0x2b0   :  { %5248 = vmatprep.subr.bf16.mxu1 %v5247_v33  ;;  %v1464_v33 = vld [vmem:[%s10477_s1 + $0x2c58] sm:$0xff]  ;;  %v5269_v37 = vpack.c.bf16 %v1459_v30, %v1455_v28  ;;  %v1495_v26 = vld [vmem:[%s10477_s1 + $0x2d50] sm:$0xff]  ;;  %v5287_v27 = vpack.c.bf16 %v1500_v20, %v1496_v19  ;;  %v1506_v30 = vld [vmem:[%s10477_s1 + $0x2da8] sm:$0xff] }
 0x2b1   :  { %v5271_v42 = vpack.c.bf16 %v1468_v34, %v1464_v33  ;;  %v1499_v28 = vld [vmem:[%s10477_s1 + $0x2d70] sm:$0xff]  ;;  %v1533_v20 = vld [vmem:[%s10477_s1 + $0x2e80] sm:$0xff] }
 0x2b2   :  { %4466 = vmatpush1.bf16.msra.mxu0 %v4465_v39  ;;  %v1461_v39 = vld [vmem:[%s10477_s1 + $0x2c40] sm:$0xff]  ;;  %v5289_v34 = vpack.c.bf16 %v1499_v28, %v1495_v26  ;;  %v1546_v26 = vld [vmem:[%s10477_s1 + $0x2ee8] sm:$0xff]  ;;  %v1548_v28 = vld [vmem:[%s10477_s1 + $0x2ef8] sm:$0xff] }
 0x2b3   :  { %5250 = vmatpush1.bf16.msra.mxu1 %v5249_v40  ;;  %4468 = vmatprep.subr.bf16.mxu0 %v4467_v41  ;;  %v1465_v40 = vld [vmem:[%s10477_s1 + $0x2c60] sm:$0xff]  ;;  %v1463_v41 = vld [vmem:[%s10477_s1 + $0x2c50] sm:$0xff] }
 0x2b4   :  { %5252 = vmatprep.subr.bf16.mxu1 %v5251_v45  ;;  %v1474_v45 = vld [vmem:[%s10477_s1 + $0x2ca8] sm:$0xff]  ;;  %v4489_v49 = vpack.c.bf16 %v1465_v40, %v1461_v39  ;;  %v5273_v50 = vpack.c.bf16 %v1467_v43, %v1463_v41  ;;  %v5291_v39 = vpack.c.bf16 %v1508_v32, %v1504_v31  ;;  %v1507_v40 = vld [vmem:[%s10477_s1 + $0x2db0] sm:$0xff]  ;;  %v1512_v43 = vld [vmem:[%s10477_s1 + $0x2dd8] sm:$0xff] }
 0x2b5   :  { %v1510_v41 = vld [vmem:[%s10477_s1 + $0x2dc8] sm:$0xff]  ;;  %v1541_v32 = vld [vmem:[%s10477_s1 + $0x2ec0] sm:$0xff] }
 0x2b6   :  { %4470 = vmatpush1.bf16.msra.mxu0 %v4469_v51  ;;  %v4491_v51 = vpack.c.bf16 %v1474_v45, %v1470_v44  ;;  %v1516_v44 = vld [vmem:[%s10477_s1 + $0x2df8] sm:$0xff] }
 0x2b7   :  { %5254 = vmatpush1.bf16.msra.mxu1 %v5253_v52  ;;  %4472 = vmatprep.subr.bf16.mxu0 %v4471_v53  ;;  %v1469_v52 = vld [vmem:[%s10477_s1 + $0x2c80] sm:$0xff] }
 0x2b8   :  { %5256 = vmatprep.subr.bf16.mxu1 %v5255_v57  ;;  %v1473_v53 = vld [vmem:[%s10477_s1 + $0x2ca0] sm:$0xff]  ;;  %v1478_v57 = vld [vmem:[%s10477_s1 + $0x2cc8] sm:$0xff] }
 0x2b9   :  { %v4493_v61 = vpack.c.bf16 %v1473_v53, %v1469_v52  ;;  %v1515_v52 = vld [vmem:[%s10477_s1 + $0x2df0] sm:$0xff]  ;;  %v1518_v53 = vld [vmem:[%s10477_s1 + $0x2e08] sm:$0xff] }
 0x2ba   :  { %4474 = vmatpush1.bf16.msra.mxu0 %v4473_v63  ;;  %v4495_v63 = vpack.c.bf16 %v1482_v58, %v1478_v57  ;;  %v4515_v59 = vpack.c.bf16 %v1522_v54, %v1518_v53 }
 0x2bb   :  { %5258 = vmatpush1.bf16.msra.mxu1 %v5257_v0  ;;  %4476 = vmatprep.subr.bf16.mxu0 %v4475_v1  ;;  %v1477_v0 = vld [vmem:[%s10477_s1 + $0x2cc0] sm:$0xff] }
 0x2bc   :  { %5260 = vmatprep.subr.bf16.mxu1 %v5259_v5  ;;  %v1481_v1 = vld [vmem:[%s10477_s1 + $0x2ce0] sm:$0xff]  ;;  %v1486_v5 = vld [vmem:[%s10477_s1 + $0x2d08] sm:$0xff] }
 0x2bd   :  { %v4497_v9 = vpack.c.bf16 %v1481_v1, %v1477_v0  ;;  %v1523_v0 = vld [vmem:[%s10477_s1 + $0x2e30] sm:$0xff]  ;;  %v1526_v1 = vld [vmem:[%s10477_s1 + $0x2e48] sm:$0xff] }
 0x2be   :  { %4478 = vmatpush1.bf16.msra.mxu0 %v4477_v11  ;;  %v4499_v11 = vpack.c.bf16 %v1490_v6, %v1486_v5  ;;  %v4519_v7 = vpack.c.bf16 %v1530_v2, %v1526_v1 }
 0x2bf   :  { %5262 = vmatpush1.bf16.msra.mxu1 %v5261_v12  ;;  %4480 = vmatprep.subr.bf16.mxu0 %v4479_v13  ;;  %v1485_v12 = vld [vmem:[%s10477_s1 + $0x2d00] sm:$0xff] }
 0x2c0   :  { %5264 = vmatprep.subr.bf16.mxu1 %v5263_v17  ;;  %v1489_v13 = vld [vmem:[%s10477_s1 + $0x2d20] sm:$0xff]  ;;  %v1494_v17 = vld [vmem:[%s10477_s1 + $0x2d48] sm:$0xff] }
 0x2c1   :  { %v4501_v21 = vpack.c.bf16 %v1489_v13, %v1485_v12  ;;  %v1531_v12 = vld [vmem:[%s10477_s1 + $0x2e70] sm:$0xff]  ;;  %v1534_v13 = vld [vmem:[%s10477_s1 + $0x2e88] sm:$0xff] }
 0x2c2   :  { %4482 = vmatpush1.bf16.msra.mxu0 %v4481_v23  ;;  %v4503_v23 = vpack.c.bf16 %v1498_v18, %v1494_v17  ;;  %v4523_v19 = vpack.c.bf16 %v1538_v14, %v1534_v13 }
 0x2c3   :  { %5266 = vmatpush1.bf16.msra.mxu1 %v5265_v24  ;;  %4484 = vmatprep.subr.bf16.mxu0 %v4483_v25  ;;  %v1493_v24 = vld [vmem:[%s10477_s1 + $0x2d40] sm:$0xff] }
 0x2c4   :  { %5268 = vmatprep.subr.bf16.mxu1 %v5267_v29  ;;  %v1497_v25 = vld [vmem:[%s10477_s1 + $0x2d60] sm:$0xff]  ;;  %v1502_v29 = vld [vmem:[%s10477_s1 + $0x2d88] sm:$0xff] }
 0x2c5   :  { %2414 = vmatmul.mubr.f32.vlgmr.msra.gmra.mrb[0].mxu0 %v40_v35  ;;  %v4505_v33 = vpack.c.bf16 %v1497_v25, %v1493_v24  ;;  %v1539_v24 = vld [vmem:[%s10477_s1 + $0x2eb0] sm:$0xff]  ;;  %v1542_v25 = vld [vmem:[%s10477_s1 + $0x2ec8] sm:$0xff] }
 0x2c6   :  { %4486 = vmatpush1.bf16.msra.mxu0 %v4485_v36  ;;  %3337 = vmatmul.mubr.f32.vlgmr.msra.gmra.mrb[0].mxu1 %v40_v35  ;;  %v4507_v35 = vpack.c.bf16 %v1506_v30, %v1502_v29  ;;  %v1501_v36 = vld [vmem:[%s10477_s1 + $0x2d80] sm:$0xff]  ;;  %v4527_v31 = vpack.c.bf16 %v1546_v26, %v1542_v25 }
 0x2c7   :  { %5270 = vmatpush1.bf16.msra.mxu1 %v5269_v37  ;;  %4488 = vmatprep.subr.bf16.mxu0 %v4487_v38  ;;  %v1505_v37 = vld [vmem:[%s10477_s1 + $0x2da0] sm:$0xff]  ;;  %v1503_v38 = vld [vmem:[%s10477_s1 + $0x2d90] sm:$0xff] }
 0x2c8   :  { %5272 = vmatprep.subr.bf16.mxu1 %v5271_v42  ;;  %2484 = vmatprep.mubr.f32.mxu0 %v43_v48  ;;  %v1514_v42 = vld [vmem:[%s10477_s1 + $0x2de8] sm:$0xff]  ;;  %v4509_v45 = vpack.c.bf16 %v1505_v37, %v1501_v36  ;;  %v5293_v46 = vpack.c.bf16 %v1507_v40, %v1503_v38  ;;  %v1547_v36 = vld [vmem:[%s10477_s1 + $0x2ef0] sm:$0xff]  ;;  %v1556_v40 = vld [vmem:[%s10477_s1 + $0x2f38] sm:$0xff] }
 0x2c9   :  { %3407 = vmatprep.mubr.f32.mxu1 %v43_v48  ;;  %v4511_v47 = vpack.c.bf16 %v1514_v42, %v1510_v41  ;;  %v1509_v48 = vld [vmem:[%s10477_s1 + $0x2dc0] sm:$0xff]  ;;  %v1550_v37 = vld [vmem:[%s10477_s1 + $0x2f08] sm:$0xff] }
 0x2ca   :  { %4490 = vmatpush1.bf16.msra.mxu0 %v4489_v49  ;;  %v1513_v49 = vld [vmem:[%s10477_s1 + $0x2de0] sm:$0xff]  ;;  %v1554_v38 = vld [vmem:[%s10477_s1 + $0x2f28] sm:$0xff] }
 0x2cb   :  { %5274 = vmatpush1.bf16.msra.mxu1 %v5273_v50  ;;  %4492 = vmatprep.subr.bf16.mxu0 %v4491_v51  ;;  %v1511_v50 = vld [vmem:[%s10477_s1 + $0x2dd0] sm:$0xff]  ;;  %v5295_v51 = vpack.c.bf16 %v1516_v44, %v1512_v43  ;;  %v4513_v57 = vpack.c.bf16 %v1513_v49, %v1509_v48  ;;  %v4531_v43 = vpack.c.bf16 %v1554_v38, %v1550_v37  ;;  %v1549_v44 = vld [vmem:[%s10477_s1 + $0x2f00] sm:$0xff]  ;;  %v1558_v49 = vld [vmem:[%s10477_s1 + $0x2f48] sm:$0xff] }
 0x2cc   :  { %5276 = vmatprep.subr.bf16.mxu1 %v5275_v55  ;;  %v1520_v55 = vld [vmem:[%s10477_s1 + $0x2e18] sm:$0xff]  ;;  %v5297_v58 = vpack.c.bf16 %v1515_v52, %v1511_v50  ;;  %v1555_v48 = vld [vmem:[%s10477_s1 + $0x2f30] sm:$0xff]  ;;  %v1562_v50 = vld [vmem:[%s10477_s1 + $0x2f68] sm:$0xff] }
 0x2cd   :  { %v1564_v52 = vld [vmem:[%s10477_s1 + $0x2f78] sm:$0xff]  ;;  %v42_v37 = vld [vmem:[%s10478_s0 + $0xb0] sm:$0xff] }
 0x2ce   :  { %4494 = vmatpush1.bf16.msra.mxu0 %v4493_v61  ;;  %v1521_v61 = vld [vmem:[%s10477_s1 + $0x2e20] sm:$0xff] }
 0x2cf   :  { %5278 = vmatpush1.bf16.msra.mxu1 %v5277_v62  ;;  %4496 = vmatprep.subr.bf16.mxu0 %v4495_v63  ;;  %v1519_v62 = vld [vmem:[%s10477_s1 + $0x2e10] sm:$0xff]  ;;  %v5299_v63 = vpack.c.bf16 %v1524_v56, %v1520_v55  ;;  %v4517_v5 = vpack.c.bf16 %v1521_v61, %v1517_v60  ;;  %v4535_v55 = vpack.c.bf16 %v1562_v50, %v1558_v49  ;;  %v1557_v56 = vld [vmem:[%s10477_s1 + $0x2f40] sm:$0xff]  ;;  %v1566_v61 = vld [vmem:[%s10477_s1 + $0x2f88] sm:$0xff] }
 0x2d0   :  { %5280 = vmatprep.subr.bf16.mxu1 %v5279_v3  ;;  %v1528_v3 = vld [vmem:[%s10477_s1 + $0x2e58] sm:$0xff]  ;;  %v5301_v6 = vpack.c.bf16 %v1523_v0, %v1519_v62  ;;  %v1563_v60 = vld [vmem:[%s10477_s1 + $0x2f70] sm:$0xff]  ;;  %v1570_v62 = vld [vmem:[%s10477_s1 + $0x2fa8] sm:$0xff] }
 0x2d1   :  { %v1572_v0 = vld [vmem:[%s10477_s1 + $0x2fb8] sm:$0xff] }
 0x2d2   :  { %4498 = vmatpush1.bf16.msra.mxu0 %v4497_v9  ;;  %v1529_v9 = vld [vmem:[%s10477_s1 + $0x2e60] sm:$0xff]  ;;  %v1604_v49 = vld [vmem:[%s10477_s1 + $0x30b8] sm:$0xff] }
 0x2d3   :  { %5282 = vmatpush1.bf16.msra.mxu1 %v5281_v10  ;;  %4500 = vmatprep.subr.bf16.mxu0 %v4499_v11  ;;  %v1527_v10 = vld [vmem:[%s10477_s1 + $0x2e50] sm:$0xff]  ;;  %v5303_v11 = vpack.c.bf16 %v1532_v4, %v1528_v3  ;;  %v4521_v17 = vpack.c.bf16 %v1529_v9, %v1525_v8  ;;  %v4539_v3 = vpack.c.bf16 %v1570_v62, %v1566_v61  ;;  %v1565_v4 = vld [vmem:[%s10477_s1 + $0x2f80] sm:$0xff]  ;;  %v1574_v9 = vld [vmem:[%s10477_s1 + $0x2fc8] sm:$0xff] }
 0x2d4   :  { %5284 = vmatprep.subr.bf16.mxu1 %v5283_v15  ;;  %v1536_v15 = vld [vmem:[%s10477_s1 + $0x2e98] sm:$0xff]  ;;  %v5305_v18 = vpack.c.bf16 %v1531_v12, %v1527_v10  ;;  %v1571_v8 = vld [vmem:[%s10477_s1 + $0x2fb0] sm:$0xff]  ;;  %v1578_v10 = vld [vmem:[%s10477_s1 + $0x2fe8] sm:$0xff] }
 0x2d5   :  { %v1580_v12 = vld [vmem:[%s10477_s1 + $0x2ff8] sm:$0xff] }
 0x2d6   :  { %4502 = vmatpush1.bf16.msra.mxu0 %v4501_v21  ;;  %v1537_v21 = vld [vmem:[%s10477_s1 + $0x2ea0] sm:$0xff]  ;;  %v1608_v61 = vld [vmem:[%s10477_s1 + $0x30d8] sm:$0xff] }
 0x2d7   :  { %5286 = vmatpush1.bf16.msra.mxu1 %v5285_v22  ;;  %4504 = vmatprep.subr.bf16.mxu0 %v4503_v23  ;;  %v1535_v22 = vld [vmem:[%s10477_s1 + $0x2e90] sm:$0xff]  ;;  %v5307_v23 = vpack.c.bf16 %v1540_v16, %v1536_v15  ;;  %v4525_v29 = vpack.c.bf16 %v1537_v21, %v1533_v20  ;;  %v4543_v15 = vpack.c.bf16 %v1578_v10, %v1574_v9  ;;  %v1573_v16 = vld [vmem:[%s10477_s1 + $0x2fc0] sm:$0xff]  ;;  %v1582_v21 = vld [vmem:[%s10477_s1 + $0x3008] sm:$0xff] }
 0x2d8   :  { %5288 = vmatprep.subr.bf16.mxu1 %v5287_v27  ;;  %v1544_v27 = vld [vmem:[%s10477_s1 + $0x2ed8] sm:$0xff]  ;;  %v5309_v30 = vpack.c.bf16 %v1539_v24, %v1535_v22  ;;  %v1579_v20 = vld [vmem:[%s10477_s1 + $0x2ff0] sm:$0xff]  ;;  %v1586_v22 = vld [vmem:[%s10477_s1 + $0x3028] sm:$0xff] }
 0x2d9   :  { %v1588_v24 = vld [vmem:[%s10477_s1 + $0x3038] sm:$0xff]  ;;  %v3537_v9 = vld [vmem:[%s10479_s3 + $0x180] sm:$0xff]  ;;  %v3538_v10 = vld [vmem:[%s10479_s3 + $0x188] sm:$0xff] }
 0x2da   :  { %4506 = vmatpush1.bf16.msra.mxu0 %v4505_v33  ;;  %v1545_v33 = vld [vmem:[%s10477_s1 + $0x2ee0] sm:$0xff]  ;;  %v1612_v62 = vld [vmem:[%s10477_s1 + $0x30f8] sm:$0xff] }
 0x2db   :  { %5290 = vmatpush1.bf16.msra.mxu1 %v5289_v34  ;;  %4508 = vmatprep.subr.bf16.mxu0 %v4507_v35  ;;  %v1543_v34 = vld [vmem:[%s10477_s1 + $0x2ed0] sm:$0xff]  ;;  %v5311_v35 = vpack.c.bf16 %v1548_v28, %v1544_v27  ;;  %v4529_v41 = vpack.c.bf16 %v1545_v33, %v1541_v32  ;;  %v4547_v27 = vpack.c.bf16 %v1586_v22, %v1582_v21  ;;  %v1581_v28 = vld [vmem:[%s10477_s1 + $0x3000] sm:$0xff]  ;;  %v1590_v33 = vld [vmem:[%s10477_s1 + $0x3048] sm:$0xff] }
 0x2dc   :  { %5292 = vmatprep.subr.bf16.mxu1 %v5291_v39  ;;  %v1552_v39 = vld [vmem:[%s10477_s1 + $0x2f18] sm:$0xff]  ;;  %v5313_v42 = vpack.c.bf16 %v1547_v36, %v1543_v34  ;;  %v1587_v32 = vld [vmem:[%s10477_s1 + $0x3030] sm:$0xff]  ;;  %v1594_v34 = vld [vmem:[%s10477_s1 + $0x3068] sm:$0xff] }
 0x2dd   :  { %v1596_v36 = vld [vmem:[%s10477_s1 + $0x3078] sm:$0xff]  ;;  %v3539_v21 = vld [vmem:[%s10479_s3 + $0x190] sm:$0xff] }
 0x2de   :  { %4510 = vmatpush1.bf16.msra.mxu0 %v4509_v45  ;;  %v1553_v45 = vld [vmem:[%s10477_s1 + $0x2f20] sm:$0xff]  ;;  %v3540_v22 = vld [vmem:[%s10479_s3 + $0x198] sm:$0xff] }
 0x2df   :  { %5294 = vmatpush1.bf16.msra.mxu1 %v5293_v46  ;;  %4512 = vmatprep.subr.bf16.mxu0 %v4511_v47  ;;  %v1551_v46 = vld [vmem:[%s10477_s1 + $0x2f10] sm:$0xff]  ;;  %v5315_v47 = vpack.c.bf16 %v1556_v40, %v1552_v39  ;;  %v4533_v53 = vpack.c.bf16 %v1553_v45, %v1549_v44  ;;  %v4551_v40 = vpack.c.bf16 %v1594_v34, %v1590_v33  ;;  %v3510_v33 = vld [vmem:[%s10479_s3 + $0xa8] sm:$0xff]  ;;  %v3541_v34 = vld [vmem:[%s10479_s3 + $0x1a0] sm:$0xff] }
 0x2e0   :  { %5296 = vmatprep.subr.bf16.mxu1 %v5295_v51  ;;  %v1560_v51 = vld [vmem:[%s10477_s1 + $0x2f58] sm:$0xff]  ;;  %v5317_v54 = vpack.c.bf16 %v1555_v48, %v1551_v46  ;;  %v1595_v45 = vld [vmem:[%s10477_s1 + $0x3070] sm:$0xff]  ;;  %v1598_v46 = vld [vmem:[%s10477_s1 + $0x3088] sm:$0xff] }
 0x2e1   :  { %v1600_v48 = vld [vmem:[%s10477_s1 + $0x3098] sm:$0xff] }
 0x2e2   :  { %4514 = vmatpush1.bf16.msra.mxu0 %v4513_v57  ;;  %v1561_v57 = vld [vmem:[%s10477_s1 + $0x2f60] sm:$0xff] }
 0x2e3   :  { %5298 = vmatpush1.bf16.msra.mxu1 %v5297_v58  ;;  %4516 = vmatprep.subr.bf16.mxu0 %v4515_v59  ;;  %v1559_v58 = vld [vmem:[%s10477_s1 + $0x2f50] sm:$0xff]  ;;  %v5319_v59 = vpack.c.bf16 %v1564_v52, %v1560_v51  ;;  %v4537_v1 = vpack.c.bf16 %v1561_v57, %v1557_v56  ;;  %v5339_v56 = vpack.c.bf16 %v1604_v49, %v1600_v48 }
 0x2e4   :  { %5300 = vmatprep.subr.bf16.mxu1 %v5299_v63  ;;  %v1568_v63 = vld [vmem:[%s10477_s1 + $0x2f98] sm:$0xff]  ;;  %v5321_v2 = vpack.c.bf16 %v1563_v60, %v1559_v58  ;;  %v1603_v57 = vld [vmem:[%s10477_s1 + $0x30b0] sm:$0xff]  ;;  %v1606_v58 = vld [vmem:[%s10477_s1 + $0x30c8] sm:$0xff]  ;;  %v5464_v60 = vmov 0.0  }
 0x2e6   :  { %4518 = vmatpush1.bf16.msra.mxu0 %v4517_v5  ;;  %v1569_v5 = vld [vmem:[%s10477_s1 + $0x2fa0] sm:$0xff] }
 0x2e7   :  { %5302 = vmatpush1.bf16.msra.mxu1 %v5301_v6  ;;  %4520 = vmatprep.subr.bf16.mxu0 %v4519_v7  ;;  %v1567_v6 = vld [vmem:[%s10477_s1 + $0x2f90] sm:$0xff]  ;;  %v5323_v7 = vpack.c.bf16 %v1572_v0, %v1568_v63  ;;  %v4541_v13 = vpack.c.bf16 %v1569_v5, %v1565_v4  ;;  %v5343_v5 = vpack.c.bf16 %v1612_v62, %v1608_v61 }
 0x2e8   :  { %5304 = vmatprep.subr.bf16.mxu1 %v5303_v11  ;;  %v1576_v11 = vld [vmem:[%s10477_s1 + $0x2fd8] sm:$0xff]  ;;  %v5325_v14 = vpack.c.bf16 %v1571_v8, %v1567_v6  ;;  %v1607_v4 = vld [vmem:[%s10477_s1 + $0x30d0] sm:$0xff]  ;;  %v3506_v8 = vld [vmem:[%s10479_s3 + $0x88] sm:$0xff] }
 0x2e9   :  { %v1611_v6 = vld [vmem:[%s10477_s1 + $0x30f0] sm:$0xff] }
 0x2ea   :  { %4522 = vmatpush1.bf16.msra.mxu0 %v4521_v17  ;;  %v1577_v17 = vld [vmem:[%s10477_s1 + $0x2fe0] sm:$0xff] }
 0x2eb   :  { %5306 = vmatpush1.bf16.msra.mxu1 %v5305_v18  ;;  %4524 = vmatprep.subr.bf16.mxu0 %v4523_v19  ;;  %v1575_v18 = vld [vmem:[%s10477_s1 + $0x2fd0] sm:$0xff]  ;;  %v5327_v19 = vpack.c.bf16 %v1580_v12, %v1576_v11  ;;  %v4545_v25 = vpack.c.bf16 %v1577_v17, %v1573_v16  ;;  %v5345_v12 = vpack.c.bf16 %v1611_v6, %v1607_v4  ;;  %v3521_v16 = vld [vmem:[%s10479_s3 + $0x100] sm:$0xff] }
 0x2ec   :  { %5308 = vmatprep.subr.bf16.mxu1 %v5307_v23  ;;  %v1584_v23 = vld [vmem:[%s10477_s1 + $0x3018] sm:$0xff]  ;;  %v5329_v26 = vpack.c.bf16 %v1579_v20, %v1575_v18  ;;  %v5379_v17 = vpack.c.bf16 %v3538_v10, %v3537_v9  ;;  %v3522_v18 = vld [vmem:[%s10479_s3 + $0x108] sm:$0xff]  ;;  %v3515_v4 = vld [vmem:[%s10479_s3 + $0xd0] sm:$0xff] }
 0x2ed   :  { %v3508_v20 = vld [vmem:[%s10479_s3 + $0x98] sm:$0xff]  ;;  %v3547_v6 = vld [vmem:[%s10479_s3 + $0x1d0] sm:$0xff] }
 0x2ee   :  { %4526 = vmatpush1.bf16.msra.mxu0 %v4525_v29  ;;  %v1585_v29 = vld [vmem:[%s10477_s1 + $0x3020] sm:$0xff] }
 0x2ef   :  { %5310 = vmatpush1.bf16.msra.mxu1 %v5309_v30  ;;  %4528 = vmatprep.subr.bf16.mxu0 %v4527_v31  ;;  %v1583_v30 = vld [vmem:[%s10477_s1 + $0x3010] sm:$0xff]  ;;  %v5331_v31 = vpack.c.bf16 %v1588_v24, %v1584_v23  ;;  %v4549_v38 = vpack.c.bf16 %v1585_v29, %v1581_v28  ;;  %v44_v23 = vld [vmem:[%s10478_s0 + $0xc0] sm:$0xff]  ;;  %v3492_v28 = vld [vmem:[%s10479_s3 + $0x18] sm:$0xff] }
 0x2f0   :  { %5312 = vmatprep.subr.bf16.mxu1 %v5311_v35  ;;  %v1592_v35 = vld [vmem:[%s10477_s1 + $0x3058] sm:$0xff]  ;;  %v5333_v39 = vpack.c.bf16 %v1587_v32, %v1583_v30  ;;  %v3523_v29 = vld [vmem:[%s10479_s3 + $0x110] sm:$0xff]  ;;  %v5383_v30 = vpack.c.bf16 %v3540_v22, %v3539_v21  ;;  %v3509_v32 = vld [vmem:[%s10479_s3 + $0xa0] sm:$0xff] }
 0x2f1   :  { %v5335_v44 = vpack.c.bf16 %v1596_v36, %v1592_v35  ;;  %v3542_v35 = vld [vmem:[%s10479_s3 + $0x1a8] sm:$0xff] }
 0x2f2   :  { %4530 = vmatpush1.bf16.msra.mxu0 %v4529_v41  ;;  %v1589_v41 = vld [vmem:[%s10477_s1 + $0x3040] sm:$0xff] }
 0x2f3   :  { %5314 = vmatpush1.bf16.msra.mxu1 %v5313_v42  ;;  %4532 = vmatprep.subr.bf16.mxu0 %v4531_v43  ;;  %v1593_v42 = vld [vmem:[%s10477_s1 + $0x3060] sm:$0xff]  ;;  %v1591_v43 = vld [vmem:[%s10477_s1 + $0x3050] sm:$0xff] }
 0x2f4   :  { %5316 = vmatprep.subr.bf16.mxu1 %v5315_v47  ;;  %v1602_v47 = vld [vmem:[%s10477_s1 + $0x30a8] sm:$0xff]  ;;  %v4553_v50 = vpack.c.bf16 %v1593_v42, %v1589_v41  ;;  %v5337_v51 = vpack.c.bf16 %v1595_v45, %v1591_v43  ;;  %v3525_v41 = vld [vmem:[%s10479_s3 + $0x120] sm:$0xff]  ;;  %v5387_v42 = vpack.c.bf16 %v3542_v35, %v3541_v34  ;;  %v3512_v45 = vld [vmem:[%s10479_s3 + $0xb8] sm:$0xff] }
 0x2f5   :  { %v4555_v52 = vpack.c.bf16 %v1602_v47, %v1598_v46  ;;  %v3526_v43 = vld [vmem:[%s10479_s3 + $0x128] sm:$0xff]  ;;  %v3543_v46 = vld [vmem:[%s10479_s3 + $0x1b0] sm:$0xff]  ;;  %v3544_v47 = vld [vmem:[%s10479_s3 + $0x1b8] sm:$0xff] }
 0x2f6   :  { %4534 = vmatpush1.bf16.msra.mxu0 %v4533_v53  ;;  %v1597_v53 = vld [vmem:[%s10477_s1 + $0x3080] sm:$0xff]  ;;  %v5389_v49 = vpack.c.bf16 %v3526_v43, %v3525_v41  ;;  %v3552_v34 = vld [vmem:[%s10479_s3 + $0x1f8] sm:$0xff]  ;;  %v3503_v35 = vld [vmem:[%s10479_s3 + $0x70] sm:$0xff] }
 0x2f7   :  { %5318 = vmatpush1.bf16.msra.mxu1 %v5317_v54  ;;  %4536 = vmatprep.subr.bf16.mxu0 %v4535_v55  ;;  %v1601_v54 = vld [vmem:[%s10477_s1 + $0x30a0] sm:$0xff]  ;;  %v1599_v55 = vld [vmem:[%s10477_s1 + $0x3090] sm:$0xff] }
 0x2f8   :  { %5320 = vmatprep.subr.bf16.mxu1 %v5319_v59  ;;  %v1610_v59 = vld [vmem:[%s10477_s1 + $0x30e8] sm:$0xff]  ;;  %v4557_v63 = vpack.c.bf16 %v1601_v54, %v1597_v53  ;;  %v5341_v0 = vpack.c.bf16 %v1603_v57, %v1599_v55  ;;  %v3527_v53 = vld [vmem:[%s10479_s3 + $0x130] sm:$0xff]  ;;  %v5391_v54 = vpack.c.bf16 %v3544_v47, %v3543_v46  ;;  %v3528_v55 = vld [vmem:[%s10479_s3 + $0x138] sm:$0xff] }
 0x2f9   :  { %v3514_v57 = vld [vmem:[%s10479_s3 + $0xc8] sm:$0xff]  ;;  %v5393_v61 = vpack.c.bf16 %v3528_v55, %v3527_v53 }
 0x2fa   :  { %4538 = vmatpush1.bf16.msra.mxu0 %v4537_v1  ;;  %v4559_v1 = vpack.c.bf16 %v1610_v59, %v1606_v58  ;;  %v3545_v58 = vld [vmem:[%s10479_s3 + $0x1c0] sm:$0xff]  ;;  %v3546_v59 = vld [vmem:[%s10479_s3 + $0x1c8] sm:$0xff] }
 0x2fb   :  { %5322 = vmatpush1.bf16.msra.mxu1 %v5321_v2  ;;  %4540 = vmatprep.subr.bf16.mxu0 %v4539_v3  ;;  %v1605_v2 = vld [vmem:[%s10477_s1 + $0x30c0] sm:$0xff] }
 0x2fc   :  { %5324 = vmatprep.subr.bf16.mxu1 %v5323_v7  ;;  %v1609_v3 = vld [vmem:[%s10477_s1 + $0x30e0] sm:$0xff] }
 0x2fd   :  { %v3505_v7 = vld [vmem:[%s10479_s3 + $0x80] sm:$0xff]  ;;  %v4561_v11 = vpack.c.bf16 %v1609_v3, %v1605_v2  ;;  %v5395_v2 = vpack.c.bf16 %v3546_v59, %v3545_v58  ;;  %v3530_v3 = vld [vmem:[%s10479_s3 + $0x148] sm:$0xff] }
 0x2fe   :  { %4542 = vmatpush1.bf16.msra.mxu0 %v4541_v13  ;;  %v5347_v13 = vpack.c.bf16 %v3506_v8, %v3505_v7  ;;  %v3548_v7 = vld [vmem:[%s10479_s3 + $0x1d8] sm:$0xff] }
 0x2ff   :  { %5326 = vmatpush1.bf16.msra.mxu1 %v5325_v14  ;;  %4544 = vmatprep.subr.bf16.mxu0 %v4543_v15  ;;  %v3489_v14 = vld [vmem:[%s10479_s3] sm:$0xff]  ;;  %v3490_v15 = vld [vmem:[%s10479_s3 + $0x8] sm:$0xff] }
 0x300   :  { %5328 = vmatprep.subr.bf16.mxu1 %v5327_v19  ;;  %v3507_v19 = vld [vmem:[%s10479_s3 + $0x90] sm:$0xff]  ;;  %v5349_v24 = vpack.c.bf16 %v3490_v15, %v3489_v14  ;;  %v5399_v14 = vpack.c.bf16 %v3548_v7, %v3547_v6  ;;  %v3532_v15 = vld [vmem:[%s10479_s3 + $0x158] sm:$0xff] }
 0x302   :  { %4546 = vmatpush1.bf16.msra.mxu0 %v4545_v25  ;;  %v5381_v25 = vpack.c.bf16 %v3522_v18, %v3521_v16  ;;  %v3517_v16 = vld [vmem:[%s10479_s3 + $0xe0] sm:$0xff] }
 0x303   :  { %5330 = vmatpush1.bf16.msra.mxu1 %v5329_v26  ;;  %4548 = vmatprep.subr.bf16.mxu0 %v4547_v27  ;;  %v5351_v26 = vpack.c.bf16 %v3508_v20, %v3507_v19  ;;  %v3491_v27 = vld [vmem:[%s10479_s3 + $0x10] sm:$0xff]  ;;  %v3549_v18 = vld [vmem:[%s10479_s3 + $0x1e0] sm:$0xff]  ;;  %v3550_v19 = vld [vmem:[%s10479_s3 + $0x1e8] sm:$0xff] }
 0x304   :  { %5332 = vmatprep.subr.bf16.mxu1 %v5331_v31  ;;  %v3524_v31 = vld [vmem:[%s10479_s3 + $0x118] sm:$0xff]  ;;  %v5353_v36 = vpack.c.bf16 %v3492_v28, %v3491_v27  ;;  %v3534_v28 = vld [vmem:[%s10479_s3 + $0x168] sm:$0xff] }
 0x305   :  { %2485 = vmatmul.mubr.f32.vlgmr.msra.gmra.mrb[0].mxu0 %v42_v37 }
 0x306   :  { %4550 = vmatpush1.bf16.msra.mxu0 %v4549_v38  ;;  %3408 = vmatmul.mubr.f32.vlgmr.msra.gmra.mrb[0].mxu1 %v42_v37  ;;  %v5385_v37 = vpack.c.bf16 %v3524_v31, %v3523_v29  ;;  %v5355_v38 = vpack.c.bf16 %v3510_v33, %v3509_v32  ;;  %v3520_v31 = vld [vmem:[%s10479_s3 + $0xf8] sm:$0xff]  ;;  %v3551_v32 = vld [vmem:[%s10479_s3 + $0x1f0] sm:$0xff] }
 0x307   :  { %5334 = vmatpush1.bf16.msra.mxu1 %v5333_v39  ;;  %4552 = vmatprep.subr.bf16.mxu0 %v4551_v40  ;;  %v3493_v39 = vld [vmem:[%s10479_s3 + $0x20] sm:$0xff]  ;;  %v3494_v40 = vld [vmem:[%s10479_s3 + $0x28] sm:$0xff] }
 0x308   :  { %5336 = vmatprep.subr.bf16.mxu1 %v5335_v44  ;;  %2555 = vmatprep.mubr.f32.mxu0 %v5464_v60  ;;  %v3511_v44 = vld [vmem:[%s10479_s3 + $0xb0] sm:$0xff]  ;;  %v5357_v48 = vpack.c.bf16 %v3494_v40, %v3493_v39  ;;  %v3536_v40 = vld [vmem:[%s10479_s3 + $0x178] sm:$0xff] }
 0x309   :  { %3478 = vmatprep.mubr.f32.mxu1 %v5464_v60  ;;  %v3535_v39 = vld [vmem:[%s10479_s3 + $0x170] sm:$0xff] }
 0x30a   :  { %4554 = vmatpush1.bf16.msra.mxu0 %v4553_v50  ;;  %v5359_v50 = vpack.c.bf16 %v3512_v45, %v3511_v44  ;;  %v5409_v41 = vpack.c.bf16 %v3536_v40, %v3535_v39  ;;  %v1613_v45 = vld [vmem:[%s10480_s2] sm:$0xf] }
 0x30b   :  { %5338 = vmatpush1.bf16.msra.mxu1 %v5337_v51  ;;  %4556 = vmatprep.subr.bf16.mxu0 %v4555_v52  ;;  %v3495_v51 = vld [vmem:[%s10479_s3 + $0x30] sm:$0xff]  ;;  %v3496_v52 = vld [vmem:[%s10479_s3 + $0x38] sm:$0xff] }
 0x30c   :  { %5340 = vmatprep.subr.bf16.mxu1 %v5339_v56  ;;  %v3513_v56 = vld [vmem:[%s10479_s3 + $0xc0] sm:$0xff]  ;;  %v5361_v60 = vpack.c.bf16 %v3496_v52, %v3495_v51 }
 0x30d   :  { %v5363_v62 = vpack.c.bf16 %v3514_v57, %v3513_v56 }
 0x30e   :  { %4558 = vmatpush1.bf16.msra.mxu0 %v4557_v63  ;;  %v3497_v63 = vld [vmem:[%s10479_s3 + $0x40] sm:$0xff] }
 0x30f   :  { %5342 = vmatpush1.bf16.msra.mxu1 %v5341_v0  ;;  %4560 = vmatprep.subr.bf16.mxu0 %v4559_v1  ;;  %v3498_v0 = vld [vmem:[%s10479_s3 + $0x48] sm:$0xff]  ;;  %v3529_v1 = vld [vmem:[%s10479_s3 + $0x140] sm:$0xff] }
 0x310   :  { %5344 = vmatprep.subr.bf16.mxu1 %v5343_v5  ;;  %v3516_v5 = vld [vmem:[%s10479_s3 + $0xd8] sm:$0xff]  ;;  %v5365_v8 = vpack.c.bf16 %v3498_v0, %v3497_v63  ;;  %v5397_v9 = vpack.c.bf16 %v3530_v3, %v3529_v1  ;;  %v3708_v3 = vld [vmem:[%s10481_s4] ss:$0 sm:$0xff] }
 0x311   :  { %v5367_v10 = vpack.c.bf16 %v3516_v5, %v3515_v4 }
 0x312   :  { %4562 = vmatpush1.bf16.msra.mxu0 %v4561_v11  ;;  %v3499_v11 = vld [vmem:[%s10479_s3 + $0x50] sm:$0xff] }
 0x313   :  { %5346 = vmatpush1.bf16.msra.mxu1 %v5345_v12  ;;  %5348 = vmatprep.subr.bf16.mxu0 %v5347_v13  ;;  %v3500_v12 = vld [vmem:[%s10479_s3 + $0x58] sm:$0xff]  ;;  %v3531_v13 = vld [vmem:[%s10479_s3 + $0x150] sm:$0xff] }
 0x314   :  { %5380 = vmatprep.subr.bf16.mxu1 %v5379_v17  ;;  %v3518_v17 = vld [vmem:[%s10479_s3 + $0xe8] sm:$0xff]  ;;  %v5369_v20 = vpack.c.bf16 %v3500_v12, %v3499_v11  ;;  %v5401_v21 = vpack.c.bf16 %v3532_v15, %v3531_v13 }
 0x315   :  { %3706 = vmatmul.mubr.msk.f32.vlgmr.msra.gmra.mrb[0].mxu0 %vm1635_vm0, %v44_v23  ;;  %v5371_v22 = vpack.c.bf16 %v3518_v17, %v3517_v16 }
 0x316   :  { %3707 = vmatmul.mubr.msk.f32.vlgmr.msra.gmra.mrb[0].mxu1 %vm1635_vm0, %v44_v23  ;;  %5350 = vmatpush3.bf16.msra.mxu0 %v5349_v24  ;;  %v5403_v23 = vpack.c.bf16 %v3550_v19, %v3549_v18  ;;  %v3501_v24 = vld [vmem:[%s10479_s3 + $0x60] sm:$0xff] }
 0x317   :  { %5382 = vmatpush3.bf16.msra.mxu1 %v5381_v25  ;;  %5352 = vmatprep.subr.bf16.mxu0 %v5351_v26  ;;  %v3502_v25 = vld [vmem:[%s10479_s3 + $0x68] sm:$0xff]  ;;  %v3533_v26 = vld [vmem:[%s10479_s3 + $0x160] sm:$0xff] }
 0x318   :  { %5384 = vmatprep.subr.bf16.mxu1 %v5383_v30  ;;  %v5373_v27 = vpack.c.bf16 %v3502_v25, %v3501_v24  ;;  %v5405_v29 = vpack.c.bf16 %v3534_v28, %v3533_v26  ;;  %v3519_v30 = vld [vmem:[%s10479_s3 + $0xf0] sm:$0xff] }
 0x319   :  { %v5375_v33 = vpack.c.bf16 %v3520_v31, %v3519_v30 }
 0x31a   :  { %5354 = vmatpush3.bf16.msra.mxu0 %v5353_v36  ;;  %v3504_v36 = vld [vmem:[%s10479_s3 + $0x78] sm:$0xff] }
 0x31b   :  { %5386 = vmatpush3.bf16.msra.mxu1 %v5385_v37  ;;  %5356 = vmatprep.subr.bf16.mxu0 %v5355_v38  ;;  %v5407_v37 = vpack.c.bf16 %v3552_v34, %v3551_v32  ;;  %v5377_v38 = vpack.c.bf16 %v3504_v36, %v3503_v35 }
 0x31c   :  { %5388 = vmatprep.subr.bf16.mxu1 %v5387_v42  ;;  %v1615_v42 = vlaneseq }
 0x31e   :  { %5358 = vmatpush3.bf16.msra.mxu0 %v5357_v48  ;;  %v1616_v43 = vshrl.u32 %v1615_v42, 7 }
 0x31f   :  { %5390 = vmatpush3.bf16.msra.mxu1 %v5389_v49  ;;  %5360 = vmatprep.subr.bf16.mxu0 %v5359_v50 }
 0x320   :  { %5392 = vmatprep.subr.bf16.mxu1 %v5391_v54  ;;  %v1617_v44 = vsub.s32 0, %v1616_v43  ;;  %v1625_v46 = vsub.s32 2, %v1616_v43  ;;  %v1621_v47 = vsub.s32 1, %v1616_v43  ;;  %v1629_v48 = vsub.s32 3, %v1616_v43 }
 0x322   :  { %5362 = vmatpush3.bf16.msra.mxu0 %v5361_v60  ;;  %v1618_v49 = vrot.slane %v1613_v45, %v1617_v44  ;;  %v1626_v50 = vrot.slane %v1613_v45, %v1625_v46  ;;  %v1622_v51 = vrot.slane %v1613_v45, %v1621_v47  ;;  %v1630_v52 = vrot.slane %v1613_v45, %v1629_v48 }
 0x323   :  { %5394 = vmatpush3.bf16.msra.mxu1 %v5393_v61  ;;  %5364 = vmatprep.subr.bf16.mxu0 %v5363_v62 }
 0x324   :  { %5396 = vmatprep.subr.bf16.mxu1 %v5395_v2 }
 0x326   :  { %5366 = vmatpush3.bf16.msra.mxu0 %v5365_v8 }
 0x327   :  { %5398 = vmatpush3.bf16.msra.mxu1 %v5397_v9  ;;  %5368 = vmatprep.subr.bf16.mxu0 %v5367_v10 }
 0x328   :  { %5400 = vmatprep.subr.bf16.mxu1 %v5399_v14 }
 0x32a   :  { %5370 = vmatpush3.bf16.msra.mxu0 %v5369_v20 }
 0x32b   :  { %5402 = vmatpush3.bf16.msra.mxu1 %v5401_v21  ;;  %5372 = vmatprep.subr.bf16.mxu0 %v5371_v22 }
 0x32c   :  { %5404 = vmatprep.subr.bf16.mxu1 %v5403_v23 }
 0x32e   :  { %5374 = vmatpush3.bf16.msra.mxu0 %v5373_v27 }
 0x32f   :  { %5406 = vmatpush3.bf16.msra.mxu1 %v5405_v29  ;;  %5376 = vmatprep.subr.bf16.mxu0 %v5375_v33 }
 0x330   :  { %5408 = vmatprep.subr.bf16.mxu1 %v5407_v37 }
 0x332   :  { %5378 = vmatpush3.bf16.msra.mxu0 %v5377_v38 }
 0x333   :  { %5410 = vmatpush3.bf16.msra.mxu1 %v5409_v41 }
 0x3e8   :  { %v2557_v53 = vpop.f32.mrb[0].mxu0 }
 0x3e9   :  { %v5411_v54 = vadd.f32 %v2557_v53, %v1618_v49  ;;  %v3480_v55 = vpop.f32.mrb[0].mxu1  ;;  %v2559_v56 = vpop.f32.mrb[1].mxu0 }
 0x3ea   :  { %v5413_v57 = vadd.f32 %v3480_v55, %v1626_v50  ;;  %v5412_v58 = vadd.f32 %v2559_v56, %v1622_v51  ;;  %v3482_v59 = vpop.f32.mrb[1].mxu1 }
 0x3eb   :  { %v5414_v60 = vadd.f32 %v3482_v59, %v1630_v52  ;;  %v3485_v62 = vmax.f32 %v5411_v54, 0.0 }
 0x3ec   :  { %v3486_v61 = vmax.f32 %v5412_v58, 0.0  ;;  %v3487_v0 = vmax.f32 %v5413_v57, 0.0 }
 0x3ed   :  { %v3488_v63 = vmax.f32 %v5414_v60, 0.0 }
 0x3ee   :  { %3624 = vmatprep.mubr.f32.mxu0 %v3486_v61 }
 0x3ef   :  { %3694 = vmatprep.mubr.f32.mxu1 %v3488_v63  ;;  %3625 = vmatmul.mubr.f32.vlgmr.msra.gmra.mrb[2].mxu0 %v3485_v62 }
 0x3f0   :  { %3695 = vmatmul.mubr.f32.vlgmr.msra.gmra.mrb[2].mxu1 %v3487_v0 }
 0x4c2   :  { %v3741_v1 = vpop.f32.mrb[2].mxu0 }
 0x4c3   :  { %v3776_v2 = vpop.f32.mrb[2].mxu1  ;;  %v3742_v4 = vpop.f32.mrb[3].mxu0 }
 0x4c4   :  { %v3743_v5 = vadd.f32 %v3742_v4, %v3741_v1  ;;  %v3777_v6 = vpop.f32.mrb[3].mxu1 }
 0x4c5   :  { %v3778_v7 = vadd.f32 %v3777_v6, %v3776_v2 }
 0x4c6   :  { %v3627_v8 = vadd.f32 %v3743_v5, %v3708_v3 }
 0x4c8   :  { %v3697_v9 = vadd.f32 %v3778_v7, %v3627_v8 }
 0x4ca   :  { %3701 = vst.msk [vmem:[%s10482_s5] sm:$0xff] %vm3700_vm1, %v3697_v9 }

</bundles_post_ra>
